<compile_context>
chip_gen: v7x
topology: tpu7x:2x2x1
jax: 0.10.0
libtpu: 0.0.40
codegen_flags: <defaults>
</compile_context>

<pallas_src>
import numpy as np
import jax
import jax.numpy as jnp
from jax import lax
from jax.experimental import pallas as pl
from jax.experimental.pallas import tpu as pltpu


# ----------------------------------------------------------------------------
# Geometry (Python ints, resolved at trace time).
# Activation layout: channels on sublanes, zero-padded image flattened row-major along
# lanes (flat index = hh * Wp + ww, with Wp = W + 4, halo of 2 for the 5x5 'same' conv).
# ----------------------------------------------------------------------------
def _geom(H, W):
    Wp, Hp = W + 4, H + 4
    L = Hp * Wp                       # padded-flat image length (lane dim of the scratch)
    NPl = (H - 1) * Wp + W            # conv-output slab length (covers every valid pixel)
    NPm = (H - 2) * Wp + W - 1        # slab length needed by the 2x2 max-pool
    q0 = 2 * Wp + 2                   # padded-flat position of pixel (0, 0)
    return Wp, Hp, L, NPl, NPm, q0


# ----------------------------------------------------------------------------
# Host-built {0,1} selection matrices (exact; used as MXU operands inside the kernel).
# ----------------------------------------------------------------------------
def _input_scatter(H, W):
    """(H*W, L): scatter the raw row-major image into the padded-flat layout."""
    Wp, _, L, _, _, _ = _geom(H, W)
    S = np.zeros((H * W, L), np.float32)
    for h in range(H):
        for w in range(W):
            S[h * W + w, (h + 2) * Wp + (w + 2)] = 1.0
    return S


def _conv_out_scatter(H, W):
    """(NPl, L): scatter valid conv-output positions back into the padded-flat layout
    (positions on horizontal padding columns map nowhere -> come out zero)."""
    Wp, _, L, NPl, _, q0 = _geom(H, W)
    S = np.zeros((NPl, L), np.float32)
    for p in range(NPl):
        if p % Wp < W:
            S[p, q0 + p] = 1.0
    return S


def _pool_scatter(H, W, pad_out):
    """Pick the top-left corner of every 2x2 pooling window out of the
    'window max at every position' slab; if pad_out, scatter straight into the next
    block's padded-flat layout (halo columns stay zero)."""
    Wp, _, _, _, NPm, _ = _geom(H, W)
    H2, W2 = H // 2, W // 2
    if pad_out:
        Wp2 = W2 + 4
        L2 = (H2 + 4) * Wp2
        S = np.zeros((NPm, L2), np.float32)
        for h2 in range(H2):
            for w2 in range(W2):
                S[2 * h2 * Wp + 2 * w2, (h2 + 2) * Wp2 + (w2 + 2)] = 1.0
    else:
        S = np.zeros((NPm, H2 * W2), np.float32)
        for h2 in range(H2):
            for w2 in range(W2):
                S[2 * h2 * Wp + 2 * w2, h2 * W2 + w2] = 1.0
    return S


# ----------------------------------------------------------------------------
# Fused 3-block encoder kernel (one image per grid step).
# ----------------------------------------------------------------------------
def _make_kernel(G, C0):
    g1 = _geom(G, G)
    g2 = _geom(G // 2, G // 2)
    g3 = _geom(G // 4, G // 4)

    def res_block(x_ref, a_ref, w1_ref, b1_ref, ws_ref, w2_ref, b2s_ref, selA_ref, g):
        """One ResidualBlock on a padded-flat bf16 image held in VMEM.
        Returns the 2x2-window max at every slab position (f32); stride-2 decimation is
        done by the caller with an exact selection matmul."""
        Wp, _, _, NPl, NPm, q0 = g

        # conv1 (5x5 'same'): 25 shifted (Cout, Cin) @ (Cin, NPl) matmuls, f32 accumulate.
        acc = None
        for di in range(5):
            for dj in range(5):
                rhs = x_ref[:, di * Wp + dj: di * Wp + dj + NPl]
                d = jnp.dot(w1_ref[di * 5 + dj], rhs, preferred_element_type=jnp.float32)
                acc = d if acc is None else acc + d
        h1 = jnp.maximum(acc + b1_ref[...], 0.0).astype(jnp.bfloat16)

        # Re-embed the conv1 output into the padded-flat layout (zero halo + zero the
        # horizontal-padding columns) with one exact {0,1} selection matmul; store bf16 once.
        a_ref[...] = jnp.dot(h1, selA_ref[...],
                             preferred_element_type=jnp.float32).astype(jnp.bfloat16)

        # conv2 (5x5 'same') + 1x1-conv shortcut + (conv2 bias + shortcut bias), then ReLU.
        xc = x_ref[:, q0: q0 + NPl]
        acc2 = jnp.dot(ws_ref[...], xc, preferred_element_type=jnp.float32)
        for di in range(5):
            for dj in range(5):
                rhs = a_ref[:, di * Wp + dj: di * Wp + dj + NPl]
                acc2 = acc2 + jnp.dot(w2_ref[di * 5 + dj], rhs,
                                      preferred_element_type=jnp.float32)
        c = jnp.maximum(acc2 + b2s_ref[...], 0.0)

        # 2x2 window max at every position: three lane-dense vector max ops.
        return jnp.maximum(jnp.maximum(c[:, 0:NPm], c[:, 1:1 + NPm]),
                           jnp.maximum(c[:, Wp:Wp + NPm], c[:, Wp + 1:Wp + 1 + NPm]))

    def kernel(x_ref, scat1_ref,
               w1a, b1a, wsa, w2a, b2sa, selAa, poola,
               w1b, b1b, wsb, w2b, b2sb, selAb, poolb,
               w1c, b1c, wsc, w2c, b2sc, selAc, poolc,
               o_ref,
               x1, a1, x2, a2, x3, a3):
        # Block 1 input: raw (C0, H*W) image -> padded-flat bf16 layout via one exact
        # selection matmul (halo columns come out zero); single bf16 cast of the image.
        xin = x_ref[...].astype(jnp.bfloat16)
        x1[...] = jnp.dot(xin, scat1_ref[...],
                          preferred_element_type=jnp.float32).astype(jnp.bfloat16)

        m1 = res_block(x1, a1, w1a, b1a, wsa, w2a, b2sa, selAa, g1)
        # pool decimation + scatter into block 2's padded-flat layout (exact selection).
        x2[...] = jnp.dot(m1.astype(jnp.bfloat16), poola[...],
                          preferred_element_type=jnp.float32).astype(jnp.bfloat16)

        m2 = res_block(x2, a2, w1b, b1b, wsb, w2b, b2sb, selAb, g2)
        x3[...] = jnp.dot(m2.astype(jnp.bfloat16), poolb[...],
                          preferred_element_type=jnp.float32).astype(jnp.bfloat16)

        m3 = res_block(x3, a3, w1c, b1c, wsc, w2c, b2sc, selAc, g3)
        # Final pool decimation in exact f32.  The (C3, H3*W3) result flattened row-major
        # IS the (C, H, W) flatten order that nn.Flatten applies to NCHW.
        o_ref[...] = jnp.dot(m3, poolc[...], preferred_element_type=jnp.float32)

    return kernel


# ----------------------------------------------------------------------------
# One-time parameter / constant packing (outside the jitted forward).
# ----------------------------------------------------------------------------
def pack_params(params, grid_size, in_channels):
    G, C0 = grid_size, in_channels
    sizes = [(G, C0, 16), (G // 2, 16, 8), (G // 4, 8, 8)]   # (H, Cin, Cout) per block
    packed = [jnp.asarray(_input_scatter(G, G), jnp.bfloat16)]
    for bi, name in enumerate(("b1", "b2", "b3")):
        p = params[name]
        H, Cin, Cout = sizes[bi]
        # conv weights in HWIO -> per-tap (Cout, Cin) lhs operands, bf16.
        w1 = jnp.transpose(p["w1"], (0, 1, 3, 2)).reshape(25, Cout, Cin).astype(jnp.bfloat16)
        w2 = jnp.transpose(p["w2"], (0, 1, 3, 2)).reshape(25, Cout, Cout).astype(jnp.bfloat16)
        ws = jnp.transpose(p["ws"].reshape(Cin, Cout)).astype(jnp.bfloat16)
        b1 = p["b1"].reshape(Cout, 1).astype(jnp.float32)
        b2s = (p["b2"] + p["bs"]).reshape(Cout, 1).astype(jnp.float32)
        selA = jnp.asarray(_conv_out_scatter(H, H), jnp.bfloat16)
        last = bi == 2
        pool = jnp.asarray(_pool_scatter(H, H, pad_out=not last),
                           jnp.float32 if last else jnp.bfloat16)
        packed += [w1, b1, ws, w2, b2s, selA, pool]
    return tuple(packed)


# ----------------------------------------------------------------------------
# Encoder512 forward: one pallas_call, zero-copy reshapes only.
# ----------------------------------------------------------------------------
def encoder512(x_nchw, packed):
    B, C0, H, W = x_nchw.shape
    assert H == W and H % 8 == 0, "grid_size must be square and a multiple of 8"
    G = H
    OW = (G // 8) ** 2                                            # spatial size after 3 pools
    x_flat = x_nchw.reshape(B, C0, H * W).astype(jnp.float32)     # zero-copy reshape

    def _const_spec(a):
        nd = a.ndim
        return pl.BlockSpec(a.shape, lambda b, nd=nd: (0,) * nd)

    in_specs = [pl.BlockSpec((None, C0, H * W), lambda b: (b, 0, 0))]
    in_specs += [_const_spec(a) for a in packed]

    g1, g2, g3 = _geom(G, G), _geom(G // 2, G // 2), _geom(G // 4, G // 4)
    scratch_shapes = [
        pltpu.VMEM((C0, g1[2]), jnp.bfloat16),   # block1 padded-flat input (bf16, cast once)
        pltpu.VMEM((16, g1[2]), jnp.bfloat16),   # block1 conv1 output
        pltpu.VMEM((16, g2[2]), jnp.bfloat16),   # block2 padded-flat input
        pltpu.VMEM((8, g2[2]), jnp.bfloat16),    # block2 conv1 output
        pltpu.VMEM((8, g3[2]), jnp.bfloat16),    # block3 padded-flat input
        pltpu.VMEM((8, g3[2]), jnp.bfloat16),    # block3 conv1 output
    ]

    out = pl.pallas_call(
        _make_kernel(G, C0),
        out_shape=jax.ShapeDtypeStruct((B, 8, OW), jnp.float32),
        grid=(B,),
        in_specs=in_specs,
        out_specs=pl.BlockSpec((None, 8, OW), lambda b: (b, 0, 0)),
        scratch_shapes=scratch_shapes,
        compiler_params=pltpu.CompilerParams(
            dimension_semantics=("parallel",),          # one image per TensorCore on v7x
            vmem_limit_bytes=32 * 1024 * 1024),
    )(x_flat, *packed)
    # nn.Flatten on NCHW flattens in (C, H, W) order == row-major flatten of (C3, H3*W3).
    return out.reshape(B, -1)


# ----------------------------------------------------------------------------
# Deterministic synthetic parameters (shapes from the PyTorch __init__).
# ----------------------------------------------------------------------------
def _init_conv(key, kh, kw, cin, cout):
    kw_key, kb_key = jax.random.split(key)
    fan_in = kh * kw * cin
    w = jax.random.normal(kw_key, (kh, kw, cin, cout), jnp.float32) / np.sqrt(fan_in)
    b = jax.random.normal(kb_key, (cout,), jnp.float32) * 0.01
    return w, b


def init_res_block(key, cin, cout, k=5):
    k1, k2, k3 = jax.random.split(key, 3)
    ws, bs = _init_conv(k1, 1, 1, cin, cout)
    w1, b1 = _init_conv(k2, k, k, cin, cout)
    w2, b2 = _init_conv(k3, k, k, cout, cout)
    return dict(ws=ws, bs=bs, w1=w1, b1=b1, w2=w2, b2=b2)


# ----------------------------------------------------------------------------
# Pure-JAX reference.  It mirrors the kernel's MXU numerics (bf16 matmul operands,
# f32 accumulation) so the comparison can stay tight.
# ----------------------------------------------------------------------------
def encoder512_ref(x, params):
    def conv(x, w, b, pad):
        y = lax.conv_general_dilated(
            x.astype(jnp.bfloat16), w.astype(jnp.bfloat16),
            window_strides=(1, 1), padding=pad,
            dimension_numbers=("NCHW", "HWIO", "NCHW"),
            preferred_element_type=jnp.float32)
        return y + b[None, :, None, None]

    def block(x, p):
        sc = conv(x, p["ws"], p["bs"], "VALID")
        h = jax.nn.relu(conv(x, p["w1"], p["b1"], "SAME"))
        h = conv(h, p["w2"], p["b2"], "SAME") + sc
        return jax.nn.relu(h)

    def pool(x):
        return lax.reduce_window(x, -jnp.inf, lax.max,
                                 (1, 1, 2, 2), (1, 1, 2, 2), "VALID")

    x = block(x, params["b1"]); x = pool(x)
    x = block(x, params["b2"]); x = pool(x)
    x = block(x, params["b3"]); x = pool(x)
    return x.reshape(x.shape[0], -1)


# ----------------------------------------------------------------------------
if __name__ == "__main__":
    key = jax.random.PRNGKey(0)
    kx, kb1, kb2, kb3 = jax.random.split(key, 4)

    B, C, G = 2, 26, 16          # polygons_columns_len=26, small grid_size=16
    x = jax.random.normal(kx, (B, C, G, G), jnp.float32)
    params = dict(
        b1=init_res_block(kb1, 26, 16),
        b2=init_res_block(kb2, 16, 8),
        b3=init_res_block(kb3, 8, 8),
    )

    packed = pack_params(params, G, C)        # one-time packing, outside the jitted forward
    out = jax.block_until_ready(jax.jit(encoder512)(x, packed))
    ref = jax.block_until_ready(jax.jit(encoder512_ref)(x, params))

    assert out.shape == (B, 8 * (G // 8) ** 2), out.shape
    # Both paths use bf16 matmul operands with f32 accumulation; the tolerance covers bf16
    # rounding-boundary flips from differing f32 accumulation orders across three blocks.
    np.testing.assert_allclose(np.asarray(out), np.asarray(ref), rtol=1e-2, atol=1e-2)
    print("KERNEL_OK")
</pallas_src>

<mosaic_0001>
module attributes {stable_mosaic.version = 11 : i64} {
  func.func @kernel(%arg0: i32, %arg1: memref<1x26x256xf32, #tpu.memory_space<vmem>>, %arg2: memref<256x400xbf16, #tpu.memory_space<vmem>>, %arg3: memref<25x16x26xbf16, #tpu.memory_space<vmem>>, %arg4: memref<16x1xf32, #tpu.memory_space<vmem>>, %arg5: memref<16x26xbf16, #tpu.memory_space<vmem>>, %arg6: memref<25x16x16xbf16, #tpu.memory_space<vmem>>, %arg7: memref<16x1xf32, #tpu.memory_space<vmem>>, %arg8: memref<316x400xbf16, #tpu.memory_space<vmem>>, %arg9: memref<295x144xbf16, #tpu.memory_space<vmem>>, %arg10: memref<25x8x16xbf16, #tpu.memory_space<vmem>>, %arg11: memref<8x1xf32, #tpu.memory_space<vmem>>, %arg12: memref<8x16xbf16, #tpu.memory_space<vmem>>, %arg13: memref<25x8x8xbf16, #tpu.memory_space<vmem>>, %arg14: memref<8x1xf32, #tpu.memory_space<vmem>>, %arg15: memref<92x144xbf16, #tpu.memory_space<vmem>>, %arg16: memref<79x64xbf16, #tpu.memory_space<vmem>>, %arg17: memref<25x8x8xbf16, #tpu.memory_space<vmem>>, %arg18: memref<8x1xf32, #tpu.memory_space<vmem>>, %arg19: memref<8x8xbf16, #tpu.memory_space<vmem>>, %arg20: memref<25x8x8xbf16, #tpu.memory_space<vmem>>, %arg21: memref<8x1xf32, #tpu.memory_space<vmem>>, %arg22: memref<28x64xbf16, #tpu.memory_space<vmem>>, %arg23: memref<19x4xf32, #tpu.memory_space<vmem>>, %arg24: memref<1x8x4xf32, #tpu.memory_space<vmem>>, %arg25: memref<26x400xbf16, #tpu.memory_space<vmem>>, %arg26: memref<16x400xbf16, #tpu.memory_space<vmem>>, %arg27: memref<16x144xbf16, #tpu.memory_space<vmem>>, %arg28: memref<8x144xbf16, #tpu.memory_space<vmem>>, %arg29: memref<8x64xbf16, #tpu.memory_space<vmem>>, %arg30: memref<8x64xbf16, #tpu.memory_space<vmem>>) attributes {dimension_semantics = [#tpu.dimension_semantics<parallel>], iteration_bounds = array<i64: 2>, scalar_prefetch = 0 : i64, scratch_operands = 6 : i64, tpu.core_type = #tpu.core_type<tc>, window_params = [{transform_indices = @transform_0, window_bounds = array<i64: 1, 26, 256>}, {pipeline_mode = #tpu.pipeline_mode<synchronous>, transform_indices = @transform_1, window_bounds = array<i64: 256, 400>}, {pipeline_mode = #tpu.pipeline_mode<synchronous>, transform_indices = @transform_2, window_bounds = array<i64: 25, 16, 26>}, {pipeline_mode = #tpu.pipeline_mode<synchronous>, transform_indices = @transform_3, window_bounds = array<i64: 16, 1>}, {pipeline_mode = #tpu.pipeline_mode<synchronous>, transform_indices = @transform_4, window_bounds = array<i64: 16, 26>}, {pipeline_mode = #tpu.pipeline_mode<synchronous>, transform_indices = @transform_5, window_bounds = array<i64: 25, 16, 16>}, {pipeline_mode = #tpu.pipeline_mode<synchronous>, transform_indices = @transform_6, window_bounds = array<i64: 16, 1>}, {pipeline_mode = #tpu.pipeline_mode<synchronous>, transform_indices = @transform_7, window_bounds = array<i64: 316, 400>}, {pipeline_mode = #tpu.pipeline_mode<synchronous>, transform_indices = @transform_8, window_bounds = array<i64: 295, 144>}, {pipeline_mode = #tpu.pipeline_mode<synchronous>, transform_indices = @transform_9, window_bounds = array<i64: 25, 8, 16>}, {pipeline_mode = #tpu.pipeline_mode<synchronous>, transform_indices = @transform_10, window_bounds = array<i64: 8, 1>}, {pipeline_mode = #tpu.pipeline_mode<synchronous>, transform_indices = @transform_11, window_bounds = array<i64: 8, 16>}, {pipeline_mode = #tpu.pipeline_mode<synchronous>, transform_indices = @transform_12, window_bounds = array<i64: 25, 8, 8>}, {pipeline_mode = #tpu.pipeline_mode<synchronous>, transform_indices = @transform_13, window_bounds = array<i64: 8, 1>}, {pipeline_mode = #tpu.pipeline_mode<synchronous>, transform_indices = @transform_14, window_bounds = array<i64: 92, 144>}, {pipeline_mode = #tpu.pipeline_mode<synchronous>, transform_indices = @transform_15, window_bounds = array<i64: 79, 64>}, {pipeline_mode = #tpu.pipeline_mode<synchronous>, transform_indices = @transform_16, window_bounds = array<i64: 25, 8, 8>}, {pipeline_mode = #tpu.pipeline_mode<synchronous>, transform_indices = @transform_17, window_bounds = array<i64: 8, 1>}, {pipeline_mode = #tpu.pipeline_mode<synchronous>, transform_indices = @transform_18, window_bounds = array<i64: 8, 8>}, {pipeline_mode = #tpu.pipeline_mode<synchronous>, transform_indices = @transform_19, window_bounds = array<i64: 25, 8, 8>}, {pipeline_mode = #tpu.pipeline_mode<synchronous>, transform_indices = @transform_20, window_bounds = array<i64: 8, 1>}, {pipeline_mode = #tpu.pipeline_mode<synchronous>, transform_indices = @transform_21, window_bounds = array<i64: 28, 64>}, {pipeline_mode = #tpu.pipeline_mode<synchronous>, transform_indices = @transform_22, window_bounds = array<i64: 19, 4>}, {transform_indices = @transform_23, window_bounds = array<i64: 1, 8, 4>}]} {
    %c0 = arith.constant 0 : index
    %c0_0 = arith.constant 0 : index
    %c0_1 = arith.constant 0 : index
    %0 = vector.load %arg1[%c0, %c0_0, %c0_1] : memref<1x26x256xf32, #tpu.memory_space<vmem>>, vector<1x26x256xf32>
    %1 = vector.shape_cast %0 : vector<1x26x256xf32> to vector<26x256xf32>
    %2 = arith.truncf %1 : vector<26x256xf32> to vector<26x256xbf16>
    %c0_2 = arith.constant 0 : index
    %c0_3 = arith.constant 0 : index
    %3 = vector.load %arg2[%c0_2, %c0_3] : memref<256x400xbf16, #tpu.memory_space<vmem>>, vector<256x400xbf16>
    %cst = arith.constant dense<0.000000e+00> : vector<26x400xf32>
    %4 = tpu.matmul %2, %3, %cst {dimension_numbers = #tpu.dot_dimension_numbers<[1], [0], [0], [1], [0, 0, 1, 1], [], []>} : vector<26x256xbf16>, vector<256x400xbf16>, vector<26x400xf32> -> vector<26x400xf32>
    %5 = arith.truncf %4 : vector<26x400xf32> to vector<26x400xbf16>
    %c0_4 = arith.constant 0 : index
    %c0_5 = arith.constant 0 : index
    %6 = vector.load %arg25[%c0_4, %c0_5] : memref<26x400xbf16, #tpu.memory_space<vmem>>, vector<26x400xbf16>
    tpu.vector_store %arg25[%c0_4, %c0_5], %5 {strides = array<i32>} : memref<26x400xbf16, #tpu.memory_space<vmem>>, vector<26x400xbf16>,
    %c0_6 = arith.constant 0 : index
    %c0_7 = arith.constant 0 : index
    %7 = vector.load %arg25[%c0_6, %c0_7] : memref<26x400xbf16, #tpu.memory_space<vmem>>, vector<26x316xbf16>
    %c0_8 = arith.constant 0 : index
    %c0_9 = arith.constant 0 : index
    %c0_10 = arith.constant 0 : index
    %8 = vector.load %arg3[%c0_8, %c0_9, %c0_10] : memref<25x16x26xbf16, #tpu.memory_space<vmem>>, vector<1x16x26xbf16>
    %9 = vector.shape_cast %8 : vector<1x16x26xbf16> to vector<16x26xbf16>
    %cst_11 = arith.constant dense<0.000000e+00> : vector<16x316xf32>
    %10 = tpu.matmul %9, %7, %cst_11 {dimension_numbers = #tpu.dot_dimension_numbers<[1], [0], [0], [1], [0, 0, 1, 1], [], []>} : vector<16x26xbf16>, vector<26x316xbf16>, vector<16x316xf32> -> vector<16x316xf32>
    %c0_12 = arith.constant 0 : index
    %c1 = arith.constant 1 : index
    %11 = vector.load %arg25[%c0_12, %c1] : memref<26x400xbf16, #tpu.memory_space<vmem>>, vector<26x316xbf16>
    %c1_13 = arith.constant 1 : index
    %c0_14 = arith.constant 0 : index
    %c0_15 = arith.constant 0 : index
    %12 = vector.load %arg3[%c1_13, %c0_14, %c0_15] : memref<25x16x26xbf16, #tpu.memory_space<vmem>>, vector<1x16x26xbf16>
    %13 = vector.shape_cast %12 : vector<1x16x26xbf16> to vector<16x26xbf16>
    %cst_16 = arith.constant dense<0.000000e+00> : vector<16x316xf32>
    %14 = tpu.matmul %13, %11, %cst_16 {dimension_numbers = #tpu.dot_dimension_numbers<[1], [0], [0], [1], [0, 0, 1, 1], [], []>} : vector<16x26xbf16>, vector<26x316xbf16>, vector<16x316xf32> -> vector<16x316xf32>
    %15 = arith.addf %10, %14 : vector<16x316xf32>
    %c0_17 = arith.constant 0 : index
    %c2 = arith.constant 2 : index
    %16 = vector.load %arg25[%c0_17, %c2] : memref<26x400xbf16, #tpu.memory_space<vmem>>, vector<26x316xbf16>
    %c2_18 = arith.constant 2 : index
    %c0_19 = arith.constant 0 : index
    %c0_20 = arith.constant 0 : index
    %17 = vector.load %arg3[%c2_18, %c0_19, %c0_20] : memref<25x16x26xbf16, #tpu.memory_space<vmem>>, vector<1x16x26xbf16>
    %18 = vector.shape_cast %17 : vector<1x16x26xbf16> to vector<16x26xbf16>
    %cst_21 = arith.constant dense<0.000000e+00> : vector<16x316xf32>
    %19 = tpu.matmul %18, %16, %cst_21 {dimension_numbers = #tpu.dot_dimension_numbers<[1], [0], [0], [1], [0, 0, 1, 1], [], []>} : vector<16x26xbf16>, vector<26x316xbf16>, vector<16x316xf32> -> vector<16x316xf32>
    %20 = arith.addf %15, %19 : vector<16x316xf32>
    %c0_22 = arith.constant 0 : index
    %c3 = arith.constant 3 : index
    %21 = vector.load %arg25[%c0_22, %c3] : memref<26x400xbf16, #tpu.memory_space<vmem>>, vector<26x316xbf16>
    %c3_23 = arith.constant 3 : index
    %c0_24 = arith.constant 0 : index
    %c0_25 = arith.constant 0 : index
    %22 = vector.load %arg3[%c3_23, %c0_24, %c0_25] : memref<25x16x26xbf16, #tpu.memory_space<vmem>>, vector<1x16x26xbf16>
    %23 = vector.shape_cast %22 : vector<1x16x26xbf16> to vector<16x26xbf16>
    %cst_26 = arith.constant dense<0.000000e+00> : vector<16x316xf32>
    %24 = tpu.matmul %23, %21, %cst_26 {dimension_numbers = #tpu.dot_dimension_numbers<[1], [0], [0], [1], [0, 0, 1, 1], [], []>} : vector<16x26xbf16>, vector<26x316xbf16>, vector<16x316xf32> -> vector<16x316xf32>
    %25 = arith.addf %20, %24 : vector<16x316xf32>
    %c0_27 = arith.constant 0 : index
    %c4 = arith.constant 4 : index
    %26 = vector.load %arg25[%c0_27, %c4] : memref<26x400xbf16, #tpu.memory_space<vmem>>, vector<26x316xbf16>
    %c4_28 = arith.constant 4 : index
    %c0_29 = arith.constant 0 : index
    %c0_30 = arith.constant 0 : index
    %27 = vector.load %arg3[%c4_28, %c0_29, %c0_30] : memref<25x16x26xbf16, #tpu.memory_space<vmem>>, vector<1x16x26xbf16>
    %28 = vector.shape_cast %27 : vector<1x16x26xbf16> to vector<16x26xbf16>
    %cst_31 = arith.constant dense<0.000000e+00> : vector<16x316xf32>
    %29 = tpu.matmul %28, %26, %cst_31 {dimension_numbers = #tpu.dot_dimension_numbers<[1], [0], [0], [1], [0, 0, 1, 1], [], []>} : vector<16x26xbf16>, vector<26x316xbf16>, vector<16x316xf32> -> vector<16x316xf32>
    %30 = arith.addf %25, %29 : vector<16x316xf32>
    %c0_32 = arith.constant 0 : index
    %c20 = arith.constant 20 : index
    %31 = vector.load %arg25[%c0_32, %c20] : memref<26x400xbf16, #tpu.memory_space<vmem>>, vector<26x316xbf16>
    %c5 = arith.constant 5 : index
    %c0_33 = arith.constant 0 : index
    %c0_34 = arith.constant 0 : index
    %32 = vector.load %arg3[%c5, %c0_33, %c0_34] : memref<25x16x26xbf16, #tpu.memory_space<vmem>>, vector<1x16x26xbf16>
    %33 = vector.shape_cast %32 : vector<1x16x26xbf16> to vector<16x26xbf16>
    %cst_35 = arith.constant dense<0.000000e+00> : vector<16x316xf32>
    %34 = tpu.matmul %33, %31, %cst_35 {dimension_numbers = #tpu.dot_dimension_numbers<[1], [0], [0], [1], [0, 0, 1, 1], [], []>} : vector<16x26xbf16>, vector<26x316xbf16>, vector<16x316xf32> -> vector<16x316xf32>
    %35 = arith.addf %30, %34 : vector<16x316xf32>
    %c0_36 = arith.constant 0 : index
    %c21 = arith.constant 21 : index
    %36 = vector.load %arg25[%c0_36, %c21] : memref<26x400xbf16, #tpu.memory_space<vmem>>, vector<26x316xbf16>
    %c6 = arith.constant 6 : index
    %c0_37 = arith.constant 0 : index
    %c0_38 = arith.constant 0 : index
    %37 = vector.load %arg3[%c6, %c0_37, %c0_38] : memref<25x16x26xbf16, #tpu.memory_space<vmem>>, vector<1x16x26xbf16>
    %38 = vector.shape_cast %37 : vector<1x16x26xbf16> to vector<16x26xbf16>
    %cst_39 = arith.constant dense<0.000000e+00> : vector<16x316xf32>
    %39 = tpu.matmul %38, %36, %cst_39 {dimension_numbers = #tpu.dot_dimension_numbers<[1], [0], [0], [1], [0, 0, 1, 1], [], []>} : vector<16x26xbf16>, vector<26x316xbf16>, vector<16x316xf32> -> vector<16x316xf32>
    %40 = arith.addf %35, %39 : vector<16x316xf32>
    %c0_40 = arith.constant 0 : index
    %c22 = arith.constant 22 : index
    %41 = vector.load %arg25[%c0_40, %c22] : memref<26x400xbf16, #tpu.memory_space<vmem>>, vector<26x316xbf16>
    %c7 = arith.constant 7 : index
    %c0_41 = arith.constant 0 : index
    %c0_42 = arith.constant 0 : index
    %42 = vector.load %arg3[%c7, %c0_41, %c0_42] : memref<25x16x26xbf16, #tpu.memory_space<vmem>>, vector<1x16x26xbf16>
    %43 = vector.shape_cast %42 : vector<1x16x26xbf16> to vector<16x26xbf16>
    %cst_43 = arith.constant dense<0.000000e+00> : vector<16x316xf32>
    %44 = tpu.matmul %43, %41, %cst_43 {dimension_numbers = #tpu.dot_dimension_numbers<[1], [0], [0], [1], [0, 0, 1, 1], [], []>} : vector<16x26xbf16>, vector<26x316xbf16>, vector<16x316xf32> -> vector<16x316xf32>
    %45 = arith.addf %40, %44 : vector<16x316xf32>
    %c0_44 = arith.constant 0 : index
    %c23 = arith.constant 23 : index
    %46 = vector.load %arg25[%c0_44, %c23] : memref<26x400xbf16, #tpu.memory_space<vmem>>, vector<26x316xbf16>
    %c8 = arith.constant 8 : index
    %c0_45 = arith.constant 0 : index
    %c0_46 = arith.constant 0 : index
    %47 = vector.load %arg3[%c8, %c0_45, %c0_46] : memref<25x16x26xbf16, #tpu.memory_space<vmem>>, vector<1x16x26xbf16>
    %48 = vector.shape_cast %47 : vector<1x16x26xbf16> to vector<16x26xbf16>
    %cst_47 = arith.constant dense<0.000000e+00> : vector<16x316xf32>
    %49 = tpu.matmul %48, %46, %cst_47 {dimension_numbers = #tpu.dot_dimension_numbers<[1], [0], [0], [1], [0, 0, 1, 1], [], []>} : vector<16x26xbf16>, vector<26x316xbf16>, vector<16x316xf32> -> vector<16x316xf32>
    %50 = arith.addf %45, %49 : vector<16x316xf32>
    %c0_48 = arith.constant 0 : index
    %c24 = arith.constant 24 : index
    %51 = vector.load %arg25[%c0_48, %c24] : memref<26x400xbf16, #tpu.memory_space<vmem>>, vector<26x316xbf16>
    %c9 = arith.constant 9 : index
    %c0_49 = arith.constant 0 : index
    %c0_50 = arith.constant 0 : index
    %52 = vector.load %arg3[%c9, %c0_49, %c0_50] : memref<25x16x26xbf16, #tpu.memory_space<vmem>>, vector<1x16x26xbf16>
    %53 = vector.shape_cast %52 : vector<1x16x26xbf16> to vector<16x26xbf16>
    %cst_51 = arith.constant dense<0.000000e+00> : vector<16x316xf32>
    %54 = tpu.matmul %53, %51, %cst_51 {dimension_numbers = #tpu.dot_dimension_numbers<[1], [0], [0], [1], [0, 0, 1, 1], [], []>} : vector<16x26xbf16>, vector<26x316xbf16>, vector<16x316xf32> -> vector<16x316xf32>
    %55 = arith.addf %50, %54 : vector<16x316xf32>
    %c0_52 = arith.constant 0 : index
    %c40 = arith.constant 40 : index
    %56 = vector.load %arg25[%c0_52, %c40] : memref<26x400xbf16, #tpu.memory_space<vmem>>, vector<26x316xbf16>
    %c10 = arith.constant 10 : index
    %c0_53 = arith.constant 0 : index
    %c0_54 = arith.constant 0 : index
    %57 = vector.load %arg3[%c10, %c0_53, %c0_54] : memref<25x16x26xbf16, #tpu.memory_space<vmem>>, vector<1x16x26xbf16>
    %58 = vector.shape_cast %57 : vector<1x16x26xbf16> to vector<16x26xbf16>
    %cst_55 = arith.constant dense<0.000000e+00> : vector<16x316xf32>
    %59 = tpu.matmul %58, %56, %cst_55 {dimension_numbers = #tpu.dot_dimension_numbers<[1], [0], [0], [1], [0, 0, 1, 1], [], []>} : vector<16x26xbf16>, vector<26x316xbf16>, vector<16x316xf32> -> vector<16x316xf32>
    %60 = arith.addf %55, %59 : vector<16x316xf32>
    %c0_56 = arith.constant 0 : index
    %c41 = arith.constant 41 : index
    %61 = vector.load %arg25[%c0_56, %c41] : memref<26x400xbf16, #tpu.memory_space<vmem>>, vector<26x316xbf16>
    %c11 = arith.constant 11 : index
    %c0_57 = arith.constant 0 : index
    %c0_58 = arith.constant 0 : index
    %62 = vector.load %arg3[%c11, %c0_57, %c0_58] : memref<25x16x26xbf16, #tpu.memory_space<vmem>>, vector<1x16x26xbf16>
    %63 = vector.shape_cast %62 : vector<1x16x26xbf16> to vector<16x26xbf16>
    %cst_59 = arith.constant dense<0.000000e+00> : vector<16x316xf32>
    %64 = tpu.matmul %63, %61, %cst_59 {dimension_numbers = #tpu.dot_dimension_numbers<[1], [0], [0], [1], [0, 0, 1, 1], [], []>} : vector<16x26xbf16>, vector<26x316xbf16>, vector<16x316xf32> -> vector<16x316xf32>
    %65 = arith.addf %60, %64 : vector<16x316xf32>
    %c0_60 = arith.constant 0 : index
    %c42 = arith.constant 42 : index
    %66 = vector.load %arg25[%c0_60, %c42] : memref<26x400xbf16, #tpu.memory_space<vmem>>, vector<26x316xbf16>
    %c12 = arith.constant 12 : index
    %c0_61 = arith.constant 0 : index
    %c0_62 = arith.constant 0 : index
    %67 = vector.load %arg3[%c12, %c0_61, %c0_62] : memref<25x16x26xbf16, #tpu.memory_space<vmem>>, vector<1x16x26xbf16>
    %68 = vector.shape_cast %67 : vector<1x16x26xbf16> to vector<16x26xbf16>
    %cst_63 = arith.constant dense<0.000000e+00> : vector<16x316xf32>
    %69 = tpu.matmul %68, %66, %cst_63 {dimension_numbers = #tpu.dot_dimension_numbers<[1], [0], [0], [1], [0, 0, 1, 1], [], []>} : vector<16x26xbf16>, vector<26x316xbf16>, vector<16x316xf32> -> vector<16x316xf32>
    %70 = arith.addf %65, %69 : vector<16x316xf32>
    %c0_64 = arith.constant 0 : index
    %c43 = arith.constant 43 : index
    %71 = vector.load %arg25[%c0_64, %c43] : memref<26x400xbf16, #tpu.memory_space<vmem>>, vector<26x316xbf16>
    %c13 = arith.constant 13 : index
    %c0_65 = arith.constant 0 : index
    %c0_66 = arith.constant 0 : index
    %72 = vector.load %arg3[%c13, %c0_65, %c0_66] : memref<25x16x26xbf16, #tpu.memory_space<vmem>>, vector<1x16x26xbf16>
    %73 = vector.shape_cast %72 : vector<1x16x26xbf16> to vector<16x26xbf16>
    %cst_67 = arith.constant dense<0.000000e+00> : vector<16x316xf32>
    %74 = tpu.matmul %73, %71, %cst_67 {dimension_numbers = #tpu.dot_dimension_numbers<[1], [0], [0], [1], [0, 0, 1, 1], [], []>} : vector<16x26xbf16>, vector<26x316xbf16>, vector<16x316xf32> -> vector<16x316xf32>
    %75 = arith.addf %70, %74 : vector<16x316xf32>
    %c0_68 = arith.constant 0 : index
    %c44 = arith.constant 44 : index
    %76 = vector.load %arg25[%c0_68, %c44] : memref<26x400xbf16, #tpu.memory_space<vmem>>, vector<26x316xbf16>
    %c14 = arith.constant 14 : index
    %c0_69 = arith.constant 0 : index
    %c0_70 = arith.constant 0 : index
    %77 = vector.load %arg3[%c14, %c0_69, %c0_70] : memref<25x16x26xbf16, #tpu.memory_space<vmem>>, vector<1x16x26xbf16>
    %78 = vector.shape_cast %77 : vector<1x16x26xbf16> to vector<16x26xbf16>
    %cst_71 = arith.constant dense<0.000000e+00> : vector<16x316xf32>
    %79 = tpu.matmul %78, %76, %cst_71 {dimension_numbers = #tpu.dot_dimension_numbers<[1], [0], [0], [1], [0, 0, 1, 1], [], []>} : vector<16x26xbf16>, vector<26x316xbf16>, vector<16x316xf32> -> vector<16x316xf32>
    %80 = arith.addf %75, %79 : vector<16x316xf32>
    %c0_72 = arith.constant 0 : index
    %c60 = arith.constant 60 : index
    %81 = vector.load %arg25[%c0_72, %c60] : memref<26x400xbf16, #tpu.memory_space<vmem>>, vector<26x316xbf16>
    %c15 = arith.constant 15 : index
    %c0_73 = arith.constant 0 : index
    %c0_74 = arith.constant 0 : index
    %82 = vector.load %arg3[%c15, %c0_73, %c0_74] : memref<25x16x26xbf16, #tpu.memory_space<vmem>>, vector<1x16x26xbf16>
    %83 = vector.shape_cast %82 : vector<1x16x26xbf16> to vector<16x26xbf16>
    %cst_75 = arith.constant dense<0.000000e+00> : vector<16x316xf32>
    %84 = tpu.matmul %83, %81, %cst_75 {dimension_numbers = #tpu.dot_dimension_numbers<[1], [0], [0], [1], [0, 0, 1, 1], [], []>} : vector<16x26xbf16>, vector<26x316xbf16>, vector<16x316xf32> -> vector<16x316xf32>
    %85 = arith.addf %80, %84 : vector<16x316xf32>
    %c0_76 = arith.constant 0 : index
    %c61 = arith.constant 61 : index
    %86 = vector.load %arg25[%c0_76, %c61] : memref<26x400xbf16, #tpu.memory_space<vmem>>, vector<26x316xbf16>
    %c16 = arith.constant 16 : index
    %c0_77 = arith.constant 0 : index
    %c0_78 = arith.constant 0 : index
    %87 = vector.load %arg3[%c16, %c0_77, %c0_78] : memref<25x16x26xbf16, #tpu.memory_space<vmem>>, vector<1x16x26xbf16>
    %88 = vector.shape_cast %87 : vector<1x16x26xbf16> to vector<16x26xbf16>
    %cst_79 = arith.constant dense<0.000000e+00> : vector<16x316xf32>
    %89 = tpu.matmul %88, %86, %cst_79 {dimension_numbers = #tpu.dot_dimension_numbers<[1], [0], [0], [1], [0, 0, 1, 1], [], []>} : vector<16x26xbf16>, vector<26x316xbf16>, vector<16x316xf32> -> vector<16x316xf32>
    %90 = arith.addf %85, %89 : vector<16x316xf32>
    %c0_80 = arith.constant 0 : index
    %c62 = arith.constant 62 : index
    %91 = vector.load %arg25[%c0_80, %c62] : memref<26x400xbf16, #tpu.memory_space<vmem>>, vector<26x316xbf16>
    %c17 = arith.constant 17 : index
    %c0_81 = arith.constant 0 : index
    %c0_82 = arith.constant 0 : index
    %92 = vector.load %arg3[%c17, %c0_81, %c0_82] : memref<25x16x26xbf16, #tpu.memory_space<vmem>>, vector<1x16x26xbf16>
    %93 = vector.shape_cast %92 : vector<1x16x26xbf16> to vector<16x26xbf16>
    %cst_83 = arith.constant dense<0.000000e+00> : vector<16x316xf32>
    %94 = tpu.matmul %93, %91, %cst_83 {dimension_numbers = #tpu.dot_dimension_numbers<[1], [0], [0], [1], [0, 0, 1, 1], [], []>} : vector<16x26xbf16>, vector<26x316xbf16>, vector<16x316xf32> -> vector<16x316xf32>
    %95 = arith.addf %90, %94 : vector<16x316xf32>
    %c0_84 = arith.constant 0 : index
    %c63 = arith.constant 63 : index
    %96 = vector.load %arg25[%c0_84, %c63] : memref<26x400xbf16, #tpu.memory_space<vmem>>, vector<26x316xbf16>
    %c18 = arith.constant 18 : index
    %c0_85 = arith.constant 0 : index
    %c0_86 = arith.constant 0 : index
    %97 = vector.load %arg3[%c18, %c0_85, %c0_86] : memref<25x16x26xbf16, #tpu.memory_space<vmem>>, vector<1x16x26xbf16>
    %98 = vector.shape_cast %97 : vector<1x16x26xbf16> to vector<16x26xbf16>
    %cst_87 = arith.constant dense<0.000000e+00> : vector<16x316xf32>
    %99 = tpu.matmul %98, %96, %cst_87 {dimension_numbers = #tpu.dot_dimension_numbers<[1], [0], [0], [1], [0, 0, 1, 1], [], []>} : vector<16x26xbf16>, vector<26x316xbf16>, vector<16x316xf32> -> vector<16x316xf32>
    %100 = arith.addf %95, %99 : vector<16x316xf32>
    %c0_88 = arith.constant 0 : index
    %c64 = arith.constant 64 : index
    %101 = vector.load %arg25[%c0_88, %c64] : memref<26x400xbf16, #tpu.memory_space<vmem>>, vector<26x316xbf16>
    %c19 = arith.constant 19 : index
    %c0_89 = arith.constant 0 : index
    %c0_90 = arith.constant 0 : index
    %102 = vector.load %arg3[%c19, %c0_89, %c0_90] : memref<25x16x26xbf16, #tpu.memory_space<vmem>>, vector<1x16x26xbf16>
    %103 = vector.shape_cast %102 : vector<1x16x26xbf16> to vector<16x26xbf16>
    %cst_91 = arith.constant dense<0.000000e+00> : vector<16x316xf32>
    %104 = tpu.matmul %103, %101, %cst_91 {dimension_numbers = #tpu.dot_dimension_numbers<[1], [0], [0], [1], [0, 0, 1, 1], [], []>} : vector<16x26xbf16>, vector<26x316xbf16>, vector<16x316xf32> -> vector<16x316xf32>
    %105 = arith.addf %100, %104 : vector<16x316xf32>
    %c0_92 = arith.constant 0 : index
    %c80 = arith.constant 80 : index
    %106 = vector.load %arg25[%c0_92, %c80] : memref<26x400xbf16, #tpu.memory_space<vmem>>, vector<26x316xbf16>
    %c20_93 = arith.constant 20 : index
    %c0_94 = arith.constant 0 : index
    %c0_95 = arith.constant 0 : index
    %107 = vector.load %arg3[%c20_93, %c0_94, %c0_95] : memref<25x16x26xbf16, #tpu.memory_space<vmem>>, vector<1x16x26xbf16>
    %108 = vector.shape_cast %107 : vector<1x16x26xbf16> to vector<16x26xbf16>
    %cst_96 = arith.constant dense<0.000000e+00> : vector<16x316xf32>
    %109 = tpu.matmul %108, %106, %cst_96 {dimension_numbers = #tpu.dot_dimension_numbers<[1], [0], [0], [1], [0, 0, 1, 1], [], []>} : vector<16x26xbf16>, vector<26x316xbf16>, vector<16x316xf32> -> vector<16x316xf32>
    %110 = arith.addf %105, %109 : vector<16x316xf32>
    %c0_97 = arith.constant 0 : index
    %c81 = arith.constant 81 : index
    %111 = vector.load %arg25[%c0_97, %c81] : memref<26x400xbf16, #tpu.memory_space<vmem>>, vector<26x316xbf16>
    %c21_98 = arith.constant 21 : index
    %c0_99 = arith.constant 0 : index
    %c0_100 = arith.constant 0 : index
    %112 = vector.load %arg3[%c21_98, %c0_99, %c0_100] : memref<25x16x26xbf16, #tpu.memory_space<vmem>>, vector<1x16x26xbf16>
    %113 = vector.shape_cast %112 : vector<1x16x26xbf16> to vector<16x26xbf16>
    %cst_101 = arith.constant dense<0.000000e+00> : vector<16x316xf32>
    %114 = tpu.matmul %113, %111, %cst_101 {dimension_numbers = #tpu.dot_dimension_numbers<[1], [0], [0], [1], [0, 0, 1, 1], [], []>} : vector<16x26xbf16>, vector<26x316xbf16>, vector<16x316xf32> -> vector<16x316xf32>
    %115 = arith.addf %110, %114 : vector<16x316xf32>
    %c0_102 = arith.constant 0 : index
    %c82 = arith.constant 82 : index
    %116 = vector.load %arg25[%c0_102, %c82] : memref<26x400xbf16, #tpu.memory_space<vmem>>, vector<26x316xbf16>
    %c22_103 = arith.constant 22 : index
    %c0_104 = arith.constant 0 : index
    %c0_105 = arith.constant 0 : index
    %117 = vector.load %arg3[%c22_103, %c0_104, %c0_105] : memref<25x16x26xbf16, #tpu.memory_space<vmem>>, vector<1x16x26xbf16>
    %118 = vector.shape_cast %117 : vector<1x16x26xbf16> to vector<16x26xbf16>
    %cst_106 = arith.constant dense<0.000000e+00> : vector<16x316xf32>
    %119 = tpu.matmul %118, %116, %cst_106 {dimension_numbers = #tpu.dot_dimension_numbers<[1], [0], [0], [1], [0, 0, 1, 1], [], []>} : vector<16x26xbf16>, vector<26x316xbf16>, vector<16x316xf32> -> vector<16x316xf32>
    %120 = arith.addf %115, %119 : vector<16x316xf32>
    %c0_107 = arith.constant 0 : index
    %c83 = arith.constant 83 : index
    %121 = vector.load %arg25[%c0_107, %c83] : memref<26x400xbf16, #tpu.memory_space<vmem>>, vector<26x316xbf16>
    %c23_108 = arith.constant 23 : index
    %c0_109 = arith.constant 0 : index
    %c0_110 = arith.constant 0 : index
    %122 = vector.load %arg3[%c23_108, %c0_109, %c0_110] : memref<25x16x26xbf16, #tpu.memory_space<vmem>>, vector<1x16x26xbf16>
    %123 = vector.shape_cast %122 : vector<1x16x26xbf16> to vector<16x26xbf16>
    %cst_111 = arith.constant dense<0.000000e+00> : vector<16x316xf32>
    %124 = tpu.matmul %123, %121, %cst_111 {dimension_numbers = #tpu.dot_dimension_numbers<[1], [0], [0], [1], [0, 0, 1, 1], [], []>} : vector<16x26xbf16>, vector<26x316xbf16>, vector<16x316xf32> -> vector<16x316xf32>
    %125 = arith.addf %120, %124 : vector<16x316xf32>
    %c0_112 = arith.constant 0 : index
    %c84 = arith.constant 84 : index
    %126 = vector.load %arg25[%c0_112, %c84] : memref<26x400xbf16, #tpu.memory_space<vmem>>, vector<26x316xbf16>
    %c24_113 = arith.constant 24 : index
    %c0_114 = arith.constant 0 : index
    %c0_115 = arith.constant 0 : index
    %127 = vector.load %arg3[%c24_113, %c0_114, %c0_115] : memref<25x16x26xbf16, #tpu.memory_space<vmem>>, vector<1x16x26xbf16>
    %128 = vector.shape_cast %127 : vector<1x16x26xbf16> to vector<16x26xbf16>
    %cst_116 = arith.constant dense<0.000000e+00> : vector<16x316xf32>
    %129 = tpu.matmul %128, %126, %cst_116 {dimension_numbers = #tpu.dot_dimension_numbers<[1], [0], [0], [1], [0, 0, 1, 1], [], []>} : vector<16x26xbf16>, vector<26x316xbf16>, vector<16x316xf32> -> vector<16x316xf32>
    %130 = arith.addf %125, %129 : vector<16x316xf32>
    %c0_117 = arith.constant 0 : index
    %c0_118 = arith.constant 0 : index
    %131 = vector.load %arg4[%c0_117, %c0_118] : memref<16x1xf32, #tpu.memory_space<vmem>>, vector<16x1xf32>
    %132 = vector.broadcast %131 : vector<16x1xf32> to vector<16x316xf32>
    %133 = arith.addf %130, %132 : vector<16x316xf32>
    %cst_119 = arith.constant 0.000000e+00 : f32
    %134 = vector.broadcast %cst_119 : f32 to vector<16x316xf32>
    %135 = arith.maximumf %133, %134 : vector<16x316xf32>
    %136 = arith.truncf %135 : vector<16x316xf32> to vector<16x316xbf16>
    %c0_120 = arith.constant 0 : index
    %c0_121 = arith.constant 0 : index
    %137 = vector.load %arg8[%c0_120, %c0_121] : memref<316x400xbf16, #tpu.memory_space<vmem>>, vector<316x400xbf16>
    %cst_122 = arith.constant dense<0.000000e+00> : vector<16x400xf32>
    %138 = tpu.matmul %136, %137, %cst_122 {dimension_numbers = #tpu.dot_dimension_numbers<[1], [0], [0], [1], [0, 0, 1, 1], [], []>} : vector<16x316xbf16>, vector<316x400xbf16>, vector<16x400xf32> -> vector<16x400xf32>
    %139 = arith.truncf %138 : vector<16x400xf32> to vector<16x400xbf16>
    %c0_123 = arith.constant 0 : index
    %c0_124 = arith.constant 0 : index
    %140 = vector.load %arg26[%c0_123, %c0_124] : memref<16x400xbf16, #tpu.memory_space<vmem>>, vector<16x400xbf16>
    tpu.vector_store %arg26[%c0_123, %c0_124], %139 {strides = array<i32>} : memref<16x400xbf16, #tpu.memory_space<vmem>>, vector<16x400xbf16>,
    %c0_125 = arith.constant 0 : index
    %c42_126 = arith.constant 42 : index
    %141 = vector.load %arg25[%c0_125, %c42_126] : memref<26x400xbf16, #tpu.memory_space<vmem>>, vector<26x316xbf16>
    %c0_127 = arith.constant 0 : index
    %c0_128 = arith.constant 0 : index
    %142 = vector.load %arg5[%c0_127, %c0_128] : memref<16x26xbf16, #tpu.memory_space<vmem>>, vector<16x26xbf16>
    %cst_129 = arith.constant dense<0.000000e+00> : vector<16x316xf32>
    %143 = tpu.matmul %142, %141, %cst_129 {dimension_numbers = #tpu.dot_dimension_numbers<[1], [0], [0], [1], [0, 0, 1, 1], [], []>} : vector<16x26xbf16>, vector<26x316xbf16>, vector<16x316xf32> -> vector<16x316xf32>
    %c0_130 = arith.constant 0 : index
    %c0_131 = arith.constant 0 : index
    %144 = vector.load %arg26[%c0_130, %c0_131] : memref<16x400xbf16, #tpu.memory_space<vmem>>, vector<16x316xbf16>
    %c0_132 = arith.constant 0 : index
    %c0_133 = arith.constant 0 : index
    %c0_134 = arith.constant 0 : index
    %145 = vector.load %arg6[%c0_132, %c0_133, %c0_134] : memref<25x16x16xbf16, #tpu.memory_space<vmem>>, vector<1x16x16xbf16>
    %146 = vector.shape_cast %145 : vector<1x16x16xbf16> to vector<16x16xbf16>
    %cst_135 = arith.constant dense<0.000000e+00> : vector<16x316xf32>
    %147 = tpu.matmul %146, %144, %cst_135 {dimension_numbers = #tpu.dot_dimension_numbers<[1], [0], [0], [1], [0, 0, 1, 1], [], []>} : vector<16x16xbf16>, vector<16x316xbf16>, vector<16x316xf32> -> vector<16x316xf32>
    %148 = arith.addf %143, %147 : vector<16x316xf32>
    %c0_136 = arith.constant 0 : index
    %c1_137 = arith.constant 1 : index
    %149 = vector.load %arg26[%c0_136, %c1_137] : memref<16x400xbf16, #tpu.memory_space<vmem>>, vector<16x316xbf16>
    %c1_138 = arith.constant 1 : index
    %c0_139 = arith.constant 0 : index
    %c0_140 = arith.constant 0 : index
    %150 = vector.load %arg6[%c1_138, %c0_139, %c0_140] : memref<25x16x16xbf16, #tpu.memory_space<vmem>>, vector<1x16x16xbf16>
    %151 = vector.shape_cast %150 : vector<1x16x16xbf16> to vector<16x16xbf16>
    %cst_141 = arith.constant dense<0.000000e+00> : vector<16x316xf32>
    %152 = tpu.matmul %151, %149, %cst_141 {dimension_numbers = #tpu.dot_dimension_numbers<[1], [0], [0], [1], [0, 0, 1, 1], [], []>} : vector<16x16xbf16>, vector<16x316xbf16>, vector<16x316xf32> -> vector<16x316xf32>
    %153 = arith.addf %148, %152 : vector<16x316xf32>
    %c0_142 = arith.constant 0 : index
    %c2_143 = arith.constant 2 : index
    %154 = vector.load %arg26[%c0_142, %c2_143] : memref<16x400xbf16, #tpu.memory_space<vmem>>, vector<16x316xbf16>
    %c2_144 = arith.constant 2 : index
    %c0_145 = arith.constant 0 : index
    %c0_146 = arith.constant 0 : index
    %155 = vector.load %arg6[%c2_144, %c0_145, %c0_146] : memref<25x16x16xbf16, #tpu.memory_space<vmem>>, vector<1x16x16xbf16>
    %156 = vector.shape_cast %155 : vector<1x16x16xbf16> to vector<16x16xbf16>
    %cst_147 = arith.constant dense<0.000000e+00> : vector<16x316xf32>
    %157 = tpu.matmul %156, %154, %cst_147 {dimension_numbers = #tpu.dot_dimension_numbers<[1], [0], [0], [1], [0, 0, 1, 1], [], []>} : vector<16x16xbf16>, vector<16x316xbf16>, vector<16x316xf32> -> vector<16x316xf32>
    %158 = arith.addf %153, %157 : vector<16x316xf32>
    %c0_148 = arith.constant 0 : index
    %c3_149 = arith.constant 3 : index
    %159 = vector.load %arg26[%c0_148, %c3_149] : memref<16x400xbf16, #tpu.memory_space<vmem>>, vector<16x316xbf16>
    %c3_150 = arith.constant 3 : index
    %c0_151 = arith.constant 0 : index
    %c0_152 = arith.constant 0 : index
    %160 = vector.load %arg6[%c3_150, %c0_151, %c0_152] : memref<25x16x16xbf16, #tpu.memory_space<vmem>>, vector<1x16x16xbf16>
    %161 = vector.shape_cast %160 : vector<1x16x16xbf16> to vector<16x16xbf16>
    %cst_153 = arith.constant dense<0.000000e+00> : vector<16x316xf32>
    %162 = tpu.matmul %161, %159, %cst_153 {dimension_numbers = #tpu.dot_dimension_numbers<[1], [0], [0], [1], [0, 0, 1, 1], [], []>} : vector<16x16xbf16>, vector<16x316xbf16>, vector<16x316xf32> -> vector<16x316xf32>
    %163 = arith.addf %158, %162 : vector<16x316xf32>
    %c0_154 = arith.constant 0 : index
    %c4_155 = arith.constant 4 : index
    %164 = vector.load %arg26[%c0_154, %c4_155] : memref<16x400xbf16, #tpu.memory_space<vmem>>, vector<16x316xbf16>
    %c4_156 = arith.constant 4 : index
    %c0_157 = arith.constant 0 : index
    %c0_158 = arith.constant 0 : index
    %165 = vector.load %arg6[%c4_156, %c0_157, %c0_158] : memref<25x16x16xbf16, #tpu.memory_space<vmem>>, vector<1x16x16xbf16>
    %166 = vector.shape_cast %165 : vector<1x16x16xbf16> to vector<16x16xbf16>
    %cst_159 = arith.constant dense<0.000000e+00> : vector<16x316xf32>
    %167 = tpu.matmul %166, %164, %cst_159 {dimension_numbers = #tpu.dot_dimension_numbers<[1], [0], [0], [1], [0, 0, 1, 1], [], []>} : vector<16x16xbf16>, vector<16x316xbf16>, vector<16x316xf32> -> vector<16x316xf32>
    %168 = arith.addf %163, %167 : vector<16x316xf32>
    %c0_160 = arith.constant 0 : index
    %c20_161 = arith.constant 20 : index
    %169 = vector.load %arg26[%c0_160, %c20_161] : memref<16x400xbf16, #tpu.memory_space<vmem>>, vector<16x316xbf16>
    %c5_162 = arith.constant 5 : index
    %c0_163 = arith.constant 0 : index
    %c0_164 = arith.constant 0 : index
    %170 = vector.load %arg6[%c5_162, %c0_163, %c0_164] : memref<25x16x16xbf16, #tpu.memory_space<vmem>>, vector<1x16x16xbf16>
    %171 = vector.shape_cast %170 : vector<1x16x16xbf16> to vector<16x16xbf16>
    %cst_165 = arith.constant dense<0.000000e+00> : vector<16x316xf32>
    %172 = tpu.matmul %171, %169, %cst_165 {dimension_numbers = #tpu.dot_dimension_numbers<[1], [0], [0], [1], [0, 0, 1, 1], [], []>} : vector<16x16xbf16>, vector<16x316xbf16>, vector<16x316xf32> -> vector<16x316xf32>
    %173 = arith.addf %168, %172 : vector<16x316xf32>
    %c0_166 = arith.constant 0 : index
    %c21_167 = arith.constant 21 : index
    %174 = vector.load %arg26[%c0_166, %c21_167] : memref<16x400xbf16, #tpu.memory_space<vmem>>, vector<16x316xbf16>
    %c6_168 = arith.constant 6 : index
    %c0_169 = arith.constant 0 : index
    %c0_170 = arith.constant 0 : index
    %175 = vector.load %arg6[%c6_168, %c0_169, %c0_170] : memref<25x16x16xbf16, #tpu.memory_space<vmem>>, vector<1x16x16xbf16>
    %176 = vector.shape_cast %175 : vector<1x16x16xbf16> to vector<16x16xbf16>
    %cst_171 = arith.constant dense<0.000000e+00> : vector<16x316xf32>
    %177 = tpu.matmul %176, %174, %cst_171 {dimension_numbers = #tpu.dot_dimension_numbers<[1], [0], [0], [1], [0, 0, 1, 1], [], []>} : vector<16x16xbf16>, vector<16x316xbf16>, vector<16x316xf32> -> vector<16x316xf32>
    %178 = arith.addf %173, %177 : vector<16x316xf32>
    %c0_172 = arith.constant 0 : index
    %c22_173 = arith.constant 22 : index
    %179 = vector.load %arg26[%c0_172, %c22_173] : memref<16x400xbf16, #tpu.memory_space<vmem>>, vector<16x316xbf16>
    %c7_174 = arith.constant 7 : index
    %c0_175 = arith.constant 0 : index
    %c0_176 = arith.constant 0 : index
    %180 = vector.load %arg6[%c7_174, %c0_175, %c0_176] : memref<25x16x16xbf16, #tpu.memory_space<vmem>>, vector<1x16x16xbf16>
    %181 = vector.shape_cast %180 : vector<1x16x16xbf16> to vector<16x16xbf16>
    %cst_177 = arith.constant dense<0.000000e+00> : vector<16x316xf32>
    %182 = tpu.matmul %181, %179, %cst_177 {dimension_numbers = #tpu.dot_dimension_numbers<[1], [0], [0], [1], [0, 0, 1, 1], [], []>} : vector<16x16xbf16>, vector<16x316xbf16>, vector<16x316xf32> -> vector<16x316xf32>
    %183 = arith.addf %178, %182 : vector<16x316xf32>
    %c0_178 = arith.constant 0 : index
    %c23_179 = arith.constant 23 : index
    %184 = vector.load %arg26[%c0_178, %c23_179] : memref<16x400xbf16, #tpu.memory_space<vmem>>, vector<16x316xbf16>
    %c8_180 = arith.constant 8 : index
    %c0_181 = arith.constant 0 : index
    %c0_182 = arith.constant 0 : index
    %185 = vector.load %arg6[%c8_180, %c0_181, %c0_182] : memref<25x16x16xbf16, #tpu.memory_space<vmem>>, vector<1x16x16xbf16>
    %186 = vector.shape_cast %185 : vector<1x16x16xbf16> to vector<16x16xbf16>
    %cst_183 = arith.constant dense<0.000000e+00> : vector<16x316xf32>
    %187 = tpu.matmul %186, %184, %cst_183 {dimension_numbers = #tpu.dot_dimension_numbers<[1], [0], [0], [1], [0, 0, 1, 1], [], []>} : vector<16x16xbf16>, vector<16x316xbf16>, vector<16x316xf32> -> vector<16x316xf32>
    %188 = arith.addf %183, %187 : vector<16x316xf32>
    %c0_184 = arith.constant 0 : index
    %c24_185 = arith.constant 24 : index
    %189 = vector.load %arg26[%c0_184, %c24_185] : memref<16x400xbf16, #tpu.memory_space<vmem>>, vector<16x316xbf16>
    %c9_186 = arith.constant 9 : index
    %c0_187 = arith.constant 0 : index
    %c0_188 = arith.constant 0 : index
    %190 = vector.load %arg6[%c9_186, %c0_187, %c0_188] : memref<25x16x16xbf16, #tpu.memory_space<vmem>>, vector<1x16x16xbf16>
    %191 = vector.shape_cast %190 : vector<1x16x16xbf16> to vector<16x16xbf16>
    %cst_189 = arith.constant dense<0.000000e+00> : vector<16x316xf32>
    %192 = tpu.matmul %191, %189, %cst_189 {dimension_numbers = #tpu.dot_dimension_numbers<[1], [0], [0], [1], [0, 0, 1, 1], [], []>} : vector<16x16xbf16>, vector<16x316xbf16>, vector<16x316xf32> -> vector<16x316xf32>
    %193 = arith.addf %188, %192 : vector<16x316xf32>
    %c0_190 = arith.constant 0 : index
    %c40_191 = arith.constant 40 : index
    %194 = vector.load %arg26[%c0_190, %c40_191] : memref<16x400xbf16, #tpu.memory_space<vmem>>, vector<16x316xbf16>
    %c10_192 = arith.constant 10 : index
    %c0_193 = arith.constant 0 : index
    %c0_194 = arith.constant 0 : index
    %195 = vector.load %arg6[%c10_192, %c0_193, %c0_194] : memref<25x16x16xbf16, #tpu.memory_space<vmem>>, vector<1x16x16xbf16>
    %196 = vector.shape_cast %195 : vector<1x16x16xbf16> to vector<16x16xbf16>
    %cst_195 = arith.constant dense<0.000000e+00> : vector<16x316xf32>
    %197 = tpu.matmul %196, %194, %cst_195 {dimension_numbers = #tpu.dot_dimension_numbers<[1], [0], [0], [1], [0, 0, 1, 1], [], []>} : vector<16x16xbf16>, vector<16x316xbf16>, vector<16x316xf32> -> vector<16x316xf32>
    %198 = arith.addf %193, %197 : vector<16x316xf32>
    %c0_196 = arith.constant 0 : index
    %c41_197 = arith.constant 41 : index
    %199 = vector.load %arg26[%c0_196, %c41_197] : memref<16x400xbf16, #tpu.memory_space<vmem>>, vector<16x316xbf16>
    %c11_198 = arith.constant 11 : index
    %c0_199 = arith.constant 0 : index
    %c0_200 = arith.constant 0 : index
    %200 = vector.load %arg6[%c11_198, %c0_199, %c0_200] : memref<25x16x16xbf16, #tpu.memory_space<vmem>>, vector<1x16x16xbf16>
    %201 = vector.shape_cast %200 : vector<1x16x16xbf16> to vector<16x16xbf16>
    %cst_201 = arith.constant dense<0.000000e+00> : vector<16x316xf32>
    %202 = tpu.matmul %201, %199, %cst_201 {dimension_numbers = #tpu.dot_dimension_numbers<[1], [0], [0], [1], [0, 0, 1, 1], [], []>} : vector<16x16xbf16>, vector<16x316xbf16>, vector<16x316xf32> -> vector<16x316xf32>
    %203 = arith.addf %198, %202 : vector<16x316xf32>
    %c0_202 = arith.constant 0 : index
    %c42_203 = arith.constant 42 : index
    %204 = vector.load %arg26[%c0_202, %c42_203] : memref<16x400xbf16, #tpu.memory_space<vmem>>, vector<16x316xbf16>
    %c12_204 = arith.constant 12 : index
    %c0_205 = arith.constant 0 : index
    %c0_206 = arith.constant 0 : index
    %205 = vector.load %arg6[%c12_204, %c0_205, %c0_206] : memref<25x16x16xbf16, #tpu.memory_space<vmem>>, vector<1x16x16xbf16>
    %206 = vector.shape_cast %205 : vector<1x16x16xbf16> to vector<16x16xbf16>
    %cst_207 = arith.constant dense<0.000000e+00> : vector<16x316xf32>
    %207 = tpu.matmul %206, %204, %cst_207 {dimension_numbers = #tpu.dot_dimension_numbers<[1], [0], [0], [1], [0, 0, 1, 1], [], []>} : vector<16x16xbf16>, vector<16x316xbf16>, vector<16x316xf32> -> vector<16x316xf32>
    %208 = arith.addf %203, %207 : vector<16x316xf32>
    %c0_208 = arith.constant 0 : index
    %c43_209 = arith.constant 43 : index
    %209 = vector.load %arg26[%c0_208, %c43_209] : memref<16x400xbf16, #tpu.memory_space<vmem>>, vector<16x316xbf16>
    %c13_210 = arith.constant 13 : index
    %c0_211 = arith.constant 0 : index
    %c0_212 = arith.constant 0 : index
    %210 = vector.load %arg6[%c13_210, %c0_211, %c0_212] : memref<25x16x16xbf16, #tpu.memory_space<vmem>>, vector<1x16x16xbf16>
    %211 = vector.shape_cast %210 : vector<1x16x16xbf16> to vector<16x16xbf16>
    %cst_213 = arith.constant dense<0.000000e+00> : vector<16x316xf32>
    %212 = tpu.matmul %211, %209, %cst_213 {dimension_numbers = #tpu.dot_dimension_numbers<[1], [0], [0], [1], [0, 0, 1, 1], [], []>} : vector<16x16xbf16>, vector<16x316xbf16>, vector<16x316xf32> -> vector<16x316xf32>
    %213 = arith.addf %208, %212 : vector<16x316xf32>
    %c0_214 = arith.constant 0 : index
    %c44_215 = arith.constant 44 : index
    %214 = vector.load %arg26[%c0_214, %c44_215] : memref<16x400xbf16, #tpu.memory_space<vmem>>, vector<16x316xbf16>
    %c14_216 = arith.constant 14 : index
    %c0_217 = arith.constant 0 : index
    %c0_218 = arith.constant 0 : index
    %215 = vector.load %arg6[%c14_216, %c0_217, %c0_218] : memref<25x16x16xbf16, #tpu.memory_space<vmem>>, vector<1x16x16xbf16>
    %216 = vector.shape_cast %215 : vector<1x16x16xbf16> to vector<16x16xbf16>
    %cst_219 = arith.constant dense<0.000000e+00> : vector<16x316xf32>
    %217 = tpu.matmul %216, %214, %cst_219 {dimension_numbers = #tpu.dot_dimension_numbers<[1], [0], [0], [1], [0, 0, 1, 1], [], []>} : vector<16x16xbf16>, vector<16x316xbf16>, vector<16x316xf32> -> vector<16x316xf32>
    %218 = arith.addf %213, %217 : vector<16x316xf32>
    %c0_220 = arith.constant 0 : index
    %c60_221 = arith.constant 60 : index
    %219 = vector.load %arg26[%c0_220, %c60_221] : memref<16x400xbf16, #tpu.memory_space<vmem>>, vector<16x316xbf16>
    %c15_222 = arith.constant 15 : index
    %c0_223 = arith.constant 0 : index
    %c0_224 = arith.constant 0 : index
    %220 = vector.load %arg6[%c15_222, %c0_223, %c0_224] : memref<25x16x16xbf16, #tpu.memory_space<vmem>>, vector<1x16x16xbf16>
    %221 = vector.shape_cast %220 : vector<1x16x16xbf16> to vector<16x16xbf16>
    %cst_225 = arith.constant dense<0.000000e+00> : vector<16x316xf32>
    %222 = tpu.matmul %221, %219, %cst_225 {dimension_numbers = #tpu.dot_dimension_numbers<[1], [0], [0], [1], [0, 0, 1, 1], [], []>} : vector<16x16xbf16>, vector<16x316xbf16>, vector<16x316xf32> -> vector<16x316xf32>
    %223 = arith.addf %218, %222 : vector<16x316xf32>
    %c0_226 = arith.constant 0 : index
    %c61_227 = arith.constant 61 : index
    %224 = vector.load %arg26[%c0_226, %c61_227] : memref<16x400xbf16, #tpu.memory_space<vmem>>, vector<16x316xbf16>
    %c16_228 = arith.constant 16 : index
    %c0_229 = arith.constant 0 : index
    %c0_230 = arith.constant 0 : index
    %225 = vector.load %arg6[%c16_228, %c0_229, %c0_230] : memref<25x16x16xbf16, #tpu.memory_space<vmem>>, vector<1x16x16xbf16>
    %226 = vector.shape_cast %225 : vector<1x16x16xbf16> to vector<16x16xbf16>
    %cst_231 = arith.constant dense<0.000000e+00> : vector<16x316xf32>
    %227 = tpu.matmul %226, %224, %cst_231 {dimension_numbers = #tpu.dot_dimension_numbers<[1], [0], [0], [1], [0, 0, 1, 1], [], []>} : vector<16x16xbf16>, vector<16x316xbf16>, vector<16x316xf32> -> vector<16x316xf32>
    %228 = arith.addf %223, %227 : vector<16x316xf32>
    %c0_232 = arith.constant 0 : index
    %c62_233 = arith.constant 62 : index
    %229 = vector.load %arg26[%c0_232, %c62_233] : memref<16x400xbf16, #tpu.memory_space<vmem>>, vector<16x316xbf16>
    %c17_234 = arith.constant 17 : index
    %c0_235 = arith.constant 0 : index
    %c0_236 = arith.constant 0 : index
    %230 = vector.load %arg6[%c17_234, %c0_235, %c0_236] : memref<25x16x16xbf16, #tpu.memory_space<vmem>>, vector<1x16x16xbf16>
    %231 = vector.shape_cast %230 : vector<1x16x16xbf16> to vector<16x16xbf16>
    %cst_237 = arith.constant dense<0.000000e+00> : vector<16x316xf32>
    %232 = tpu.matmul %231, %229, %cst_237 {dimension_numbers = #tpu.dot_dimension_numbers<[1], [0], [0], [1], [0, 0, 1, 1], [], []>} : vector<16x16xbf16>, vector<16x316xbf16>, vector<16x316xf32> -> vector<16x316xf32>
    %233 = arith.addf %228, %232 : vector<16x316xf32>
    %c0_238 = arith.constant 0 : index
    %c63_239 = arith.constant 63 : index
    %234 = vector.load %arg26[%c0_238, %c63_239] : memref<16x400xbf16, #tpu.memory_space<vmem>>, vector<16x316xbf16>
    %c18_240 = arith.constant 18 : index
    %c0_241 = arith.constant 0 : index
    %c0_242 = arith.constant 0 : index
    %235 = vector.load %arg6[%c18_240, %c0_241, %c0_242] : memref<25x16x16xbf16, #tpu.memory_space<vmem>>, vector<1x16x16xbf16>
    %236 = vector.shape_cast %235 : vector<1x16x16xbf16> to vector<16x16xbf16>
    %cst_243 = arith.constant dense<0.000000e+00> : vector<16x316xf32>
    %237 = tpu.matmul %236, %234, %cst_243 {dimension_numbers = #tpu.dot_dimension_numbers<[1], [0], [0], [1], [0, 0, 1, 1], [], []>} : vector<16x16xbf16>, vector<16x316xbf16>, vector<16x316xf32> -> vector<16x316xf32>
    %238 = arith.addf %233, %237 : vector<16x316xf32>
    %c0_244 = arith.constant 0 : index
    %c64_245 = arith.constant 64 : index
    %239 = vector.load %arg26[%c0_244, %c64_245] : memref<16x400xbf16, #tpu.memory_space<vmem>>, vector<16x316xbf16>
    %c19_246 = arith.constant 19 : index
    %c0_247 = arith.constant 0 : index
    %c0_248 = arith.constant 0 : index
    %240 = vector.load %arg6[%c19_246, %c0_247, %c0_248] : memref<25x16x16xbf16, #tpu.memory_space<vmem>>, vector<1x16x16xbf16>
    %241 = vector.shape_cast %240 : vector<1x16x16xbf16> to vector<16x16xbf16>
    %cst_249 = arith.constant dense<0.000000e+00> : vector<16x316xf32>
    %242 = tpu.matmul %241, %239, %cst_249 {dimension_numbers = #tpu.dot_dimension_numbers<[1], [0], [0], [1], [0, 0, 1, 1], [], []>} : vector<16x16xbf16>, vector<16x316xbf16>, vector<16x316xf32> -> vector<16x316xf32>
    %243 = arith.addf %238, %242 : vector<16x316xf32>
    %c0_250 = arith.constant 0 : index
    %c80_251 = arith.constant 80 : index
    %244 = vector.load %arg26[%c0_250, %c80_251] : memref<16x400xbf16, #tpu.memory_space<vmem>>, vector<16x316xbf16>
    %c20_252 = arith.constant 20 : index
    %c0_253 = arith.constant 0 : index
    %c0_254 = arith.constant 0 : index
    %245 = vector.load %arg6[%c20_252, %c0_253, %c0_254] : memref<25x16x16xbf16, #tpu.memory_space<vmem>>, vector<1x16x16xbf16>
    %246 = vector.shape_cast %245 : vector<1x16x16xbf16> to vector<16x16xbf16>
    %cst_255 = arith.constant dense<0.000000e+00> : vector<16x316xf32>
    %247 = tpu.matmul %246, %244, %cst_255 {dimension_numbers = #tpu.dot_dimension_numbers<[1], [0], [0], [1], [0, 0, 1, 1], [], []>} : vector<16x16xbf16>, vector<16x316xbf16>, vector<16x316xf32> -> vector<16x316xf32>
    %248 = arith.addf %243, %247 : vector<16x316xf32>
    %c0_256 = arith.constant 0 : index
    %c81_257 = arith.constant 81 : index
    %249 = vector.load %arg26[%c0_256, %c81_257] : memref<16x400xbf16, #tpu.memory_space<vmem>>, vector<16x316xbf16>
    %c21_258 = arith.constant 21 : index
    %c0_259 = arith.constant 0 : index
    %c0_260 = arith.constant 0 : index
    %250 = vector.load %arg6[%c21_258, %c0_259, %c0_260] : memref<25x16x16xbf16, #tpu.memory_space<vmem>>, vector<1x16x16xbf16>
    %251 = vector.shape_cast %250 : vector<1x16x16xbf16> to vector<16x16xbf16>
    %cst_261 = arith.constant dense<0.000000e+00> : vector<16x316xf32>
    %252 = tpu.matmul %251, %249, %cst_261 {dimension_numbers = #tpu.dot_dimension_numbers<[1], [0], [0], [1], [0, 0, 1, 1], [], []>} : vector<16x16xbf16>, vector<16x316xbf16>, vector<16x316xf32> -> vector<16x316xf32>
    %253 = arith.addf %248, %252 : vector<16x316xf32>
    %c0_262 = arith.constant 0 : index
    %c82_263 = arith.constant 82 : index
    %254 = vector.load %arg26[%c0_262, %c82_263] : memref<16x400xbf16, #tpu.memory_space<vmem>>, vector<16x316xbf16>
    %c22_264 = arith.constant 22 : index
    %c0_265 = arith.constant 0 : index
    %c0_266 = arith.constant 0 : index
    %255 = vector.load %arg6[%c22_264, %c0_265, %c0_266] : memref<25x16x16xbf16, #tpu.memory_space<vmem>>, vector<1x16x16xbf16>
    %256 = vector.shape_cast %255 : vector<1x16x16xbf16> to vector<16x16xbf16>
    %cst_267 = arith.constant dense<0.000000e+00> : vector<16x316xf32>
    %257 = tpu.matmul %256, %254, %cst_267 {dimension_numbers = #tpu.dot_dimension_numbers<[1], [0], [0], [1], [0, 0, 1, 1], [], []>} : vector<16x16xbf16>, vector<16x316xbf16>, vector<16x316xf32> -> vector<16x316xf32>
    %258 = arith.addf %253, %257 : vector<16x316xf32>
    %c0_268 = arith.constant 0 : index
    %c83_269 = arith.constant 83 : index
    %259 = vector.load %arg26[%c0_268, %c83_269] : memref<16x400xbf16, #tpu.memory_space<vmem>>, vector<16x316xbf16>
    %c23_270 = arith.constant 23 : index
    %c0_271 = arith.constant 0 : index
    %c0_272 = arith.constant 0 : index
    %260 = vector.load %arg6[%c23_270, %c0_271, %c0_272] : memref<25x16x16xbf16, #tpu.memory_space<vmem>>, vector<1x16x16xbf16>
    %261 = vector.shape_cast %260 : vector<1x16x16xbf16> to vector<16x16xbf16>
    %cst_273 = arith.constant dense<0.000000e+00> : vector<16x316xf32>
    %262 = tpu.matmul %261, %259, %cst_273 {dimension_numbers = #tpu.dot_dimension_numbers<[1], [0], [0], [1], [0, 0, 1, 1], [], []>} : vector<16x16xbf16>, vector<16x316xbf16>, vector<16x316xf32> -> vector<16x316xf32>
    %263 = arith.addf %258, %262 : vector<16x316xf32>
    %c0_274 = arith.constant 0 : index
    %c84_275 = arith.constant 84 : index
    %264 = vector.load %arg26[%c0_274, %c84_275] : memref<16x400xbf16, #tpu.memory_space<vmem>>, vector<16x316xbf16>
    %c24_276 = arith.constant 24 : index
    %c0_277 = arith.constant 0 : index
    %c0_278 = arith.constant 0 : index
    %265 = vector.load %arg6[%c24_276, %c0_277, %c0_278] : memref<25x16x16xbf16, #tpu.memory_space<vmem>>, vector<1x16x16xbf16>
    %266 = vector.shape_cast %265 : vector<1x16x16xbf16> to vector<16x16xbf16>
    %cst_279 = arith.constant dense<0.000000e+00> : vector<16x316xf32>
    %267 = tpu.matmul %266, %264, %cst_279 {dimension_numbers = #tpu.dot_dimension_numbers<[1], [0], [0], [1], [0, 0, 1, 1], [], []>} : vector<16x16xbf16>, vector<16x316xbf16>, vector<16x316xf32> -> vector<16x316xf32>
    %268 = arith.addf %263, %267 : vector<16x316xf32>
    %c0_280 = arith.constant 0 : index
    %c0_281 = arith.constant 0 : index
    %269 = vector.load %arg7[%c0_280, %c0_281] : memref<16x1xf32, #tpu.memory_space<vmem>>, vector<16x1xf32>
    %270 = vector.broadcast %269 : vector<16x1xf32> to vector<16x316xf32>
    %271 = arith.addf %268, %270 : vector<16x316xf32>
    %cst_282 = arith.constant 0.000000e+00 : f32
    %272 = vector.broadcast %cst_282 : f32 to vector<16x316xf32>
    %273 = arith.maximumf %271, %272 : vector<16x316xf32>
    %274 = vector.extract_strided_slice %273 {offsets = [0, 0], sizes = [16, 295], strides = [1, 1]} : vector<16x316xf32> to vector<16x295xf32>
    %275 = vector.extract_strided_slice %273 {offsets = [0, 1], sizes = [16, 295], strides = [1, 1]} : vector<16x316xf32> to vector<16x295xf32>
    %276 = arith.maximumf %274, %275 : vector<16x295xf32>
    %277 = vector.extract_strided_slice %273 {offsets = [0, 20], sizes = [16, 295], strides = [1, 1]} : vector<16x316xf32> to vector<16x295xf32>
    %278 = vector.extract_strided_slice %273 {offsets = [0, 21], sizes = [16, 295], strides = [1, 1]} : vector<16x316xf32> to vector<16x295xf32>
    %279 = arith.maximumf %277, %278 : vector<16x295xf32>
    %280 = arith.maximumf %276, %279 : vector<16x295xf32>
    %281 = arith.truncf %280 : vector<16x295xf32> to vector<16x295xbf16>
    %c0_283 = arith.constant 0 : index
    %c0_284 = arith.constant 0 : index
    %282 = vector.load %arg9[%c0_283, %c0_284] : memref<295x144xbf16, #tpu.memory_space<vmem>>, vector<295x144xbf16>
    %cst_285 = arith.constant dense<0.000000e+00> : vector<16x144xf32>
    %283 = tpu.matmul %281, %282, %cst_285 {dimension_numbers = #tpu.dot_dimension_numbers<[1], [0], [0], [1], [0, 0, 1, 1], [], []>} : vector<16x295xbf16>, vector<295x144xbf16>, vector<16x144xf32> -> vector<16x144xf32>
    %284 = arith.truncf %283 : vector<16x144xf32> to vector<16x144xbf16>
    %c0_286 = arith.constant 0 : index
    %c0_287 = arith.constant 0 : index
    %285 = vector.load %arg27[%c0_286, %c0_287] : memref<16x144xbf16, #tpu.memory_space<vmem>>, vector<16x144xbf16>
    tpu.vector_store %arg27[%c0_286, %c0_287], %284 {strides = array<i32>} : memref<16x144xbf16, #tpu.memory_space<vmem>>, vector<16x144xbf16>,
    %c0_288 = arith.constant 0 : index
    %c0_289 = arith.constant 0 : index
    %286 = vector.load %arg27[%c0_288, %c0_289] : memref<16x144xbf16, #tpu.memory_space<vmem>>, vector<16x92xbf16>
    %c0_290 = arith.constant 0 : index
    %c0_291 = arith.constant 0 : index
    %c0_292 = arith.constant 0 : index
    %287 = vector.load %arg10[%c0_290, %c0_291, %c0_292] : memref<25x8x16xbf16, #tpu.memory_space<vmem>>, vector<1x8x16xbf16>
    %288 = vector.shape_cast %287 : vector<1x8x16xbf16> to vector<8x16xbf16>
    %cst_293 = arith.constant dense<0.000000e+00> : vector<8x92xf32>
    %289 = tpu.matmul %288, %286, %cst_293 {dimension_numbers = #tpu.dot_dimension_numbers<[1], [0], [0], [1], [0, 0, 1, 1], [], []>} : vector<8x16xbf16>, vector<16x92xbf16>, vector<8x92xf32> -> vector<8x92xf32>
    %c0_294 = arith.constant 0 : index
    %c1_295 = arith.constant 1 : index
    %290 = vector.load %arg27[%c0_294, %c1_295] : memref<16x144xbf16, #tpu.memory_space<vmem>>, vector<16x92xbf16>
    %c1_296 = arith.constant 1 : index
    %c0_297 = arith.constant 0 : index
    %c0_298 = arith.constant 0 : index
    %291 = vector.load %arg10[%c1_296, %c0_297, %c0_298] : memref<25x8x16xbf16, #tpu.memory_space<vmem>>, vector<1x8x16xbf16>
    %292 = vector.shape_cast %291 : vector<1x8x16xbf16> to vector<8x16xbf16>
    %cst_299 = arith.constant dense<0.000000e+00> : vector<8x92xf32>
    %293 = tpu.matmul %292, %290, %cst_299 {dimension_numbers = #tpu.dot_dimension_numbers<[1], [0], [0], [1], [0, 0, 1, 1], [], []>} : vector<8x16xbf16>, vector<16x92xbf16>, vector<8x92xf32> -> vector<8x92xf32>
    %294 = arith.addf %289, %293 : vector<8x92xf32>
    %c0_300 = arith.constant 0 : index
    %c2_301 = arith.constant 2 : index
    %295 = vector.load %arg27[%c0_300, %c2_301] : memref<16x144xbf16, #tpu.memory_space<vmem>>, vector<16x92xbf16>
    %c2_302 = arith.constant 2 : index
    %c0_303 = arith.constant 0 : index
    %c0_304 = arith.constant 0 : index
    %296 = vector.load %arg10[%c2_302, %c0_303, %c0_304] : memref<25x8x16xbf16, #tpu.memory_space<vmem>>, vector<1x8x16xbf16>
    %297 = vector.shape_cast %296 : vector<1x8x16xbf16> to vector<8x16xbf16>
    %cst_305 = arith.constant dense<0.000000e+00> : vector<8x92xf32>
    %298 = tpu.matmul %297, %295, %cst_305 {dimension_numbers = #tpu.dot_dimension_numbers<[1], [0], [0], [1], [0, 0, 1, 1], [], []>} : vector<8x16xbf16>, vector<16x92xbf16>, vector<8x92xf32> -> vector<8x92xf32>
    %299 = arith.addf %294, %298 : vector<8x92xf32>
    %c0_306 = arith.constant 0 : index
    %c3_307 = arith.constant 3 : index
    %300 = vector.load %arg27[%c0_306, %c3_307] : memref<16x144xbf16, #tpu.memory_space<vmem>>, vector<16x92xbf16>
    %c3_308 = arith.constant 3 : index
    %c0_309 = arith.constant 0 : index
    %c0_310 = arith.constant 0 : index
    %301 = vector.load %arg10[%c3_308, %c0_309, %c0_310] : memref<25x8x16xbf16, #tpu.memory_space<vmem>>, vector<1x8x16xbf16>
    %302 = vector.shape_cast %301 : vector<1x8x16xbf16> to vector<8x16xbf16>
    %cst_311 = arith.constant dense<0.000000e+00> : vector<8x92xf32>
    %303 = tpu.matmul %302, %300, %cst_311 {dimension_numbers = #tpu.dot_dimension_numbers<[1], [0], [0], [1], [0, 0, 1, 1], [], []>} : vector<8x16xbf16>, vector<16x92xbf16>, vector<8x92xf32> -> vector<8x92xf32>
    %304 = arith.addf %299, %303 : vector<8x92xf32>
    %c0_312 = arith.constant 0 : index
    %c4_313 = arith.constant 4 : index
    %305 = vector.load %arg27[%c0_312, %c4_313] : memref<16x144xbf16, #tpu.memory_space<vmem>>, vector<16x92xbf16>
    %c4_314 = arith.constant 4 : index
    %c0_315 = arith.constant 0 : index
    %c0_316 = arith.constant 0 : index
    %306 = vector.load %arg10[%c4_314, %c0_315, %c0_316] : memref<25x8x16xbf16, #tpu.memory_space<vmem>>, vector<1x8x16xbf16>
    %307 = vector.shape_cast %306 : vector<1x8x16xbf16> to vector<8x16xbf16>
    %cst_317 = arith.constant dense<0.000000e+00> : vector<8x92xf32>
    %308 = tpu.matmul %307, %305, %cst_317 {dimension_numbers = #tpu.dot_dimension_numbers<[1], [0], [0], [1], [0, 0, 1, 1], [], []>} : vector<8x16xbf16>, vector<16x92xbf16>, vector<8x92xf32> -> vector<8x92xf32>
    %309 = arith.addf %304, %308 : vector<8x92xf32>
    %c0_318 = arith.constant 0 : index
    %c12_319 = arith.constant 12 : index
    %310 = vector.load %arg27[%c0_318, %c12_319] : memref<16x144xbf16, #tpu.memory_space<vmem>>, vector<16x92xbf16>
    %c5_320 = arith.constant 5 : index
    %c0_321 = arith.constant 0 : index
    %c0_322 = arith.constant 0 : index
    %311 = vector.load %arg10[%c5_320, %c0_321, %c0_322] : memref<25x8x16xbf16, #tpu.memory_space<vmem>>, vector<1x8x16xbf16>
    %312 = vector.shape_cast %311 : vector<1x8x16xbf16> to vector<8x16xbf16>
    %cst_323 = arith.constant dense<0.000000e+00> : vector<8x92xf32>
    %313 = tpu.matmul %312, %310, %cst_323 {dimension_numbers = #tpu.dot_dimension_numbers<[1], [0], [0], [1], [0, 0, 1, 1], [], []>} : vector<8x16xbf16>, vector<16x92xbf16>, vector<8x92xf32> -> vector<8x92xf32>
    %314 = arith.addf %309, %313 : vector<8x92xf32>
    %c0_324 = arith.constant 0 : index
    %c13_325 = arith.constant 13 : index
    %315 = vector.load %arg27[%c0_324, %c13_325] : memref<16x144xbf16, #tpu.memory_space<vmem>>, vector<16x92xbf16>
    %c6_326 = arith.constant 6 : index
    %c0_327 = arith.constant 0 : index
    %c0_328 = arith.constant 0 : index
    %316 = vector.load %arg10[%c6_326, %c0_327, %c0_328] : memref<25x8x16xbf16, #tpu.memory_space<vmem>>, vector<1x8x16xbf16>
    %317 = vector.shape_cast %316 : vector<1x8x16xbf16> to vector<8x16xbf16>
    %cst_329 = arith.constant dense<0.000000e+00> : vector<8x92xf32>
    %318 = tpu.matmul %317, %315, %cst_329 {dimension_numbers = #tpu.dot_dimension_numbers<[1], [0], [0], [1], [0, 0, 1, 1], [], []>} : vector<8x16xbf16>, vector<16x92xbf16>, vector<8x92xf32> -> vector<8x92xf32>
    %319 = arith.addf %314, %318 : vector<8x92xf32>
    %c0_330 = arith.constant 0 : index
    %c14_331 = arith.constant 14 : index
    %320 = vector.load %arg27[%c0_330, %c14_331] : memref<16x144xbf16, #tpu.memory_space<vmem>>, vector<16x92xbf16>
    %c7_332 = arith.constant 7 : index
    %c0_333 = arith.constant 0 : index
    %c0_334 = arith.constant 0 : index
    %321 = vector.load %arg10[%c7_332, %c0_333, %c0_334] : memref<25x8x16xbf16, #tpu.memory_space<vmem>>, vector<1x8x16xbf16>
    %322 = vector.shape_cast %321 : vector<1x8x16xbf16> to vector<8x16xbf16>
    %cst_335 = arith.constant dense<0.000000e+00> : vector<8x92xf32>
    %323 = tpu.matmul %322, %320, %cst_335 {dimension_numbers = #tpu.dot_dimension_numbers<[1], [0], [0], [1], [0, 0, 1, 1], [], []>} : vector<8x16xbf16>, vector<16x92xbf16>, vector<8x92xf32> -> vector<8x92xf32>
    %324 = arith.addf %319, %323 : vector<8x92xf32>
    %c0_336 = arith.constant 0 : index
    %c15_337 = arith.constant 15 : index
    %325 = vector.load %arg27[%c0_336, %c15_337] : memref<16x144xbf16, #tpu.memory_space<vmem>>, vector<16x92xbf16>
    %c8_338 = arith.constant 8 : index
    %c0_339 = arith.constant 0 : index
    %c0_340 = arith.constant 0 : index
    %326 = vector.load %arg10[%c8_338, %c0_339, %c0_340] : memref<25x8x16xbf16, #tpu.memory_space<vmem>>, vector<1x8x16xbf16>
    %327 = vector.shape_cast %326 : vector<1x8x16xbf16> to vector<8x16xbf16>
    %cst_341 = arith.constant dense<0.000000e+00> : vector<8x92xf32>
    %328 = tpu.matmul %327, %325, %cst_341 {dimension_numbers = #tpu.dot_dimension_numbers<[1], [0], [0], [1], [0, 0, 1, 1], [], []>} : vector<8x16xbf16>, vector<16x92xbf16>, vector<8x92xf32> -> vector<8x92xf32>
    %329 = arith.addf %324, %328 : vector<8x92xf32>
    %c0_342 = arith.constant 0 : index
    %c16_343 = arith.constant 16 : index
    %330 = vector.load %arg27[%c0_342, %c16_343] : memref<16x144xbf16, #tpu.memory_space<vmem>>, vector<16x92xbf16>
    %c9_344 = arith.constant 9 : index
    %c0_345 = arith.constant 0 : index
    %c0_346 = arith.constant 0 : index
    %331 = vector.load %arg10[%c9_344, %c0_345, %c0_346] : memref<25x8x16xbf16, #tpu.memory_space<vmem>>, vector<1x8x16xbf16>
    %332 = vector.shape_cast %331 : vector<1x8x16xbf16> to vector<8x16xbf16>
    %cst_347 = arith.constant dense<0.000000e+00> : vector<8x92xf32>
    %333 = tpu.matmul %332, %330, %cst_347 {dimension_numbers = #tpu.dot_dimension_numbers<[1], [0], [0], [1], [0, 0, 1, 1], [], []>} : vector<8x16xbf16>, vector<16x92xbf16>, vector<8x92xf32> -> vector<8x92xf32>
    %334 = arith.addf %329, %333 : vector<8x92xf32>
    %c0_348 = arith.constant 0 : index
    %c24_349 = arith.constant 24 : index
    %335 = vector.load %arg27[%c0_348, %c24_349] : memref<16x144xbf16, #tpu.memory_space<vmem>>, vector<16x92xbf16>
    %c10_350 = arith.constant 10 : index
    %c0_351 = arith.constant 0 : index
    %c0_352 = arith.constant 0 : index
    %336 = vector.load %arg10[%c10_350, %c0_351, %c0_352] : memref<25x8x16xbf16, #tpu.memory_space<vmem>>, vector<1x8x16xbf16>
    %337 = vector.shape_cast %336 : vector<1x8x16xbf16> to vector<8x16xbf16>
    %cst_353 = arith.constant dense<0.000000e+00> : vector<8x92xf32>
    %338 = tpu.matmul %337, %335, %cst_353 {dimension_numbers = #tpu.dot_dimension_numbers<[1], [0], [0], [1], [0, 0, 1, 1], [], []>} : vector<8x16xbf16>, vector<16x92xbf16>, vector<8x92xf32> -> vector<8x92xf32>
    %339 = arith.addf %334, %338 : vector<8x92xf32>
    %c0_354 = arith.constant 0 : index
    %c25 = arith.constant 25 : index
    %340 = vector.load %arg27[%c0_354, %c25] : memref<16x144xbf16, #tpu.memory_space<vmem>>, vector<16x92xbf16>
    %c11_355 = arith.constant 11 : index
    %c0_356 = arith.constant 0 : index
    %c0_357 = arith.constant 0 : index
    %341 = vector.load %arg10[%c11_355, %c0_356, %c0_357] : memref<25x8x16xbf16, #tpu.memory_space<vmem>>, vector<1x8x16xbf16>
    %342 = vector.shape_cast %341 : vector<1x8x16xbf16> to vector<8x16xbf16>
    %cst_358 = arith.constant dense<0.000000e+00> : vector<8x92xf32>
    %343 = tpu.matmul %342, %340, %cst_358 {dimension_numbers = #tpu.dot_dimension_numbers<[1], [0], [0], [1], [0, 0, 1, 1], [], []>} : vector<8x16xbf16>, vector<16x92xbf16>, vector<8x92xf32> -> vector<8x92xf32>
    %344 = arith.addf %339, %343 : vector<8x92xf32>
    %c0_359 = arith.constant 0 : index
    %c26 = arith.constant 26 : index
    %345 = vector.load %arg27[%c0_359, %c26] : memref<16x144xbf16, #tpu.memory_space<vmem>>, vector<16x92xbf16>
    %c12_360 = arith.constant 12 : index
    %c0_361 = arith.constant 0 : index
    %c0_362 = arith.constant 0 : index
    %346 = vector.load %arg10[%c12_360, %c0_361, %c0_362] : memref<25x8x16xbf16, #tpu.memory_space<vmem>>, vector<1x8x16xbf16>
    %347 = vector.shape_cast %346 : vector<1x8x16xbf16> to vector<8x16xbf16>
    %cst_363 = arith.constant dense<0.000000e+00> : vector<8x92xf32>
    %348 = tpu.matmul %347, %345, %cst_363 {dimension_numbers = #tpu.dot_dimension_numbers<[1], [0], [0], [1], [0, 0, 1, 1], [], []>} : vector<8x16xbf16>, vector<16x92xbf16>, vector<8x92xf32> -> vector<8x92xf32>
    %349 = arith.addf %344, %348 : vector<8x92xf32>
    %c0_364 = arith.constant 0 : index
    %c27 = arith.constant 27 : index
    %350 = vector.load %arg27[%c0_364, %c27] : memref<16x144xbf16, #tpu.memory_space<vmem>>, vector<16x92xbf16>
    %c13_365 = arith.constant 13 : index
    %c0_366 = arith.constant 0 : index
    %c0_367 = arith.constant 0 : index
    %351 = vector.load %arg10[%c13_365, %c0_366, %c0_367] : memref<25x8x16xbf16, #tpu.memory_space<vmem>>, vector<1x8x16xbf16>
    %352 = vector.shape_cast %351 : vector<1x8x16xbf16> to vector<8x16xbf16>
    %cst_368 = arith.constant dense<0.000000e+00> : vector<8x92xf32>
    %353 = tpu.matmul %352, %350, %cst_368 {dimension_numbers = #tpu.dot_dimension_numbers<[1], [0], [0], [1], [0, 0, 1, 1], [], []>} : vector<8x16xbf16>, vector<16x92xbf16>, vector<8x92xf32> -> vector<8x92xf32>
    %354 = arith.addf %349, %353 : vector<8x92xf32>
    %c0_369 = arith.constant 0 : index
    %c28 = arith.constant 28 : index
    %355 = vector.load %arg27[%c0_369, %c28] : memref<16x144xbf16, #tpu.memory_space<vmem>>, vector<16x92xbf16>
    %c14_370 = arith.constant 14 : index
    %c0_371 = arith.constant 0 : index
    %c0_372 = arith.constant 0 : index
    %356 = vector.load %arg10[%c14_370, %c0_371, %c0_372] : memref<25x8x16xbf16, #tpu.memory_space<vmem>>, vector<1x8x16xbf16>
    %357 = vector.shape_cast %356 : vector<1x8x16xbf16> to vector<8x16xbf16>
    %cst_373 = arith.constant dense<0.000000e+00> : vector<8x92xf32>
    %358 = tpu.matmul %357, %355, %cst_373 {dimension_numbers = #tpu.dot_dimension_numbers<[1], [0], [0], [1], [0, 0, 1, 1], [], []>} : vector<8x16xbf16>, vector<16x92xbf16>, vector<8x92xf32> -> vector<8x92xf32>
    %359 = arith.addf %354, %358 : vector<8x92xf32>
    %c0_374 = arith.constant 0 : index
    %c36 = arith.constant 36 : index
    %360 = vector.load %arg27[%c0_374, %c36] : memref<16x144xbf16, #tpu.memory_space<vmem>>, vector<16x92xbf16>
    %c15_375 = arith.constant 15 : index
    %c0_376 = arith.constant 0 : index
    %c0_377 = arith.constant 0 : index
    %361 = vector.load %arg10[%c15_375, %c0_376, %c0_377] : memref<25x8x16xbf16, #tpu.memory_space<vmem>>, vector<1x8x16xbf16>
    %362 = vector.shape_cast %361 : vector<1x8x16xbf16> to vector<8x16xbf16>
    %cst_378 = arith.constant dense<0.000000e+00> : vector<8x92xf32>
    %363 = tpu.matmul %362, %360, %cst_378 {dimension_numbers = #tpu.dot_dimension_numbers<[1], [0], [0], [1], [0, 0, 1, 1], [], []>} : vector<8x16xbf16>, vector<16x92xbf16>, vector<8x92xf32> -> vector<8x92xf32>
    %364 = arith.addf %359, %363 : vector<8x92xf32>
    %c0_379 = arith.constant 0 : index
    %c37 = arith.constant 37 : index
    %365 = vector.load %arg27[%c0_379, %c37] : memref<16x144xbf16, #tpu.memory_space<vmem>>, vector<16x92xbf16>
    %c16_380 = arith.constant 16 : index
    %c0_381 = arith.constant 0 : index
    %c0_382 = arith.constant 0 : index
    %366 = vector.load %arg10[%c16_380, %c0_381, %c0_382] : memref<25x8x16xbf16, #tpu.memory_space<vmem>>, vector<1x8x16xbf16>
    %367 = vector.shape_cast %366 : vector<1x8x16xbf16> to vector<8x16xbf16>
    %cst_383 = arith.constant dense<0.000000e+00> : vector<8x92xf32>
    %368 = tpu.matmul %367, %365, %cst_383 {dimension_numbers = #tpu.dot_dimension_numbers<[1], [0], [0], [1], [0, 0, 1, 1], [], []>} : vector<8x16xbf16>, vector<16x92xbf16>, vector<8x92xf32> -> vector<8x92xf32>
    %369 = arith.addf %364, %368 : vector<8x92xf32>
    %c0_384 = arith.constant 0 : index
    %c38 = arith.constant 38 : index
    %370 = vector.load %arg27[%c0_384, %c38] : memref<16x144xbf16, #tpu.memory_space<vmem>>, vector<16x92xbf16>
    %c17_385 = arith.constant 17 : index
    %c0_386 = arith.constant 0 : index
    %c0_387 = arith.constant 0 : index
    %371 = vector.load %arg10[%c17_385, %c0_386, %c0_387] : memref<25x8x16xbf16, #tpu.memory_space<vmem>>, vector<1x8x16xbf16>
    %372 = vector.shape_cast %371 : vector<1x8x16xbf16> to vector<8x16xbf16>
    %cst_388 = arith.constant dense<0.000000e+00> : vector<8x92xf32>
    %373 = tpu.matmul %372, %370, %cst_388 {dimension_numbers = #tpu.dot_dimension_numbers<[1], [0], [0], [1], [0, 0, 1, 1], [], []>} : vector<8x16xbf16>, vector<16x92xbf16>, vector<8x92xf32> -> vector<8x92xf32>
    %374 = arith.addf %369, %373 : vector<8x92xf32>
    %c0_389 = arith.constant 0 : index
    %c39 = arith.constant 39 : index
    %375 = vector.load %arg27[%c0_389, %c39] : memref<16x144xbf16, #tpu.memory_space<vmem>>, vector<16x92xbf16>
    %c18_390 = arith.constant 18 : index
    %c0_391 = arith.constant 0 : index
    %c0_392 = arith.constant 0 : index
    %376 = vector.load %arg10[%c18_390, %c0_391, %c0_392] : memref<25x8x16xbf16, #tpu.memory_space<vmem>>, vector<1x8x16xbf16>
    %377 = vector.shape_cast %376 : vector<1x8x16xbf16> to vector<8x16xbf16>
    %cst_393 = arith.constant dense<0.000000e+00> : vector<8x92xf32>
    %378 = tpu.matmul %377, %375, %cst_393 {dimension_numbers = #tpu.dot_dimension_numbers<[1], [0], [0], [1], [0, 0, 1, 1], [], []>} : vector<8x16xbf16>, vector<16x92xbf16>, vector<8x92xf32> -> vector<8x92xf32>
    %379 = arith.addf %374, %378 : vector<8x92xf32>
    %c0_394 = arith.constant 0 : index
    %c40_395 = arith.constant 40 : index
    %380 = vector.load %arg27[%c0_394, %c40_395] : memref<16x144xbf16, #tpu.memory_space<vmem>>, vector<16x92xbf16>
    %c19_396 = arith.constant 19 : index
    %c0_397 = arith.constant 0 : index
    %c0_398 = arith.constant 0 : index
    %381 = vector.load %arg10[%c19_396, %c0_397, %c0_398] : memref<25x8x16xbf16, #tpu.memory_space<vmem>>, vector<1x8x16xbf16>
    %382 = vector.shape_cast %381 : vector<1x8x16xbf16> to vector<8x16xbf16>
    %cst_399 = arith.constant dense<0.000000e+00> : vector<8x92xf32>
    %383 = tpu.matmul %382, %380, %cst_399 {dimension_numbers = #tpu.dot_dimension_numbers<[1], [0], [0], [1], [0, 0, 1, 1], [], []>} : vector<8x16xbf16>, vector<16x92xbf16>, vector<8x92xf32> -> vector<8x92xf32>
    %384 = arith.addf %379, %383 : vector<8x92xf32>
    %c0_400 = arith.constant 0 : index
    %c48 = arith.constant 48 : index
    %385 = vector.load %arg27[%c0_400, %c48] : memref<16x144xbf16, #tpu.memory_space<vmem>>, vector<16x92xbf16>
    %c20_401 = arith.constant 20 : index
    %c0_402 = arith.constant 0 : index
    %c0_403 = arith.constant 0 : index
    %386 = vector.load %arg10[%c20_401, %c0_402, %c0_403] : memref<25x8x16xbf16, #tpu.memory_space<vmem>>, vector<1x8x16xbf16>
    %387 = vector.shape_cast %386 : vector<1x8x16xbf16> to vector<8x16xbf16>
    %cst_404 = arith.constant dense<0.000000e+00> : vector<8x92xf32>
    %388 = tpu.matmul %387, %385, %cst_404 {dimension_numbers = #tpu.dot_dimension_numbers<[1], [0], [0], [1], [0, 0, 1, 1], [], []>} : vector<8x16xbf16>, vector<16x92xbf16>, vector<8x92xf32> -> vector<8x92xf32>
    %389 = arith.addf %384, %388 : vector<8x92xf32>
    %c0_405 = arith.constant 0 : index
    %c49 = arith.constant 49 : index
    %390 = vector.load %arg27[%c0_405, %c49] : memref<16x144xbf16, #tpu.memory_space<vmem>>, vector<16x92xbf16>
    %c21_406 = arith.constant 21 : index
    %c0_407 = arith.constant 0 : index
    %c0_408 = arith.constant 0 : index
    %391 = vector.load %arg10[%c21_406, %c0_407, %c0_408] : memref<25x8x16xbf16, #tpu.memory_space<vmem>>, vector<1x8x16xbf16>
    %392 = vector.shape_cast %391 : vector<1x8x16xbf16> to vector<8x16xbf16>
    %cst_409 = arith.constant dense<0.000000e+00> : vector<8x92xf32>
    %393 = tpu.matmul %392, %390, %cst_409 {dimension_numbers = #tpu.dot_dimension_numbers<[1], [0], [0], [1], [0, 0, 1, 1], [], []>} : vector<8x16xbf16>, vector<16x92xbf16>, vector<8x92xf32> -> vector<8x92xf32>
    %394 = arith.addf %389, %393 : vector<8x92xf32>
    %c0_410 = arith.constant 0 : index
    %c50 = arith.constant 50 : index
    %395 = vector.load %arg27[%c0_410, %c50] : memref<16x144xbf16, #tpu.memory_space<vmem>>, vector<16x92xbf16>
    %c22_411 = arith.constant 22 : index
    %c0_412 = arith.constant 0 : index
    %c0_413 = arith.constant 0 : index
    %396 = vector.load %arg10[%c22_411, %c0_412, %c0_413] : memref<25x8x16xbf16, #tpu.memory_space<vmem>>, vector<1x8x16xbf16>
    %397 = vector.shape_cast %396 : vector<1x8x16xbf16> to vector<8x16xbf16>
    %cst_414 = arith.constant dense<0.000000e+00> : vector<8x92xf32>
    %398 = tpu.matmul %397, %395, %cst_414 {dimension_numbers = #tpu.dot_dimension_numbers<[1], [0], [0], [1], [0, 0, 1, 1], [], []>} : vector<8x16xbf16>, vector<16x92xbf16>, vector<8x92xf32> -> vector<8x92xf32>
    %399 = arith.addf %394, %398 : vector<8x92xf32>
    %c0_415 = arith.constant 0 : index
    %c51 = arith.constant 51 : index
    %400 = vector.load %arg27[%c0_415, %c51] : memref<16x144xbf16, #tpu.memory_space<vmem>>, vector<16x92xbf16>
    %c23_416 = arith.constant 23 : index
    %c0_417 = arith.constant 0 : index
    %c0_418 = arith.constant 0 : index
    %401 = vector.load %arg10[%c23_416, %c0_417, %c0_418] : memref<25x8x16xbf16, #tpu.memory_space<vmem>>, vector<1x8x16xbf16>
    %402 = vector.shape_cast %401 : vector<1x8x16xbf16> to vector<8x16xbf16>
    %cst_419 = arith.constant dense<0.000000e+00> : vector<8x92xf32>
    %403 = tpu.matmul %402, %400, %cst_419 {dimension_numbers = #tpu.dot_dimension_numbers<[1], [0], [0], [1], [0, 0, 1, 1], [], []>} : vector<8x16xbf16>, vector<16x92xbf16>, vector<8x92xf32> -> vector<8x92xf32>
    %404 = arith.addf %399, %403 : vector<8x92xf32>
    %c0_420 = arith.constant 0 : index
    %c52 = arith.constant 52 : index
    %405 = vector.load %arg27[%c0_420, %c52] : memref<16x144xbf16, #tpu.memory_space<vmem>>, vector<16x92xbf16>
    %c24_421 = arith.constant 24 : index
    %c0_422 = arith.constant 0 : index
    %c0_423 = arith.constant 0 : index
    %406 = vector.load %arg10[%c24_421, %c0_422, %c0_423] : memref<25x8x16xbf16, #tpu.memory_space<vmem>>, vector<1x8x16xbf16>
    %407 = vector.shape_cast %406 : vector<1x8x16xbf16> to vector<8x16xbf16>
    %cst_424 = arith.constant dense<0.000000e+00> : vector<8x92xf32>
    %408 = tpu.matmul %407, %405, %cst_424 {dimension_numbers = #tpu.dot_dimension_numbers<[1], [0], [0], [1], [0, 0, 1, 1], [], []>} : vector<8x16xbf16>, vector<16x92xbf16>, vector<8x92xf32> -> vector<8x92xf32>
    %409 = arith.addf %404, %408 : vector<8x92xf32>
    %c0_425 = arith.constant 0 : index
    %c0_426 = arith.constant 0 : index
    %410 = vector.load %arg11[%c0_425, %c0_426] : memref<8x1xf32, #tpu.memory_space<vmem>>, vector<8x1xf32>
    %411 = vector.broadcast %410 : vector<8x1xf32> to vector<8x92xf32>
    %412 = arith.addf %409, %411 : vector<8x92xf32>
    %cst_427 = arith.constant 0.000000e+00 : f32
    %413 = vector.broadcast %cst_427 : f32 to vector<8x92xf32>
    %414 = arith.maximumf %412, %413 : vector<8x92xf32>
    %415 = arith.truncf %414 : vector<8x92xf32> to vector<8x92xbf16>
    %c0_428 = arith.constant 0 : index
    %c0_429 = arith.constant 0 : index
    %416 = vector.load %arg15[%c0_428, %c0_429] : memref<92x144xbf16, #tpu.memory_space<vmem>>, vector<92x144xbf16>
    %cst_430 = arith.constant dense<0.000000e+00> : vector<8x144xf32>
    %417 = tpu.matmul %415, %416, %cst_430 {dimension_numbers = #tpu.dot_dimension_numbers<[1], [0], [0], [1], [0, 0, 1, 1], [], []>} : vector<8x92xbf16>, vector<92x144xbf16>, vector<8x144xf32> -> vector<8x144xf32>
    %418 = arith.truncf %417 : vector<8x144xf32> to vector<8x144xbf16>
    %c0_431 = arith.constant 0 : index
    %c0_432 = arith.constant 0 : index
    %419 = vector.load %arg28[%c0_431, %c0_432] : memref<8x144xbf16, #tpu.memory_space<vmem>>, vector<8x144xbf16>
    tpu.vector_store %arg28[%c0_431, %c0_432], %418 {strides = array<i32>} : memref<8x144xbf16, #tpu.memory_space<vmem>>, vector<8x144xbf16>,
    %c0_433 = arith.constant 0 : index
    %c26_434 = arith.constant 26 : index
    %420 = vector.load %arg27[%c0_433, %c26_434] : memref<16x144xbf16, #tpu.memory_space<vmem>>, vector<16x92xbf16>
    %c0_435 = arith.constant 0 : index
    %c0_436 = arith.constant 0 : index
    %421 = vector.load %arg12[%c0_435, %c0_436] : memref<8x16xbf16, #tpu.memory_space<vmem>>, vector<8x16xbf16>
    %cst_437 = arith.constant dense<0.000000e+00> : vector<8x92xf32>
    %422 = tpu.matmul %421, %420, %cst_437 {dimension_numbers = #tpu.dot_dimension_numbers<[1], [0], [0], [1], [0, 0, 1, 1], [], []>} : vector<8x16xbf16>, vector<16x92xbf16>, vector<8x92xf32> -> vector<8x92xf32>
    %c0_438 = arith.constant 0 : index
    %c0_439 = arith.constant 0 : index
    %423 = vector.load %arg28[%c0_438, %c0_439] : memref<8x144xbf16, #tpu.memory_space<vmem>>, vector<8x92xbf16>
    %c0_440 = arith.constant 0 : index
    %c0_441 = arith.constant 0 : index
    %c0_442 = arith.constant 0 : index
    %424 = vector.load %arg13[%c0_440, %c0_441, %c0_442] : memref<25x8x8xbf16, #tpu.memory_space<vmem>>, vector<1x8x8xbf16>
    %425 = vector.shape_cast %424 : vector<1x8x8xbf16> to vector<8x8xbf16>
    %cst_443 = arith.constant dense<0.000000e+00> : vector<8x92xf32>
    %426 = tpu.matmul %425, %423, %cst_443 {dimension_numbers = #tpu.dot_dimension_numbers<[1], [0], [0], [1], [0, 0, 1, 1], [], []>} : vector<8x8xbf16>, vector<8x92xbf16>, vector<8x92xf32> -> vector<8x92xf32>
    %427 = arith.addf %422, %426 : vector<8x92xf32>
    %c0_444 = arith.constant 0 : index
    %c1_445 = arith.constant 1 : index
    %428 = vector.load %arg28[%c0_444, %c1_445] : memref<8x144xbf16, #tpu.memory_space<vmem>>, vector<8x92xbf16>
    %c1_446 = arith.constant 1 : index
    %c0_447 = arith.constant 0 : index
    %c0_448 = arith.constant 0 : index
    %429 = vector.load %arg13[%c1_446, %c0_447, %c0_448] : memref<25x8x8xbf16, #tpu.memory_space<vmem>>, vector<1x8x8xbf16>
    %430 = vector.shape_cast %429 : vector<1x8x8xbf16> to vector<8x8xbf16>
    %cst_449 = arith.constant dense<0.000000e+00> : vector<8x92xf32>
    %431 = tpu.matmul %430, %428, %cst_449 {dimension_numbers = #tpu.dot_dimension_numbers<[1], [0], [0], [1], [0, 0, 1, 1], [], []>} : vector<8x8xbf16>, vector<8x92xbf16>, vector<8x92xf32> -> vector<8x92xf32>
    %432 = arith.addf %427, %431 : vector<8x92xf32>
    %c0_450 = arith.constant 0 : index
    %c2_451 = arith.constant 2 : index
    %433 = vector.load %arg28[%c0_450, %c2_451] : memref<8x144xbf16, #tpu.memory_space<vmem>>, vector<8x92xbf16>
    %c2_452 = arith.constant 2 : index
    %c0_453 = arith.constant 0 : index
    %c0_454 = arith.constant 0 : index
    %434 = vector.load %arg13[%c2_452, %c0_453, %c0_454] : memref<25x8x8xbf16, #tpu.memory_space<vmem>>, vector<1x8x8xbf16>
    %435 = vector.shape_cast %434 : vector<1x8x8xbf16> to vector<8x8xbf16>
    %cst_455 = arith.constant dense<0.000000e+00> : vector<8x92xf32>
    %436 = tpu.matmul %435, %433, %cst_455 {dimension_numbers = #tpu.dot_dimension_numbers<[1], [0], [0], [1], [0, 0, 1, 1], [], []>} : vector<8x8xbf16>, vector<8x92xbf16>, vector<8x92xf32> -> vector<8x92xf32>
    %437 = arith.addf %432, %436 : vector<8x92xf32>
    %c0_456 = arith.constant 0 : index
    %c3_457 = arith.constant 3 : index
    %438 = vector.load %arg28[%c0_456, %c3_457] : memref<8x144xbf16, #tpu.memory_space<vmem>>, vector<8x92xbf16>
    %c3_458 = arith.constant 3 : index
    %c0_459 = arith.constant 0 : index
    %c0_460 = arith.constant 0 : index
    %439 = vector.load %arg13[%c3_458, %c0_459, %c0_460] : memref<25x8x8xbf16, #tpu.memory_space<vmem>>, vector<1x8x8xbf16>
    %440 = vector.shape_cast %439 : vector<1x8x8xbf16> to vector<8x8xbf16>
    %cst_461 = arith.constant dense<0.000000e+00> : vector<8x92xf32>
    %441 = tpu.matmul %440, %438, %cst_461 {dimension_numbers = #tpu.dot_dimension_numbers<[1], [0], [0], [1], [0, 0, 1, 1], [], []>} : vector<8x8xbf16>, vector<8x92xbf16>, vector<8x92xf32> -> vector<8x92xf32>
    %442 = arith.addf %437, %441 : vector<8x92xf32>
    %c0_462 = arith.constant 0 : index
    %c4_463 = arith.constant 4 : index
    %443 = vector.load %arg28[%c0_462, %c4_463] : memref<8x144xbf16, #tpu.memory_space<vmem>>, vector<8x92xbf16>
    %c4_464 = arith.constant 4 : index
    %c0_465 = arith.constant 0 : index
    %c0_466 = arith.constant 0 : index
    %444 = vector.load %arg13[%c4_464, %c0_465, %c0_466] : memref<25x8x8xbf16, #tpu.memory_space<vmem>>, vector<1x8x8xbf16>
    %445 = vector.shape_cast %444 : vector<1x8x8xbf16> to vector<8x8xbf16>
    %cst_467 = arith.constant dense<0.000000e+00> : vector<8x92xf32>
    %446 = tpu.matmul %445, %443, %cst_467 {dimension_numbers = #tpu.dot_dimension_numbers<[1], [0], [0], [1], [0, 0, 1, 1], [], []>} : vector<8x8xbf16>, vector<8x92xbf16>, vector<8x92xf32> -> vector<8x92xf32>
    %447 = arith.addf %442, %446 : vector<8x92xf32>
    %c0_468 = arith.constant 0 : index
    %c12_469 = arith.constant 12 : index
    %448 = vector.load %arg28[%c0_468, %c12_469] : memref<8x144xbf16, #tpu.memory_space<vmem>>, vector<8x92xbf16>
    %c5_470 = arith.constant 5 : index
    %c0_471 = arith.constant 0 : index
    %c0_472 = arith.constant 0 : index
    %449 = vector.load %arg13[%c5_470, %c0_471, %c0_472] : memref<25x8x8xbf16, #tpu.memory_space<vmem>>, vector<1x8x8xbf16>
    %450 = vector.shape_cast %449 : vector<1x8x8xbf16> to vector<8x8xbf16>
    %cst_473 = arith.constant dense<0.000000e+00> : vector<8x92xf32>
    %451 = tpu.matmul %450, %448, %cst_473 {dimension_numbers = #tpu.dot_dimension_numbers<[1], [0], [0], [1], [0, 0, 1, 1], [], []>} : vector<8x8xbf16>, vector<8x92xbf16>, vector<8x92xf32> -> vector<8x92xf32>
    %452 = arith.addf %447, %451 : vector<8x92xf32>
    %c0_474 = arith.constant 0 : index
    %c13_475 = arith.constant 13 : index
    %453 = vector.load %arg28[%c0_474, %c13_475] : memref<8x144xbf16, #tpu.memory_space<vmem>>, vector<8x92xbf16>
    %c6_476 = arith.constant 6 : index
    %c0_477 = arith.constant 0 : index
    %c0_478 = arith.constant 0 : index
    %454 = vector.load %arg13[%c6_476, %c0_477, %c0_478] : memref<25x8x8xbf16, #tpu.memory_space<vmem>>, vector<1x8x8xbf16>
    %455 = vector.shape_cast %454 : vector<1x8x8xbf16> to vector<8x8xbf16>
    %cst_479 = arith.constant dense<0.000000e+00> : vector<8x92xf32>
    %456 = tpu.matmul %455, %453, %cst_479 {dimension_numbers = #tpu.dot_dimension_numbers<[1], [0], [0], [1], [0, 0, 1, 1], [], []>} : vector<8x8xbf16>, vector<8x92xbf16>, vector<8x92xf32> -> vector<8x92xf32>
    %457 = arith.addf %452, %456 : vector<8x92xf32>
    %c0_480 = arith.constant 0 : index
    %c14_481 = arith.constant 14 : index
    %458 = vector.load %arg28[%c0_480, %c14_481] : memref<8x144xbf16, #tpu.memory_space<vmem>>, vector<8x92xbf16>
    %c7_482 = arith.constant 7 : index
    %c0_483 = arith.constant 0 : index
    %c0_484 = arith.constant 0 : index
    %459 = vector.load %arg13[%c7_482, %c0_483, %c0_484] : memref<25x8x8xbf16, #tpu.memory_space<vmem>>, vector<1x8x8xbf16>
    %460 = vector.shape_cast %459 : vector<1x8x8xbf16> to vector<8x8xbf16>
    %cst_485 = arith.constant dense<0.000000e+00> : vector<8x92xf32>
    %461 = tpu.matmul %460, %458, %cst_485 {dimension_numbers = #tpu.dot_dimension_numbers<[1], [0], [0], [1], [0, 0, 1, 1], [], []>} : vector<8x8xbf16>, vector<8x92xbf16>, vector<8x92xf32> -> vector<8x92xf32>
    %462 = arith.addf %457, %461 : vector<8x92xf32>
    %c0_486 = arith.constant 0 : index
    %c15_487 = arith.constant 15 : index
    %463 = vector.load %arg28[%c0_486, %c15_487] : memref<8x144xbf16, #tpu.memory_space<vmem>>, vector<8x92xbf16>
    %c8_488 = arith.constant 8 : index
    %c0_489 = arith.constant 0 : index
    %c0_490 = arith.constant 0 : index
    %464 = vector.load %arg13[%c8_488, %c0_489, %c0_490] : memref<25x8x8xbf16, #tpu.memory_space<vmem>>, vector<1x8x8xbf16>
    %465 = vector.shape_cast %464 : vector<1x8x8xbf16> to vector<8x8xbf16>
    %cst_491 = arith.constant dense<0.000000e+00> : vector<8x92xf32>
    %466 = tpu.matmul %465, %463, %cst_491 {dimension_numbers = #tpu.dot_dimension_numbers<[1], [0], [0], [1], [0, 0, 1, 1], [], []>} : vector<8x8xbf16>, vector<8x92xbf16>, vector<8x92xf32> -> vector<8x92xf32>
    %467 = arith.addf %462, %466 : vector<8x92xf32>
    %c0_492 = arith.constant 0 : index
    %c16_493 = arith.constant 16 : index
    %468 = vector.load %arg28[%c0_492, %c16_493] : memref<8x144xbf16, #tpu.memory_space<vmem>>, vector<8x92xbf16>
    %c9_494 = arith.constant 9 : index
    %c0_495 = arith.constant 0 : index
    %c0_496 = arith.constant 0 : index
    %469 = vector.load %arg13[%c9_494, %c0_495, %c0_496] : memref<25x8x8xbf16, #tpu.memory_space<vmem>>, vector<1x8x8xbf16>
    %470 = vector.shape_cast %469 : vector<1x8x8xbf16> to vector<8x8xbf16>
    %cst_497 = arith.constant dense<0.000000e+00> : vector<8x92xf32>
    %471 = tpu.matmul %470, %468, %cst_497 {dimension_numbers = #tpu.dot_dimension_numbers<[1], [0], [0], [1], [0, 0, 1, 1], [], []>} : vector<8x8xbf16>, vector<8x92xbf16>, vector<8x92xf32> -> vector<8x92xf32>
    %472 = arith.addf %467, %471 : vector<8x92xf32>
    %c0_498 = arith.constant 0 : index
    %c24_499 = arith.constant 24 : index
    %473 = vector.load %arg28[%c0_498, %c24_499] : memref<8x144xbf16, #tpu.memory_space<vmem>>, vector<8x92xbf16>
    %c10_500 = arith.constant 10 : index
    %c0_501 = arith.constant 0 : index
    %c0_502 = arith.constant 0 : index
    %474 = vector.load %arg13[%c10_500, %c0_501, %c0_502] : memref<25x8x8xbf16, #tpu.memory_space<vmem>>, vector<1x8x8xbf16>
    %475 = vector.shape_cast %474 : vector<1x8x8xbf16> to vector<8x8xbf16>
    %cst_503 = arith.constant dense<0.000000e+00> : vector<8x92xf32>
    %476 = tpu.matmul %475, %473, %cst_503 {dimension_numbers = #tpu.dot_dimension_numbers<[1], [0], [0], [1], [0, 0, 1, 1], [], []>} : vector<8x8xbf16>, vector<8x92xbf16>, vector<8x92xf32> -> vector<8x92xf32>
    %477 = arith.addf %472, %476 : vector<8x92xf32>
    %c0_504 = arith.constant 0 : index
    %c25_505 = arith.constant 25 : index
    %478 = vector.load %arg28[%c0_504, %c25_505] : memref<8x144xbf16, #tpu.memory_space<vmem>>, vector<8x92xbf16>
    %c11_506 = arith.constant 11 : index
    %c0_507 = arith.constant 0 : index
    %c0_508 = arith.constant 0 : index
    %479 = vector.load %arg13[%c11_506, %c0_507, %c0_508] : memref<25x8x8xbf16, #tpu.memory_space<vmem>>, vector<1x8x8xbf16>
    %480 = vector.shape_cast %479 : vector<1x8x8xbf16> to vector<8x8xbf16>
    %cst_509 = arith.constant dense<0.000000e+00> : vector<8x92xf32>
    %481 = tpu.matmul %480, %478, %cst_509 {dimension_numbers = #tpu.dot_dimension_numbers<[1], [0], [0], [1], [0, 0, 1, 1], [], []>} : vector<8x8xbf16>, vector<8x92xbf16>, vector<8x92xf32> -> vector<8x92xf32>
    %482 = arith.addf %477, %481 : vector<8x92xf32>
    %c0_510 = arith.constant 0 : index
    %c26_511 = arith.constant 26 : index
    %483 = vector.load %arg28[%c0_510, %c26_511] : memref<8x144xbf16, #tpu.memory_space<vmem>>, vector<8x92xbf16>
    %c12_512 = arith.constant 12 : index
    %c0_513 = arith.constant 0 : index
    %c0_514 = arith.constant 0 : index
    %484 = vector.load %arg13[%c12_512, %c0_513, %c0_514] : memref<25x8x8xbf16, #tpu.memory_space<vmem>>, vector<1x8x8xbf16>
    %485 = vector.shape_cast %484 : vector<1x8x8xbf16> to vector<8x8xbf16>
    %cst_515 = arith.constant dense<0.000000e+00> : vector<8x92xf32>
    %486 = tpu.matmul %485, %483, %cst_515 {dimension_numbers = #tpu.dot_dimension_numbers<[1], [0], [0], [1], [0, 0, 1, 1], [], []>} : vector<8x8xbf16>, vector<8x92xbf16>, vector<8x92xf32> -> vector<8x92xf32>
    %487 = arith.addf %482, %486 : vector<8x92xf32>
    %c0_516 = arith.constant 0 : index
    %c27_517 = arith.constant 27 : index
    %488 = vector.load %arg28[%c0_516, %c27_517] : memref<8x144xbf16, #tpu.memory_space<vmem>>, vector<8x92xbf16>
    %c13_518 = arith.constant 13 : index
    %c0_519 = arith.constant 0 : index
    %c0_520 = arith.constant 0 : index
    %489 = vector.load %arg13[%c13_518, %c0_519, %c0_520] : memref<25x8x8xbf16, #tpu.memory_space<vmem>>, vector<1x8x8xbf16>
    %490 = vector.shape_cast %489 : vector<1x8x8xbf16> to vector<8x8xbf16>
    %cst_521 = arith.constant dense<0.000000e+00> : vector<8x92xf32>
    %491 = tpu.matmul %490, %488, %cst_521 {dimension_numbers = #tpu.dot_dimension_numbers<[1], [0], [0], [1], [0, 0, 1, 1], [], []>} : vector<8x8xbf16>, vector<8x92xbf16>, vector<8x92xf32> -> vector<8x92xf32>
    %492 = arith.addf %487, %491 : vector<8x92xf32>
    %c0_522 = arith.constant 0 : index
    %c28_523 = arith.constant 28 : index
    %493 = vector.load %arg28[%c0_522, %c28_523] : memref<8x144xbf16, #tpu.memory_space<vmem>>, vector<8x92xbf16>
    %c14_524 = arith.constant 14 : index
    %c0_525 = arith.constant 0 : index
    %c0_526 = arith.constant 0 : index
    %494 = vector.load %arg13[%c14_524, %c0_525, %c0_526] : memref<25x8x8xbf16, #tpu.memory_space<vmem>>, vector<1x8x8xbf16>
    %495 = vector.shape_cast %494 : vector<1x8x8xbf16> to vector<8x8xbf16>
    %cst_527 = arith.constant dense<0.000000e+00> : vector<8x92xf32>
    %496 = tpu.matmul %495, %493, %cst_527 {dimension_numbers = #tpu.dot_dimension_numbers<[1], [0], [0], [1], [0, 0, 1, 1], [], []>} : vector<8x8xbf16>, vector<8x92xbf16>, vector<8x92xf32> -> vector<8x92xf32>
    %497 = arith.addf %492, %496 : vector<8x92xf32>
    %c0_528 = arith.constant 0 : index
    %c36_529 = arith.constant 36 : index
    %498 = vector.load %arg28[%c0_528, %c36_529] : memref<8x144xbf16, #tpu.memory_space<vmem>>, vector<8x92xbf16>
    %c15_530 = arith.constant 15 : index
    %c0_531 = arith.constant 0 : index
    %c0_532 = arith.constant 0 : index
    %499 = vector.load %arg13[%c15_530, %c0_531, %c0_532] : memref<25x8x8xbf16, #tpu.memory_space<vmem>>, vector<1x8x8xbf16>
    %500 = vector.shape_cast %499 : vector<1x8x8xbf16> to vector<8x8xbf16>
    %cst_533 = arith.constant dense<0.000000e+00> : vector<8x92xf32>
    %501 = tpu.matmul %500, %498, %cst_533 {dimension_numbers = #tpu.dot_dimension_numbers<[1], [0], [0], [1], [0, 0, 1, 1], [], []>} : vector<8x8xbf16>, vector<8x92xbf16>, vector<8x92xf32> -> vector<8x92xf32>
    %502 = arith.addf %497, %501 : vector<8x92xf32>
    %c0_534 = arith.constant 0 : index
    %c37_535 = arith.constant 37 : index
    %503 = vector.load %arg28[%c0_534, %c37_535] : memref<8x144xbf16, #tpu.memory_space<vmem>>, vector<8x92xbf16>
    %c16_536 = arith.constant 16 : index
    %c0_537 = arith.constant 0 : index
    %c0_538 = arith.constant 0 : index
    %504 = vector.load %arg13[%c16_536, %c0_537, %c0_538] : memref<25x8x8xbf16, #tpu.memory_space<vmem>>, vector<1x8x8xbf16>
    %505 = vector.shape_cast %504 : vector<1x8x8xbf16> to vector<8x8xbf16>
    %cst_539 = arith.constant dense<0.000000e+00> : vector<8x92xf32>
    %506 = tpu.matmul %505, %503, %cst_539 {dimension_numbers = #tpu.dot_dimension_numbers<[1], [0], [0], [1], [0, 0, 1, 1], [], []>} : vector<8x8xbf16>, vector<8x92xbf16>, vector<8x92xf32> -> vector<8x92xf32>
    %507 = arith.addf %502, %506 : vector<8x92xf32>
    %c0_540 = arith.constant 0 : index
    %c38_541 = arith.constant 38 : index
    %508 = vector.load %arg28[%c0_540, %c38_541] : memref<8x144xbf16, #tpu.memory_space<vmem>>, vector<8x92xbf16>
    %c17_542 = arith.constant 17 : index
    %c0_543 = arith.constant 0 : index
    %c0_544 = arith.constant 0 : index
    %509 = vector.load %arg13[%c17_542, %c0_543, %c0_544] : memref<25x8x8xbf16, #tpu.memory_space<vmem>>, vector<1x8x8xbf16>
    %510 = vector.shape_cast %509 : vector<1x8x8xbf16> to vector<8x8xbf16>
    %cst_545 = arith.constant dense<0.000000e+00> : vector<8x92xf32>
    %511 = tpu.matmul %510, %508, %cst_545 {dimension_numbers = #tpu.dot_dimension_numbers<[1], [0], [0], [1], [0, 0, 1, 1], [], []>} : vector<8x8xbf16>, vector<8x92xbf16>, vector<8x92xf32> -> vector<8x92xf32>
    %512 = arith.addf %507, %511 : vector<8x92xf32>
    %c0_546 = arith.constant 0 : index
    %c39_547 = arith.constant 39 : index
    %513 = vector.load %arg28[%c0_546, %c39_547] : memref<8x144xbf16, #tpu.memory_space<vmem>>, vector<8x92xbf16>
    %c18_548 = arith.constant 18 : index
    %c0_549 = arith.constant 0 : index
    %c0_550 = arith.constant 0 : index
    %514 = vector.load %arg13[%c18_548, %c0_549, %c0_550] : memref<25x8x8xbf16, #tpu.memory_space<vmem>>, vector<1x8x8xbf16>
    %515 = vector.shape_cast %514 : vector<1x8x8xbf16> to vector<8x8xbf16>
    %cst_551 = arith.constant dense<0.000000e+00> : vector<8x92xf32>
    %516 = tpu.matmul %515, %513, %cst_551 {dimension_numbers = #tpu.dot_dimension_numbers<[1], [0], [0], [1], [0, 0, 1, 1], [], []>} : vector<8x8xbf16>, vector<8x92xbf16>, vector<8x92xf32> -> vector<8x92xf32>
    %517 = arith.addf %512, %516 : vector<8x92xf32>
    %c0_552 = arith.constant 0 : index
    %c40_553 = arith.constant 40 : index
    %518 = vector.load %arg28[%c0_552, %c40_553] : memref<8x144xbf16, #tpu.memory_space<vmem>>, vector<8x92xbf16>
    %c19_554 = arith.constant 19 : index
    %c0_555 = arith.constant 0 : index
    %c0_556 = arith.constant 0 : index
    %519 = vector.load %arg13[%c19_554, %c0_555, %c0_556] : memref<25x8x8xbf16, #tpu.memory_space<vmem>>, vector<1x8x8xbf16>
    %520 = vector.shape_cast %519 : vector<1x8x8xbf16> to vector<8x8xbf16>
    %cst_557 = arith.constant dense<0.000000e+00> : vector<8x92xf32>
    %521 = tpu.matmul %520, %518, %cst_557 {dimension_numbers = #tpu.dot_dimension_numbers<[1], [0], [0], [1], [0, 0, 1, 1], [], []>} : vector<8x8xbf16>, vector<8x92xbf16>, vector<8x92xf32> -> vector<8x92xf32>
    %522 = arith.addf %517, %521 : vector<8x92xf32>
    %c0_558 = arith.constant 0 : index
    %c48_559 = arith.constant 48 : index
    %523 = vector.load %arg28[%c0_558, %c48_559] : memref<8x144xbf16, #tpu.memory_space<vmem>>, vector<8x92xbf16>
    %c20_560 = arith.constant 20 : index
    %c0_561 = arith.constant 0 : index
    %c0_562 = arith.constant 0 : index
    %524 = vector.load %arg13[%c20_560, %c0_561, %c0_562] : memref<25x8x8xbf16, #tpu.memory_space<vmem>>, vector<1x8x8xbf16>
    %525 = vector.shape_cast %524 : vector<1x8x8xbf16> to vector<8x8xbf16>
    %cst_563 = arith.constant dense<0.000000e+00> : vector<8x92xf32>
    %526 = tpu.matmul %525, %523, %cst_563 {dimension_numbers = #tpu.dot_dimension_numbers<[1], [0], [0], [1], [0, 0, 1, 1], [], []>} : vector<8x8xbf16>, vector<8x92xbf16>, vector<8x92xf32> -> vector<8x92xf32>
    %527 = arith.addf %522, %526 : vector<8x92xf32>
    %c0_564 = arith.constant 0 : index
    %c49_565 = arith.constant 49 : index
    %528 = vector.load %arg28[%c0_564, %c49_565] : memref<8x144xbf16, #tpu.memory_space<vmem>>, vector<8x92xbf16>
    %c21_566 = arith.constant 21 : index
    %c0_567 = arith.constant 0 : index
    %c0_568 = arith.constant 0 : index
    %529 = vector.load %arg13[%c21_566, %c0_567, %c0_568] : memref<25x8x8xbf16, #tpu.memory_space<vmem>>, vector<1x8x8xbf16>
    %530 = vector.shape_cast %529 : vector<1x8x8xbf16> to vector<8x8xbf16>
    %cst_569 = arith.constant dense<0.000000e+00> : vector<8x92xf32>
    %531 = tpu.matmul %530, %528, %cst_569 {dimension_numbers = #tpu.dot_dimension_numbers<[1], [0], [0], [1], [0, 0, 1, 1], [], []>} : vector<8x8xbf16>, vector<8x92xbf16>, vector<8x92xf32> -> vector<8x92xf32>
    %532 = arith.addf %527, %531 : vector<8x92xf32>
    %c0_570 = arith.constant 0 : index
    %c50_571 = arith.constant 50 : index
    %533 = vector.load %arg28[%c0_570, %c50_571] : memref<8x144xbf16, #tpu.memory_space<vmem>>, vector<8x92xbf16>
    %c22_572 = arith.constant 22 : index
    %c0_573 = arith.constant 0 : index
    %c0_574 = arith.constant 0 : index
    %534 = vector.load %arg13[%c22_572, %c0_573, %c0_574] : memref<25x8x8xbf16, #tpu.memory_space<vmem>>, vector<1x8x8xbf16>
    %535 = vector.shape_cast %534 : vector<1x8x8xbf16> to vector<8x8xbf16>
    %cst_575 = arith.constant dense<0.000000e+00> : vector<8x92xf32>
    %536 = tpu.matmul %535, %533, %cst_575 {dimension_numbers = #tpu.dot_dimension_numbers<[1], [0], [0], [1], [0, 0, 1, 1], [], []>} : vector<8x8xbf16>, vector<8x92xbf16>, vector<8x92xf32> -> vector<8x92xf32>
    %537 = arith.addf %532, %536 : vector<8x92xf32>
    %c0_576 = arith.constant 0 : index
    %c51_577 = arith.constant 51 : index
    %538 = vector.load %arg28[%c0_576, %c51_577] : memref<8x144xbf16, #tpu.memory_space<vmem>>, vector<8x92xbf16>
    %c23_578 = arith.constant 23 : index
    %c0_579 = arith.constant 0 : index
    %c0_580 = arith.constant 0 : index
    %539 = vector.load %arg13[%c23_578, %c0_579, %c0_580] : memref<25x8x8xbf16, #tpu.memory_space<vmem>>, vector<1x8x8xbf16>
    %540 = vector.shape_cast %539 : vector<1x8x8xbf16> to vector<8x8xbf16>
    %cst_581 = arith.constant dense<0.000000e+00> : vector<8x92xf32>
    %541 = tpu.matmul %540, %538, %cst_581 {dimension_numbers = #tpu.dot_dimension_numbers<[1], [0], [0], [1], [0, 0, 1, 1], [], []>} : vector<8x8xbf16>, vector<8x92xbf16>, vector<8x92xf32> -> vector<8x92xf32>
    %542 = arith.addf %537, %541 : vector<8x92xf32>
    %c0_582 = arith.constant 0 : index
    %c52_583 = arith.constant 52 : index
    %543 = vector.load %arg28[%c0_582, %c52_583] : memref<8x144xbf16, #tpu.memory_space<vmem>>, vector<8x92xbf16>
    %c24_584 = arith.constant 24 : index
    %c0_585 = arith.constant 0 : index
    %c0_586 = arith.constant 0 : index
    %544 = vector.load %arg13[%c24_584, %c0_585, %c0_586] : memref<25x8x8xbf16, #tpu.memory_space<vmem>>, vector<1x8x8xbf16>
    %545 = vector.shape_cast %544 : vector<1x8x8xbf16> to vector<8x8xbf16>
    %cst_587 = arith.constant dense<0.000000e+00> : vector<8x92xf32>
    %546 = tpu.matmul %545, %543, %cst_587 {dimension_numbers = #tpu.dot_dimension_numbers<[1], [0], [0], [1], [0, 0, 1, 1], [], []>} : vector<8x8xbf16>, vector<8x92xbf16>, vector<8x92xf32> -> vector<8x92xf32>
    %547 = arith.addf %542, %546 : vector<8x92xf32>
    %c0_588 = arith.constant 0 : index
    %c0_589 = arith.constant 0 : index
    %548 = vector.load %arg14[%c0_588, %c0_589] : memref<8x1xf32, #tpu.memory_space<vmem>>, vector<8x1xf32>
    %549 = vector.broadcast %548 : vector<8x1xf32> to vector<8x92xf32>
    %550 = arith.addf %547, %549 : vector<8x92xf32>
    %cst_590 = arith.constant 0.000000e+00 : f32
    %551 = vector.broadcast %cst_590 : f32 to vector<8x92xf32>
    %552 = arith.maximumf %550, %551 : vector<8x92xf32>
    %553 = vector.extract_strided_slice %552 {offsets = [0, 0], sizes = [8, 79], strides = [1, 1]} : vector<8x92xf32> to vector<8x79xf32>
    %554 = vector.extract_strided_slice %552 {offsets = [0, 1], sizes = [8, 79], strides = [1, 1]} : vector<8x92xf32> to vector<8x79xf32>
    %555 = arith.maximumf %553, %554 : vector<8x79xf32>
    %556 = vector.extract_strided_slice %552 {offsets = [0, 12], sizes = [8, 79], strides = [1, 1]} : vector<8x92xf32> to vector<8x79xf32>
    %557 = vector.extract_strided_slice %552 {offsets = [0, 13], sizes = [8, 79], strides = [1, 1]} : vector<8x92xf32> to vector<8x79xf32>
    %558 = arith.maximumf %556, %557 : vector<8x79xf32>
    %559 = arith.maximumf %555, %558 : vector<8x79xf32>
    %560 = arith.truncf %559 : vector<8x79xf32> to vector<8x79xbf16>
    %c0_591 = arith.constant 0 : index
    %c0_592 = arith.constant 0 : index
    %561 = vector.load %arg16[%c0_591, %c0_592] : memref<79x64xbf16, #tpu.memory_space<vmem>>, vector<79x64xbf16>
    %cst_593 = arith.constant dense<0.000000e+00> : vector<8x64xf32>
    %562 = tpu.matmul %560, %561, %cst_593 {dimension_numbers = #tpu.dot_dimension_numbers<[1], [0], [0], [1], [0, 0, 1, 1], [], []>} : vector<8x79xbf16>, vector<79x64xbf16>, vector<8x64xf32> -> vector<8x64xf32>
    %563 = arith.truncf %562 : vector<8x64xf32> to vector<8x64xbf16>
    %c0_594 = arith.constant 0 : index
    %c0_595 = arith.constant 0 : index
    %564 = vector.load %arg29[%c0_594, %c0_595] : memref<8x64xbf16, #tpu.memory_space<vmem>>, vector<8x64xbf16>
    tpu.vector_store %arg29[%c0_594, %c0_595], %563 {strides = array<i32>} : memref<8x64xbf16, #tpu.memory_space<vmem>>, vector<8x64xbf16>,
    %c0_596 = arith.constant 0 : index
    %c0_597 = arith.constant 0 : index
    %565 = vector.load %arg29[%c0_596, %c0_597] : memref<8x64xbf16, #tpu.memory_space<vmem>>, vector<8x28xbf16>
    %c0_598 = arith.constant 0 : index
    %c0_599 = arith.constant 0 : index
    %c0_600 = arith.constant 0 : index
    %566 = vector.load %arg17[%c0_598, %c0_599, %c0_600] : memref<25x8x8xbf16, #tpu.memory_space<vmem>>, vector<1x8x8xbf16>
    %567 = vector.shape_cast %566 : vector<1x8x8xbf16> to vector<8x8xbf16>
    %cst_601 = arith.constant dense<0.000000e+00> : vector<8x28xf32>
    %568 = tpu.matmul %567, %565, %cst_601 {dimension_numbers = #tpu.dot_dimension_numbers<[1], [0], [0], [1], [0, 0, 1, 1], [], []>} : vector<8x8xbf16>, vector<8x28xbf16>, vector<8x28xf32> -> vector<8x28xf32>
    %c0_602 = arith.constant 0 : index
    %c1_603 = arith.constant 1 : index
    %569 = vector.load %arg29[%c0_602, %c1_603] : memref<8x64xbf16, #tpu.memory_space<vmem>>, vector<8x28xbf16>
    %c1_604 = arith.constant 1 : index
    %c0_605 = arith.constant 0 : index
    %c0_606 = arith.constant 0 : index
    %570 = vector.load %arg17[%c1_604, %c0_605, %c0_606] : memref<25x8x8xbf16, #tpu.memory_space<vmem>>, vector<1x8x8xbf16>
    %571 = vector.shape_cast %570 : vector<1x8x8xbf16> to vector<8x8xbf16>
    %cst_607 = arith.constant dense<0.000000e+00> : vector<8x28xf32>
    %572 = tpu.matmul %571, %569, %cst_607 {dimension_numbers = #tpu.dot_dimension_numbers<[1], [0], [0], [1], [0, 0, 1, 1], [], []>} : vector<8x8xbf16>, vector<8x28xbf16>, vector<8x28xf32> -> vector<8x28xf32>
    %573 = arith.addf %568, %572 : vector<8x28xf32>
    %c0_608 = arith.constant 0 : index
    %c2_609 = arith.constant 2 : index
    %574 = vector.load %arg29[%c0_608, %c2_609] : memref<8x64xbf16, #tpu.memory_space<vmem>>, vector<8x28xbf16>
    %c2_610 = arith.constant 2 : index
    %c0_611 = arith.constant 0 : index
    %c0_612 = arith.constant 0 : index
    %575 = vector.load %arg17[%c2_610, %c0_611, %c0_612] : memref<25x8x8xbf16, #tpu.memory_space<vmem>>, vector<1x8x8xbf16>
    %576 = vector.shape_cast %575 : vector<1x8x8xbf16> to vector<8x8xbf16>
    %cst_613 = arith.constant dense<0.000000e+00> : vector<8x28xf32>
    %577 = tpu.matmul %576, %574, %cst_613 {dimension_numbers = #tpu.dot_dimension_numbers<[1], [0], [0], [1], [0, 0, 1, 1], [], []>} : vector<8x8xbf16>, vector<8x28xbf16>, vector<8x28xf32> -> vector<8x28xf32>
    %578 = arith.addf %573, %577 : vector<8x28xf32>
    %c0_614 = arith.constant 0 : index
    %c3_615 = arith.constant 3 : index
    %579 = vector.load %arg29[%c0_614, %c3_615] : memref<8x64xbf16, #tpu.memory_space<vmem>>, vector<8x28xbf16>
    %c3_616 = arith.constant 3 : index
    %c0_617 = arith.constant 0 : index
    %c0_618 = arith.constant 0 : index
    %580 = vector.load %arg17[%c3_616, %c0_617, %c0_618] : memref<25x8x8xbf16, #tpu.memory_space<vmem>>, vector<1x8x8xbf16>
    %581 = vector.shape_cast %580 : vector<1x8x8xbf16> to vector<8x8xbf16>
    %cst_619 = arith.constant dense<0.000000e+00> : vector<8x28xf32>
    %582 = tpu.matmul %581, %579, %cst_619 {dimension_numbers = #tpu.dot_dimension_numbers<[1], [0], [0], [1], [0, 0, 1, 1], [], []>} : vector<8x8xbf16>, vector<8x28xbf16>, vector<8x28xf32> -> vector<8x28xf32>
    %583 = arith.addf %578, %582 : vector<8x28xf32>
    %c0_620 = arith.constant 0 : index
    %c4_621 = arith.constant 4 : index
    %584 = vector.load %arg29[%c0_620, %c4_621] : memref<8x64xbf16, #tpu.memory_space<vmem>>, vector<8x28xbf16>
    %c4_622 = arith.constant 4 : index
    %c0_623 = arith.constant 0 : index
    %c0_624 = arith.constant 0 : index
    %585 = vector.load %arg17[%c4_622, %c0_623, %c0_624] : memref<25x8x8xbf16, #tpu.memory_space<vmem>>, vector<1x8x8xbf16>
    %586 = vector.shape_cast %585 : vector<1x8x8xbf16> to vector<8x8xbf16>
    %cst_625 = arith.constant dense<0.000000e+00> : vector<8x28xf32>
    %587 = tpu.matmul %586, %584, %cst_625 {dimension_numbers = #tpu.dot_dimension_numbers<[1], [0], [0], [1], [0, 0, 1, 1], [], []>} : vector<8x8xbf16>, vector<8x28xbf16>, vector<8x28xf32> -> vector<8x28xf32>
    %588 = arith.addf %583, %587 : vector<8x28xf32>
    %c0_626 = arith.constant 0 : index
    %c8_627 = arith.constant 8 : index
    %589 = vector.load %arg29[%c0_626, %c8_627] : memref<8x64xbf16, #tpu.memory_space<vmem>>, vector<8x28xbf16>
    %c5_628 = arith.constant 5 : index
    %c0_629 = arith.constant 0 : index
    %c0_630 = arith.constant 0 : index
    %590 = vector.load %arg17[%c5_628, %c0_629, %c0_630] : memref<25x8x8xbf16, #tpu.memory_space<vmem>>, vector<1x8x8xbf16>
    %591 = vector.shape_cast %590 : vector<1x8x8xbf16> to vector<8x8xbf16>
    %cst_631 = arith.constant dense<0.000000e+00> : vector<8x28xf32>
    %592 = tpu.matmul %591, %589, %cst_631 {dimension_numbers = #tpu.dot_dimension_numbers<[1], [0], [0], [1], [0, 0, 1, 1], [], []>} : vector<8x8xbf16>, vector<8x28xbf16>, vector<8x28xf32> -> vector<8x28xf32>
    %593 = arith.addf %588, %592 : vector<8x28xf32>
    %c0_632 = arith.constant 0 : index
    %c9_633 = arith.constant 9 : index
    %594 = vector.load %arg29[%c0_632, %c9_633] : memref<8x64xbf16, #tpu.memory_space<vmem>>, vector<8x28xbf16>
    %c6_634 = arith.constant 6 : index
    %c0_635 = arith.constant 0 : index
    %c0_636 = arith.constant 0 : index
    %595 = vector.load %arg17[%c6_634, %c0_635, %c0_636] : memref<25x8x8xbf16, #tpu.memory_space<vmem>>, vector<1x8x8xbf16>
    %596 = vector.shape_cast %595 : vector<1x8x8xbf16> to vector<8x8xbf16>
    %cst_637 = arith.constant dense<0.000000e+00> : vector<8x28xf32>
    %597 = tpu.matmul %596, %594, %cst_637 {dimension_numbers = #tpu.dot_dimension_numbers<[1], [0], [0], [1], [0, 0, 1, 1], [], []>} : vector<8x8xbf16>, vector<8x28xbf16>, vector<8x28xf32> -> vector<8x28xf32>
    %598 = arith.addf %593, %597 : vector<8x28xf32>
    %c0_638 = arith.constant 0 : index
    %c10_639 = arith.constant 10 : index
    %599 = vector.load %arg29[%c0_638, %c10_639] : memref<8x64xbf16, #tpu.memory_space<vmem>>, vector<8x28xbf16>
    %c7_640 = arith.constant 7 : index
    %c0_641 = arith.constant 0 : index
    %c0_642 = arith.constant 0 : index
    %600 = vector.load %arg17[%c7_640, %c0_641, %c0_642] : memref<25x8x8xbf16, #tpu.memory_space<vmem>>, vector<1x8x8xbf16>
    %601 = vector.shape_cast %600 : vector<1x8x8xbf16> to vector<8x8xbf16>
    %cst_643 = arith.constant dense<0.000000e+00> : vector<8x28xf32>
    %602 = tpu.matmul %601, %599, %cst_643 {dimension_numbers = #tpu.dot_dimension_numbers<[1], [0], [0], [1], [0, 0, 1, 1], [], []>} : vector<8x8xbf16>, vector<8x28xbf16>, vector<8x28xf32> -> vector<8x28xf32>
    %603 = arith.addf %598, %602 : vector<8x28xf32>
    %c0_644 = arith.constant 0 : index
    %c11_645 = arith.constant 11 : index
    %604 = vector.load %arg29[%c0_644, %c11_645] : memref<8x64xbf16, #tpu.memory_space<vmem>>, vector<8x28xbf16>
    %c8_646 = arith.constant 8 : index
    %c0_647 = arith.constant 0 : index
    %c0_648 = arith.constant 0 : index
    %605 = vector.load %arg17[%c8_646, %c0_647, %c0_648] : memref<25x8x8xbf16, #tpu.memory_space<vmem>>, vector<1x8x8xbf16>
    %606 = vector.shape_cast %605 : vector<1x8x8xbf16> to vector<8x8xbf16>
    %cst_649 = arith.constant dense<0.000000e+00> : vector<8x28xf32>
    %607 = tpu.matmul %606, %604, %cst_649 {dimension_numbers = #tpu.dot_dimension_numbers<[1], [0], [0], [1], [0, 0, 1, 1], [], []>} : vector<8x8xbf16>, vector<8x28xbf16>, vector<8x28xf32> -> vector<8x28xf32>
    %608 = arith.addf %603, %607 : vector<8x28xf32>
    %c0_650 = arith.constant 0 : index
    %c12_651 = arith.constant 12 : index
    %609 = vector.load %arg29[%c0_650, %c12_651] : memref<8x64xbf16, #tpu.memory_space<vmem>>, vector<8x28xbf16>
    %c9_652 = arith.constant 9 : index
    %c0_653 = arith.constant 0 : index
    %c0_654 = arith.constant 0 : index
    %610 = vector.load %arg17[%c9_652, %c0_653, %c0_654] : memref<25x8x8xbf16, #tpu.memory_space<vmem>>, vector<1x8x8xbf16>
    %611 = vector.shape_cast %610 : vector<1x8x8xbf16> to vector<8x8xbf16>
    %cst_655 = arith.constant dense<0.000000e+00> : vector<8x28xf32>
    %612 = tpu.matmul %611, %609, %cst_655 {dimension_numbers = #tpu.dot_dimension_numbers<[1], [0], [0], [1], [0, 0, 1, 1], [], []>} : vector<8x8xbf16>, vector<8x28xbf16>, vector<8x28xf32> -> vector<8x28xf32>
    %613 = arith.addf %608, %612 : vector<8x28xf32>
    %c0_656 = arith.constant 0 : index
    %c16_657 = arith.constant 16 : index
    %614 = vector.load %arg29[%c0_656, %c16_657] : memref<8x64xbf16, #tpu.memory_space<vmem>>, vector<8x28xbf16>
    %c10_658 = arith.constant 10 : index
    %c0_659 = arith.constant 0 : index
    %c0_660 = arith.constant 0 : index
    %615 = vector.load %arg17[%c10_658, %c0_659, %c0_660] : memref<25x8x8xbf16, #tpu.memory_space<vmem>>, vector<1x8x8xbf16>
    %616 = vector.shape_cast %615 : vector<1x8x8xbf16> to vector<8x8xbf16>
    %cst_661 = arith.constant dense<0.000000e+00> : vector<8x28xf32>
    %617 = tpu.matmul %616, %614, %cst_661 {dimension_numbers = #tpu.dot_dimension_numbers<[1], [0], [0], [1], [0, 0, 1, 1], [], []>} : vector<8x8xbf16>, vector<8x28xbf16>, vector<8x28xf32> -> vector<8x28xf32>
    %618 = arith.addf %613, %617 : vector<8x28xf32>
    %c0_662 = arith.constant 0 : index
    %c17_663 = arith.constant 17 : index
    %619 = vector.load %arg29[%c0_662, %c17_663] : memref<8x64xbf16, #tpu.memory_space<vmem>>, vector<8x28xbf16>
    %c11_664 = arith.constant 11 : index
    %c0_665 = arith.constant 0 : index
    %c0_666 = arith.constant 0 : index
    %620 = vector.load %arg17[%c11_664, %c0_665, %c0_666] : memref<25x8x8xbf16, #tpu.memory_space<vmem>>, vector<1x8x8xbf16>
    %621 = vector.shape_cast %620 : vector<1x8x8xbf16> to vector<8x8xbf16>
    %cst_667 = arith.constant dense<0.000000e+00> : vector<8x28xf32>
    %622 = tpu.matmul %621, %619, %cst_667 {dimension_numbers = #tpu.dot_dimension_numbers<[1], [0], [0], [1], [0, 0, 1, 1], [], []>} : vector<8x8xbf16>, vector<8x28xbf16>, vector<8x28xf32> -> vector<8x28xf32>
    %623 = arith.addf %618, %622 : vector<8x28xf32>
    %c0_668 = arith.constant 0 : index
    %c18_669 = arith.constant 18 : index
    %624 = vector.load %arg29[%c0_668, %c18_669] : memref<8x64xbf16, #tpu.memory_space<vmem>>, vector<8x28xbf16>
    %c12_670 = arith.constant 12 : index
    %c0_671 = arith.constant 0 : index
    %c0_672 = arith.constant 0 : index
    %625 = vector.load %arg17[%c12_670, %c0_671, %c0_672] : memref<25x8x8xbf16, #tpu.memory_space<vmem>>, vector<1x8x8xbf16>
    %626 = vector.shape_cast %625 : vector<1x8x8xbf16> to vector<8x8xbf16>
    %cst_673 = arith.constant dense<0.000000e+00> : vector<8x28xf32>
    %627 = tpu.matmul %626, %624, %cst_673 {dimension_numbers = #tpu.dot_dimension_numbers<[1], [0], [0], [1], [0, 0, 1, 1], [], []>} : vector<8x8xbf16>, vector<8x28xbf16>, vector<8x28xf32> -> vector<8x28xf32>
    %628 = arith.addf %623, %627 : vector<8x28xf32>
    %c0_674 = arith.constant 0 : index
    %c19_675 = arith.constant 19 : index
    %629 = vector.load %arg29[%c0_674, %c19_675] : memref<8x64xbf16, #tpu.memory_space<vmem>>, vector<8x28xbf16>
    %c13_676 = arith.constant 13 : index
    %c0_677 = arith.constant 0 : index
    %c0_678 = arith.constant 0 : index
    %630 = vector.load %arg17[%c13_676, %c0_677, %c0_678] : memref<25x8x8xbf16, #tpu.memory_space<vmem>>, vector<1x8x8xbf16>
    %631 = vector.shape_cast %630 : vector<1x8x8xbf16> to vector<8x8xbf16>
    %cst_679 = arith.constant dense<0.000000e+00> : vector<8x28xf32>
    %632 = tpu.matmul %631, %629, %cst_679 {dimension_numbers = #tpu.dot_dimension_numbers<[1], [0], [0], [1], [0, 0, 1, 1], [], []>} : vector<8x8xbf16>, vector<8x28xbf16>, vector<8x28xf32> -> vector<8x28xf32>
    %633 = arith.addf %628, %632 : vector<8x28xf32>
    %c0_680 = arith.constant 0 : index
    %c20_681 = arith.constant 20 : index
    %634 = vector.load %arg29[%c0_680, %c20_681] : memref<8x64xbf16, #tpu.memory_space<vmem>>, vector<8x28xbf16>
    %c14_682 = arith.constant 14 : index
    %c0_683 = arith.constant 0 : index
    %c0_684 = arith.constant 0 : index
    %635 = vector.load %arg17[%c14_682, %c0_683, %c0_684] : memref<25x8x8xbf16, #tpu.memory_space<vmem>>, vector<1x8x8xbf16>
    %636 = vector.shape_cast %635 : vector<1x8x8xbf16> to vector<8x8xbf16>
    %cst_685 = arith.constant dense<0.000000e+00> : vector<8x28xf32>
    %637 = tpu.matmul %636, %634, %cst_685 {dimension_numbers = #tpu.dot_dimension_numbers<[1], [0], [0], [1], [0, 0, 1, 1], [], []>} : vector<8x8xbf16>, vector<8x28xbf16>, vector<8x28xf32> -> vector<8x28xf32>
    %638 = arith.addf %633, %637 : vector<8x28xf32>
    %c0_686 = arith.constant 0 : index
    %c24_687 = arith.constant 24 : index
    %639 = vector.load %arg29[%c0_686, %c24_687] : memref<8x64xbf16, #tpu.memory_space<vmem>>, vector<8x28xbf16>
    %c15_688 = arith.constant 15 : index
    %c0_689 = arith.constant 0 : index
    %c0_690 = arith.constant 0 : index
    %640 = vector.load %arg17[%c15_688, %c0_689, %c0_690] : memref<25x8x8xbf16, #tpu.memory_space<vmem>>, vector<1x8x8xbf16>
    %641 = vector.shape_cast %640 : vector<1x8x8xbf16> to vector<8x8xbf16>
    %cst_691 = arith.constant dense<0.000000e+00> : vector<8x28xf32>
    %642 = tpu.matmul %641, %639, %cst_691 {dimension_numbers = #tpu.dot_dimension_numbers<[1], [0], [0], [1], [0, 0, 1, 1], [], []>} : vector<8x8xbf16>, vector<8x28xbf16>, vector<8x28xf32> -> vector<8x28xf32>
    %643 = arith.addf %638, %642 : vector<8x28xf32>
    %c0_692 = arith.constant 0 : index
    %c25_693 = arith.constant 25 : index
    %644 = vector.load %arg29[%c0_692, %c25_693] : memref<8x64xbf16, #tpu.memory_space<vmem>>, vector<8x28xbf16>
    %c16_694 = arith.constant 16 : index
    %c0_695 = arith.constant 0 : index
    %c0_696 = arith.constant 0 : index
    %645 = vector.load %arg17[%c16_694, %c0_695, %c0_696] : memref<25x8x8xbf16, #tpu.memory_space<vmem>>, vector<1x8x8xbf16>
    %646 = vector.shape_cast %645 : vector<1x8x8xbf16> to vector<8x8xbf16>
    %cst_697 = arith.constant dense<0.000000e+00> : vector<8x28xf32>
    %647 = tpu.matmul %646, %644, %cst_697 {dimension_numbers = #tpu.dot_dimension_numbers<[1], [0], [0], [1], [0, 0, 1, 1], [], []>} : vector<8x8xbf16>, vector<8x28xbf16>, vector<8x28xf32> -> vector<8x28xf32>
    %648 = arith.addf %643, %647 : vector<8x28xf32>
    %c0_698 = arith.constant 0 : index
    %c26_699 = arith.constant 26 : index
    %649 = vector.load %arg29[%c0_698, %c26_699] : memref<8x64xbf16, #tpu.memory_space<vmem>>, vector<8x28xbf16>
    %c17_700 = arith.constant 17 : index
    %c0_701 = arith.constant 0 : index
    %c0_702 = arith.constant 0 : index
    %650 = vector.load %arg17[%c17_700, %c0_701, %c0_702] : memref<25x8x8xbf16, #tpu.memory_space<vmem>>, vector<1x8x8xbf16>
    %651 = vector.shape_cast %650 : vector<1x8x8xbf16> to vector<8x8xbf16>
    %cst_703 = arith.constant dense<0.000000e+00> : vector<8x28xf32>
    %652 = tpu.matmul %651, %649, %cst_703 {dimension_numbers = #tpu.dot_dimension_numbers<[1], [0], [0], [1], [0, 0, 1, 1], [], []>} : vector<8x8xbf16>, vector<8x28xbf16>, vector<8x28xf32> -> vector<8x28xf32>
    %653 = arith.addf %648, %652 : vector<8x28xf32>
    %c0_704 = arith.constant 0 : index
    %c27_705 = arith.constant 27 : index
    %654 = vector.load %arg29[%c0_704, %c27_705] : memref<8x64xbf16, #tpu.memory_space<vmem>>, vector<8x28xbf16>
    %c18_706 = arith.constant 18 : index
    %c0_707 = arith.constant 0 : index
    %c0_708 = arith.constant 0 : index
    %655 = vector.load %arg17[%c18_706, %c0_707, %c0_708] : memref<25x8x8xbf16, #tpu.memory_space<vmem>>, vector<1x8x8xbf16>
    %656 = vector.shape_cast %655 : vector<1x8x8xbf16> to vector<8x8xbf16>
    %cst_709 = arith.constant dense<0.000000e+00> : vector<8x28xf32>
    %657 = tpu.matmul %656, %654, %cst_709 {dimension_numbers = #tpu.dot_dimension_numbers<[1], [0], [0], [1], [0, 0, 1, 1], [], []>} : vector<8x8xbf16>, vector<8x28xbf16>, vector<8x28xf32> -> vector<8x28xf32>
    %658 = arith.addf %653, %657 : vector<8x28xf32>
    %c0_710 = arith.constant 0 : index
    %c28_711 = arith.constant 28 : index
    %659 = vector.load %arg29[%c0_710, %c28_711] : memref<8x64xbf16, #tpu.memory_space<vmem>>, vector<8x28xbf16>
    %c19_712 = arith.constant 19 : index
    %c0_713 = arith.constant 0 : index
    %c0_714 = arith.constant 0 : index
    %660 = vector.load %arg17[%c19_712, %c0_713, %c0_714] : memref<25x8x8xbf16, #tpu.memory_space<vmem>>, vector<1x8x8xbf16>
    %661 = vector.shape_cast %660 : vector<1x8x8xbf16> to vector<8x8xbf16>
    %cst_715 = arith.constant dense<0.000000e+00> : vector<8x28xf32>
    %662 = tpu.matmul %661, %659, %cst_715 {dimension_numbers = #tpu.dot_dimension_numbers<[1], [0], [0], [1], [0, 0, 1, 1], [], []>} : vector<8x8xbf16>, vector<8x28xbf16>, vector<8x28xf32> -> vector<8x28xf32>
    %663 = arith.addf %658, %662 : vector<8x28xf32>
    %c0_716 = arith.constant 0 : index
    %c32 = arith.constant 32 : index
    %664 = vector.load %arg29[%c0_716, %c32] : memref<8x64xbf16, #tpu.memory_space<vmem>>, vector<8x28xbf16>
    %c20_717 = arith.constant 20 : index
    %c0_718 = arith.constant 0 : index
    %c0_719 = arith.constant 0 : index
    %665 = vector.load %arg17[%c20_717, %c0_718, %c0_719] : memref<25x8x8xbf16, #tpu.memory_space<vmem>>, vector<1x8x8xbf16>
    %666 = vector.shape_cast %665 : vector<1x8x8xbf16> to vector<8x8xbf16>
    %cst_720 = arith.constant dense<0.000000e+00> : vector<8x28xf32>
    %667 = tpu.matmul %666, %664, %cst_720 {dimension_numbers = #tpu.dot_dimension_numbers<[1], [0], [0], [1], [0, 0, 1, 1], [], []>} : vector<8x8xbf16>, vector<8x28xbf16>, vector<8x28xf32> -> vector<8x28xf32>
    %668 = arith.addf %663, %667 : vector<8x28xf32>
    %c0_721 = arith.constant 0 : index
    %c33 = arith.constant 33 : index
    %669 = vector.load %arg29[%c0_721, %c33] : memref<8x64xbf16, #tpu.memory_space<vmem>>, vector<8x28xbf16>
    %c21_722 = arith.constant 21 : index
    %c0_723 = arith.constant 0 : index
    %c0_724 = arith.constant 0 : index
    %670 = vector.load %arg17[%c21_722, %c0_723, %c0_724] : memref<25x8x8xbf16, #tpu.memory_space<vmem>>, vector<1x8x8xbf16>
    %671 = vector.shape_cast %670 : vector<1x8x8xbf16> to vector<8x8xbf16>
    %cst_725 = arith.constant dense<0.000000e+00> : vector<8x28xf32>
    %672 = tpu.matmul %671, %669, %cst_725 {dimension_numbers = #tpu.dot_dimension_numbers<[1], [0], [0], [1], [0, 0, 1, 1], [], []>} : vector<8x8xbf16>, vector<8x28xbf16>, vector<8x28xf32> -> vector<8x28xf32>
    %673 = arith.addf %668, %672 : vector<8x28xf32>
    %c0_726 = arith.constant 0 : index
    %c34 = arith.constant 34 : index
    %674 = vector.load %arg29[%c0_726, %c34] : memref<8x64xbf16, #tpu.memory_space<vmem>>, vector<8x28xbf16>
    %c22_727 = arith.constant 22 : index
    %c0_728 = arith.constant 0 : index
    %c0_729 = arith.constant 0 : index
    %675 = vector.load %arg17[%c22_727, %c0_728, %c0_729] : memref<25x8x8xbf16, #tpu.memory_space<vmem>>, vector<1x8x8xbf16>
    %676 = vector.shape_cast %675 : vector<1x8x8xbf16> to vector<8x8xbf16>
    %cst_730 = arith.constant dense<0.000000e+00> : vector<8x28xf32>
    %677 = tpu.matmul %676, %674, %cst_730 {dimension_numbers = #tpu.dot_dimension_numbers<[1], [0], [0], [1], [0, 0, 1, 1], [], []>} : vector<8x8xbf16>, vector<8x28xbf16>, vector<8x28xf32> -> vector<8x28xf32>
    %678 = arith.addf %673, %677 : vector<8x28xf32>
    %c0_731 = arith.constant 0 : index
    %c35 = arith.constant 35 : index
    %679 = vector.load %arg29[%c0_731, %c35] : memref<8x64xbf16, #tpu.memory_space<vmem>>, vector<8x28xbf16>
    %c23_732 = arith.constant 23 : index
    %c0_733 = arith.constant 0 : index
    %c0_734 = arith.constant 0 : index
    %680 = vector.load %arg17[%c23_732, %c0_733, %c0_734] : memref<25x8x8xbf16, #tpu.memory_space<vmem>>, vector<1x8x8xbf16>
    %681 = vector.shape_cast %680 : vector<1x8x8xbf16> to vector<8x8xbf16>
    %cst_735 = arith.constant dense<0.000000e+00> : vector<8x28xf32>
    %682 = tpu.matmul %681, %679, %cst_735 {dimension_numbers = #tpu.dot_dimension_numbers<[1], [0], [0], [1], [0, 0, 1, 1], [], []>} : vector<8x8xbf16>, vector<8x28xbf16>, vector<8x28xf32> -> vector<8x28xf32>
    %683 = arith.addf %678, %682 : vector<8x28xf32>
    %c0_736 = arith.constant 0 : index
    %c36_737 = arith.constant 36 : index
    %684 = vector.load %arg29[%c0_736, %c36_737] : memref<8x64xbf16, #tpu.memory_space<vmem>>, vector<8x28xbf16>
    %c24_738 = arith.constant 24 : index
    %c0_739 = arith.constant 0 : index
    %c0_740 = arith.constant 0 : index
    %685 = vector.load %arg17[%c24_738, %c0_739, %c0_740] : memref<25x8x8xbf16, #tpu.memory_space<vmem>>, vector<1x8x8xbf16>
    %686 = vector.shape_cast %685 : vector<1x8x8xbf16> to vector<8x8xbf16>
    %cst_741 = arith.constant dense<0.000000e+00> : vector<8x28xf32>
    %687 = tpu.matmul %686, %684, %cst_741 {dimension_numbers = #tpu.dot_dimension_numbers<[1], [0], [0], [1], [0, 0, 1, 1], [], []>} : vector<8x8xbf16>, vector<8x28xbf16>, vector<8x28xf32> -> vector<8x28xf32>
    %688 = arith.addf %683, %687 : vector<8x28xf32>
    %c0_742 = arith.constant 0 : index
    %c0_743 = arith.constant 0 : index
    %689 = vector.load %arg18[%c0_742, %c0_743] : memref<8x1xf32, #tpu.memory_space<vmem>>, vector<8x1xf32>
    %690 = vector.broadcast %689 : vector<8x1xf32> to vector<8x28xf32>
    %691 = arith.addf %688, %690 : vector<8x28xf32>
    %cst_744 = arith.constant 0.000000e+00 : f32
    %692 = vector.broadcast %cst_744 : f32 to vector<8x28xf32>
    %693 = arith.maximumf %691, %692 : vector<8x28xf32>
    %694 = arith.truncf %693 : vector<8x28xf32> to vector<8x28xbf16>
    %c0_745 = arith.constant 0 : index
    %c0_746 = arith.constant 0 : index
    %695 = vector.load %arg22[%c0_745, %c0_746] : memref<28x64xbf16, #tpu.memory_space<vmem>>, vector<28x64xbf16>
    %cst_747 = arith.constant dense<0.000000e+00> : vector<8x64xf32>
    %696 = tpu.matmul %694, %695, %cst_747 {dimension_numbers = #tpu.dot_dimension_numbers<[1], [0], [0], [1], [0, 0, 1, 1], [], []>} : vector<8x28xbf16>, vector<28x64xbf16>, vector<8x64xf32> -> vector<8x64xf32>
    %697 = arith.truncf %696 : vector<8x64xf32> to vector<8x64xbf16>
    %c0_748 = arith.constant 0 : index
    %c0_749 = arith.constant 0 : index
    %698 = vector.load %arg30[%c0_748, %c0_749] : memref<8x64xbf16, #tpu.memory_space<vmem>>, vector<8x64xbf16>
    tpu.vector_store %arg30[%c0_748, %c0_749], %697 {strides = array<i32>} : memref<8x64xbf16, #tpu.memory_space<vmem>>, vector<8x64xbf16>,
    %c0_750 = arith.constant 0 : index
    %c18_751 = arith.constant 18 : index
    %699 = vector.load %arg29[%c0_750, %c18_751] : memref<8x64xbf16, #tpu.memory_space<vmem>>, vector<8x28xbf16>
    %c0_752 = arith.constant 0 : index
    %c0_753 = arith.constant 0 : index
    %700 = vector.load %arg19[%c0_752, %c0_753] : memref<8x8xbf16, #tpu.memory_space<vmem>>, vector<8x8xbf16>
    %cst_754 = arith.constant dense<0.000000e+00> : vector<8x28xf32>
    %701 = tpu.matmul %700, %699, %cst_754 {dimension_numbers = #tpu.dot_dimension_numbers<[1], [0], [0], [1], [0, 0, 1, 1], [], []>} : vector<8x8xbf16>, vector<8x28xbf16>, vector<8x28xf32> -> vector<8x28xf32>
    %c0_755 = arith.constant 0 : index
    %c0_756 = arith.constant 0 : index
    %702 = vector.load %arg30[%c0_755, %c0_756] : memref<8x64xbf16, #tpu.memory_space<vmem>>, vector<8x28xbf16>
    %c0_757 = arith.constant 0 : index
    %c0_758 = arith.constant 0 : index
    %c0_759 = arith.constant 0 : index
    %703 = vector.load %arg20[%c0_757, %c0_758, %c0_759] : memref<25x8x8xbf16, #tpu.memory_space<vmem>>, vector<1x8x8xbf16>
    %704 = vector.shape_cast %703 : vector<1x8x8xbf16> to vector<8x8xbf16>
    %cst_760 = arith.constant dense<0.000000e+00> : vector<8x28xf32>
    %705 = tpu.matmul %704, %702, %cst_760 {dimension_numbers = #tpu.dot_dimension_numbers<[1], [0], [0], [1], [0, 0, 1, 1], [], []>} : vector<8x8xbf16>, vector<8x28xbf16>, vector<8x28xf32> -> vector<8x28xf32>
    %706 = arith.addf %701, %705 : vector<8x28xf32>
    %c0_761 = arith.constant 0 : index
    %c1_762 = arith.constant 1 : index
    %707 = vector.load %arg30[%c0_761, %c1_762] : memref<8x64xbf16, #tpu.memory_space<vmem>>, vector<8x28xbf16>
    %c1_763 = arith.constant 1 : index
    %c0_764 = arith.constant 0 : index
    %c0_765 = arith.constant 0 : index
    %708 = vector.load %arg20[%c1_763, %c0_764, %c0_765] : memref<25x8x8xbf16, #tpu.memory_space<vmem>>, vector<1x8x8xbf16>
    %709 = vector.shape_cast %708 : vector<1x8x8xbf16> to vector<8x8xbf16>
    %cst_766 = arith.constant dense<0.000000e+00> : vector<8x28xf32>
    %710 = tpu.matmul %709, %707, %cst_766 {dimension_numbers = #tpu.dot_dimension_numbers<[1], [0], [0], [1], [0, 0, 1, 1], [], []>} : vector<8x8xbf16>, vector<8x28xbf16>, vector<8x28xf32> -> vector<8x28xf32>
    %711 = arith.addf %706, %710 : vector<8x28xf32>
    %c0_767 = arith.constant 0 : index
    %c2_768 = arith.constant 2 : index
    %712 = vector.load %arg30[%c0_767, %c2_768] : memref<8x64xbf16, #tpu.memory_space<vmem>>, vector<8x28xbf16>
    %c2_769 = arith.constant 2 : index
    %c0_770 = arith.constant 0 : index
    %c0_771 = arith.constant 0 : index
    %713 = vector.load %arg20[%c2_769, %c0_770, %c0_771] : memref<25x8x8xbf16, #tpu.memory_space<vmem>>, vector<1x8x8xbf16>
    %714 = vector.shape_cast %713 : vector<1x8x8xbf16> to vector<8x8xbf16>
    %cst_772 = arith.constant dense<0.000000e+00> : vector<8x28xf32>
    %715 = tpu.matmul %714, %712, %cst_772 {dimension_numbers = #tpu.dot_dimension_numbers<[1], [0], [0], [1], [0, 0, 1, 1], [], []>} : vector<8x8xbf16>, vector<8x28xbf16>, vector<8x28xf32> -> vector<8x28xf32>
    %716 = arith.addf %711, %715 : vector<8x28xf32>
    %c0_773 = arith.constant 0 : index
    %c3_774 = arith.constant 3 : index
    %717 = vector.load %arg30[%c0_773, %c3_774] : memref<8x64xbf16, #tpu.memory_space<vmem>>, vector<8x28xbf16>
    %c3_775 = arith.constant 3 : index
    %c0_776 = arith.constant 0 : index
    %c0_777 = arith.constant 0 : index
    %718 = vector.load %arg20[%c3_775, %c0_776, %c0_777] : memref<25x8x8xbf16, #tpu.memory_space<vmem>>, vector<1x8x8xbf16>
    %719 = vector.shape_cast %718 : vector<1x8x8xbf16> to vector<8x8xbf16>
    %cst_778 = arith.constant dense<0.000000e+00> : vector<8x28xf32>
    %720 = tpu.matmul %719, %717, %cst_778 {dimension_numbers = #tpu.dot_dimension_numbers<[1], [0], [0], [1], [0, 0, 1, 1], [], []>} : vector<8x8xbf16>, vector<8x28xbf16>, vector<8x28xf32> -> vector<8x28xf32>
    %721 = arith.addf %716, %720 : vector<8x28xf32>
    %c0_779 = arith.constant 0 : index
    %c4_780 = arith.constant 4 : index
    %722 = vector.load %arg30[%c0_779, %c4_780] : memref<8x64xbf16, #tpu.memory_space<vmem>>, vector<8x28xbf16>
    %c4_781 = arith.constant 4 : index
    %c0_782 = arith.constant 0 : index
    %c0_783 = arith.constant 0 : index
    %723 = vector.load %arg20[%c4_781, %c0_782, %c0_783] : memref<25x8x8xbf16, #tpu.memory_space<vmem>>, vector<1x8x8xbf16>
    %724 = vector.shape_cast %723 : vector<1x8x8xbf16> to vector<8x8xbf16>
    %cst_784 = arith.constant dense<0.000000e+00> : vector<8x28xf32>
    %725 = tpu.matmul %724, %722, %cst_784 {dimension_numbers = #tpu.dot_dimension_numbers<[1], [0], [0], [1], [0, 0, 1, 1], [], []>} : vector<8x8xbf16>, vector<8x28xbf16>, vector<8x28xf32> -> vector<8x28xf32>
    %726 = arith.addf %721, %725 : vector<8x28xf32>
    %c0_785 = arith.constant 0 : index
    %c8_786 = arith.constant 8 : index
    %727 = vector.load %arg30[%c0_785, %c8_786] : memref<8x64xbf16, #tpu.memory_space<vmem>>, vector<8x28xbf16>
    %c5_787 = arith.constant 5 : index
    %c0_788 = arith.constant 0 : index
    %c0_789 = arith.constant 0 : index
    %728 = vector.load %arg20[%c5_787, %c0_788, %c0_789] : memref<25x8x8xbf16, #tpu.memory_space<vmem>>, vector<1x8x8xbf16>
    %729 = vector.shape_cast %728 : vector<1x8x8xbf16> to vector<8x8xbf16>
    %cst_790 = arith.constant dense<0.000000e+00> : vector<8x28xf32>
    %730 = tpu.matmul %729, %727, %cst_790 {dimension_numbers = #tpu.dot_dimension_numbers<[1], [0], [0], [1], [0, 0, 1, 1], [], []>} : vector<8x8xbf16>, vector<8x28xbf16>, vector<8x28xf32> -> vector<8x28xf32>
    %731 = arith.addf %726, %730 : vector<8x28xf32>
    %c0_791 = arith.constant 0 : index
    %c9_792 = arith.constant 9 : index
    %732 = vector.load %arg30[%c0_791, %c9_792] : memref<8x64xbf16, #tpu.memory_space<vmem>>, vector<8x28xbf16>
    %c6_793 = arith.constant 6 : index
    %c0_794 = arith.constant 0 : index
    %c0_795 = arith.constant 0 : index
    %733 = vector.load %arg20[%c6_793, %c0_794, %c0_795] : memref<25x8x8xbf16, #tpu.memory_space<vmem>>, vector<1x8x8xbf16>
    %734 = vector.shape_cast %733 : vector<1x8x8xbf16> to vector<8x8xbf16>
    %cst_796 = arith.constant dense<0.000000e+00> : vector<8x28xf32>
    %735 = tpu.matmul %734, %732, %cst_796 {dimension_numbers = #tpu.dot_dimension_numbers<[1], [0], [0], [1], [0, 0, 1, 1], [], []>} : vector<8x8xbf16>, vector<8x28xbf16>, vector<8x28xf32> -> vector<8x28xf32>
    %736 = arith.addf %731, %735 : vector<8x28xf32>
    %c0_797 = arith.constant 0 : index
    %c10_798 = arith.constant 10 : index
    %737 = vector.load %arg30[%c0_797, %c10_798] : memref<8x64xbf16, #tpu.memory_space<vmem>>, vector<8x28xbf16>
    %c7_799 = arith.constant 7 : index
    %c0_800 = arith.constant 0 : index
    %c0_801 = arith.constant 0 : index
    %738 = vector.load %arg20[%c7_799, %c0_800, %c0_801] : memref<25x8x8xbf16, #tpu.memory_space<vmem>>, vector<1x8x8xbf16>
    %739 = vector.shape_cast %738 : vector<1x8x8xbf16> to vector<8x8xbf16>
    %cst_802 = arith.constant dense<0.000000e+00> : vector<8x28xf32>
    %740 = tpu.matmul %739, %737, %cst_802 {dimension_numbers = #tpu.dot_dimension_numbers<[1], [0], [0], [1], [0, 0, 1, 1], [], []>} : vector<8x8xbf16>, vector<8x28xbf16>, vector<8x28xf32> -> vector<8x28xf32>
    %741 = arith.addf %736, %740 : vector<8x28xf32>
    %c0_803 = arith.constant 0 : index
    %c11_804 = arith.constant 11 : index
    %742 = vector.load %arg30[%c0_803, %c11_804] : memref<8x64xbf16, #tpu.memory_space<vmem>>, vector<8x28xbf16>
    %c8_805 = arith.constant 8 : index
    %c0_806 = arith.constant 0 : index
    %c0_807 = arith.constant 0 : index
    %743 = vector.load %arg20[%c8_805, %c0_806, %c0_807] : memref<25x8x8xbf16, #tpu.memory_space<vmem>>, vector<1x8x8xbf16>
    %744 = vector.shape_cast %743 : vector<1x8x8xbf16> to vector<8x8xbf16>
    %cst_808 = arith.constant dense<0.000000e+00> : vector<8x28xf32>
    %745 = tpu.matmul %744, %742, %cst_808 {dimension_numbers = #tpu.dot_dimension_numbers<[1], [0], [0], [1], [0, 0, 1, 1], [], []>} : vector<8x8xbf16>, vector<8x28xbf16>, vector<8x28xf32> -> vector<8x28xf32>
    %746 = arith.addf %741, %745 : vector<8x28xf32>
    %c0_809 = arith.constant 0 : index
    %c12_810 = arith.constant 12 : index
    %747 = vector.load %arg30[%c0_809, %c12_810] : memref<8x64xbf16, #tpu.memory_space<vmem>>, vector<8x28xbf16>
    %c9_811 = arith.constant 9 : index
    %c0_812 = arith.constant 0 : index
    %c0_813 = arith.constant 0 : index
    %748 = vector.load %arg20[%c9_811, %c0_812, %c0_813] : memref<25x8x8xbf16, #tpu.memory_space<vmem>>, vector<1x8x8xbf16>
    %749 = vector.shape_cast %748 : vector<1x8x8xbf16> to vector<8x8xbf16>
    %cst_814 = arith.constant dense<0.000000e+00> : vector<8x28xf32>
    %750 = tpu.matmul %749, %747, %cst_814 {dimension_numbers = #tpu.dot_dimension_numbers<[1], [0], [0], [1], [0, 0, 1, 1], [], []>} : vector<8x8xbf16>, vector<8x28xbf16>, vector<8x28xf32> -> vector<8x28xf32>
    %751 = arith.addf %746, %750 : vector<8x28xf32>
    %c0_815 = arith.constant 0 : index
    %c16_816 = arith.constant 16 : index
    %752 = vector.load %arg30[%c0_815, %c16_816] : memref<8x64xbf16, #tpu.memory_space<vmem>>, vector<8x28xbf16>
    %c10_817 = arith.constant 10 : index
    %c0_818 = arith.constant 0 : index
    %c0_819 = arith.constant 0 : index
    %753 = vector.load %arg20[%c10_817, %c0_818, %c0_819] : memref<25x8x8xbf16, #tpu.memory_space<vmem>>, vector<1x8x8xbf16>
    %754 = vector.shape_cast %753 : vector<1x8x8xbf16> to vector<8x8xbf16>
    %cst_820 = arith.constant dense<0.000000e+00> : vector<8x28xf32>
    %755 = tpu.matmul %754, %752, %cst_820 {dimension_numbers = #tpu.dot_dimension_numbers<[1], [0], [0], [1], [0, 0, 1, 1], [], []>} : vector<8x8xbf16>, vector<8x28xbf16>, vector<8x28xf32> -> vector<8x28xf32>
    %756 = arith.addf %751, %755 : vector<8x28xf32>
    %c0_821 = arith.constant 0 : index
    %c17_822 = arith.constant 17 : index
    %757 = vector.load %arg30[%c0_821, %c17_822] : memref<8x64xbf16, #tpu.memory_space<vmem>>, vector<8x28xbf16>
    %c11_823 = arith.constant 11 : index
    %c0_824 = arith.constant 0 : index
    %c0_825 = arith.constant 0 : index
    %758 = vector.load %arg20[%c11_823, %c0_824, %c0_825] : memref<25x8x8xbf16, #tpu.memory_space<vmem>>, vector<1x8x8xbf16>
    %759 = vector.shape_cast %758 : vector<1x8x8xbf16> to vector<8x8xbf16>
    %cst_826 = arith.constant dense<0.000000e+00> : vector<8x28xf32>
    %760 = tpu.matmul %759, %757, %cst_826 {dimension_numbers = #tpu.dot_dimension_numbers<[1], [0], [0], [1], [0, 0, 1, 1], [], []>} : vector<8x8xbf16>, vector<8x28xbf16>, vector<8x28xf32> -> vector<8x28xf32>
    %761 = arith.addf %756, %760 : vector<8x28xf32>
    %c0_827 = arith.constant 0 : index
    %c18_828 = arith.constant 18 : index
    %762 = vector.load %arg30[%c0_827, %c18_828] : memref<8x64xbf16, #tpu.memory_space<vmem>>, vector<8x28xbf16>
    %c12_829 = arith.constant 12 : index
    %c0_830 = arith.constant 0 : index
    %c0_831 = arith.constant 0 : index
    %763 = vector.load %arg20[%c12_829, %c0_830, %c0_831] : memref<25x8x8xbf16, #tpu.memory_space<vmem>>, vector<1x8x8xbf16>
    %764 = vector.shape_cast %763 : vector<1x8x8xbf16> to vector<8x8xbf16>
    %cst_832 = arith.constant dense<0.000000e+00> : vector<8x28xf32>
    %765 = tpu.matmul %764, %762, %cst_832 {dimension_numbers = #tpu.dot_dimension_numbers<[1], [0], [0], [1], [0, 0, 1, 1], [], []>} : vector<8x8xbf16>, vector<8x28xbf16>, vector<8x28xf32> -> vector<8x28xf32>
    %766 = arith.addf %761, %765 : vector<8x28xf32>
    %c0_833 = arith.constant 0 : index
    %c19_834 = arith.constant 19 : index
    %767 = vector.load %arg30[%c0_833, %c19_834] : memref<8x64xbf16, #tpu.memory_space<vmem>>, vector<8x28xbf16>
    %c13_835 = arith.constant 13 : index
    %c0_836 = arith.constant 0 : index
    %c0_837 = arith.constant 0 : index
    %768 = vector.load %arg20[%c13_835, %c0_836, %c0_837] : memref<25x8x8xbf16, #tpu.memory_space<vmem>>, vector<1x8x8xbf16>
    %769 = vector.shape_cast %768 : vector<1x8x8xbf16> to vector<8x8xbf16>
    %cst_838 = arith.constant dense<0.000000e+00> : vector<8x28xf32>
    %770 = tpu.matmul %769, %767, %cst_838 {dimension_numbers = #tpu.dot_dimension_numbers<[1], [0], [0], [1], [0, 0, 1, 1], [], []>} : vector<8x8xbf16>, vector<8x28xbf16>, vector<8x28xf32> -> vector<8x28xf32>
    %771 = arith.addf %766, %770 : vector<8x28xf32>
    %c0_839 = arith.constant 0 : index
    %c20_840 = arith.constant 20 : index
    %772 = vector.load %arg30[%c0_839, %c20_840] : memref<8x64xbf16, #tpu.memory_space<vmem>>, vector<8x28xbf16>
    %c14_841 = arith.constant 14 : index
    %c0_842 = arith.constant 0 : index
    %c0_843 = arith.constant 0 : index
    %773 = vector.load %arg20[%c14_841, %c0_842, %c0_843] : memref<25x8x8xbf16, #tpu.memory_space<vmem>>, vector<1x8x8xbf16>
    %774 = vector.shape_cast %773 : vector<1x8x8xbf16> to vector<8x8xbf16>
    %cst_844 = arith.constant dense<0.000000e+00> : vector<8x28xf32>
    %775 = tpu.matmul %774, %772, %cst_844 {dimension_numbers = #tpu.dot_dimension_numbers<[1], [0], [0], [1], [0, 0, 1, 1], [], []>} : vector<8x8xbf16>, vector<8x28xbf16>, vector<8x28xf32> -> vector<8x28xf32>
    %776 = arith.addf %771, %775 : vector<8x28xf32>
    %c0_845 = arith.constant 0 : index
    %c24_846 = arith.constant 24 : index
    %777 = vector.load %arg30[%c0_845, %c24_846] : memref<8x64xbf16, #tpu.memory_space<vmem>>, vector<8x28xbf16>
    %c15_847 = arith.constant 15 : index
    %c0_848 = arith.constant 0 : index
    %c0_849 = arith.constant 0 : index
    %778 = vector.load %arg20[%c15_847, %c0_848, %c0_849] : memref<25x8x8xbf16, #tpu.memory_space<vmem>>, vector<1x8x8xbf16>
    %779 = vector.shape_cast %778 : vector<1x8x8xbf16> to vector<8x8xbf16>
    %cst_850 = arith.constant dense<0.000000e+00> : vector<8x28xf32>
    %780 = tpu.matmul %779, %777, %cst_850 {dimension_numbers = #tpu.dot_dimension_numbers<[1], [0], [0], [1], [0, 0, 1, 1], [], []>} : vector<8x8xbf16>, vector<8x28xbf16>, vector<8x28xf32> -> vector<8x28xf32>
    %781 = arith.addf %776, %780 : vector<8x28xf32>
    %c0_851 = arith.constant 0 : index
    %c25_852 = arith.constant 25 : index
    %782 = vector.load %arg30[%c0_851, %c25_852] : memref<8x64xbf16, #tpu.memory_space<vmem>>, vector<8x28xbf16>
    %c16_853 = arith.constant 16 : index
    %c0_854 = arith.constant 0 : index
    %c0_855 = arith.constant 0 : index
    %783 = vector.load %arg20[%c16_853, %c0_854, %c0_855] : memref<25x8x8xbf16, #tpu.memory_space<vmem>>, vector<1x8x8xbf16>
    %784 = vector.shape_cast %783 : vector<1x8x8xbf16> to vector<8x8xbf16>
    %cst_856 = arith.constant dense<0.000000e+00> : vector<8x28xf32>
    %785 = tpu.matmul %784, %782, %cst_856 {dimension_numbers = #tpu.dot_dimension_numbers<[1], [0], [0], [1], [0, 0, 1, 1], [], []>} : vector<8x8xbf16>, vector<8x28xbf16>, vector<8x28xf32> -> vector<8x28xf32>
    %786 = arith.addf %781, %785 : vector<8x28xf32>
    %c0_857 = arith.constant 0 : index
    %c26_858 = arith.constant 26 : index
    %787 = vector.load %arg30[%c0_857, %c26_858] : memref<8x64xbf16, #tpu.memory_space<vmem>>, vector<8x28xbf16>
    %c17_859 = arith.constant 17 : index
    %c0_860 = arith.constant 0 : index
    %c0_861 = arith.constant 0 : index
    %788 = vector.load %arg20[%c17_859, %c0_860, %c0_861] : memref<25x8x8xbf16, #tpu.memory_space<vmem>>, vector<1x8x8xbf16>
    %789 = vector.shape_cast %788 : vector<1x8x8xbf16> to vector<8x8xbf16>
    %cst_862 = arith.constant dense<0.000000e+00> : vector<8x28xf32>
    %790 = tpu.matmul %789, %787, %cst_862 {dimension_numbers = #tpu.dot_dimension_numbers<[1], [0], [0], [1], [0, 0, 1, 1], [], []>} : vector<8x8xbf16>, vector<8x28xbf16>, vector<8x28xf32> -> vector<8x28xf32>
    %791 = arith.addf %786, %790 : vector<8x28xf32>
    %c0_863 = arith.constant 0 : index
    %c27_864 = arith.constant 27 : index
    %792 = vector.load %arg30[%c0_863, %c27_864] : memref<8x64xbf16, #tpu.memory_space<vmem>>, vector<8x28xbf16>
    %c18_865 = arith.constant 18 : index
    %c0_866 = arith.constant 0 : index
    %c0_867 = arith.constant 0 : index
    %793 = vector.load %arg20[%c18_865, %c0_866, %c0_867] : memref<25x8x8xbf16, #tpu.memory_space<vmem>>, vector<1x8x8xbf16>
    %794 = vector.shape_cast %793 : vector<1x8x8xbf16> to vector<8x8xbf16>
    %cst_868 = arith.constant dense<0.000000e+00> : vector<8x28xf32>
    %795 = tpu.matmul %794, %792, %cst_868 {dimension_numbers = #tpu.dot_dimension_numbers<[1], [0], [0], [1], [0, 0, 1, 1], [], []>} : vector<8x8xbf16>, vector<8x28xbf16>, vector<8x28xf32> -> vector<8x28xf32>
    %796 = arith.addf %791, %795 : vector<8x28xf32>
    %c0_869 = arith.constant 0 : index
    %c28_870 = arith.constant 28 : index
    %797 = vector.load %arg30[%c0_869, %c28_870] : memref<8x64xbf16, #tpu.memory_space<vmem>>, vector<8x28xbf16>
    %c19_871 = arith.constant 19 : index
    %c0_872 = arith.constant 0 : index
    %c0_873 = arith.constant 0 : index
    %798 = vector.load %arg20[%c19_871, %c0_872, %c0_873] : memref<25x8x8xbf16, #tpu.memory_space<vmem>>, vector<1x8x8xbf16>
    %799 = vector.shape_cast %798 : vector<1x8x8xbf16> to vector<8x8xbf16>
    %cst_874 = arith.constant dense<0.000000e+00> : vector<8x28xf32>
    %800 = tpu.matmul %799, %797, %cst_874 {dimension_numbers = #tpu.dot_dimension_numbers<[1], [0], [0], [1], [0, 0, 1, 1], [], []>} : vector<8x8xbf16>, vector<8x28xbf16>, vector<8x28xf32> -> vector<8x28xf32>
    %801 = arith.addf %796, %800 : vector<8x28xf32>
    %c0_875 = arith.constant 0 : index
    %c32_876 = arith.constant 32 : index
    %802 = vector.load %arg30[%c0_875, %c32_876] : memref<8x64xbf16, #tpu.memory_space<vmem>>, vector<8x28xbf16>
    %c20_877 = arith.constant 20 : index
    %c0_878 = arith.constant 0 : index
    %c0_879 = arith.constant 0 : index
    %803 = vector.load %arg20[%c20_877, %c0_878, %c0_879] : memref<25x8x8xbf16, #tpu.memory_space<vmem>>, vector<1x8x8xbf16>
    %804 = vector.shape_cast %803 : vector<1x8x8xbf16> to vector<8x8xbf16>
    %cst_880 = arith.constant dense<0.000000e+00> : vector<8x28xf32>
    %805 = tpu.matmul %804, %802, %cst_880 {dimension_numbers = #tpu.dot_dimension_numbers<[1], [0], [0], [1], [0, 0, 1, 1], [], []>} : vector<8x8xbf16>, vector<8x28xbf16>, vector<8x28xf32> -> vector<8x28xf32>
    %806 = arith.addf %801, %805 : vector<8x28xf32>
    %c0_881 = arith.constant 0 : index
    %c33_882 = arith.constant 33 : index
    %807 = vector.load %arg30[%c0_881, %c33_882] : memref<8x64xbf16, #tpu.memory_space<vmem>>, vector<8x28xbf16>
    %c21_883 = arith.constant 21 : index
    %c0_884 = arith.constant 0 : index
    %c0_885 = arith.constant 0 : index
    %808 = vector.load %arg20[%c21_883, %c0_884, %c0_885] : memref<25x8x8xbf16, #tpu.memory_space<vmem>>, vector<1x8x8xbf16>
    %809 = vector.shape_cast %808 : vector<1x8x8xbf16> to vector<8x8xbf16>
    %cst_886 = arith.constant dense<0.000000e+00> : vector<8x28xf32>
    %810 = tpu.matmul %809, %807, %cst_886 {dimension_numbers = #tpu.dot_dimension_numbers<[1], [0], [0], [1], [0, 0, 1, 1], [], []>} : vector<8x8xbf16>, vector<8x28xbf16>, vector<8x28xf32> -> vector<8x28xf32>
    %811 = arith.addf %806, %810 : vector<8x28xf32>
    %c0_887 = arith.constant 0 : index
    %c34_888 = arith.constant 34 : index
    %812 = vector.load %arg30[%c0_887, %c34_888] : memref<8x64xbf16, #tpu.memory_space<vmem>>, vector<8x28xbf16>
    %c22_889 = arith.constant 22 : index
    %c0_890 = arith.constant 0 : index
    %c0_891 = arith.constant 0 : index
    %813 = vector.load %arg20[%c22_889, %c0_890, %c0_891] : memref<25x8x8xbf16, #tpu.memory_space<vmem>>, vector<1x8x8xbf16>
    %814 = vector.shape_cast %813 : vector<1x8x8xbf16> to vector<8x8xbf16>
    %cst_892 = arith.constant dense<0.000000e+00> : vector<8x28xf32>
    %815 = tpu.matmul %814, %812, %cst_892 {dimension_numbers = #tpu.dot_dimension_numbers<[1], [0], [0], [1], [0, 0, 1, 1], [], []>} : vector<8x8xbf16>, vector<8x28xbf16>, vector<8x28xf32> -> vector<8x28xf32>
    %816 = arith.addf %811, %815 : vector<8x28xf32>
    %c0_893 = arith.constant 0 : index
    %c35_894 = arith.constant 35 : index
    %817 = vector.load %arg30[%c0_893, %c35_894] : memref<8x64xbf16, #tpu.memory_space<vmem>>, vector<8x28xbf16>
    %c23_895 = arith.constant 23 : index
    %c0_896 = arith.constant 0 : index
    %c0_897 = arith.constant 0 : index
    %818 = vector.load %arg20[%c23_895, %c0_896, %c0_897] : memref<25x8x8xbf16, #tpu.memory_space<vmem>>, vector<1x8x8xbf16>
    %819 = vector.shape_cast %818 : vector<1x8x8xbf16> to vector<8x8xbf16>
    %cst_898 = arith.constant dense<0.000000e+00> : vector<8x28xf32>
    %820 = tpu.matmul %819, %817, %cst_898 {dimension_numbers = #tpu.dot_dimension_numbers<[1], [0], [0], [1], [0, 0, 1, 1], [], []>} : vector<8x8xbf16>, vector<8x28xbf16>, vector<8x28xf32> -> vector<8x28xf32>
    %821 = arith.addf %816, %820 : vector<8x28xf32>
    %c0_899 = arith.constant 0 : index
    %c36_900 = arith.constant 36 : index
    %822 = vector.load %arg30[%c0_899, %c36_900] : memref<8x64xbf16, #tpu.memory_space<vmem>>, vector<8x28xbf16>
    %c24_901 = arith.constant 24 : index
    %c0_902 = arith.constant 0 : index
    %c0_903 = arith.constant 0 : index
    %823 = vector.load %arg20[%c24_901, %c0_902, %c0_903] : memref<25x8x8xbf16, #tpu.memory_space<vmem>>, vector<1x8x8xbf16>
    %824 = vector.shape_cast %823 : vector<1x8x8xbf16> to vector<8x8xbf16>
    %cst_904 = arith.constant dense<0.000000e+00> : vector<8x28xf32>
    %825 = tpu.matmul %824, %822, %cst_904 {dimension_numbers = #tpu.dot_dimension_numbers<[1], [0], [0], [1], [0, 0, 1, 1], [], []>} : vector<8x8xbf16>, vector<8x28xbf16>, vector<8x28xf32> -> vector<8x28xf32>
    %826 = arith.addf %821, %825 : vector<8x28xf32>
    %c0_905 = arith.constant 0 : index
    %c0_906 = arith.constant 0 : index
    %827 = vector.load %arg21[%c0_905, %c0_906] : memref<8x1xf32, #tpu.memory_space<vmem>>, vector<8x1xf32>
    %828 = vector.broadcast %827 : vector<8x1xf32> to vector<8x28xf32>
    %829 = arith.addf %826, %828 : vector<8x28xf32>
    %cst_907 = arith.constant 0.000000e+00 : f32
    %830 = vector.broadcast %cst_907 : f32 to vector<8x28xf32>
    %831 = arith.maximumf %829, %830 : vector<8x28xf32>
    %832 = vector.extract_strided_slice %831 {offsets = [0, 0], sizes = [8, 19], strides = [1, 1]} : vector<8x28xf32> to vector<8x19xf32>
    %833 = vector.extract_strided_slice %831 {offsets = [0, 1], sizes = [8, 19], strides = [1, 1]} : vector<8x28xf32> to vector<8x19xf32>
    %834 = arith.maximumf %832, %833 : vector<8x19xf32>
    %835 = vector.extract_strided_slice %831 {offsets = [0, 8], sizes = [8, 19], strides = [1, 1]} : vector<8x28xf32> to vector<8x19xf32>
    %836 = vector.extract_strided_slice %831 {offsets = [0, 9], sizes = [8, 19], strides = [1, 1]} : vector<8x28xf32> to vector<8x19xf32>
    %837 = arith.maximumf %835, %836 : vector<8x19xf32>
    %838 = arith.maximumf %834, %837 : vector<8x19xf32>
    %c0_908 = arith.constant 0 : index
    %c0_909 = arith.constant 0 : index
    %839 = vector.load %arg23[%c0_908, %c0_909] : memref<19x4xf32, #tpu.memory_space<vmem>>, vector<19x4xf32>
    %cst_910 = arith.constant dense<0.000000e+00> : vector<8x4xf32>
    %840 = tpu.matmul %838, %839, %cst_910 {dimension_numbers = #tpu.dot_dimension_numbers<[1], [0], [0], [1], [0, 0, 1, 1], [], []>} : vector<8x19xf32>, vector<19x4xf32>, vector<8x4xf32> -> vector<8x4xf32>
    %c0_911 = arith.constant 0 : index
    %c0_912 = arith.constant 0 : index
    %c0_913 = arith.constant 0 : index
    %841 = vector.load %arg24[%c0_911, %c0_912, %c0_913] : memref<1x8x4xf32, #tpu.memory_space<vmem>>, vector<1x8x4xf32>
    %842 = vector.shape_cast %841 : vector<1x8x4xf32> to vector<8x4xf32>
    %843 = vector.shape_cast %840 : vector<8x4xf32> to vector<1x8x4xf32>
    tpu.vector_store %arg24[%c0_911, %c0_912, %c0_913], %843 {strides = array<i32>} : memref<1x8x4xf32, #tpu.memory_space<vmem>>, vector<1x8x4xf32>,
    return
  }
  func.func @transform_0(%arg0: i32) -> (i32, i32, i32) {
    %c0_i32 = arith.constant 0 : i32
    %c0_i32_0 = arith.constant 0 : i32
    %c0_i32_1 = arith.constant 0 : i32
    return %arg0, %c0_i32, %c0_i32_0 : i32, i32, i32
  }
  func.func @transform_1(%arg0: i32) -> (i32, i32) {
    %c0_i32 = arith.constant 0 : i32
    %c0_i32_0 = arith.constant 0 : i32
    %c0_i32_1 = arith.constant 0 : i32
    return %c0_i32, %c0_i32_0 : i32, i32
  }
  func.func @transform_2(%arg0: i32) -> (i32, i32, i32) {
    %c0_i32 = arith.constant 0 : i32
    %c0_i32_0 = arith.constant 0 : i32
    %c0_i32_1 = arith.constant 0 : i32
    %c0_i32_2 = arith.constant 0 : i32
    return %c0_i32, %c0_i32_0, %c0_i32_1 : i32, i32, i32
  }
  func.func @transform_3(%arg0: i32) -> (i32, i32) {
    %c0_i32 = arith.constant 0 : i32
    %c0_i32_0 = arith.constant 0 : i32
    %c0_i32_1 = arith.constant 0 : i32
    return %c0_i32, %c0_i32_0 : i32, i32
  }
  func.func @transform_4(%arg0: i32) -> (i32, i32) {
    %c0_i32 = arith.constant 0 : i32
    %c0_i32_0 = arith.constant 0 : i32
    %c0_i32_1 = arith.constant 0 : i32
    return %c0_i32, %c0_i32_0 : i32, i32
  }
  func.func @transform_5(%arg0: i32) -> (i32, i32, i32) {
    %c0_i32 = arith.constant 0 : i32
    %c0_i32_0 = arith.constant 0 : i32
    %c0_i32_1 = arith.constant 0 : i32
    %c0_i32_2 = arith.constant 0 : i32
    return %c0_i32, %c0_i32_0, %c0_i32_1 : i32, i32, i32
  }
  func.func @transform_6(%arg0: i32) -> (i32, i32) {
    %c0_i32 = arith.constant 0 : i32
    %c0_i32_0 = arith.constant 0 : i32
    %c0_i32_1 = arith.constant 0 : i32
    return %c0_i32, %c0_i32_0 : i32, i32
  }
  func.func @transform_7(%arg0: i32) -> (i32, i32) {
    %c0_i32 = arith.constant 0 : i32
    %c0_i32_0 = arith.constant 0 : i32
    %c0_i32_1 = arith.constant 0 : i32
    return %c0_i32, %c0_i32_0 : i32, i32
  }
  func.func @transform_8(%arg0: i32) -> (i32, i32) {
    %c0_i32 = arith.constant 0 : i32
    %c0_i32_0 = arith.constant 0 : i32
    %c0_i32_1 = arith.constant 0 : i32
    return %c0_i32, %c0_i32_0 : i32, i32
  }
  func.func @transform_9(%arg0: i32) -> (i32, i32, i32) {
    %c0_i32 = arith.constant 0 : i32
    %c0_i32_0 = arith.constant 0 : i32
    %c0_i32_1 = arith.constant 0 : i32
    %c0_i32_2 = arith.constant 0 : i32
    return %c0_i32, %c0_i32_0, %c0_i32_1 : i32, i32, i32
  }
  func.func @transform_10(%arg0: i32) -> (i32, i32) {
    %c0_i32 = arith.constant 0 : i32
    %c0_i32_0 = arith.constant 0 : i32
    %c0_i32_1 = arith.constant 0 : i32
    return %c0_i32, %c0_i32_0 : i32, i32
  }
  func.func @transform_11(%arg0: i32) -> (i32, i32) {
    %c0_i32 = arith.constant 0 : i32
    %c0_i32_0 = arith.constant 0 : i32
    %c0_i32_1 = arith.constant 0 : i32
    return %c0_i32, %c0_i32_0 : i32, i32
  }
  func.func @transform_12(%arg0: i32) -> (i32, i32, i32) {
    %c0_i32 = arith.constant 0 : i32
    %c0_i32_0 = arith.constant 0 : i32
    %c0_i32_1 = arith.constant 0 : i32
    %c0_i32_2 = arith.constant 0 : i32
    return %c0_i32, %c0_i32_0, %c0_i32_1 : i32, i32, i32
  }
  func.func @transform_13(%arg0: i32) -> (i32, i32) {
    %c0_i32 = arith.constant 0 : i32
    %c0_i32_0 = arith.constant 0 : i32
    %c0_i32_1 = arith.constant 0 : i32
    return %c0_i32, %c0_i32_0 : i32, i32
  }
  func.func @transform_14(%arg0: i32) -> (i32, i32) {
    %c0_i32 = arith.constant 0 : i32
    %c0_i32_0 = arith.constant 0 : i32
    %c0_i32_1 = arith.constant 0 : i32
    return %c0_i32, %c0_i32_0 : i32, i32
  }
  func.func @transform_15(%arg0: i32) -> (i32, i32) {
    %c0_i32 = arith.constant 0 : i32
    %c0_i32_0 = arith.constant 0 : i32
    %c0_i32_1 = arith.constant 0 : i32
    return %c0_i32, %c0_i32_0 : i32, i32
  }
  func.func @transform_16(%arg0: i32) -> (i32, i32, i32) {
    %c0_i32 = arith.constant 0 : i32
    %c0_i32_0 = arith.constant 0 : i32
    %c0_i32_1 = arith.constant 0 : i32
    %c0_i32_2 = arith.constant 0 : i32
    return %c0_i32, %c0_i32_0, %c0_i32_1 : i32, i32, i32
  }
  func.func @transform_17(%arg0: i32) -> (i32, i32) {
    %c0_i32 = arith.constant 0 : i32
    %c0_i32_0 = arith.constant 0 : i32
    %c0_i32_1 = arith.constant 0 : i32
    return %c0_i32, %c0_i32_0 : i32, i32
  }
  func.func @transform_18(%arg0: i32) -> (i32, i32) {
    %c0_i32 = arith.constant 0 : i32
    %c0_i32_0 = arith.constant 0 : i32
    %c0_i32_1 = arith.constant 0 : i32
    return %c0_i32, %c0_i32_0 : i32, i32
  }
  func.func @transform_19(%arg0: i32) -> (i32, i32, i32) {
    %c0_i32 = arith.constant 0 : i32
    %c0_i32_0 = arith.constant 0 : i32
    %c0_i32_1 = arith.constant 0 : i32
    %c0_i32_2 = arith.constant 0 : i32
    return %c0_i32, %c0_i32_0, %c0_i32_1 : i32, i32, i32
  }
  func.func @transform_20(%arg0: i32) -> (i32, i32) {
    %c0_i32 = arith.constant 0 : i32
    %c0_i32_0 = arith.constant 0 : i32
    %c0_i32_1 = arith.constant 0 : i32
    return %c0_i32, %c0_i32_0 : i32, i32
  }
  func.func @transform_21(%arg0: i32) -> (i32, i32) {
    %c0_i32 = arith.constant 0 : i32
    %c0_i32_0 = arith.constant 0 : i32
    %c0_i32_1 = arith.constant 0 : i32
    return %c0_i32, %c0_i32_0 : i32, i32
  }
  func.func @transform_22(%arg0: i32) -> (i32, i32) {
    %c0_i32 = arith.constant 0 : i32
    %c0_i32_0 = arith.constant 0 : i32
    %c0_i32_1 = arith.constant 0 : i32
    return %c0_i32, %c0_i32_0 : i32, i32
  }
  func.func @transform_23(%arg0: i32) -> (i32, i32, i32) {
    %c0_i32 = arith.constant 0 : i32
    %c0_i32_0 = arith.constant 0 : i32
    %c0_i32_1 = arith.constant 0 : i32
    return %arg0, %c0_i32, %c0_i32_0 : i32, i32, i32
  }
}

</mosaic_0001>

<bundles_post_ra>
// kernel: encoder512.1
= control target key start
LH: loop header
LB: loop body
LE: loop exit
PB: predicated region body
PF: predicated region fallthrough
CT: control target
= control target key end

     0   :  { %s20783_s0 = inlined_call_operand.vmem [shape: f32[2,26,256], index: 0, kind: input, shape index: {}]   ;;  %s20784_s1 = inlined_call_operand.vmem [shape: bf16[256,400], index: 1, kind: input, shape index: {}]   ;;  %s20785_s2 = inlined_call_operand.vmem [shape: bf16[25,16,26], index: 2, kind: input, shape index: {}]   ;;  %s20786_s3 = inlined_call_operand.vmem [shape: f32[16,1], index: 3, kind: input, shape index: {}]   ;;  %s20787_s4 = inlined_call_operand.vmem [shape: bf16[16,26], index: 4, kind: input, shape index: {}]   ;;  %s20788_s5 = inlined_call_operand.vmem [shape: bf16[25,16,16], index: 5, kind: input, shape index: {}]   ;;  %s20789_s6 = inlined_call_operand.vmem [shape: f32[16,1], index: 6, kind: input, shape index: {}]   ;;  %s20790_s7 = inlined_call_operand.vmem [shape: bf16[316,400], index: 7, kind: input, shape index: {}]   ;;  %s20791_s8 = inlined_call_operand.vmem [shape: bf16[295,144], index: 8, kind: input, shape index: {}]   ;;  %s20792_s9 = inlined_call_operand.vmem [shape: bf16[25,8,16], index: 9, kind: input, shape index: {}]   ;;  %s20793_s10 = inlined_call_operand.vmem [shape: f32[8,1], index: 10, kind: input, shape index: {}]   ;;  %s20794_s11 = inlined_call_operand.vmem [shape: bf16[8,16], index: 11, kind: input, shape index: {}]   ;;  %s20795_s12 = inlined_call_operand.vmem [shape: bf16[25,8,8], index: 12, kind: input, shape index: {}]   ;;  %s20796_s13 = inlined_call_operand.vmem [shape: f32[8,1], index: 13, kind: input, shape index: {}]   ;;  %s20797_s14 = inlined_call_operand.vmem [shape: bf16[92,144], index: 14, kind: input, shape index: {}]   ;;  %s20798_s15 = inlined_call_operand.vmem [shape: bf16[79,64], index: 15, kind: input, shape index: {}]   ;;  %s20799_s16 = inlined_call_operand.vmem [shape: bf16[25,8,8], index: 16, kind: input, shape index: {}]   ;;  %s20800_s17 = inlined_call_operand.vmem [shape: f32[8,1], index: 17, kind: input, shape index: {}]   ;;  %s20801_s18 = inlined_call_operand.vmem [shape: bf16[8,8], index: 18, kind: input, shape index: {}]   ;;  %s20802_s19 = inlined_call_operand.vmem [shape: bf16[25,8,8], index: 19, kind: input, shape index: {}]   ;;  %s20803_s20 = inlined_call_operand.vmem [shape: f32[8,1], index: 20, kind: input, shape index: {}]   ;;  %s20804_s21 = inlined_call_operand.vmem [shape: bf16[28,64], index: 21, kind: input, shape index: {}]   ;;  %s20805_s22 = inlined_call_operand.vmem [shape: f32[19,4], index: 22, kind: input, shape index: {}]   ;;  %s20806_s23 = inlined_call_operand.vmem [shape: f32[2,8,4], index: 23, kind: output, shape index: {}]  }
   0x1   :  { %20928 = sst [smem:[#allocation10_spill]] %s20783_s0 }
   0x2   :  { %20929 = sst [smem:[#allocation11_spill]] %s20784_s1 }
   0x3   :  { %20930 = sst [smem:[#allocation12_spill]] %s20785_s2 }
   0x4   :  { %20931 = sst [smem:[#allocation13_spill]] %s20786_s3 }
   0x5   :  { %20932 = sst [smem:[#allocation14_spill]] %s20787_s4  ;;  %s17338_s4 = smov 0  }
   0x6   :  { %20933 = sst [smem:[#allocation15_spill]] %s20788_s5 }
   0x7   :  { %20934 = sst [smem:[#allocation16_spill]] %s20789_s6 }
   0x8   :  { %20935 = sst [smem:[#allocation17_spill]] %s20790_s7 }
   0x9   :  { %20936 = sst [smem:[#allocation18_spill]] %s20791_s8 }
   0xa   :  { %20937 = sst [smem:[#allocation19_spill]] %s20792_s9 }
   0xb   :  { %20938 = sst [smem:[#allocation20_spill]] %s20793_s10 }
   0xc   :  { %20939 = sst [smem:[#allocation21_spill]] %s20794_s11 }
   0xd   :  { %20940 = sst [smem:[#allocation22_spill]] %s20805_s22 }
   0xe   :  { %20941 = sst [smem:[#allocation23_spill]] %s20806_s23 }
   0xf LB: > { %20942 = sst [smem:[#allocation8_spill]] %s17158_s4  ;;  %s14387_s30 = sadd.s32 4294967295, %s17158_s4   ;;  %s17158_s4 = sphi %s17338_s4, %s33_s4  }
  0x10   : > { %p14391_p0 = scmp.ge.s32.totalorder %s17158_s4, 1  ;;  %p637_p1 = scmp.lt.s32.totalorder %s17158_s4, 3 }
  0x12   : > { %p638_p2 = pnand %p14391_p0, %p637_p1 }
  0x14   : > { %641 = sbr.rel (%p638_p2) target bundleno = 5411 (0x1523), region = 112 }
  0x1b   : > { %s20943_s5 = sld [smem:[#allocation11_spill]]  ;;  %p700_p3 = scmp.lt.s32.totalorder %s14387_s30, 1  ;;  %vm20839_vm0 = vcmask 1043456   ;;  %vm1262_vm1 = vcmask 130052   ;;  %vm1270_vm3 = vcmask 1040384   ;;  %vm1271_vm4 = vcmask 126980  }
  0x1c   : > { %s20945_s6 = sld [smem:[#allocation10_spill]]  ;;  %vm17559_vm2 = vmor %vm1262_vm1, %vm20839_vm0  ;;  %vm17163_vm6 = vmmov 0   ;;  %s20870_s2 = smov 126   ;;  %vm1330_vm7 = vcmask 1039360   ;;  %vm1342_vm8 = vcmask 1044480   ;;  %vm1338_vm9 = vcmask 211968  }
  0x1d   : > { %s21115_s30 = smov (!%p700_p3, %s14387_s30), 1  ;;  %vm1272_vm5 = vmor %vm1271_vm4, %vm1270_vm3  ;;  %s20843_s7 = smov 124   ;;  %vm1560_vm10 = vcmask 1031168   ;;  %vm1690_vm11 = vcmask 1022976   ;;  %vm1820_vm12 = vcmask 1014784   ;;  %vm1950_vm13 = vcmask 883712  }
  0x1e   : > { %20944 = sst [smem:[#allocation9_spill]] %s21115_s30  ;;  %s15117_s28 = sshll.u32 %s21115_s30, 6  ;;  %vm2080_vm14 = vcmask 875520   ;;  %vm2210_vm15 = vcmask 867328   ;;  %vm20860_vm1 = vcmask 859136   ;;  %vm20859_vm3 = vcmask 850944  }
  0x1f   : > { %s20825_s29 = smov 108   ;;  %s20819_s3 = smov 107   ;;  %vm20845_vm4 = vcmask 719872   ;;  %vm2860_vm0 = vcmask 703488  }
  0x20   : > { %s20817_s0 = smov 106   ;;  %s20815_s24 = smov 105  }
  0x21   : > { %v16782_v0 = vld [vmem:[%s20943_s5 + $0x4] ss:$16 sps:$4 sm:$0xff]   ;;  %v16784_v1 = vld [vmem:[%s20943_s5] ss:$16 sps:$4 sm:$0xff]   ;;  %v16785_v2 = vld [vmem:[%s20943_s5 + $0xc] ss:$16 sps:$4 sm:$0xff]  }
  0x22   : > { %1106 = vmatprep.subr.bf16.mxu0 %v16782_v0  ;;  %v16787_v3 = vld [vmem:[%s20943_s5 + $0x8] ss:$16 sps:$4 sm:$0xff]   ;;  %v16788_v4 = vld [vmem:[%s20943_s5 + $0x24] ss:$16 sps:$4 sm:$0xff]   ;;  %v16790_v5 = vld [vmem:[%s20943_s5 + $0x20] ss:$16 sps:$4 sm:$0xff]   ;;  %1159 = vmatprep.subr.bf16.mxu1 %v16785_v2  ;;  %s17485_s27 = scalar_lea.vmem %s20945_s6, %s15117_s28 }
  0x23   : > { %1107 = vmatpush1.bf16.msra.mxu0 %v16784_v1  ;;  %v16791_v6 = vld [vmem:[%s20943_s5 + $0x2c] ss:$16 sps:$4 sm:$0xff]   ;;  %1160 = vmatpush1.bf16.msra.mxu1 %v16787_v3  ;;  %v16793_v7 = vld [vmem:[%s20943_s5 + $0x28] ss:$16 sps:$4 sm:$0xff]   ;;  %v16794_v8 = vld [vmem:[%s20943_s5 + $0x44] ss:$16 sps:$4 sm:$0xff]  }
  0x24   : > { %1108 = vmatprep.subr.bf16.mxu0 %v16788_v4  ;;  %1161 = vmatprep.subr.bf16.mxu1 %v16791_v6  ;;  %v16796_v9 = vld [vmem:[%s20943_s5 + $0x40] ss:$16 sps:$4 sm:$0xff]   ;;  %v16797_v10 = vld [vmem:[%s20943_s5 + $0x4c] ss:$16 sps:$4 sm:$0xff]   ;;  %v16800_v11 = vld [vmem:[%s20943_s5 + $0x64] ss:$16 sps:$4 sm:$0xff]  }
  0x25   : > { %v16799_v12 = vld [vmem:[%s20943_s5 + $0x48] ss:$16 sps:$4 sm:$0xff]   ;;  %v16803_v13 = vld [vmem:[%s20943_s5 + $0x6c] ss:$16 sps:$4 sm:$0xff]   ;;  %v16802_v14 = vld [vmem:[%s20943_s5 + $0x60] ss:$16 sps:$4 sm:$0xff]  }
  0x26   : > { %v16806_v15 = vld [vmem:[%s20943_s5 + $0x84] ss:$16 sps:$4 sm:$0xff]   ;;  %v16805_v16 = vld [vmem:[%s20943_s5 + $0x68] ss:$16 sps:$4 sm:$0xff]   ;;  %v16809_v17 = vld [vmem:[%s20943_s5 + $0x8c] ss:$16 sps:$4 sm:$0xff]  }
  0x27   : > { %1109 = vmatpush1.bf16.msra.mxu0 %v16790_v5  ;;  %1162 = vmatpush1.bf16.msra.mxu1 %v16793_v7  ;;  %v16808_v18 = vld [vmem:[%s20943_s5 + $0x80] ss:$16 sps:$4 sm:$0xff]   ;;  %v16812_v19 = vld [vmem:[%s20943_s5 + $0xa4] ss:$16 sps:$4 sm:$0xff]   ;;  %v16811_v20 = vld [vmem:[%s20943_s5 + $0x88] ss:$16 sps:$4 sm:$0xff]  }
  0x28   : > { %1110 = vmatprep.subr.bf16.mxu0 %v16794_v8  ;;  %1163 = vmatprep.subr.bf16.mxu1 %v16797_v10  ;;  %v16815_v21 = vld [vmem:[%s20943_s5 + $0xac] ss:$16 sps:$4 sm:$0xff]   ;;  %v16814_v22 = vld [vmem:[%s20943_s5 + $0xa0] ss:$16 sps:$4 sm:$0xff]   ;;  %v16818_v23 = vld [vmem:[%s20943_s5 + $0xc4] ss:$16 sps:$4 sm:$0xff]  }
  0x29   : > { %v16817_v24 = vld [vmem:[%s20943_s5 + $0xa8] ss:$16 sps:$4 sm:$0xff]   ;;  %v16821_v25 = vld [vmem:[%s20943_s5 + $0xcc] ss:$16 sps:$4 sm:$0xff]   ;;  %v16820_v26 = vld [vmem:[%s20943_s5 + $0xc0] ss:$16 sps:$4 sm:$0xff]  }
  0x2a   : > { %v16824_v27 = vld [vmem:[%s20943_s5 + $0xe4] ss:$16 sps:$4 sm:$0xff]   ;;  %v16823_v28 = vld [vmem:[%s20943_s5 + $0xc8] ss:$16 sps:$4 sm:$0xff]   ;;  %v16827_v29 = vld [vmem:[%s20943_s5 + $0xec] ss:$16 sps:$4 sm:$0xff]  }
  0x2b   : > { %1111 = vmatpush1.bf16.msra.mxu0 %v16796_v9  ;;  %1164 = vmatpush1.bf16.msra.mxu1 %v16799_v12  ;;  %v16826_v30 = vld [vmem:[%s20943_s5 + $0xe0] ss:$16 sps:$4 sm:$0xff]   ;;  %v16830_v31 = vld [vmem:[%s20943_s5 + $0x104] ss:$16 sps:$4 sm:$0xff]   ;;  %v16829_v32 = vld [vmem:[%s20943_s5 + $0xe8] ss:$16 sps:$4 sm:$0xff]  }
  0x2c   : > { %1112 = vmatprep.subr.bf16.mxu0 %v16800_v11  ;;  %1165 = vmatprep.subr.bf16.mxu1 %v16803_v13  ;;  %v16833_v33 = vld [vmem:[%s20943_s5 + $0x10c] ss:$16 sps:$4 sm:$0xff]   ;;  %v16832_v34 = vld [vmem:[%s20943_s5 + $0x100] ss:$16 sps:$4 sm:$0xff]   ;;  %v16836_v35 = vld [vmem:[%s20943_s5 + $0x124] ss:$16 sps:$4 sm:$0xff]  }
  0x2d   : > { %v16835_v36 = vld [vmem:[%s20943_s5 + $0x108] ss:$16 sps:$4 sm:$0xff]   ;;  %v16839_v37 = vld [vmem:[%s20943_s5 + $0x12c] ss:$16 sps:$4 sm:$0xff]   ;;  %v16838_v38 = vld [vmem:[%s20943_s5 + $0x120] ss:$16 sps:$4 sm:$0xff]  }
  0x2e   : > { %v16842_v39 = vld [vmem:[%s20943_s5 + $0x144] ss:$16 sps:$4 sm:$0xff]   ;;  %v16841_v40 = vld [vmem:[%s20943_s5 + $0x128] ss:$16 sps:$4 sm:$0xff]   ;;  %v16845_v41 = vld [vmem:[%s20943_s5 + $0x14c] ss:$16 sps:$4 sm:$0xff]  }
  0x2f   : > { %1113 = vmatpush1.bf16.msra.mxu0 %v16802_v14  ;;  %1166 = vmatpush1.bf16.msra.mxu1 %v16805_v16  ;;  %v16844_v42 = vld [vmem:[%s20943_s5 + $0x140] ss:$16 sps:$4 sm:$0xff]   ;;  %v16848_v43 = vld [vmem:[%s20943_s5 + $0x164] ss:$16 sps:$4 sm:$0xff]   ;;  %v16847_v44 = vld [vmem:[%s20943_s5 + $0x148] ss:$16 sps:$4 sm:$0xff]  }
  0x30   : > { %1114 = vmatprep.subr.bf16.mxu0 %v16806_v15  ;;  %1167 = vmatprep.subr.bf16.mxu1 %v16809_v17  ;;  %v16851_v45 = vld [vmem:[%s20943_s5 + $0x16c] ss:$16 sps:$4 sm:$0xff]   ;;  %v16850_v47 = vld [vmem:[%s20943_s5 + $0x160] ss:$16 sps:$4 sm:$0xff]   ;;  %v16853_v49 = vld [vmem:[%s20943_s5 + $0x168] ss:$16 sps:$4 sm:$0xff]  }
  0x31   : > { %v711_v46 = vld [vmem:[%s17485_s27 + $0x8] sm:$0xff]  ;;  %v713_v48 = vld [vmem:[%s17485_s27 + $0x18] sm:$0xff]  ;;  %v16854_v50 = vld [vmem:[%s20943_s5 + $0x184] ss:$16 sps:$4 sm:$0xff]   ;;  %s20868_s6 = smov 125   ;;  %s20813_s25 = smov 104  }
  0x32   : > { %v719_v51 = vpack.c.bf16 %v713_v48, %v711_v46  ;;  %v16856_v52 = vld [vmem:[%s20943_s5 + $0x180] ss:$16 sps:$4 sm:$0xff]   ;;  %v16857_v53 = vld [vmem:[%s20943_s5 + $0x18c] ss:$16 sps:$4 sm:$0xff]   ;;  %v16860_v54 = vld [vmem:[%s20943_s5 + $0x1a4] ss:$16 sps:$4 sm:$0xff]  }
  0x33   : > { %1115 = vmatpush1.bf16.msra.mxu0 %v16808_v18  ;;  %1168 = vmatpush1.bf16.msra.mxu1 %v16811_v20  ;;  %v16859_v55 = vld [vmem:[%s20943_s5 + $0x188] ss:$16 sps:$4 sm:$0xff]   ;;  %v16863_v56 = vld [vmem:[%s20943_s5 + $0x1ac] ss:$16 sps:$4 sm:$0xff]   ;;  %v16862_v57 = vld [vmem:[%s20943_s5 + $0x1a0] ss:$16 sps:$4 sm:$0xff]  }
  0x34   : > { %1116 = vmatprep.subr.bf16.mxu0 %v16812_v19  ;;  %1169 = vmatprep.subr.bf16.mxu1 %v16815_v21  ;;  %v16866_v58 = vld [vmem:[%s20943_s5 + $0x1c4] ss:$16 sps:$4 sm:$0xff]   ;;  %v16865_v59 = vld [vmem:[%s20943_s5 + $0x1a8] ss:$16 sps:$4 sm:$0xff]   ;;  %v16869_v60 = vld [vmem:[%s20943_s5 + $0x1cc] ss:$16 sps:$4 sm:$0xff]  }
  0x35   : > { %1138 = vmatprep.mubr.bf16.mxu0 %v719_v51  ;;  %1191 = vmatprep.mubr.bf16.mxu1 %v719_v51  ;;  %v16868_v61 = vld [vmem:[%s20943_s5 + $0x1c0] ss:$16 sps:$4 sm:$0xff]   ;;  %v16872_v62 = vld [vmem:[%s20943_s5 + $0x1e4] ss:$16 sps:$4 sm:$0xff]   ;;  %v16871_v63 = vld [vmem:[%s20943_s5 + $0x1c8] ss:$16 sps:$4 sm:$0xff]  }
  0x36   : > { %v16875_v0 = vld [vmem:[%s20943_s5 + $0x1ec] ss:$16 sps:$4 sm:$0xff]   ;;  %v16874_v1 = vld [vmem:[%s20943_s5 + $0x1e0] ss:$16 sps:$4 sm:$0xff]   ;;  %v717_v5 = vld [vmem:[%s17485_s27 + $0x38] sm:$0x3] }
  0x37   : > { %1117 = vmatpush1.bf16.msra.mxu0 %v16814_v22  ;;  %1170 = vmatpush1.bf16.msra.mxu1 %v16817_v24  ;;  %v710_v2 = vld [vmem:[%s17485_s27] sm:$0xff]  ;;  %v712_v3 = vld [vmem:[%s17485_s27 + $0x10] sm:$0xff]  ;;  %v715_v4 = vld [vmem:[%s17485_s27 + $0x28] sm:$0xff]  ;;  %v17160_v24 = vmov 0.0   ;;  %s20821_s28 = smov 88   ;;  %s20823_s1 = smov 87  }
  0x38   : > { %1118 = vmatprep.subr.bf16.mxu0 %v16818_v23  ;;  %1171 = vmatprep.subr.bf16.mxu1 %v16821_v25  ;;  %v16877_v6 = vld [vmem:[%s20943_s5 + $0x1e8] ss:$16 sps:$4 sm:$0xff]   ;;  %v718_v7 = vpack.c.bf16 %v712_v3, %v710_v2  ;;  %v721_v8 = vpack.c.bf16 %v717_v5, %v715_v4  ;;  %v714_v9 = vld [vmem:[%s17485_s27 + $0x20] sm:$0xff]  ;;  %v716_v10 = vld [vmem:[%s17485_s27 + $0x30] sm:$0x3]  ;;  %s20872_s27 = smov 127  }
  0x39   : > { %v720_v11 = vpack.c.bf16 %v716_v10, %v714_v9  ;;  %s20866_s26 = smov 86   ;;  %s20951_s5 = sld [smem:[#allocation15_spill]] }
  0x3a   : > { %s20977_s23 = sld [smem:[#allocation16_spill]]  ;;  %s21008_s8 = sld [smem:[#allocation18_spill]] }
  0x3b   : > { %1119 = vmatpush1.bf16.msra.mxu0 %v16820_v26  ;;  %1172 = vmatpush1.bf16.msra.mxu1 %v16823_v28  ;;  %s20914_s4 = smov 113   ;;  %s20885_s22 = smov 112  }
  0x3c   : > { %1120 = vmatprep.subr.bf16.mxu0 %v16824_v27  ;;  %1173 = vmatprep.subr.bf16.mxu1 %v16827_v29  ;;  %s20912_s30 = smov 102   ;;  %s21010_s10 = sld [smem:[#allocation20_spill]] }
  0x3d   : > { %s21011_s9 = sld [smem:[#allocation19_spill]]  ;;  %s21014_s11 = sld [smem:[#allocation21_spill]] }
  0x3f   : > { %1121 = vmatpush1.bf16.msra.mxu0 %v16826_v30  ;;  %1174 = vmatpush1.bf16.msra.mxu1 %v16829_v32 }
  0x40   : > { %1122 = vmatprep.subr.bf16.mxu0 %v16830_v31  ;;  %1175 = vmatprep.subr.bf16.mxu1 %v16833_v33 }
  0x43   : > { %1123 = vmatpush1.bf16.msra.mxu0 %v16832_v34  ;;  %1176 = vmatpush1.bf16.msra.mxu1 %v16835_v36  ;;  %v10090_v18 = vld [vmem:[%s21014_s11] sm:$0xf]  ;;  %s20921_s11 = smov 117  }
  0x44   : > { %1124 = vmatprep.subr.bf16.mxu0 %v16836_v35  ;;  %1177 = vmatprep.subr.bf16.mxu1 %v16839_v37 }
  0x47   : > { %1125 = vmatpush1.bf16.msra.mxu0 %v16838_v38  ;;  %1178 = vmatpush1.bf16.msra.mxu1 %v16841_v40 }
  0x48   : > { %1126 = vmatprep.subr.bf16.mxu0 %v16842_v39  ;;  %1179 = vmatprep.subr.bf16.mxu1 %v16845_v41 }
  0x4b   : > { %1127 = vmatpush1.bf16.msra.mxu0 %v16844_v42  ;;  %1180 = vmatpush1.bf16.msra.mxu1 %v16847_v44 }
  0x4c   : > { %1128 = vmatprep.subr.bf16.mxu0 %v16848_v43  ;;  %1181 = vmatprep.subr.bf16.mxu1 %v16851_v45  ;;  %v17162_v43 = vmov 0  }
  0x4d   : > { %16750 = vset.pattern.permute.xlu0 %v17162_v43  ;;  %16751 = vset.pattern.permute.xlu1 %v17162_v43 }
  0x4f   : > { %1129 = vmatpush1.bf16.msra.mxu0 %v16850_v47  ;;  %1182 = vmatpush1.bf16.msra.mxu1 %v16853_v49 }
  0x50   : > { %1130 = vmatprep.subr.bf16.mxu0 %v16854_v50  ;;  %1183 = vmatprep.subr.bf16.mxu1 %v16857_v53 }
  0x53   : > { %1131 = vmatpush1.bf16.msra.mxu0 %v16856_v52  ;;  %1184 = vmatpush1.bf16.msra.mxu1 %v16859_v55 }
  0x54   : > { %1132 = vmatprep.subr.bf16.mxu0 %v16860_v54  ;;  %1185 = vmatprep.subr.bf16.mxu1 %v16863_v56 }
  0x57   : > { %1133 = vmatpush1.bf16.msra.mxu0 %v16862_v57  ;;  %1186 = vmatpush1.bf16.msra.mxu1 %v16865_v59 }
  0x58   : > { %1134 = vmatprep.subr.bf16.mxu0 %v16866_v58  ;;  %1187 = vmatprep.subr.bf16.mxu1 %v16869_v60 }
  0x5b   : > { %1135 = vmatpush1.bf16.msra.mxu0 %v16868_v61  ;;  %1188 = vmatpush1.bf16.msra.mxu1 %v16871_v63 }
  0x5c   : > { %1136 = vmatprep.subr.bf16.mxu0 %v16872_v62  ;;  %1189 = vmatprep.subr.bf16.mxu1 %v16875_v0 }
  0x5f   : > { %1137 = vmatpush1.bf16.msra.mxu0 %v16874_v1  ;;  %1190 = vmatpush1.bf16.msra.mxu1 %v16877_v6 }
  0x60   : > { %15472 = vmatprep.subr.bf16.mxu1 %v17160_v24 }
  0x62   : > { %1139 = vmatmul.mubr.bf16.vlgmr.msra.gmra.mrb[0].mxu0 %v718_v7  ;;  %1192 = vmatmul.mubr.bf16.vlgmr.msra.gmra.mrb[0].mxu1 %v718_v7 }
  0x63   : > { %1148 = vmatprep.mubr.bf16.mxu0 %v721_v8  ;;  %1201 = vmatprep.mubr.bf16.mxu1 %v721_v8 }
  0x6a   : > { %1149 = vmatmul.mubr.bf16.gmra.mrb[4].mxu0 %v720_v11  ;;  %1202 = vmatmul.mubr.bf16.gmra.mrb[4].mxu1 %v720_v11 }
  0x6b   : > { %1384 = vmatprep.mubr.bf16.mxu0 %v17162_v43  ;;  %15476 = vmatprep.mubr.msk.bf16.mxu1 %vm17163_vm6, %v17160_v24 }
 0x135   : > { %v1140_v12 = vpop.f32.mrb[0].mxu0  ;;  %v1193_v15 = vpop.f32.mrb[0].mxu1 }
 0x136   : > { %v1142_v13 = vpop.f32.mrb[1].mxu0  ;;  %v1195_v17 = vpop.f32.mrb[1].mxu1 }
 0x137   : > { %v15118_v14 = vpack.c.bf16 %v1142_v13, %v1140_v12  ;;  %v1144_v16 = vpop.f32.mrb[2].mxu0  ;;  %v15119_v20 = vpack.c.bf16 %v1195_v17, %v1193_v15  ;;  %v1197_v22 = vpop.f32.mrb[2].mxu1 }
 0x138   : > { %v1146_v19 = vpop.f32.mrb[3].mxu0  ;;  %v1199_v23 = vpop.f32.mrb[3].mxu1  ;;  %v17566_v25 = vpack.c.bf16 %v1144_v16, %v1140_v12 }
 0x139   : > { %1260 = vst [vmem:[#allocation2] sm:$0xff] %v15118_v14  ;;  %v15120_v21 = vpack.c.bf16 %v1146_v19, %v1144_v16  ;;  %1264 = vst.msk [vmem:[#allocation2 + $0x8] sm:$0xff] %vm17559_vm2, %v15119_v20  ;;  %v17568_v26 = vpack.c.bf16 %v1146_v19, %v1142_v13  ;;  %v15121_v27 = vpack.c.bf16 %v1199_v23, %v1197_v22 }
 0x13a   : > { %1318 = vrot.lane.b32.xlu1 %v17566_v25, %s20872_s27 }
 0x13b   : > { %1265 = vst [vmem:[#allocation2 + $0x10] sm:$0xff] %v15120_v21  ;;  %1266 = vst.msk [vmem:[#allocation2 + $0x18] sm:$0xff] %vm17559_vm2, %v15121_v27  ;;  %1320 = vrot.lane.b32.xlu0 %v17568_v26, %s20872_s27 }
 0x13d   : > { %v1150_v28 = vpop.f32.mrb[4].mxu0  ;;  %v1203_v31 = vpop.f32.mrb[4].mxu1 }
 0x13e   : > { %v1152_v29 = vpop.f32.mrb[5].mxu0  ;;  %v1205_v33 = vpop.f32.mrb[5].mxu1 }
 0x13f   : > { %v17576_v30 = vpack.c.bf16 %v1152_v29, %v1150_v28  ;;  %v1154_v32 = vpop.f32.mrb[6].mxu0  ;;  %v15123_v35 = vpack.c.bf16 %v1205_v33, %v1203_v31  ;;  %v1207_v37 = vpop.f32.mrb[6].mxu1 }
 0x140   : > { %v1156_v34 = vpop.f32.mrb[7].mxu0  ;;  %v1275_v38 = vld [vmem:[#allocation2 + $0x8] sm:$0xf]  ;;  %v1209_v39 = vpop.f32.mrb[7].mxu1 }
 0x141   : > { %1267 = vst [vmem:[#allocation2 + $0x20] sm:$0xff] %v17576_v30  ;;  %v15124_v36 = vpack.c.bf16 %v1156_v34, %v1154_v32  ;;  %1268 = vst.msk [vmem:[#allocation2 + $0x28] sm:$0xff] %vm17559_vm2, %v15123_v35  ;;  %v15125_v40 = vpack.c.bf16 %v1209_v39, %v1207_v37 }
 0x142   : > { %v1277_v41 = vld [vmem:[#allocation2 + $0x18] sm:$0xf] }
 0x143   : > { %1269 = vst [vmem:[#allocation2 + $0x30] sm:$0x11] %v15124_v36  ;;  %v17581_v42 = vcombine.low %v1275_v38, %v1277_v41  ;;  %1273 = vst.msk [vmem:[#allocation2 + $0x38] sm:$0x11] %vm1272_vm5, %v15125_v40  ;;  %vm20842_vm5 = vcmask 711680  }
 0x145   : > { %1322 = vrot.lane.b32.xlu0 %v17581_v42, %s20872_s27 }
 0x148   : > { %v1279_v45 = vld [vmem:[#allocation2 + $0x28] sm:$0xf] }
 0x14a   : > { %v1280_v44 = vld [vmem:[#allocation2 + $0x30] sm:$0x11]  ;;  %v1281_v48 = vld [vmem:[#allocation2 + $0x38] sm:$0x1] }
 0x14b   : > { %v17591_v46 = vcombine.low %v17576_v30, %v1280_v44  ;;  %v17594_v47 = vcombine.high %v17576_v30, %v1280_v44  ;;  %v17600_v49 = vcombine.low %v1279_v45, %v1281_v48 }
 0x14d   : > { %1326 = vrot.lane.b32.xlu0 %v17594_v47, %s20872_s27  ;;  %1324 = vrot.lane.b32.xlu1 %v17591_v46, %s20872_s27  ;;  %v1454_v4 = vsel %vm1342_vm8, %v17600_v49, 0  ;;  %v1448_v5 = vsel %vm1342_vm8, %v17591_v46, 0 }
 0x151   : > { %1550 = vrot.lane.b32.xlu0 %v17568_v26, %s20870_s2  ;;  %1328 = vrot.lane.b32.xlu1 %v17600_v49, %s20872_s27  ;;  %s20958_s27 = smov 107  }
 0x155   : > { %1548 = vrot.lane.b32.xlu0 %v17566_v25, %s20870_s2  ;;  %1552 = vrot.lane.b32.xlu1 %v17581_v42, %s20870_s2 }
 0x159   : > { %1680 = vrot.lane.b32.xlu0 %v17568_v26, %s20868_s6  ;;  %1682 = vrot.lane.b32.xlu1 %v17581_v42, %s20868_s6 }
 0x15d   : > { %1678 = vrot.lane.b32.xlu0 %v17566_v25, %s20868_s6  ;;  %1812 = vrot.lane.b32.xlu1 %v17581_v42, %s20843_s7 }
 0x161   : > { %1810 = vrot.lane.b32.xlu0 %v17568_v26, %s20843_s7  ;;  %1554 = vrot.lane.b32.xlu1 %v17591_v46, %s20870_s2 }
 0x165   : > { %1556 = vrot.lane.b32.xlu0 %v17594_v47, %s20870_s2  ;;  %1942 = vrot.lane.b32.xlu1 %v17581_v42, %s20825_s29 }
 0x169   : > { %1808 = vrot.lane.b32.xlu0 %v17566_v25, %s20843_s7  ;;  %1558 = vrot.lane.b32.xlu1 %v17600_v49, %s20870_s2  ;;  %s20956_s2 = smov 124  }
 0x16d   : > { %1940 = vrot.lane.b32.xlu0 %v17568_v26, %s20825_s29  ;;  %1684 = vrot.lane.b32.xlu1 %v17591_v46, %s20868_s6 }
 0x171   : > { %1686 = vrot.lane.b32.xlu0 %v17594_v47, %s20868_s6  ;;  %2072 = vrot.lane.b32.xlu1 %v17581_v42, %s20819_s3 }
 0x175   : > { %1938 = vrot.lane.b32.xlu0 %v17566_v25, %s20825_s29  ;;  %1688 = vrot.lane.b32.xlu1 %v17600_v49, %s20868_s6  ;;  %s20957_s6 = smov 108  }
 0x179   : > { %2070 = vrot.lane.b32.xlu0 %v17568_v26, %s20819_s3  ;;  %1814 = vrot.lane.b32.xlu1 %v17591_v46, %s20843_s7 }
 0x17d   : > { %1816 = vrot.lane.b32.xlu0 %v17594_v47, %s20843_s7  ;;  %2202 = vrot.lane.b32.xlu1 %v17581_v42, %s20817_s0 }
 0x181   : > { %2068 = vrot.lane.b32.xlu0 %v17566_v25, %s20819_s3  ;;  %1818 = vrot.lane.b32.xlu1 %v17600_v49, %s20843_s7  ;;  %s20862_s7 = smov 44  }
 0x185   : > { %2200 = vrot.lane.b32.xlu0 %v17568_v26, %s20817_s0  ;;  %1944 = vrot.lane.b32.xlu1 %v17591_v46, %s20825_s29 }
 0x189   : > { %1946 = vrot.lane.b32.xlu0 %v17594_v47, %s20825_s29  ;;  %2332 = vrot.lane.b32.xlu1 %v17581_v42, %s20815_s24 }
 0x18d   : > { %2198 = vrot.lane.b32.xlu0 %v17566_v25, %s20817_s0  ;;  %1948 = vrot.lane.b32.xlu1 %v17600_v49, %s20825_s29  ;;  %s20835_s29 = smov 66  }
 0x191   : > { %2330 = vrot.lane.b32.xlu0 %v17568_v26, %s20815_s24  ;;  %2074 = vrot.lane.b32.xlu1 %v17591_v46, %s20819_s3 }
 0x195   : > { %2076 = vrot.lane.b32.xlu0 %v17594_v47, %s20819_s3  ;;  %2462 = vrot.lane.b32.xlu1 %v17581_v42, %s20813_s25 }
 0x199   : > { %2328 = vrot.lane.b32.xlu0 %v17566_v25, %s20815_s24  ;;  %2078 = vrot.lane.b32.xlu1 %v17600_v49, %s20819_s3  ;;  %s20948_s3 = sld [smem:[#allocation12_spill]] }
 0x19d   : > { %2460 = vrot.lane.b32.xlu0 %v17568_v26, %s20813_s25  ;;  %2204 = vrot.lane.b32.xlu1 %v17591_v46, %s20817_s0 }
 0x19f   : > { %v16878_v63 = vld [vmem:[%s20948_s3 + $0x8] sm:$0xff]   ;;  %v16879_v6 = vld [vmem:[%s20948_s3] sm:$0xff]   ;;  %v16880_v22 = vld [vmem:[%s20948_s3 + $0x10] sm:$0xff]  }
 0x1a0   : > { %v16881_v39 = vld [vmem:[%s20948_s3 + $0x18] sm:$0xff]  }
 0x1a1   : > { %2206 = vrot.lane.b32.xlu0 %v17594_v47, %s20817_s0  ;;  %2592 = vrot.lane.b32.xlu1 %v17581_v42, %s20821_s28 }
 0x1a5   : > { %2458 = vrot.lane.b32.xlu0 %v17566_v25, %s20813_s25  ;;  %2208 = vrot.lane.b32.xlu1 %v17600_v49, %s20817_s0  ;;  %s20831_s0 = smov 68  }
 0x1a9   : > { %2590 = vrot.lane.b32.xlu0 %v17568_v26, %s20821_s28  ;;  %2334 = vrot.lane.b32.xlu1 %v17591_v46, %s20815_s24 }
 0x1ac   : > { %v1319_v51 = vpop.permute.xlu1 %1318 }
 0x1ad   : > { %2336 = vrot.lane.b32.xlu0 %v17594_v47, %s20815_s24  ;;  %2722 = vrot.lane.b32.xlu1 %v17581_v42, %s20823_s1  ;;  %v1321_v50 = vpop.permute.xlu0 %1320 }
 0x1ae   : > { %v1331_v54 = vsel %vm1330_vm7, %v1319_v51, %v1321_v50 }
 0x1b1   : > { %2588 = vrot.lane.b32.xlu0 %v17566_v25, %s20821_s28  ;;  %2338 = vrot.lane.b32.xlu1 %v17600_v49, %s20815_s24  ;;  %s20953_s24 = smov 126  }
 0x1b5   : > { %2720 = vrot.lane.b32.xlu0 %v17568_v26, %s20823_s1  ;;  %2464 = vrot.lane.b32.xlu1 %v17591_v46, %s20813_s25 }
 0x1b7   : > { %v1323_v52 = vpop.permute.xlu0 %1322 }
 0x1b8   : > { %15473 = vmatpush3.bf16.msra.mxu1 %v1323_v52  ;;  %v1332_v53 = vsel %vm1330_vm7, %v1321_v50, %v1323_v52 }
 0x1b9   : > { %2466 = vrot.lane.b32.xlu0 %v17594_v47, %s20813_s25  ;;  %2852 = vrot.lane.b32.xlu1 %v17581_v42, %s20866_s26 }
 0x1ba   : > { %1352 = vmatprep.subr.bf16.mxu0 %v1332_v53  ;;  %15474 = vmatprep.subr.bf16.mxu1 %v17160_v24 }
 0x1bb   : > { %1353 = vmatpush1.bf16.msra.mxu0 %v1331_v54 }
 0x1bd   : > { %2718 = vrot.lane.b32.xlu0 %v17566_v25, %s20823_s1  ;;  %2468 = vrot.lane.b32.xlu1 %v17600_v49, %s20813_s25  ;;  %s20827_s25 = smov 85  }
 0x1bf   : > { %v1327_v55 = vpop.permute.xlu0 %1326  ;;  %v1325_v56 = vpop.permute.xlu1 %1324 }
 0x1c0   : > { %v1333_v57 = vsel %vm1330_vm7, %v1325_v56, %v1327_v55 }
 0x1c1   : > { %2850 = vrot.lane.b32.xlu0 %v17568_v26, %s20866_s26  ;;  %2594 = vrot.lane.b32.xlu1 %v17591_v46, %s20821_s28  ;;  %v1344_v62 = vsel %vm1342_vm8, %v1333_v57, 0  ;;  %v16882_v57 = vld [vmem:[%s20948_s3 + $0x20] sm:$0xff]  }
 0x1c3   : > { %v1551_v58 = vpop.permute.xlu0 %1550  ;;  %v1329_v59 = vpop.permute.xlu1 %1328 }
 0x1c4   : > { %v1334_v60 = vsel %vm1330_vm7, %v1327_v55, %v1329_v59  ;;  %v1350_v61 = vsel %vm1342_vm8, %v1329_v59, 0 }
 0x1c5   : > { %2596 = vrot.lane.b32.xlu0 %v17594_v47, %s20821_s28  ;;  %2982 = vrot.lane.b32.xlu1 %v17581_v42, %s20827_s25 }
 0x1c6   : > { %14476 = vmatprep.subr.msk.bf16.mxu0 %vm1342_vm8, %v1334_v60  ;;  %15475 = vmatpush3.bf16.msra.mxu1 %v1350_v61 }
 0x1c7   : > { %1355 = vmatpush1.bf16.msra.mxu0 %v1344_v62  ;;  %v1549_v0 = vpop.permute.xlu0 %1548  ;;  %v1553_v1 = vpop.permute.xlu1 %1552  ;;  %15480 = vmatprep.subr.bf16.mxu1 %v17160_v24 }
 0x1c8   : > { %1456 = vmatprep.subr.bf16.mxu0 %v17568_v26  ;;  %v1562_v9 = vsel %vm1560_vm10, %v1551_v58, %v1553_v1  ;;  %v1561_v12 = vsel %vm1560_vm10, %v1549_v0, %v1551_v58 }
 0x1c9   : > { %2848 = vrot.lane.b32.xlu0 %v17566_v25, %s20866_s26  ;;  %2598 = vrot.lane.b32.xlu1 %v17600_v49, %s20821_s28  ;;  %s20829_s28 = smov 84  }
 0x1ca   : > { %14477 = vmatmul.mubr.msk.bf16.vlgmr.msra.gmra.mrb[8].mxu0 %vm1338_vm9, %v16878_v63  ;;  %15477 = vmatmul.mubr.msk.bf16.vlgmr.msra.gmra.mrb[8].mxu1 %vm1338_vm9, %v16878_v63 }
 0x1cb   : > { %15481 = vmatpush3.bf16.msra.mxu1 %v17581_v42  ;;  %1457 = vmatpush1.bf16.msra.mxu0 %v17566_v25  ;;  %v1681_v2 = vpop.permute.xlu0 %1680  ;;  %v1683_v3 = vpop.permute.xlu1 %1682 }
 0x1cc   : > { %14480 = vmatprep.subr.msk.bf16.mxu0 %vm1342_vm8, %v17594_v47  ;;  %15482 = vmatprep.subr.bf16.mxu1 %v17160_v24  ;;  %v1692_v28 = vsel %vm1690_vm11, %v1681_v2, %v1683_v3 }
 0x1cd   : > { %2980 = vrot.lane.b32.xlu0 %v17568_v26, %s20827_s25  ;;  %2724 = vrot.lane.b32.xlu1 %v17591_v46, %s20823_s1 }
 0x1ce   : > { %15484 = vmatprep.mubr.msk.bf16.mxu1 %vm17163_vm6, %v17160_v24  ;;  %1488 = vmatprep.mubr.bf16.mxu0 %v17162_v43 }
 0x1cf   : > { %15483 = vmatpush3.bf16.msra.mxu1 %v1454_v4  ;;  %1459 = vmatpush1.bf16.msra.mxu0 %v1448_v5  ;;  %v1679_v7 = vpop.permute.xlu0 %1678  ;;  %v17760_v8 = vpop.permute.xlu1 %1812 }
 0x1d0   : > { %1580 = vmatprep.subr.bf16.mxu0 %v1562_v9  ;;  %15488 = vmatprep.subr.bf16.mxu1 %v17160_v24  ;;  %v1691_v29 = vsel %vm1690_vm11, %v1679_v7, %v1681_v2 }
 0x1d1   : > { %2726 = vrot.lane.b32.xlu0 %v17594_v47, %s20823_s1  ;;  %3112 = vrot.lane.b32.xlu1 %v17581_v42, %s20829_s28 }
 0x1d2   : > { %15485 = vmatmul.mubr.msk.bf16.vlgmr.msra.gmra.mrb[12].mxu1 %vm1338_vm9, %v16879_v6 }
 0x1d3   : > { %15489 = vmatpush3.bf16.msra.mxu1 %v1553_v1  ;;  %v17769_v10 = vpop.permute.xlu0 %1810  ;;  %v1555_v11 = vpop.permute.xlu1 %1554  ;;  %15492 = vmatprep.mubr.msk.bf16.mxu1 %vm17163_vm6, %v17160_v24 }
 0x1d4   : > { %15490 = vmatprep.subr.bf16.mxu1 %v17160_v24  ;;  %v1822_v44 = vsel %vm1820_vm12, %v17769_v10, %v17760_v8 }
 0x1d5   : > { %2978 = vrot.lane.b32.xlu0 %v17566_v25, %s20827_s25  ;;  %2728 = vrot.lane.b32.xlu1 %v17600_v49, %s20823_s1  ;;  %s20833_s1 = smov 67  }
 0x1d6   : > { %14481 = vmatmul.mubr.msk.bf16.vlgmr.msra.gmra.mrb[8].mxu0 %vm1338_vm9, %v16879_v6  ;;  %v16883_v6 = vld [vmem:[%s20948_s3 + $0x28] sm:$0xff]  }
 0x1d7   : > { %1581 = vmatpush1.bf16.msra.mxu0 %v1561_v12  ;;  %v1557_v13 = vpop.permute.xlu0 %1556  ;;  %v17780_v14 = vpop.permute.xlu1 %1942  ;;  %1612 = vmatprep.mubr.bf16.mxu0 %v17162_v43 }
 0x1d8   : > { %v1563_v15 = vsel %vm1560_vm10, %v1555_v11, %v1557_v13 }
 0x1d9   : > { %3110 = vrot.lane.b32.xlu0 %v17568_v26, %s20829_s28  ;;  %2854 = vrot.lane.b32.xlu1 %v17591_v46, %s20866_s26  ;;  %v1572_v21 = vsel %vm1342_vm8, %v1563_v15, 0 }
 0x1db   : > { %v1809_v16 = vpop.permute.xlu0 %1808  ;;  %v1559_v17 = vpop.permute.xlu1 %1558 }
 0x1dc   : > { %v1564_v19 = vsel %vm1560_vm10, %v1557_v13, %v1559_v17  ;;  %v1578_v20 = vsel %vm1342_vm8, %v1559_v17, 0  ;;  %v1821_v45 = vsel %vm1820_vm12, %v1809_v16, %v17769_v10 }
 0x1dd   : > { %2856 = vrot.lane.b32.xlu0 %v17594_v47, %s20866_s26  ;;  %3242 = vrot.lane.b32.xlu1 %v17581_v42, %s20831_s0 }
 0x1de   : > { %14486 = vmatprep.subr.msk.bf16.mxu0 %vm1342_vm8, %v1564_v19  ;;  %15491 = vmatpush3.bf16.msra.mxu1 %v1578_v20  ;;  %v16884_v20 = vld [vmem:[%s20948_s3 + $0x30] sm:$0xff]  }
 0x1df   : > { %1583 = vmatpush1.bf16.msra.mxu0 %v1572_v21  ;;  %v17799_v23 = vpop.permute.xlu0 %1940  ;;  %v1685_v27 = vpop.permute.xlu1 %1684  ;;  %15496 = vmatprep.subr.bf16.mxu1 %v17160_v24 }
 0x1e0   : > { %1710 = vmatprep.subr.bf16.mxu0 %v1692_v28  ;;  %v1952_v60 = vsel %vm1950_vm13, %v17799_v23, %v17780_v14 }
 0x1e1   : > { %3108 = vrot.lane.b32.xlu0 %v17566_v25, %s20829_s28  ;;  %2858 = vrot.lane.b32.xlu1 %v17600_v49, %s20866_s26 }
 0x1e2   : > { %14487 = vmatmul.mubr.msk.bf16.vlgmr.msra.gmra.mrb[8].mxu0 %vm1338_vm9, %v16880_v22  ;;  %15493 = vmatmul.mubr.msk.bf16.vlgmr.msra.gmra.mrb[16].mxu1 %vm1338_vm9, %v16880_v22 }
 0x1e3   : > { %15497 = vmatpush3.bf16.msra.mxu1 %v1683_v3  ;;  %1711 = vmatpush1.bf16.msra.mxu0 %v1691_v29  ;;  %v1687_v31 = vpop.permute.xlu0 %1686  ;;  %v17810_v32 = vpop.permute.xlu1 %2072 }
 0x1e4   : > { %15498 = vmatprep.subr.bf16.mxu1 %v17160_v24  ;;  %1742 = vmatprep.mubr.bf16.mxu0 %v17162_v43  ;;  %v1693_v33 = vsel %vm1690_vm11, %v1685_v27, %v1687_v31 }
 0x1e5   : > { %3240 = vrot.lane.b32.xlu0 %v17568_v26, %s20831_s0  ;;  %2984 = vrot.lane.b32.xlu1 %v17591_v46, %s20827_s25  ;;  %v1702_v38 = vsel %vm1342_vm8, %v1693_v33, 0  ;;  %v17969_v33 = vld [vmem:[#allocation2 + $0x8] ss:$16 sps:$4 sm:$0xff]  }
 0x1e6   : > { %15500 = vmatprep.mubr.msk.bf16.mxu1 %vm17163_vm6, %v17160_v24 }
 0x1e7   : > { %v1939_v34 = vpop.permute.xlu0 %1938  ;;  %v1689_v35 = vpop.permute.xlu1 %1688 }
 0x1e8   : > { %v1694_v36 = vsel %vm1690_vm11, %v1687_v31, %v1689_v35  ;;  %v1708_v37 = vsel %vm1342_vm8, %v1689_v35, 0  ;;  %v1951_v61 = vsel %vm1950_vm13, %v1939_v34, %v17799_v23 }
 0x1e9   : > { %2986 = vrot.lane.b32.xlu0 %v17594_v47, %s20827_s25  ;;  %3372 = vrot.lane.b32.xlu1 %v17581_v42, %s20833_s1 }
 0x1ea   : > { %14492 = vmatprep.subr.msk.bf16.mxu0 %vm1342_vm8, %v1694_v36  ;;  %15499 = vmatpush3.bf16.msra.mxu1 %v1708_v37  ;;  %v16887_v37 = vld [vmem:[%s20948_s3 + $0x38] sm:$0xff]  }
 0x1eb   : > { %1713 = vmatpush1.bf16.msra.mxu0 %v1702_v38  ;;  %v17832_v40 = vpop.permute.xlu0 %2070  ;;  %v1815_v41 = vpop.permute.xlu1 %1814  ;;  %15504 = vmatprep.subr.bf16.mxu1 %v17160_v24 }
 0x1ec   : > { %1840 = vmatprep.subr.bf16.mxu0 %v1822_v44  ;;  %v2082_v9 = vsel %vm2080_vm14, %v17832_v40, %v17810_v32 }
 0x1ed   : > { %3238 = vrot.lane.b32.xlu0 %v17566_v25, %s20831_s0  ;;  %2988 = vrot.lane.b32.xlu1 %v17600_v49, %s20827_s25  ;;  %s20837_s25 = smov 65  }
 0x1ee   : > { %14493 = vmatmul.mubr.msk.bf16.vlgmr.msra.gmra.mrb[8].mxu0 %vm1338_vm9, %v16881_v39  ;;  %15501 = vmatmul.mubr.msk.bf16.vlgmr.msra.gmra.mrb[20].mxu1 %vm1338_vm9, %v16881_v39 }
 0x1ef   : > { %15505 = vmatpush3.bf16.msra.mxu1 %v17760_v8  ;;  %1841 = vmatpush1.bf16.msra.mxu0 %v1821_v45  ;;  %v1817_v48 = vpop.permute.xlu0 %1816  ;;  %v17847_v50 = vpop.permute.xlu1 %2202 }
 0x1f0   : > { %15506 = vmatprep.subr.bf16.mxu1 %v17160_v24  ;;  %1872 = vmatprep.mubr.bf16.mxu0 %v17162_v43  ;;  %v1823_v51 = vsel %vm1820_vm12, %v1815_v41, %v1817_v48 }
 0x1f1   : > { %3370 = vrot.lane.b32.xlu0 %v17568_v26, %s20833_s1  ;;  %3114 = vrot.lane.b32.xlu1 %v17591_v46, %s20829_s28  ;;  %v1832_v56 = vsel %vm1342_vm8, %v1823_v51, 0 }
 0x1f2   : > { %15508 = vmatprep.mubr.msk.bf16.mxu1 %vm17163_vm6, %v17160_v24 }
 0x1f3   : > { %v2069_v52 = vpop.permute.xlu0 %2068  ;;  %v1819_v53 = vpop.permute.xlu1 %1818 }
 0x1f4   : > { %v1824_v54 = vsel %vm1820_vm12, %v1817_v48, %v1819_v53  ;;  %v1838_v55 = vsel %vm1342_vm8, %v1819_v53, 0  ;;  %v2081_v10 = vsel %vm2080_vm14, %v2069_v52, %v17832_v40 }
 0x1f5   : > { %3116 = vrot.lane.b32.xlu0 %v17594_v47, %s20829_s28  ;;  %3502 = vrot.lane.b32.xlu1 %v17581_v42, %s20835_s29 }
 0x1f6   : > { %14498 = vmatprep.subr.msk.bf16.mxu0 %vm1342_vm8, %v1824_v54  ;;  %15507 = vmatpush3.bf16.msra.mxu1 %v1838_v55  ;;  %v16888_v55 = vld [vmem:[%s20948_s3 + $0x40] sm:$0xff]  }
 0x1f7   : > { %1843 = vmatpush1.bf16.msra.mxu0 %v1832_v56  ;;  %v17869_v58 = vpop.permute.xlu0 %2200  ;;  %v1945_v59 = vpop.permute.xlu1 %1944  ;;  %15512 = vmatprep.subr.bf16.mxu1 %v17160_v24 }
 0x1f8   : > { %1970 = vmatprep.subr.bf16.mxu0 %v1952_v60  ;;  %v2212_v23 = vsel %vm2210_vm15, %v17869_v58, %v17847_v50 }
 0x1f9   : > { %3368 = vrot.lane.b32.xlu0 %v17566_v25, %s20833_s1  ;;  %3118 = vrot.lane.b32.xlu1 %v17600_v49, %s20829_s28  ;;  %s20840_s28 = smov 64  }
 0x1fa   : > { %14499 = vmatmul.mubr.msk.bf16.vlgmr.msra.gmra.mrb[8].mxu0 %vm1338_vm9, %v16882_v57  ;;  %15509 = vmatmul.mubr.msk.bf16.vlgmr.msra.gmra.mrb[24].mxu1 %vm1338_vm9, %v16882_v57 }
 0x1fb   : > { %15513 = vmatpush3.bf16.msra.mxu1 %v17780_v14  ;;  %1971 = vmatpush1.bf16.msra.mxu0 %v1951_v61  ;;  %v1947_v62 = vpop.permute.xlu0 %1946  ;;  %v17884_v63 = vpop.permute.xlu1 %2332 }
 0x1fc   : > { %15514 = vmatprep.subr.bf16.mxu1 %v17160_v24  ;;  %2002 = vmatprep.mubr.bf16.mxu0 %v17162_v43  ;;  %v1953_v0 = vsel %vm1950_vm13, %v1945_v59, %v1947_v62 }
 0x1fd   : > { %3500 = vrot.lane.b32.xlu0 %v17568_v26, %s20835_s29  ;;  %3244 = vrot.lane.b32.xlu1 %v17591_v46, %s20831_s0  ;;  %v1962_v5 = vsel %vm1342_vm8, %v1953_v0, 0 }
 0x1fe   : > { %15516 = vmatprep.mubr.msk.bf16.mxu1 %vm17163_vm6, %v17160_v24 }
 0x1ff   : > { %v2199_v1 = vpop.permute.xlu0 %2198  ;;  %v1949_v2 = vpop.permute.xlu1 %1948 }
 0x200   : > { %v1954_v3 = vsel %vm1950_vm13, %v1947_v62, %v1949_v2  ;;  %v1968_v4 = vsel %vm1342_vm8, %v1949_v2, 0 }
 0x201   : > { %3246 = vrot.lane.b32.xlu0 %v17594_v47, %s20831_s0  ;;  %3632 = vrot.lane.b32.xlu1 %v17581_v42, %s20837_s25 }
 0x202   : > { %14504 = vmatprep.subr.msk.bf16.mxu0 %vm1342_vm8, %v1954_v3  ;;  %15515 = vmatpush3.bf16.msra.mxu1 %v1968_v4  ;;  %v16889_v3 = vld [vmem:[%s20948_s3 + $0x48] sm:$0xff]  }
 0x203   : > { %1973 = vmatpush1.bf16.msra.mxu0 %v1962_v5  ;;  %v17906_v7 = vpop.permute.xlu0 %2330  ;;  %v2075_v8 = vpop.permute.xlu1 %2074  ;;  %15520 = vmatprep.subr.bf16.mxu1 %v17160_v24 }
 0x204   : > { %2100 = vmatprep.subr.bf16.mxu0 %v2082_v9  ;;  %v2342_v40 = vsel %vm20860_vm1, %v17906_v7, %v17884_v63 }
 0x205   : > { %3498 = vrot.lane.b32.xlu0 %v17566_v25, %s20835_s29  ;;  %3248 = vrot.lane.b32.xlu1 %v17600_v49, %s20831_s0  ;;  %s20852_s0 = smov 48  }
 0x206   : > { %14505 = vmatmul.mubr.msk.bf16.vlgmr.msra.gmra.mrb[8].mxu0 %vm1338_vm9, %v16883_v6  ;;  %15517 = vmatmul.mubr.msk.bf16.vlgmr.msra.gmra.mrb[28].mxu1 %vm1338_vm9, %v16883_v6  ;;  %v3886_v6 = vld [vmem:[#allocation2 + $0x30] sm:$0x11] }
 0x207   : > { %15521 = vmatpush3.bf16.msra.mxu1 %v17810_v32  ;;  %2101 = vmatpush1.bf16.msra.mxu0 %v2081_v10  ;;  %v2077_v11 = vpop.permute.xlu0 %2076  ;;  %v17921_v12 = vpop.permute.xlu1 %2462  ;;  %v18074_v10 = vcombine.low %v17576_v30, %v3886_v6 }
 0x208   : > { %15522 = vmatprep.subr.bf16.mxu1 %v17160_v24  ;;  %2132 = vmatprep.mubr.bf16.mxu0 %v17162_v43  ;;  %v2083_v13 = vsel %vm2080_vm14, %v2075_v8, %v2077_v11 }
 0x209   : > { %3630 = vrot.lane.b32.xlu0 %v17568_v26, %s20837_s25  ;;  %3374 = vrot.lane.b32.xlu1 %v17591_v46, %s20833_s1  ;;  %v2092_v19 = vsel %vm1342_vm8, %v2083_v13, 0  ;;  %v18086_v13 = vcombine.high %v17576_v30, %v3886_v6  ;;  %v16892_v30 = vld [vmem:[%s20948_s3 + $0x50] sm:$0xff]  }
 0x20a   : > { %15524 = vmatprep.mubr.msk.bf16.mxu1 %vm17163_vm6, %v17160_v24 }
 0x20b   : > { %v2329_v14 = vpop.permute.xlu0 %2328  ;;  %v2079_v15 = vpop.permute.xlu1 %2078 }
 0x20c   : > { %v2084_v16 = vsel %vm2080_vm14, %v2077_v11, %v2079_v15  ;;  %v2098_v17 = vsel %vm1342_vm8, %v2079_v15, 0  ;;  %v2341_v41 = vsel %vm20860_vm1, %v2329_v14, %v17906_v7  ;;  %v18088_v14 = vld [vmem:[#allocation2 + $0x28] ss:$16 sps:$4 sm:$0x1f]  }
 0x20d   : > { %3376 = vrot.lane.b32.xlu0 %v17594_v47, %s20833_s1  ;;  %3762 = vrot.lane.b32.xlu1 %v17581_v42, %s20840_s28  ;;  %v2211_v42 = vsel %vm2210_vm15, %v2199_v1, %v17869_v58 }
 0x20e   : > { %14510 = vmatprep.subr.msk.bf16.mxu0 %vm1342_vm8, %v2084_v16  ;;  %15523 = vmatpush3.bf16.msra.mxu1 %v2098_v17 }
 0x20f   : > { %2103 = vmatpush1.bf16.msra.mxu0 %v2092_v19  ;;  %v17943_v21 = vpop.permute.xlu0 %2460  ;;  %v2205_v22 = vpop.permute.xlu1 %2204  ;;  %15528 = vmatprep.subr.bf16.mxu1 %v17160_v24 }
 0x210   : > { %2230 = vmatprep.subr.bf16.mxu0 %v2212_v23  ;;  %v2472_v58 = vsel %vm20859_vm3, %v17943_v21, %v17921_v12 }
 0x211   : > { %3628 = vrot.lane.b32.xlu0 %v17566_v25, %s20837_s25  ;;  %3378 = vrot.lane.b32.xlu1 %v17600_v49, %s20833_s1  ;;  %s20850_s1 = smov 47  }
 0x212   : > { %14511 = vmatmul.mubr.msk.bf16.vlgmr.msra.gmra.mrb[8].mxu0 %vm1338_vm9, %v16884_v20  ;;  %15525 = vmatmul.mubr.msk.bf16.vlgmr.msra.gmra.mrb[32].mxu1 %vm1338_vm9, %v16884_v20 }
 0x213   : > { %15529 = vmatpush3.bf16.msra.mxu1 %v17847_v50  ;;  %2231 = vmatpush1.bf16.msra.mxu0 %v2211_v42  ;;  %v2207_v27 = vpop.permute.xlu0 %2206  ;;  %v17958_v28 = vpop.permute.xlu1 %2592 }
 0x214   : > { %15530 = vmatprep.subr.bf16.mxu1 %v17160_v24  ;;  %2262 = vmatprep.mubr.bf16.mxu0 %v17162_v43  ;;  %v2213_v29 = vsel %vm2210_vm15, %v2205_v22, %v2207_v27 }
 0x215   : > { %3760 = vrot.lane.b32.xlu0 %v17568_v26, %s20840_s28  ;;  %3504 = vrot.lane.b32.xlu1 %v17591_v46, %s20835_s29  ;;  %v2222_v36 = vsel %vm1342_vm8, %v2213_v29, 0 }
 0x216   : > { %15532 = vmatprep.mubr.msk.bf16.mxu1 %vm17163_vm6, %v17160_v24 }
 0x217   : > { %v2459_v31 = vpop.permute.xlu0 %2458  ;;  %v2209_v32 = vpop.permute.xlu1 %2208 }
 0x218   : > { %v2214_v34 = vsel %vm2210_vm15, %v2207_v27, %v2209_v32  ;;  %v2228_v35 = vsel %vm1342_vm8, %v2209_v32, 0  ;;  %v2471_v59 = vsel %vm20859_vm3, %v2459_v31, %v17943_v21  ;;  %v18118_v27 = vld [vmem:[#allocation2 + $0xc] ss:$16 sps:$4 sm:$0xff]  }
 0x219   : > { %3506 = vrot.lane.b32.xlu0 %v17594_v47, %s20835_s29  ;;  %3932 = vrot.lane.b32.xlu1 %v17969_v33, %s20852_s0 }
 0x21a   : > { %14516 = vmatprep.subr.msk.bf16.mxu0 %vm1342_vm8, %v2214_v34  ;;  %15531 = vmatpush3.bf16.msra.mxu1 %v2228_v35  ;;  %v16894_v35 = vld [vmem:[%s20948_s3 + $0x58] sm:$0xff]  }
 0x21b   : > { %2233 = vmatpush1.bf16.msra.mxu0 %v2222_v36  ;;  %v17982_v38 = vpop.permute.xlu0 %2590  ;;  %v2335_v39 = vpop.permute.xlu1 %2334  ;;  %15536 = vmatprep.subr.bf16.mxu1 %v17160_v24 }
 0x21c   : > { %2360 = vmatprep.subr.bf16.mxu0 %v2342_v40 }
 0x21d   : > { %3758 = vrot.lane.b32.xlu0 %v17566_v25, %s20840_s28  ;;  %3508 = vrot.lane.b32.xlu1 %v17600_v49, %s20835_s29  ;;  %s20847_s29 = smov 46  }
 0x21e   : > { %14517 = vmatmul.mubr.msk.bf16.vlgmr.msra.gmra.mrb[8].mxu0 %vm1338_vm9, %v16887_v37  ;;  %15533 = vmatmul.mubr.msk.bf16.vlgmr.msra.gmra.mrb[36].mxu1 %vm1338_vm9, %v16887_v37 }
 0x21f   : > { %15537 = vmatpush3.bf16.msra.mxu1 %v17884_v63  ;;  %2361 = vmatpush1.bf16.msra.mxu0 %v2341_v41  ;;  %v2337_v44 = vpop.permute.xlu0 %2336  ;;  %v17997_v45 = vpop.permute.xlu1 %2722 }
 0x220   : > { %15538 = vmatprep.subr.bf16.mxu1 %v17160_v24  ;;  %2392 = vmatprep.mubr.bf16.mxu0 %v17162_v43  ;;  %v2343_v48 = vsel %vm20860_vm1, %v2335_v39, %v2337_v44 }
 0x221   : > { %3930 = vrot.lane.b32.xlu0 %v17568_v26, %s20852_s0  ;;  %3634 = vrot.lane.b32.xlu1 %v17591_v46, %s20837_s25  ;;  %v2352_v54 = vsel %vm1342_vm8, %v2343_v48, 0 }
 0x222   : > { %15540 = vmatprep.mubr.msk.bf16.mxu1 %vm17163_vm6, %v17160_v24 }
 0x223   : > { %v2589_v50 = vpop.permute.xlu0 %2588  ;;  %v2339_v51 = vpop.permute.xlu1 %2338 }
 0x224   : > { %v2344_v52 = vsel %vm20860_vm1, %v2337_v44, %v2339_v51  ;;  %v2358_v53 = vsel %vm1342_vm8, %v2339_v51, 0  ;;  %v2601_v7 = vsel %vm20845_vm4, %v2589_v50, %v17982_v38  ;;  %vm20877_vm1 = vcmask 367616  }
 0x225   : > { %3636 = vrot.lane.b32.xlu0 %v17594_v47, %s20837_s25  ;;  %4068 = vrot.lane.b32.xlu1 %v17969_v33, %s20850_s1 }
 0x226   : > { %14522 = vmatprep.subr.msk.bf16.mxu0 %vm1342_vm8, %v2344_v52  ;;  %15539 = vmatpush3.bf16.msra.mxu1 %v2358_v53  ;;  %v16895_v53 = vld [vmem:[%s20948_s3 + $0x60] sm:$0xff]  }
 0x227   : > { %2363 = vmatpush1.bf16.msra.mxu0 %v2352_v54  ;;  %v18019_v56 = vpop.permute.xlu0 %2720  ;;  %v2465_v57 = vpop.permute.xlu1 %2464  ;;  %15544 = vmatprep.subr.bf16.mxu1 %v17160_v24 }
 0x228   : > { %2490 = vmatprep.subr.bf16.mxu0 %v2472_v58  ;;  %v2732_v21 = vsel %vm20842_vm5, %v18019_v56, %v17997_v45 }
 0x229   : > { %3928 = vrot.lane.b32.xlu0 %v17566_v25, %s20852_s0  ;;  %3638 = vrot.lane.b32.xlu1 %v17600_v49, %s20837_s25  ;;  %s20864_s25 = smov 45  }
 0x22a   : > { %14523 = vmatmul.mubr.msk.bf16.vlgmr.msra.gmra.mrb[8].mxu0 %vm1338_vm9, %v16888_v55  ;;  %15541 = vmatmul.mubr.msk.bf16.vlgmr.msra.gmra.mrb[40].mxu1 %vm1338_vm9, %v16888_v55 }
 0x22b   : > { %15545 = vmatpush3.bf16.msra.mxu1 %v17921_v12  ;;  %2491 = vmatpush1.bf16.msra.mxu0 %v2471_v59  ;;  %v2467_v60 = vpop.permute.xlu0 %2466  ;;  %v18034_v61 = vpop.permute.xlu1 %2852 }
 0x22c   : > { %15546 = vmatprep.subr.bf16.mxu1 %v17160_v24  ;;  %2522 = vmatprep.mubr.bf16.mxu0 %v17162_v43  ;;  %v2473_v62 = vsel %vm20859_vm3, %v2465_v57, %v2467_v60 }
 0x22d   : > { %4066 = vrot.lane.b32.xlu0 %v17568_v26, %s20850_s1  ;;  %3764 = vrot.lane.b32.xlu1 %v17591_v46, %s20840_s28  ;;  %v2482_v46 = vsel %vm1342_vm8, %v2473_v62, 0 }
 0x22e   : > { %15548 = vmatprep.mubr.msk.bf16.mxu1 %vm17163_vm6, %v17160_v24 }
 0x22f   : > { %v2719_v63 = vpop.permute.xlu0 %2718  ;;  %v2469_v0 = vpop.permute.xlu1 %2468 }
 0x230   : > { %v2474_v1 = vsel %vm20859_vm3, %v2467_v60, %v2469_v0  ;;  %v2488_v2 = vsel %vm1342_vm8, %v2469_v0, 0  ;;  %v2731_v22 = vsel %vm20842_vm5, %v2719_v63, %v18019_v56  ;;  %v18194_v60 = vld [vmem:[#allocation2 + $0x2c] ss:$16 sps:$4 sm:$0x1f]   ;;  %vm4216_vm3 = vcmask 375808  }
 0x231   : > { %3766 = vrot.lane.b32.xlu0 %v17594_v47, %s20840_s28  ;;  %4204 = vrot.lane.b32.xlu1 %v17969_v33, %s20847_s29  ;;  %v2602_v47 = vsel %vm20845_vm4, %v17982_v38, %v17958_v28 }
 0x232   : > { %14528 = vmatprep.subr.msk.bf16.mxu0 %vm1342_vm8, %v2474_v1  ;;  %15547 = vmatpush3.bf16.msra.mxu1 %v2488_v2  ;;  %v16897_v2 = vld [vmem:[%s20948_s3 + $0x68] sm:$0xff]  }
 0x233   : > { %2493 = vmatpush1.bf16.msra.mxu0 %v2482_v46  ;;  %v18056_v4 = vpop.permute.xlu0 %2850  ;;  %v2595_v5 = vpop.permute.xlu1 %2594  ;;  %15552 = vmatprep.subr.bf16.mxu1 %v17160_v24 }
 0x234   : > { %2620 = vmatprep.subr.bf16.mxu0 %v2602_v47  ;;  %v2862_v39 = vsel %vm2860_vm0, %v18056_v4, %v18034_v61 }
 0x235   : > { %4064 = vrot.lane.b32.xlu0 %v17566_v25, %s20850_s1  ;;  %3768 = vrot.lane.b32.xlu1 %v17600_v49, %s20840_s28  ;;  %s20960_s28 = smov 105  }
 0x236   : > { %14529 = vmatmul.mubr.msk.bf16.vlgmr.msra.gmra.mrb[8].mxu0 %vm1338_vm9, %v16889_v3  ;;  %15549 = vmatmul.mubr.msk.bf16.vlgmr.msra.gmra.mrb[44].mxu1 %vm1338_vm9, %v16889_v3 }
 0x237   : > { %15553 = vmatpush3.bf16.msra.mxu1 %v17958_v28  ;;  %2621 = vmatpush1.bf16.msra.mxu0 %v2601_v7  ;;  %v2597_v8 = vpop.permute.xlu0 %2596  ;;  %v18071_v9 = vpop.permute.xlu1 %2982 }
 0x238   : > { %15554 = vmatprep.subr.bf16.mxu1 %v17160_v24  ;;  %2652 = vmatprep.mubr.bf16.mxu0 %v17162_v43  ;;  %v2603_v49 = vsel %vm20845_vm4, %v2595_v5, %v2597_v8 }
 0x239   : > { %4202 = vrot.lane.b32.xlu0 %v17568_v26, %s20847_s29  ;;  %3936 = vrot.lane.b32.xlu1 %v18074_v10, %s20852_s0  ;;  %v2612_v17 = vsel %vm1342_vm8, %v2603_v49, 0 }
 0x23a   : > { %15556 = vmatprep.mubr.msk.bf16.mxu1 %vm17163_vm6, %v17160_v24 }
 0x23b   : > { %v2849_v11 = vpop.permute.xlu0 %2848  ;;  %v2599_v12 = vpop.permute.xlu1 %2598 }
 0x23c   : > { %v2604_v15 = vsel %vm20845_vm4, %v2597_v8, %v2599_v12  ;;  %v2618_v16 = vsel %vm1342_vm8, %v2599_v12, 0  ;;  %v2861_v40 = vsel %vm2860_vm0, %v2849_v11, %v18056_v4  ;;  %vm20849_vm4 = vcmask 687104   ;;  %v16898_v12 = vld [vmem:[%s20948_s3 + $0x70] sm:$0xff]  }
 0x23d   : > { %3938 = vrot.lane.b32.xlu0 %v18086_v13, %s20852_s0  ;;  %3940 = vrot.lane.b32.xlu1 %v18088_v14, %s20852_s0 }
 0x23e   : > { %14534 = vmatprep.subr.msk.bf16.mxu0 %vm1342_vm8, %v2604_v15  ;;  %15555 = vmatpush3.bf16.msra.mxu1 %v2618_v16 }
 0x23f   : > { %2623 = vmatpush1.bf16.msra.mxu0 %v2612_v17  ;;  %v18101_v19 = vpop.permute.xlu0 %2980  ;;  %v2725_v20 = vpop.permute.xlu1 %2724  ;;  %15560 = vmatprep.subr.bf16.mxu1 %v17160_v24 }
 0x240   : > { %2750 = vmatprep.subr.bf16.mxu0 %v2732_v21 }
 0x241   : > { %4200 = vrot.lane.b32.xlu0 %v17566_v25, %s20847_s29  ;;  %4072 = vrot.lane.b32.xlu1 %v18074_v10, %s20850_s1 }
 0x242   : > { %14535 = vmatmul.mubr.msk.bf16.vlgmr.msra.gmra.mrb[8].mxu0 %vm1338_vm9, %v16892_v30  ;;  %15557 = vmatmul.mubr.msk.bf16.vlgmr.msra.gmra.mrb[48].mxu1 %vm1338_vm9, %v16892_v30 }
 0x243   : > { %15561 = vmatpush3.bf16.msra.mxu1 %v17997_v45  ;;  %2751 = vmatpush1.bf16.msra.mxu0 %v2731_v22  ;;  %v2727_v23 = vpop.permute.xlu0 %2726  ;;  %v18116_v42 = vpop.permute.xlu1 %3112 }
 0x244   : > { %15562 = vmatprep.subr.bf16.mxu1 %v17160_v24  ;;  %15564 = vmatprep.mubr.msk.bf16.mxu1 %vm17163_vm6, %v17160_v24  ;;  %v2733_v28 = vsel %vm20842_vm5, %v2725_v20, %v2727_v23 }
 0x245   : > { %3934 = vrot.lane.b32.xlu0 %v18118_v27, %s20852_s0  ;;  %4340 = vrot.lane.b32.xlu1 %v17969_v33, %s20864_s25  ;;  %v2742_v36 = vsel %vm1342_vm8, %v2733_v28, 0 }
 0x246   : > { %2782 = vmatprep.mubr.bf16.mxu0 %v17162_v43 }
 0x247   : > { %v2979_v29 = vpop.permute.xlu0 %2978  ;;  %v2729_v31 = vpop.permute.xlu1 %2728 }
 0x248   : > { %v2734_v32 = vsel %vm20842_vm5, %v2727_v23, %v2729_v31  ;;  %v2748_v34 = vsel %vm1342_vm8, %v2729_v31, 0  ;;  %vm20846_vm5 = vcmask 695296  }
 0x249   : > { %4074 = vrot.lane.b32.xlu0 %v18086_v13, %s20850_s1  ;;  %4070 = vrot.lane.b32.xlu1 %v18118_v27, %s20850_s1  ;;  %v2992_v57 = vsel %vm20846_vm5, %v18101_v19, %v18071_v9 }
 0x24a   : > { %14540 = vmatprep.subr.msk.bf16.mxu0 %vm1342_vm8, %v2734_v32  ;;  %15563 = vmatpush3.bf16.msra.mxu1 %v2748_v34  ;;  %v16900_v32 = vld [vmem:[#allocation2 + $0x8] ss:$16 sps:$4 sm:$0xff]  }
 0x24b   : > { %2753 = vmatpush1.bf16.msra.mxu0 %v2742_v36  ;;  %v18140_v37 = vpop.permute.xlu0 %3110  ;;  %v2855_v38 = vpop.permute.xlu1 %2854  ;;  %15568 = vmatprep.subr.bf16.mxu1 %v17160_v24 }
 0x24c   : > { %2880 = vmatprep.subr.bf16.mxu0 %v2862_v39  ;;  %v3122_v5 = vsel %vm20849_vm4, %v18140_v37, %v18116_v42  ;;  %v16903_v39 = vld [vmem:[#allocation2 + $0x4] ss:$16 sps:$4 sm:$0xff]  }
 0x24d   : > { %15565 = vmatmul.mubr.msk.bf16.vlgmr.msra.gmra.mrb[52].mxu1 %vm1338_vm9, %v16894_v35  ;;  %4338 = vrot.lane.b32.xlu0 %v17568_v26, %s20864_s25 }
 0x24e   : > { %4076 = vrot.lane.b32.xlu1 %v18088_v14, %s20850_s1  ;;  %14541 = vmatmul.mubr.msk.bf16.vlgmr.msra.gmra.mrb[8].mxu0 %vm1338_vm9, %v16894_v35 }
 0x24f   : > { %15569 = vmatpush3.bf16.msra.mxu1 %v18034_v61  ;;  %2881 = vmatpush1.bf16.msra.mxu0 %v2861_v40  ;;  %v2857_v41 = vpop.permute.xlu0 %2856  ;;  %v18155_v44 = vpop.permute.xlu1 %3242 }
 0x250   : > { %15570 = vmatprep.subr.bf16.mxu1 %v17160_v24  ;;  %15572 = vmatprep.mubr.msk.bf16.mxu1 %vm17163_vm6, %v17160_v24  ;;  %v2863_v45 = vsel %vm2860_vm0, %v2855_v38, %v2857_v41  ;;  %v16901_v38 = vld [vmem:[#allocation2 + $0x20] ss:$16 sps:$4 sm:$0x1f]  }
 0x251   : > { %4336 = vrot.lane.b32.xlu0 %v17566_v25, %s20864_s25  ;;  %2912 = vmatprep.mubr.bf16.mxu0 %v17162_v43  ;;  %v2872_v54 = vsel %vm1342_vm8, %v2863_v45, 0  ;;  %v16905_v45 = vld [vmem:[#allocation2 + $0x28] ss:$16 sps:$4 sm:$0x1f]  }
 0x252   : > { %4208 = vrot.lane.b32.xlu1 %v18074_v10, %s20847_s29 }
 0x253   : > { %v3109_v48 = vpop.permute.xlu0 %3108  ;;  %v2859_v50 = vpop.permute.xlu1 %2858 }
 0x254   : > { %v2864_v51 = vsel %vm2860_vm0, %v2857_v41, %v2859_v50  ;;  %v2878_v52 = vsel %vm1342_vm8, %v2859_v50, 0  ;;  %v3121_v47 = vsel %vm20849_vm4, %v3109_v48, %v18140_v37  ;;  %v16906_v48 = vld [vmem:[#allocation2] ss:$16 sps:$4 sm:$0xff]  }
 0x255   : > { %4210 = vrot.lane.b32.xlu0 %v18086_v13, %s20847_s29  ;;  %14546 = vmatprep.subr.msk.bf16.mxu0 %vm1342_vm8, %v2864_v51 }
 0x256   : > { %4474 = vrot.lane.b32.xlu1 %v17568_v26, %s20862_s7  ;;  %15571 = vmatpush3.bf16.msra.mxu1 %v2878_v52  ;;  %v2991_v26 = vsel %vm20846_vm5, %v2979_v29, %v18101_v19  ;;  %v16907_v52 = vld [vmem:[%s20948_s3 + $0x80] sm:$0xff]  }
 0x257   : > { %2883 = vmatpush1.bf16.msra.mxu0 %v2872_v54  ;;  %v18177_v55 = vpop.permute.xlu0 %3240  ;;  %v2985_v56 = vpop.permute.xlu1 %2984  ;;  %15576 = vmatprep.subr.bf16.mxu1 %v17160_v24 }
 0x258   : > { %3010 = vmatprep.subr.bf16.mxu0 %v2992_v57  ;;  %v16908_v57 = vld [vmem:[#allocation2 + $0x24] ss:$16 sps:$4 sm:$0x1f]  }
 0x259   : > { %15573 = vmatmul.mubr.msk.bf16.vlgmr.msra.gmra.mrb[56].mxu1 %vm1338_vm9, %v16895_v53  ;;  %4206 = vrot.lane.b32.xlu0 %v18118_v27, %s20847_s29 }
 0x25a   : > { %4212 = vrot.lane.b32.xlu1 %v18088_v14, %s20847_s29  ;;  %14547 = vmatmul.mubr.msk.bf16.vlgmr.msra.gmra.mrb[8].mxu0 %vm1338_vm9, %v16895_v53 }
 0x25b   : > { %15577 = vmatpush3.bf16.msra.mxu1 %v18071_v9  ;;  %3011 = vmatpush1.bf16.msra.mxu0 %v2991_v26  ;;  %v2987_v58 = vpop.permute.xlu0 %2986  ;;  %v18192_v59 = vpop.permute.xlu1 %3372 }
 0x25c   : > { %15578 = vmatprep.subr.bf16.mxu1 %v17160_v24  ;;  %15580 = vmatprep.mubr.msk.bf16.mxu1 %vm17163_vm6, %v17160_v24  ;;  %v2993_v61 = vsel %vm20846_vm5, %v2985_v56, %v2987_v58 }
 0x25d   : > { %4344 = vrot.lane.b32.xlu0 %v18074_v10, %s20864_s25  ;;  %3042 = vmatprep.mubr.bf16.mxu0 %v17162_v43  ;;  %v3002_v46 = vsel %vm1342_vm8, %v2993_v61, 0 }
 0x25e   : > { %3942 = vrot.lane.b32.xlu1 %v18194_v60, %s20852_s0  ;;  %s20954_s0 = sld [smem:[#allocation14_spill]] }
 0x25f   : > { %v3239_v62 = vpop.permute.xlu0 %3238  ;;  %v2989_v63 = vpop.permute.xlu1 %2988 }
 0x260   : > { %v2994_v0 = vsel %vm20846_vm5, %v2987_v58, %v2989_v63  ;;  %v3008_v1 = vsel %vm1342_vm8, %v2989_v63, 0  ;;  %vm20854_vm5 = vcmask 556032  }
 0x261   : > { %4348 = vrot.lane.b32.xlu0 %v18088_v14, %s20864_s25  ;;  %14552 = vmatprep.subr.msk.bf16.mxu0 %vm1342_vm8, %v2994_v0 }
 0x262   : > { %4346 = vrot.lane.b32.xlu1 %v18086_v13, %s20864_s25  ;;  %15579 = vmatpush3.bf16.msra.mxu1 %v3008_v1  ;;  %v16909_v1 = vld [vmem:[%s20948_s3 + $0x88] sm:$0xff]  }
 0x263   : > { %3013 = vmatpush1.bf16.msra.mxu0 %v3002_v46  ;;  %v18216_v3 = vpop.permute.xlu0 %3370  ;;  %v3115_v4 = vpop.permute.xlu1 %3114  ;;  %15584 = vmatprep.subr.bf16.mxu1 %v17160_v24 }
 0x264   : > { %3140 = vmatprep.subr.bf16.mxu0 %v3122_v5 }
 0x265   : > { %15581 = vmatmul.mubr.msk.bf16.vlgmr.msra.gmra.mrb[60].mxu1 %vm1338_vm9, %v16897_v2  ;;  %4476 = vrot.lane.b32.xlu0 %v17969_v33, %s20862_s7 }
 0x266   : > { %4078 = vrot.lane.b32.xlu1 %v18194_v60, %s20850_s1  ;;  %14553 = vmatmul.mubr.msk.bf16.vlgmr.msra.gmra.mrb[8].mxu0 %vm1338_vm9, %v16897_v2  ;;  %s20950_s1 = sld [smem:[#allocation17_spill]] }
 0x267   : > { %15585 = vmatpush3.bf16.msra.mxu1 %v18116_v42  ;;  %3141 = vmatpush1.bf16.msra.mxu0 %v3121_v47  ;;  %v3117_v6 = vpop.permute.xlu0 %3116  ;;  %v18231_v7 = vpop.permute.xlu1 %3502  ;;  %v16899_v42 = vld [vmem:[%s20948_s3 + $0x78] sm:$0xff]  }
 0x268   : > { %15586 = vmatprep.subr.bf16.mxu1 %v17160_v24  ;;  %15588 = vmatprep.mubr.msk.bf16.mxu1 %vm17163_vm6, %v17160_v24  ;;  %v3123_v33 = vsel %vm20849_vm4, %v3115_v4, %v3117_v6 }
 0x269   : > { %4214 = vrot.lane.b32.xlu0 %v18194_v60, %s20847_s29  ;;  %3172 = vmatprep.mubr.bf16.mxu0 %v17162_v43  ;;  %s20949_s29 = sld [smem:[#allocation13_spill]] }
 0x26a   : > { %4472 = vrot.lane.b32.xlu1 %v17566_v25, %s20862_s7  ;;  %v3132_v25 = vsel %vm1342_vm8, %v3123_v33, 0 }
 0x26b   : > { %v3369_v8 = vpop.permute.xlu0 %3368  ;;  %v3119_v9 = vpop.permute.xlu1 %3118 }
 0x26c   : > { %v3124_v49 = vsel %vm20849_vm4, %v3117_v6, %v3119_v9  ;;  %v3138_v11 = vsel %vm1342_vm8, %v3119_v9, 0  ;;  %vm20855_vm4 = vcmask 547840  }
 0x26d   : > { %4482 = vrot.lane.b32.xlu0 %v18086_v13, %s20862_s7  ;;  %14558 = vmatprep.subr.msk.bf16.mxu0 %vm1342_vm8, %v3124_v49  ;;  %v3252_v13 = vsel %vm20854_vm5, %v18177_v55, %v18155_v44  ;;  %v3382_v31 = vsel %vm20855_vm4, %v18216_v3, %v18192_v59  ;;  %v3381_v35 = vsel %vm20855_vm4, %v3369_v8, %v18216_v3 }
 0x26e   : > { %4480 = vrot.lane.b32.xlu1 %v18074_v10, %s20862_s7  ;;  %15587 = vmatpush3.bf16.msra.mxu1 %v3138_v11  ;;  %v3251_v10 = vsel %vm20854_vm5, %v3239_v62, %v18177_v55  ;;  %v16910_v11 = vld [vmem:[%s20948_s3 + $0x90] sm:$0xff]  }
 0x26f   : > { %3143 = vmatpush1.bf16.msra.mxu0 %v3132_v25  ;;  %v18253_v15 = vpop.permute.xlu0 %3500  ;;  %v3245_v16 = vpop.permute.xlu1 %3244  ;;  %15592 = vmatprep.subr.bf16.mxu1 %v17160_v24  ;;  %v4601_v34 = vld [vmem:[%s20949_s29 + $0x8] sm:$0xff] }
 0x270   : > { %3270 = vmatprep.subr.bf16.mxu0 %v3252_v13 }
 0x271   : > { %15589 = vmatmul.mubr.msk.bf16.vlgmr.msra.gmra.mrb[64].mxu1 %vm1338_vm9, %v16898_v12  ;;  %4342 = vrot.lane.b32.xlu0 %v18118_v27, %s20864_s25 }
 0x272   : > { %4484 = vrot.lane.b32.xlu1 %v18088_v14, %s20862_s7  ;;  %14559 = vmatmul.mubr.msk.bf16.vlgmr.msra.gmra.mrb[8].mxu0 %vm1338_vm9, %v16898_v12  ;;  %v4600_v14 = vld [vmem:[%s20949_s29] sm:$0xff]  ;;  %s20973_s29 = smov 47  }
 0x273   : > { %15593 = vmatpush3.bf16.msra.mxu1 %v18155_v44  ;;  %3271 = vmatpush1.bf16.msra.mxu0 %v3251_v10  ;;  %v3247_v17 = vpop.permute.xlu0 %3246  ;;  %v18268_v30 = vpop.permute.xlu1 %3632 }
 0x274   : > { %15594 = vmatprep.subr.bf16.mxu1 %v17160_v24  ;;  %15596 = vmatprep.mubr.msk.bf16.mxu1 %vm17163_vm6, %v17160_v24  ;;  %v3253_v19 = vsel %vm20854_vm5, %v3245_v16, %v3247_v17 }
 0x275   : > { %4478 = vrot.lane.b32.xlu0 %v18118_v27, %s20862_s7  ;;  %3302 = vmatprep.mubr.bf16.mxu0 %v17162_v43  ;;  %v3262_v27 = vsel %vm1342_vm8, %v3253_v19, 0 }
 0x276   : > { %4350 = vrot.lane.b32.xlu1 %v18194_v60, %s20864_s25  ;;  %s20952_s25 = smov 127  }
 0x277   : > { %v3499_v20 = vpop.permute.xlu0 %3498  ;;  %v3249_v21 = vpop.permute.xlu1 %3248 }
 0x278   : > { %v3254_v22 = vsel %vm20854_vm5, %v3247_v17, %v3249_v21  ;;  %v3268_v23 = vsel %vm1342_vm8, %v3249_v21, 0  ;;  %vm20856_vm5 = vcmask 539648  }
 0x279   : > { %4604 = vperm.xlu0 %16750, %v4600_v14   ;;  %14564 = vmatprep.subr.msk.bf16.mxu0 %vm1342_vm8, %v3254_v22  ;;  %v3512_v56 = vsel %vm20856_vm5, %v18253_v15, %v18231_v7  ;;  %v3511_v26 = vsel %vm20856_vm5, %v3499_v20, %v18253_v15 }
 0x27a   : > { %4486 = vrot.lane.b32.xlu1 %v18194_v60, %s20862_s7  ;;  %15595 = vmatpush3.bf16.msra.mxu1 %v3268_v23  ;;  %s20961_s7 = smov 104  }
 0x27b   : > { %3273 = vmatpush1.bf16.msra.mxu0 %v3262_v27  ;;  %v18291_v28 = vpop.permute.xlu0 %3630  ;;  %v3375_v29 = vpop.permute.xlu1 %3374  ;;  %15600 = vmatprep.subr.bf16.mxu1 %v17160_v24 }
 0x27c   : > { %3400 = vmatprep.subr.bf16.mxu0 %v3382_v31 }
 0x27d   : > { %15597 = vmatmul.mubr.msk.bf16.vlgmr.msra.gmra.mrb[68].mxu1 %vm1338_vm9, %v16899_v42  ;;  %5443 = vrot.lane.b32.xlu0 %v16900_v32, %s20866_s26  ;;  %v16911_v32 = vld [vmem:[%s20948_s3 + $0x98] sm:$0xff]  }
 0x27e   : > { %4609 = vperm.xlu1 %16751, %v4601_v34   ;;  %14565 = vmatmul.mubr.msk.bf16.vlgmr.msra.gmra.mrb[8].mxu0 %vm1338_vm9, %v16899_v42 }
 0x27f   : > { %15601 = vmatpush3.bf16.msra.mxu1 %v18192_v59  ;;  %3401 = vmatpush1.bf16.msra.mxu0 %v3381_v35  ;;  %v3377_v36 = vpop.permute.xlu0 %3376  ;;  %v18306_v37 = vpop.permute.xlu1 %3762 }
 0x280   : > { %15602 = vmatprep.subr.bf16.mxu1 %v17160_v24  ;;  %15604 = vmatprep.mubr.msk.bf16.mxu1 %vm17163_vm6, %v17160_v24  ;;  %v3383_v40 = vsel %vm20855_vm4, %v3375_v29, %v3377_v36 }
 0x281   : > { %5445 = vrot.lane.b32.xlu0 %v16901_v38, %s20866_s26  ;;  %3432 = vmatprep.mubr.bf16.mxu0 %v17162_v43  ;;  %v3392_v53 = vsel %vm1342_vm8, %v3383_v40, 0 }
 0x282   : > { %5441 = vrot.lane.b32.xlu1 %v16903_v39, %s20866_s26 }
 0x283   : > { %v3629_v41 = vpop.permute.xlu0 %3628  ;;  %v3379_v44 = vpop.permute.xlu1 %3378 }
 0x284   : > { %v3384_v50 = vsel %vm20855_vm4, %v3377_v36, %v3379_v44  ;;  %v3398_v51 = vsel %vm1342_vm8, %v3379_v44, 0  ;;  %vm20857_vm4 = vcmask 531456  }
 0x285   : > { %5449 = vrot.lane.b32.xlu0 %v16905_v45, %s20866_s26  ;;  %14570 = vmatprep.subr.msk.bf16.mxu0 %vm1342_vm8, %v3384_v50  ;;  %v3642_v46 = vsel %vm20857_vm4, %v18291_v28, %v18268_v30  ;;  %v3641_v5 = vsel %vm20857_vm4, %v3629_v41, %v18291_v28 }
 0x286   : > { %5439 = vrot.lane.b32.xlu1 %v16906_v48, %s20866_s26  ;;  %15603 = vmatpush3.bf16.msra.mxu1 %v3398_v51 }
 0x287   : > { %3403 = vmatpush1.bf16.msra.mxu0 %v3392_v53  ;;  %v18324_v54 = vpop.permute.xlu0 %3760  ;;  %v3505_v55 = vpop.permute.xlu1 %3504  ;;  %15608 = vmatprep.subr.bf16.mxu1 %v17160_v24 }
 0x288   : > { %3530 = vmatprep.subr.bf16.mxu0 %v3512_v56  ;;  %v18424_v56 = vld [vmem:[%s20948_s3 + $0xa0] sm:$0xff]  }
 0x289   : > { %15605 = vmatmul.mubr.msk.bf16.vlgmr.msra.gmra.mrb[72].mxu1 %vm1338_vm9, %v16907_v52 }
 0x28a   : > { %5447 = vrot.lane.b32.xlu1 %v16908_v57, %s20866_s26  ;;  %14571 = vmatmul.mubr.msk.bf16.vlgmr.msra.gmra.mrb[8].mxu0 %vm1338_vm9, %v16907_v52  ;;  %s20955_s26 = smov 125  }
 0x28b   : > { %15609 = vmatpush3.bf16.msra.mxu1 %v18231_v7  ;;  %3531 = vmatpush1.bf16.msra.mxu0 %v3511_v26  ;;  %v3507_v58 = vpop.permute.xlu0 %3506  ;;  %v18336_v59 = vpop.permute.xlu1 %3932 }
 0x28c   : > { %15610 = vmatprep.subr.bf16.mxu1 %v17160_v24  ;;  %15612 = vmatprep.mubr.msk.bf16.mxu1 %vm17163_vm6, %v17160_v24  ;;  %v3513_v60 = vsel %vm20856_vm5, %v3505_v55, %v3507_v58 }
 0x28d   : > { %3562 = vmatprep.mubr.bf16.mxu0 %v17162_v43  ;;  %v3522_v2 = vsel %vm1342_vm8, %v3513_v60, 0 }
 0x28f   : > { %v3759_v61 = vpop.permute.xlu0 %3758  ;;  %v3509_v62 = vpop.permute.xlu1 %3508 }
 0x290   : > { %v3514_v63 = vsel %vm20856_vm5, %v3507_v58, %v3509_v62  ;;  %v3528_v0 = vsel %vm1342_vm8, %v3509_v62, 0  ;;  %vm20858_vm5 = vcmask 523264  }
 0x291   : > { %14576 = vmatprep.subr.msk.bf16.mxu0 %vm1342_vm8, %v3514_v63  ;;  %15611 = vmatpush3.bf16.msra.mxu1 %v3528_v0  ;;  %v3772_v15 = vsel %vm20858_vm5, %v18324_v54, %v18306_v37  ;;  %v3771_v14 = vsel %vm20858_vm5, %v3759_v61, %v18324_v54 }
 0x292   : > { %3533 = vmatpush1.bf16.msra.mxu0 %v3522_v2  ;;  %15616 = vmatprep.subr.bf16.mxu1 %v17160_v24 }
 0x293   : > { %v18354_v3 = vpop.permute.xlu0 %3930  ;;  %v3635_v4 = vpop.permute.xlu1 %3634  ;;  %3660 = vmatprep.subr.bf16.mxu0 %v3642_v46 }
 0x294   : > { %15613 = vmatmul.mubr.msk.bf16.vlgmr.msra.gmra.mrb[76].mxu1 %vm1338_vm9, %v16909_v1 }
 0x295   : > { %15617 = vmatpush3.bf16.msra.mxu1 %v18268_v30  ;;  %15620 = vmatprep.mubr.msk.bf16.mxu1 %vm17163_vm6, %v17160_v24 }
 0x296   : > { %14577 = vmatmul.mubr.msk.bf16.vlgmr.msra.gmra.mrb[8].mxu0 %vm1338_vm9, %v16909_v1  ;;  %15618 = vmatprep.subr.bf16.mxu1 %v17160_v24 }
 0x297   : > { %3661 = vmatpush1.bf16.msra.mxu0 %v3641_v5  ;;  %v3637_v47 = vpop.permute.xlu0 %3636  ;;  %v18364_v6 = vpop.permute.xlu1 %4068  ;;  %3692 = vmatprep.mubr.bf16.mxu0 %v17162_v43 }
 0x298   : > { %v3643_v7 = vsel %vm20857_vm4, %v3635_v4, %v3637_v47 }
 0x299   : > { %v3652_v12 = vsel %vm1342_vm8, %v3643_v7, 0 }
 0x29b   : > { %v3929_v33 = vpop.permute.xlu0 %3928  ;;  %v3639_v8 = vpop.permute.xlu1 %3638 }
 0x29c   : > { %v3644_v9 = vsel %vm20857_vm4, %v3637_v47, %v3639_v8  ;;  %v3658_v49 = vsel %vm1342_vm8, %v3639_v8, 0  ;;  %vm20861_vm4 = vcmask 392192  }
 0x29d   : > { %14582 = vmatprep.subr.msk.bf16.mxu0 %vm1342_vm8, %v3644_v9  ;;  %15619 = vmatpush3.bf16.msra.mxu1 %v3658_v49  ;;  %v1429_v25 = vpop.f32.mrb[8].mxu1  ;;  %v3946_v38 = vsel %vm20861_vm4, %v18354_v3, %v18336_v59  ;;  %v3945_v41 = vsel %vm20861_vm4, %v3929_v33, %v18354_v3  ;;  %v18446_v33 = vld [vmem:[%s20948_s3 + $0xa8] sm:$0xff]  }
 0x29e   : > { %3663 = vmatpush1.bf16.msra.mxu0 %v3652_v12  ;;  %15624 = vmatprep.subr.bf16.mxu1 %v17160_v24  ;;  %v15478_v16 = vpop.f32.mrb[9].mxu1 }
 0x29f   : > { %v18379_v13 = vpop.permute.xlu0 %4066  ;;  %v3765_v10 = vpop.permute.xlu1 %3764  ;;  %3790 = vmatprep.subr.bf16.mxu0 %v3772_v15 }
 0x2a0   : > { %15621 = vmatmul.mubr.msk.bf16.vlgmr.msra.gmra.mrb[80].mxu1 %vm1338_vm9, %v16910_v11  ;;  %v1432_v17 = vpop.f32.mrb[10].mxu1 }
 0x2a1   : > { %15625 = vmatpush3.bf16.msra.mxu1 %v18306_v37  ;;  %15628 = vmatprep.mubr.msk.bf16.mxu1 %vm17163_vm6, %v17160_v24  ;;  %v15479_v30 = vpop.f32.mrb[11].mxu1 }
 0x2a2   : > { %14583 = vmatmul.mubr.msk.bf16.vlgmr.msra.gmra.mrb[8].mxu0 %vm1338_vm9, %v16910_v11  ;;  %15626 = vmatprep.subr.bf16.mxu1 %v17160_v24 }
 0x2a3   : > { %3791 = vmatpush1.bf16.msra.mxu0 %v3771_v14  ;;  %v3767_v19 = vpop.permute.xlu0 %3766  ;;  %v18389_v20 = vpop.permute.xlu1 %4204  ;;  %3822 = vmatprep.mubr.bf16.mxu0 %v17162_v43 }
 0x2a4   : > { %v3773_v22 = vsel %vm20858_vm5, %v3765_v10, %v3767_v19 }
 0x2a5   : > { %v1533_v21 = vpop.f32.mrb[12].mxu1  ;;  %v3782_v35 = vsel %vm1342_vm8, %v3773_v22, 0 }
 0x2a6   : > { %v1534_v23 = vadd.f32 %v1533_v21, %v1429_v25  ;;  %v15486_v42 = vpop.f32.mrb[13].mxu1 }
 0x2a7   : > { %v4065_v27 = vpop.permute.xlu0 %4064  ;;  %v3769_v28 = vpop.permute.xlu1 %3768  ;;  %v18461_v42 = vld [vmem:[%s20948_s3 + $0xb0] sm:$0xff]  }
 0x2a8   : > { %v3774_v29 = vsel %vm20858_vm5, %v3767_v19, %v3769_v28  ;;  %v3788_v31 = vsel %vm1342_vm8, %v3769_v28, 0  ;;  %v1536_v34 = vpop.f32.mrb[14].mxu1  ;;  %vm4080_vm5 = vcmask 384000  }
 0x2a9   : > { %14588 = vmatprep.subr.msk.bf16.mxu0 %vm1342_vm8, %v3774_v29  ;;  %15627 = vmatpush3.bf16.msra.mxu1 %v3788_v31  ;;  %v1537_v36 = vadd.f32 %v1536_v34, %v1432_v17  ;;  %v15487_v37 = vpop.f32.mrb[15].mxu1  ;;  %v4082_v54 = vsel %vm4080_vm5, %v18379_v13, %v18364_v6  ;;  %v4081_v1 = vsel %vm4080_vm5, %v4065_v27, %v18379_v13 }
 0x2aa   : > { %3793 = vmatpush1.bf16.msra.mxu0 %v3782_v35  ;;  %15632 = vmatprep.subr.bf16.mxu1 %v17160_v24 }
 0x2ab   : > { %v4203_v39 = vpop.permute.xlu0 %4202  ;;  %v3937_v40 = vpop.permute.xlu1 %3936  ;;  %3966 = vmatprep.subr.bf16.mxu0 %v3946_v38 }
 0x2ac   : > { %15629 = vmatmul.mubr.msk.bf16.vlgmr.msra.gmra.mrb[84].mxu1 %vm1338_vm9, %v16911_v32  ;;  %v4218_v11 = vsel %vm4216_vm3, %v4203_v39, %v18389_v20 }
 0x2ad   : > { %15636 = vmatprep.mubr.msk.bf16.mxu1 %vm17163_vm6, %v17160_v24 }
 0x2ae   : > { %14589 = vmatmul.mubr.msk.bf16.vlgmr.msra.gmra.mrb[8].mxu0 %vm1338_vm9, %v16911_v32 }
 0x2af   : > { %3967 = vmatpush1.bf16.msra.mxu0 %v3945_v41  ;;  %v3939_v44 = vpop.permute.xlu0 %3938  ;;  %v18410_v45 = vpop.permute.xlu1 %3940  ;;  %3998 = vmatprep.mubr.bf16.mxu0 %v17162_v43 }
 0x2b0   : > { %v3948_v48 = vsel %vm20861_vm4, %v3937_v40, %v3939_v44  ;;  %v3949_v50 = vsel %vm20861_vm4, %v3939_v44, %v18410_v45 }
 0x2b1   : > { %14602 = vmatprep.subr.msk.bf16.mxu0 %vm1342_vm8, %v3949_v50  ;;  %v3958_v51 = vsel %vm1342_vm8, %v3948_v48, 0 }
 0x2b3   : > { %3969 = vmatpush1.bf16.msra.mxu0 %v3958_v51  ;;  %v4201_v52 = vpop.permute.xlu0 %4200  ;;  %v4073_v53 = vpop.permute.xlu1 %4072 }
 0x2b4   : > { %4102 = vmatprep.subr.bf16.mxu0 %v4082_v54  ;;  %v4217_v13 = vsel %vm4216_vm3, %v4201_v52, %v4203_v39 }
 0x2b5   : > { %v1657_v55 = vpop.f32.mrb[16].mxu1 }
 0x2b6   : > { %v1666_v57 = vadd.f32 %v1657_v55, %v1534_v23  ;;  %v15494_v26 = vpop.f32.mrb[17].mxu1 }
 0x2b7   : > { %v3935_v58 = vpop.permute.xlu0 %3934  ;;  %v18426_v60 = vpop.permute.xlu1 %4340 }
 0x2b8   : > { %v3947_v61 = vsel %vm20861_vm4, %v18336_v59, %v3935_v58  ;;  %v1660_v62 = vpop.f32.mrb[18].mxu1 }
 0x2b9   : > { %15633 = vmatpush3.bf16.msra.mxu1 %v3947_v61  ;;  %v1669_v63 = vadd.f32 %v1660_v62, %v1537_v36  ;;  %v15495_v0 = vpop.f32.mrb[19].mxu1 }
 0x2ba   : > { %14603 = vmatmul.mubr.msk.bf16.vlgmr.msra.gmra.mrb[8].mxu0 %vm1338_vm9, %v18424_v56  ;;  %15634 = vmatprep.subr.bf16.mxu1 %v17160_v24 }
 0x2bb   : > { %4103 = vmatpush1.bf16.msra.mxu0 %v4081_v1  ;;  %v4075_v2 = vpop.permute.xlu0 %4074  ;;  %v4071_v46 = vpop.permute.xlu1 %4070  ;;  %4134 = vmatprep.mubr.bf16.mxu0 %v17162_v43 }
 0x2bc   : > { %v4084_v3 = vsel %vm4080_vm5, %v4073_v53, %v4075_v2  ;;  %v4083_v48 = vsel %vm4080_vm5, %v18364_v6, %v4071_v46 }
 0x2bd   : > { %v4094_v7 = vsel %vm1342_vm8, %v4084_v3, 0 }
 0x2bf   : > { %v4339_v59 = vpop.permute.xlu0 %4338 }
 0x2c0   : > { %v18437_v4 = vpop.permute.xlu1 %4076  ;;  %v4354_v31 = vsel %vm20877_vm1, %v4339_v59, %v18426_v60 }
 0x2c1   : > { %v4085_v5 = vsel %vm4080_vm5, %v4075_v2, %v18437_v4  ;;  %v1787_v47 = vpop.f32.mrb[20].mxu1 }
 0x2c2   : > { %14608 = vmatprep.subr.msk.bf16.mxu0 %vm1342_vm8, %v4085_v5  ;;  %v1796_v8 = vadd.f32 %v1787_v47, %v1666_v57  ;;  %v15502_v9 = vpop.f32.mrb[21].mxu1 }
 0x2c3   : > { %4105 = vmatpush1.bf16.msra.mxu0 %v4094_v7  ;;  %v4337_v49 = vpop.permute.xlu0 %4336  ;;  %v1790_v12 = vpop.f32.mrb[22].mxu1 }
 0x2c4   : > { %v4209_v25 = vpop.permute.xlu1 %4208  ;;  %4238 = vmatprep.subr.bf16.mxu0 %v4218_v11  ;;  %v1799_v15 = vadd.f32 %v1790_v12, %v1669_v63  ;;  %v15503_v16 = vpop.f32.mrb[23].mxu1  ;;  %v4353_v38 = vsel %vm20877_vm1, %v4337_v49, %v4339_v59  ;;  %v16916_v49 = vld [vmem:[%s20948_s3 + $0xc0] sm:$0xff]  }
 0x2c6   : > { %14609 = vmatmul.mubr.msk.bf16.vlgmr.msra.gmra.mrb[8].mxu0 %vm1338_vm9, %v18446_v33 }
 0x2c7   : > { %4239 = vmatpush1.bf16.msra.mxu0 %v4217_v13  ;;  %v4211_v10 = vpop.permute.xlu0 %4210  ;;  %4270 = vmatprep.mubr.bf16.mxu0 %v17162_v43 }
 0x2c8   : > { %v4475_v17 = vpop.permute.xlu1 %4474  ;;  %v4220_v30 = vsel %vm4216_vm3, %v4209_v25, %v4211_v10 }
 0x2c9   : > { %v4230_v23 = vsel %vm1342_vm8, %v4220_v30, 0 }
 0x2cb   : > { %v4207_v14 = vpop.permute.xlu0 %4206 }
 0x2cc   : > { %v4213_v19 = vpop.permute.xlu1 %4212  ;;  %v4219_v2 = vsel %vm4216_vm3, %v18389_v20, %v4207_v14 }
 0x2cd   : > { %v4221_v21 = vsel %vm4216_vm3, %v4211_v10, %v4213_v19  ;;  %v1917_v22 = vpop.f32.mrb[24].mxu1 }
 0x2ce   : > { %14614 = vmatprep.subr.msk.bf16.mxu0 %vm1342_vm8, %v4221_v21  ;;  %v1926_v27 = vadd.f32 %v1917_v22, %v1796_v8  ;;  %v15510_v28 = vpop.f32.mrb[25].mxu1 }
 0x2cf   : > { %4241 = vmatpush1.bf16.msra.mxu0 %v4230_v23  ;;  %v4345_v29 = vpop.permute.xlu0 %4344  ;;  %v1920_v32 = vpop.f32.mrb[26].mxu1 }
 0x2d0   : > { %v3943_v34 = vpop.permute.xlu1 %3942  ;;  %4374 = vmatprep.subr.bf16.mxu0 %v4354_v31  ;;  %v1929_v35 = vadd.f32 %v1920_v32, %v1799_v15  ;;  %v15511_v36 = vpop.f32.mrb[27].mxu1 }
 0x2d1   : > { %v3950_v37 = vsel %vm20861_vm4, %v18410_v45, %v3943_v34  ;;  %vm20876_vm4 = vcmask 359424  }
 0x2d2   : > { %v3964_v39 = vsel %vm1342_vm8, %v3950_v37, 0  ;;  %14615 = vmatmul.mubr.msk.bf16.vlgmr.msra.gmra.mrb[8].mxu0 %vm1338_vm9, %v18461_v42 }
 0x2d3   : > { %15635 = vmatpush3.bf16.msra.mxu1 %v3964_v39  ;;  %4375 = vmatpush1.bf16.msra.mxu0 %v4353_v38  ;;  %v18471_v40 = vpop.permute.xlu0 %4348  ;;  %v16917_v38 = vld [vmem:[%s20950_s1] ss:$16 sps:$4 sm:$0xff]   ;;  %v16919_v39 = vld [vmem:[%s20950_s1 + $0x4] ss:$16 sps:$4 sm:$0xff]  }
 0x2d4   : > { %v4347_v41 = vpop.permute.xlu1 %4346  ;;  %15640 = vmatprep.subr.bf16.mxu1 %v17160_v24  ;;  %4406 = vmatprep.mubr.bf16.mxu0 %v17162_v43 }
 0x2d5   : > { %v4356_v44 = vsel %vm20877_vm1, %v4345_v29, %v4347_v41  ;;  %v4357_v45 = vsel %vm20877_vm1, %v4347_v41, %v18471_v40  ;;  %v16922_v41 = vld [vmem:[%s20950_s1 + $0xc] ss:$16 sps:$4 sm:$0xff]  }
 0x2d6   : > { %15637 = vmatmul.mubr.msk.bf16.vlgmr.msra.gmra.mrb[88].mxu1 %vm1338_vm9, %v18424_v56  ;;  %14620 = vmatprep.subr.msk.bf16.mxu0 %vm1342_vm8, %v4357_v45  ;;  %v4366_v50 = vsel %vm1342_vm8, %v4356_v44, 0  ;;  %v16915_v56 = vld [vmem:[%s20948_s3 + $0xb8] sm:$0xff]   ;;  %v16925_v44 = vld [vmem:[%s20950_s1 + $0x24] ss:$16 sps:$4 sm:$0xff]   ;;  %s20959_s3 = smov 106  }
 0x2d7   : > { %15641 = vmatpush3.bf16.msra.mxu1 %v4083_v48  ;;  %4377 = vmatpush1.bf16.msra.mxu0 %v4366_v50  ;;  %v4477_v51 = vpop.permute.xlu0 %4476  ;;  %v16928_v45 = vld [vmem:[%s20950_s1 + $0x2c] ss:$16 sps:$4 sm:$0xff]   ;;  %v16923_v48 = vld [vmem:[%s20950_s1 + $0x20] ss:$16 sps:$4 sm:$0xff]   ;;  %v16926_v50 = vld [vmem:[%s20950_s1 + $0x28] ss:$16 sps:$4 sm:$0xff]  }
 0x2d8   : > { %v4079_v52 = vpop.permute.xlu1 %4078  ;;  %15642 = vmatprep.subr.bf16.mxu1 %v17160_v24  ;;  %v4490_v53 = vsel %vm20876_vm4, %v4475_v17, %v4477_v51  ;;  %15644 = vmatprep.mubr.msk.bf16.mxu1 %vm17163_vm6, %v17160_v24 }
 0x2d9   : > { %v4086_v6 = vsel %vm4080_vm5, %v18437_v4, %v4079_v52  ;;  %4510 = vmatprep.subr.bf16.mxu0 %v4490_v53  ;;  %v2047_v54 = vpop.f32.mrb[28].mxu1  ;;  %v16934_v52 = vld [vmem:[%s20950_s1 + $0x4c] ss:$16 sps:$4 sm:$0xff]  }
 0x2da   : > { %v4100_v55 = vsel %vm1342_vm8, %v4086_v6, 0  ;;  %v2056_v57 = vadd.f32 %v2047_v54, %v1926_v27  ;;  %v15518_v26 = vpop.f32.mrb[29].mxu1  ;;  %v16929_v6 = vld [vmem:[%s20950_s1 + $0x40] ss:$16 sps:$4 sm:$0xff]  }
 0x2db   : > { %15643 = vmatpush3.bf16.msra.mxu1 %v4100_v55  ;;  %v4215_v58 = vpop.permute.xlu0 %4214  ;;  %v2050_v61 = vpop.f32.mrb[30].mxu1 }
 0x2dc   : > { %v4473_v62 = vpop.permute.xlu1 %4472  ;;  %15648 = vmatprep.subr.bf16.mxu1 %v17160_v24  ;;  %v2059_v63 = vadd.f32 %v2050_v61, %v1929_v35  ;;  %v15519_v0 = vpop.f32.mrb[31].mxu1  ;;  %v4222_v46 = vsel %vm4216_vm3, %v4213_v19, %v4215_v58  ;;  %v16940_v58 = vld [vmem:[%s20950_s1 + $0x6c] ss:$16 sps:$4 sm:$0xff]  }
 0x2dd   : > { %v4489_v1 = vsel %vm20876_vm4, %v4473_v62, %v4475_v17  ;;  %v4236_v20 = vsel %vm1342_vm8, %v4222_v46, 0  ;;  %v16938_v0 = vld [vmem:[%s20950_s1 + $0x68] ss:$16 sps:$4 sm:$0xff]   ;;  %v16941_v46 = vld [vmem:[%s20950_s1 + $0x80] ss:$16 sps:$4 sm:$0xff]  }
 0x2de   : > { %15645 = vmatmul.mubr.msk.bf16.vlgmr.msra.gmra.mrb[92].mxu1 %vm1338_vm9, %v18446_v33  ;;  %14621 = vmatmul.mubr.msk.bf16.vlgmr.msra.gmra.mrb[8].mxu0 %vm1338_vm9, %v16915_v56 }
 0x2df   : > { %4511 = vmatpush1.bf16.msra.mxu0 %v4489_v1  ;;  %15649 = vmatpush3.bf16.msra.mxu1 %v4219_v2  ;;  %v4483_v3 = vpop.permute.xlu0 %4482  ;;  %v16943_v1 = vld [vmem:[%s20950_s1 + $0x84] ss:$16 sps:$4 sm:$0xff]   ;;  %v16946_v2 = vld [vmem:[%s20950_s1 + $0x8c] ss:$16 sps:$4 sm:$0xff]  }
 0x2e0   : > { %v4481_v59 = vpop.permute.xlu1 %4480  ;;  %15650 = vmatprep.subr.bf16.mxu1 %v17160_v24  ;;  %15652 = vmatprep.mubr.msk.bf16.mxu1 %vm17163_vm6, %v17160_v24 }
 0x2e1   : > { %4542 = vmatprep.mubr.bf16.mxu0 %v17162_v43  ;;  %v4492_v4 = vsel %vm20876_vm4, %v4481_v59, %v4483_v3  ;;  %v16949_v59 = vld [vmem:[%s20950_s1 + $0xa4] ss:$16 sps:$4 sm:$0xff]  }
 0x2e2   : > { %v4502_v9 = vsel %vm1342_vm8, %v4492_v4, 0 }
 0x2e3   : > { %15651 = vmatpush3.bf16.msra.mxu1 %v4236_v20  ;;  %v4343_v5 = vpop.permute.xlu0 %4342  ;;  %v16952_v20 = vld [vmem:[%s20950_s1 + $0xac] ss:$16 sps:$4 sm:$0xff]  }
 0x2e4   : > { %v4355_v47 = vsel %vm20877_vm1, %v18426_v60, %v4343_v5  ;;  %v4485_v7 = vpop.permute.xlu1 %4484  ;;  %15656 = vmatprep.subr.bf16.mxu1 %v17160_v24  ;;  %v16947_v5 = vld [vmem:[%s20950_s1 + $0xa0] ss:$16 sps:$4 sm:$0xff]  }
 0x2e5   : > { %v4493_v33 = vsel %vm20876_vm4, %v4483_v3, %v4485_v7  ;;  %v2177_v8 = vpop.f32.mrb[32].mxu1  ;;  %v16944_v3 = vld [vmem:[%s20950_s1 + $0x88] ss:$16 sps:$4 sm:$0xff]  }
 0x2e6   : > { %15653 = vmatmul.mubr.msk.bf16.vlgmr.msra.gmra.mrb[96].mxu1 %vm1338_vm9, %v18461_v42  ;;  %14626 = vmatprep.subr.msk.bf16.mxu0 %vm1342_vm8, %v4493_v33  ;;  %v2186_v11 = vadd.f32 %v2177_v8, %v2056_v57  ;;  %v15526_v12 = vpop.f32.mrb[33].mxu1  ;;  %v16937_v57 = vld [vmem:[%s20950_s1 + $0x64] ss:$16 sps:$4 sm:$0xff]   ;;  %v16950_v33 = vld [vmem:[%s20950_s1 + $0xa8] ss:$16 sps:$4 sm:$0xff]  }
 0x2e7   : > { %15657 = vmatpush3.bf16.msra.mxu1 %v4355_v47  ;;  %4513 = vmatpush1.bf16.msra.mxu0 %v4502_v9  ;;  %v2180_v60 = vpop.f32.mrb[34].mxu1  ;;  %v4479_v17 = vpop.permute.xlu0 %4478  ;;  %v16955_v8 = vld [vmem:[%s20950_s1 + $0xc4] ss:$16 sps:$4 sm:$0xff]  }
 0x2e8   : > { %v4351_v25 = vpop.permute.xlu1 %4350  ;;  %15658 = vmatprep.subr.bf16.mxu1 %v17160_v24  ;;  %15660 = vmatprep.mubr.msk.bf16.mxu1 %vm17163_vm6, %v17160_v24  ;;  %v2189_v15 = vadd.f32 %v2180_v60, %v2059_v63  ;;  %v15527_v16 = vpop.f32.mrb[35].mxu1  ;;  %v4491_v14 = vsel %vm20876_vm4, %v4477_v51, %v4479_v17  ;;  %v16931_v51 = vld [vmem:[%s20950_s1 + $0x44] ss:$16 sps:$4 sm:$0xff]   ;;  %v16935_v63 = vld [vmem:[%s20950_s1 + $0x60] ss:$16 sps:$4 sm:$0xff]  }
 0x2e9   : > { %v4358_v13 = vsel %vm20877_vm1, %v18471_v40, %v4351_v25  ;;  %v16920_v40 = vld [vmem:[%s20950_s1 + $0x8] ss:$16 sps:$4 sm:$0xff]   ;;  %5120 = vmatprep.subr.bf16.mxu0 %v16919_v39  ;;  %v16953_v60 = vld [vmem:[%s20950_s1 + $0xc0] ss:$16 sps:$4 sm:$0xff]   ;;  %v16964_v16 = vld [vmem:[%s20950_s1 + $0xec] ss:$16 sps:$4 sm:$0xff]  }
 0x2ea   : > { %v4372_v10 = vsel %vm1342_vm8, %v4358_v13, 0  ;;  %14627 = vmatmul.mubr.msk.bf16.vlgmr.msra.gmra.mrb[8].mxu0 %vm1338_vm9, %v16916_v49  ;;  %v16956_v25 = vld [vmem:[%s20950_s1 + $0xc8] ss:$16 sps:$4 sm:$0xff]   ;;  %v16959_v13 = vld [vmem:[%s20950_s1 + $0xe0] ss:$16 sps:$4 sm:$0xff]   ;;  %vm5103_vm1 = vcmask 490496  }
 0x2eb   : > { %15659 = vmatpush3.bf16.msra.mxu1 %v4372_v10  ;;  %5121 = vmatpush1.bf16.msra.mxu0 %v16917_v38  ;;  %v16962_v10 = vld [vmem:[%s20950_s1 + $0xe8] ss:$16 sps:$4 sm:$0xff]   ;;  %v16967_v17 = vld [vmem:[%s20950_s1 + $0x104] ss:$16 sps:$4 sm:$0xff]  }
 0x2ec   : > { %v4487_v30 = vpop.permute.xlu1 %4486  ;;  %15664 = vmatprep.subr.bf16.mxu1 %v17160_v24  ;;  %5122 = vmatprep.subr.bf16.mxu0 %v16925_v44  ;;  %v16979_v39 = vld [vmem:[%s20950_s1 + $0x144] ss:$16 sps:$4 sm:$0xff]   ;;  %v16977_v44 = vld [vmem:[%s20950_s1 + $0x140] ss:$16 sps:$4 sm:$0xff]  }
 0x2ed   : > { %v4494_v19 = vsel %vm20876_vm4, %v4485_v7, %v4487_v30  ;;  %v16970_v30 = vld [vmem:[%s20950_s1 + $0x10c] ss:$16 sps:$4 sm:$0xff]   ;;  %vm5107_vm4 = vcmask 1045504  }
 0x2ee   : > { %15661 = vmatmul.mubr.msk.bf16.vlgmr.msra.gmra.mrb[100].mxu1 %vm1338_vm9, %v16915_v56  ;;  %v4508_v22 = vsel %vm1342_vm8, %v4494_v19, 0  ;;  %v16932_v56 = vld [vmem:[%s20950_s1 + $0x48] ss:$16 sps:$4 sm:$0xff]  }
 0x2ef   : > { %15665 = vmatpush3.bf16.msra.mxu1 %v4491_v14  ;;  %15668 = vmatprep.mubr.msk.bf16.mxu1 %vm17163_vm6, %v17160_v24 }
 0x2f0   : > { %15666 = vmatprep.subr.bf16.mxu1 %v17160_v24  ;;  %5123 = vmatpush1.bf16.msra.mxu0 %v16923_v48  ;;  %v16980_v48 = vld [vmem:[%s20950_s1 + $0x148] ss:$16 sps:$4 sm:$0xff]  }
 0x2f1   : > { %v2307_v21 = vpop.f32.mrb[36].mxu1  ;;  %5124 = vmatprep.subr.bf16.mxu0 %v16931_v51  ;;  %v16985_v51 = vld [vmem:[%s20950_s1 + $0x164] ss:$16 sps:$4 sm:$0xff]  }
 0x2f2   : > { %v2316_v23 = vadd.f32 %v2307_v21, %v2186_v11  ;;  %v15534_v42 = vpop.f32.mrb[37].mxu1 }
 0x2f3   : > { %15667 = vmatpush3.bf16.msra.mxu1 %v4508_v22  ;;  %v2310_v27 = vpop.f32.mrb[38].mxu1  ;;  %v16965_v22 = vld [vmem:[%s20950_s1 + $0x100] ss:$16 sps:$4 sm:$0xff]   ;;  %v16968_v42 = vld [vmem:[%s20950_s1 + $0x108] ss:$16 sps:$4 sm:$0xff]  }
 0x2f4   : > { %v2319_v28 = vadd.f32 %v2310_v27, %v2189_v15  ;;  %v15535_v29 = vpop.f32.mrb[39].mxu1  ;;  %5206 = vmatprep.subr.bf16.mxu1 %v16922_v41  ;;  %5125 = vmatpush1.bf16.msra.mxu0 %v16929_v6  ;;  %v16961_v15 = vld [vmem:[%s20950_s1 + $0xe4] ss:$16 sps:$4 sm:$0xff]  }
 0x2f5   : > { %5126 = vmatprep.subr.bf16.mxu0 %v16937_v57  ;;  %v16991_v6 = vld [vmem:[%s20950_s1 + $0x184] ss:$16 sps:$4 sm:$0xff]   ;;  %v16992_v57 = vld [vmem:[%s20950_s1 + $0x188] ss:$16 sps:$4 sm:$0xff]  }
 0x2f6   : > { %15669 = vmatmul.mubr.msk.bf16.vlgmr.msra.gmra.mrb[104].mxu1 %vm1338_vm9, %v16916_v49  ;;  %v16958_v49 = vld [vmem:[%s20950_s1 + $0xcc] ss:$16 sps:$4 sm:$0xff]  }
 0x2f7   : > { %5207 = vmatpush1.bf16.msra.mxu1 %v16920_v40 }
 0x2f8   : > { %5208 = vmatprep.subr.bf16.mxu1 %v16928_v45  ;;  %5127 = vmatpush1.bf16.msra.mxu0 %v16935_v63  ;;  %v16982_v45 = vld [vmem:[%s20950_s1 + $0x14c] ss:$16 sps:$4 sm:$0xff]  }
 0x2f9   : > { %5128 = vmatprep.subr.bf16.mxu0 %v16943_v1  ;;  %v16997_v1 = vld [vmem:[%s20950_s1 + $0x1a4] ss:$16 sps:$4 sm:$0xff]  }
 0x2fb   : > { %5209 = vmatpush1.bf16.msra.mxu1 %v16926_v50  ;;  %v16983_v50 = vld [vmem:[%s20950_s1 + $0x160] ss:$16 sps:$4 sm:$0xff]  }
 0x2fc   : > { %5210 = vmatprep.subr.bf16.mxu1 %v16934_v52  ;;  %5129 = vmatpush1.bf16.msra.mxu0 %v16941_v46  ;;  %v16986_v52 = vld [vmem:[%s20950_s1 + $0x168] ss:$16 sps:$4 sm:$0xff]   ;;  %v17000_v46 = vld [vmem:[%s20950_s1 + $0x1ac] ss:$16 sps:$4 sm:$0xff]  }
 0x2fd   : > { %v2437_v31 = vpop.f32.mrb[40].mxu1  ;;  %5130 = vmatprep.subr.bf16.mxu0 %v16949_v59  ;;  %v17006_v59 = vld [vmem:[%s20950_s1 + $0x1cc] ss:$16 sps:$4 sm:$0xff]  }
 0x2fe   : > { %v2446_v32 = vadd.f32 %v2437_v31, %v2316_v23  ;;  %v15542_v34 = vpop.f32.mrb[41].mxu1  ;;  %v16971_v31 = vld [vmem:[%s20950_s1 + $0x120] ss:$16 sps:$4 sm:$0xff]  }
 0x2ff   : > { %v2440_v35 = vpop.f32.mrb[42].mxu1  ;;  %5211 = vmatpush1.bf16.msra.mxu1 %v16932_v56 }
 0x300   : > { %v2449_v36 = vadd.f32 %v2440_v35, %v2319_v28  ;;  %v15543_v37 = vpop.f32.mrb[43].mxu1  ;;  %5212 = vmatprep.subr.bf16.mxu1 %v16940_v58  ;;  %5131 = vmatpush1.bf16.msra.mxu0 %v16947_v5 }
 0x301   : > { %5132 = vmatprep.subr.bf16.mxu0 %v16955_v8  ;;  %v16976_v37 = vld [vmem:[%s20950_s1 + $0x12c] ss:$16 sps:$4 sm:$0xff]   ;;  %v17009_v8 = vld [vmem:[%s20950_s1 + $0x1e4] ss:$16 sps:$4 sm:$0xff]  }
 0x303   : > { %5213 = vmatpush1.bf16.msra.mxu1 %v16938_v0  ;;  %v16995_v0 = vld [vmem:[%s20950_s1 + $0x1a0] ss:$16 sps:$4 sm:$0xff]  }
 0x304   : > { %5214 = vmatprep.subr.bf16.mxu1 %v16946_v2  ;;  %5133 = vmatpush1.bf16.msra.mxu0 %v16953_v60  ;;  %v16998_v2 = vld [vmem:[%s20950_s1 + $0x1a8] ss:$16 sps:$4 sm:$0xff]  }
 0x305   : > { %5134 = vmatprep.subr.bf16.mxu0 %v16961_v15  ;;  %v17018_v15 = vld [vmem:[%s20950_s1 + $0x20c] ss:$16 sps:$4 sm:$0xff]  }
 0x307   : > { %5215 = vmatpush1.bf16.msra.mxu1 %v16944_v3  ;;  %v17003_v3 = vld [vmem:[%s20950_s1 + $0x1c4] ss:$16 sps:$4 sm:$0xff]  }
 0x308   : > { %5216 = vmatprep.subr.bf16.mxu1 %v16952_v20  ;;  %5135 = vmatpush1.bf16.msra.mxu0 %v16959_v13  ;;  %v17001_v20 = vld [vmem:[%s20950_s1 + $0x1c0] ss:$16 sps:$4 sm:$0xff]  }
 0x309   : > { %v2567_v53 = vpop.f32.mrb[44].mxu1  ;;  %5136 = vmatprep.subr.bf16.mxu0 %v16967_v17 }
 0x30a   : > { %v2576_v54 = vadd.f32 %v2567_v53, %v2446_v32  ;;  %v15550_v55 = vpop.f32.mrb[45].mxu1  ;;  %v16973_v32 = vld [vmem:[%s20950_s1 + $0x124] ss:$16 sps:$4 sm:$0xff]   ;;  %v16988_v53 = vld [vmem:[%s20950_s1 + $0x16c] ss:$16 sps:$4 sm:$0xff]  }
 0x30b   : > { %v2570_v26 = vpop.f32.mrb[46].mxu1  ;;  %5217 = vmatpush1.bf16.msra.mxu1 %v16950_v33  ;;  %v16989_v55 = vld [vmem:[%s20950_s1 + $0x180] ss:$16 sps:$4 sm:$0xff]  }
 0x30c   : > { %v2579_v61 = vadd.f32 %v2570_v26, %v2449_v36  ;;  %v15551_v62 = vpop.f32.mrb[47].mxu1  ;;  %5218 = vmatprep.subr.bf16.mxu1 %v16958_v49  ;;  %5137 = vmatpush1.bf16.msra.mxu0 %v16965_v22  ;;  %v16974_v36 = vld [vmem:[%s20950_s1 + $0x128] ss:$16 sps:$4 sm:$0xff]   ;;  %v17007_v33 = vld [vmem:[%s20950_s1 + $0x1e0] ss:$16 sps:$4 sm:$0xff]  }
 0x30d   : > { %5138 = vmatprep.subr.bf16.mxu0 %v16973_v32  ;;  %v17010_v49 = vld [vmem:[%s20950_s1 + $0x1e8] ss:$16 sps:$4 sm:$0xff]  }
 0x30f   : > { %5219 = vmatpush1.bf16.msra.mxu1 %v16956_v25  ;;  %v17015_v25 = vld [vmem:[%s20950_s1 + $0x204] ss:$16 sps:$4 sm:$0xff]  }
 0x310   : > { %5220 = vmatprep.subr.bf16.mxu1 %v16964_v16  ;;  %5139 = vmatpush1.bf16.msra.mxu0 %v16971_v31 }
 0x311   : > { %5140 = vmatprep.subr.bf16.mxu0 %v16979_v39 }
 0x313   : > { %5221 = vmatpush1.bf16.msra.mxu1 %v16962_v10 }
 0x314   : > { %5222 = vmatprep.subr.bf16.mxu1 %v16970_v30  ;;  %5141 = vmatpush1.bf16.msra.mxu0 %v16977_v44 }
 0x315   : > { %v2697_v4 = vpop.f32.mrb[48].mxu1  ;;  %5142 = vmatprep.subr.bf16.mxu0 %v16985_v51 }
 0x316   : > { %v2706_v47 = vadd.f32 %v2697_v4, %v2576_v54  ;;  %v15558_v7 = vpop.f32.mrb[49].mxu1  ;;  %v16994_v54 = vld [vmem:[%s20950_s1 + $0x18c] ss:$16 sps:$4 sm:$0xff]   ;;  %v17004_v4 = vld [vmem:[%s20950_s1 + $0x1c8] ss:$16 sps:$4 sm:$0xff]  }
 0x317   : > { %v2700_v9 = vpop.f32.mrb[50].mxu1  ;;  %5223 = vmatpush1.bf16.msra.mxu1 %v16968_v42 }
 0x318   : > { %v2709_v11 = vadd.f32 %v2700_v9, %v2579_v61  ;;  %v15559_v12 = vpop.f32.mrb[51].mxu1  ;;  %5224 = vmatprep.subr.bf16.mxu1 %v16976_v37  ;;  %5143 = vmatpush1.bf16.msra.mxu0 %v16983_v50 }
 0x319   : > { %5144 = vmatprep.subr.bf16.mxu0 %v16991_v6 }
 0x31b   : > { %5225 = vmatpush1.bf16.msra.mxu1 %v16974_v36 }
 0x31c   : > { %5226 = vmatprep.subr.bf16.mxu1 %v16982_v45  ;;  %5145 = vmatpush1.bf16.msra.mxu0 %v16989_v55 }
 0x31d   : > { %5146 = vmatprep.subr.bf16.mxu0 %v16997_v1 }
 0x31f   : > { %5227 = vmatpush1.bf16.msra.mxu1 %v16980_v48 }
 0x320   : > { %v2827_v14 = vpop.f32.mrb[52].mxu1  ;;  %5228 = vmatprep.subr.bf16.mxu1 %v16988_v53  ;;  %5147 = vmatpush1.bf16.msra.mxu0 %v16995_v0 }
 0x321   : > { %v2836_v19 = vadd.f32 %v2827_v14, %v2706_v47  ;;  %v15566_v21 = vpop.f32.mrb[53].mxu1  ;;  %5148 = vmatprep.subr.bf16.mxu0 %v17003_v3 }
 0x322   : > { %v2830_v23 = vpop.f32.mrb[54].mxu1 }
 0x323   : > { %v2839_v27 = vadd.f32 %v2830_v23, %v2709_v11  ;;  %v15567_v28 = vpop.f32.mrb[55].mxu1  ;;  %5229 = vmatpush1.bf16.msra.mxu1 %v16986_v52  ;;  %v17012_v11 = vld [vmem:[%s20950_s1 + $0x1ec] ss:$16 sps:$4 sm:$0xff]  }
 0x324   : > { %5230 = vmatprep.subr.bf16.mxu1 %v16994_v54  ;;  %5149 = vmatpush1.bf16.msra.mxu0 %v17001_v20 }
 0x325   : > { %5150 = vmatprep.subr.bf16.mxu0 %v17009_v8 }
 0x327   : > { %5231 = vmatpush1.bf16.msra.mxu1 %v16992_v57 }
 0x328   : > { %5232 = vmatprep.subr.bf16.mxu1 %v17000_v46  ;;  %5151 = vmatpush1.bf16.msra.mxu0 %v17007_v33  ;;  %v4610_v33 = vpop.permute.xlu1 %4609 }
 0x329   : > { %5163 = vmatprep.subr.bf16.mxu0 %v17015_v25 }
 0x32b   : > { %5233 = vmatpush1.bf16.msra.mxu1 %v16998_v2 }
 0x32c   : > { %v2957_v29 = vpop.f32.mrb[56].mxu1  ;;  %5234 = vmatprep.subr.bf16.mxu1 %v17006_v59 }
 0x32d   : > { %v2966_v34 = vadd.f32 %v2957_v29, %v2836_v19  ;;  %v15574_v35 = vpop.f32.mrb[57].mxu1 }
 0x32e   : > { %v2960_v38 = vpop.f32.mrb[58].mxu1 }
 0x32f   : > { %v2969_v40 = vadd.f32 %v2960_v38, %v2839_v27  ;;  %v15575_v41 = vpop.f32.mrb[59].mxu1  ;;  %5235 = vmatpush1.bf16.msra.mxu1 %v17004_v4  ;;  %v4605_v4 = vpop.permute.xlu0 %4604 }
 0x330   : > { %5236 = vmatprep.subr.bf16.mxu1 %v17012_v11 }
 0x333   : > { %5237 = vmatpush1.bf16.msra.mxu1 %v17010_v49 }
 0x334   : > { %5249 = vmatprep.subr.bf16.mxu1 %v17018_v15 }
 0x338   : > { %v3087_v56 = vpop.f32.mrb[60].mxu1 }
 0x339   : > { %v3096_v26 = vadd.f32 %v3087_v56, %v2966_v34  ;;  %v15582_v58 = vpop.f32.mrb[61].mxu1 }
 0x33a   : > { %v3090_v61 = vpop.f32.mrb[62].mxu1 }
 0x33b   : > { %v3099_v62 = vadd.f32 %v3090_v61, %v2969_v40  ;;  %v15583_v63 = vpop.f32.mrb[63].mxu1 }
 0x344   : > { %v3217_v5 = vpop.f32.mrb[64].mxu1 }
 0x345   : > { %v3226_v47 = vadd.f32 %v3217_v5, %v3096_v26  ;;  %v15590_v7 = vpop.f32.mrb[65].mxu1 }
 0x346   : > { %v3220_v9 = vpop.f32.mrb[66].mxu1 }
 0x347   : > { %v3229_v12 = vadd.f32 %v3220_v9, %v3099_v62  ;;  %v15591_v60 = vpop.f32.mrb[67].mxu1 }
 0x350   : > { %v3347_v16 = vpop.f32.mrb[68].mxu1 }
 0x351   : > { %v3356_v13 = vadd.f32 %v3347_v16, %v3226_v47  ;;  %v15598_v10 = vpop.f32.mrb[69].mxu1 }
 0x352   : > { %v3350_v17 = vpop.f32.mrb[70].mxu1 }
 0x353   : > { %v3359_v30 = vadd.f32 %v3350_v17, %v3229_v12  ;;  %v15599_v14 = vpop.f32.mrb[71].mxu1 }
 0x35c   : > { %v3477_v19 = vpop.f32.mrb[72].mxu1 }
 0x35d   : > { %v3486_v21 = vadd.f32 %v3477_v19, %v3356_v13  ;;  %v15606_v22 = vpop.f32.mrb[73].mxu1 }
 0x35e   : > { %v3480_v23 = vpop.f32.mrb[74].mxu1 }
 0x35f   : > { %v3489_v42 = vadd.f32 %v3480_v23, %v3359_v30  ;;  %v15607_v27 = vpop.f32.mrb[75].mxu1  ;;  %v17013_v23 = vld [vmem:[%s20950_s1 + $0x200] ss:$16 sps:$4 sm:$0xff]  }
 0x360   : > { %v17021_v27 = vld [vmem:[%s20950_s1 + $0x224] ss:$16 sps:$4 sm:$0xff]  }
 0x367   : > { %v3607_v28 = vpop.f32.mrb[76].mxu1 }
 0x368   : > { %v3616_v29 = vadd.f32 %v3607_v28, %v3486_v21  ;;  %v15614_v31 = vpop.f32.mrb[77].mxu1  ;;  %v17024_v28 = vld [vmem:[%s20950_s1 + $0x22c] ss:$16 sps:$4 sm:$0xff]  }
 0x369   : > { %v3610_v32 = vpop.f32.mrb[78].mxu1  ;;  %v17019_v31 = vld [vmem:[%s20950_s1 + $0x220] ss:$16 sps:$4 sm:$0xff]  }
 0x36a   : > { %v3619_v34 = vadd.f32 %v3610_v32, %v3489_v42  ;;  %v15615_v35 = vpop.f32.mrb[79].mxu1  ;;  %v17016_v42 = vld [vmem:[%s20950_s1 + $0x208] ss:$16 sps:$4 sm:$0xff]  }
 0x36b   : > { %v17022_v32 = vld [vmem:[%s20950_s1 + $0x228] ss:$16 sps:$4 sm:$0xff]  }
 0x373   : > { %v3737_v36 = vpop.f32.mrb[80].mxu1 }
 0x374   : > { %v3746_v37 = vadd.f32 %v3737_v36, %v3616_v29  ;;  %v15622_v38 = vpop.f32.mrb[81].mxu1  ;;  %v17027_v36 = vld [vmem:[%s20950_s1 + $0x244] ss:$16 sps:$4 sm:$0xff]  }
 0x375   : > { %v3740_v39 = vpop.f32.mrb[82].mxu1 }
 0x376   : > { %v3749_v40 = vadd.f32 %v3740_v39, %v3619_v34  ;;  %v15623_v41 = vpop.f32.mrb[83].mxu1 }
 0x37f   : > { %v3867_v44 = vpop.f32.mrb[84].mxu1 }
 0x380   : > { %v3876_v45 = vadd.f32 %v3867_v44, %v3746_v37  ;;  %v15630_v48 = vpop.f32.mrb[85].mxu1  ;;  %v17030_v37 = vld [vmem:[%s20950_s1 + $0x24c] ss:$16 sps:$4 sm:$0xff]   ;;  %v17025_v44 = vld [vmem:[%s20950_s1 + $0x240] ss:$16 sps:$4 sm:$0xff]  }
 0x381   : > { %v3870_v50 = vpop.f32.mrb[86].mxu1  ;;  %v17031_v48 = vld [vmem:[%s20950_s1 + $0x264] ss:$16 sps:$4 sm:$0x3f]  }
 0x382   : > { %v3879_v51 = vadd.f32 %v3870_v50, %v3749_v40  ;;  %v15631_v52 = vpop.f32.mrb[87].mxu1  ;;  %v17033_v50 = vld [vmem:[%s20950_s1 + $0x26c] ss:$16 sps:$4 sm:$0x3f]  }
 0x383   : > { %v17035_v52 = vld [vmem:[%s20950_s1 + $0x260] ss:$16 sps:$4 sm:$0x3f]  }
 0x3a9   : > { %v4043_v53 = vpop.f32.mrb[88].mxu1 }
 0x3aa   : > { %v4052_v6 = vadd.f32 %v4043_v53, %v3876_v45  ;;  %v15638_v54 = vpop.f32.mrb[89].mxu1  ;;  %v17028_v45 = vld [vmem:[%s20950_s1 + $0x248] ss:$16 sps:$4 sm:$0xff]  }
 0x3ab   : > { %v4046_v55 = vpop.f32.mrb[90].mxu1  ;;  %v17036_v53 = vld [vmem:[%s20950_s1 + $0x268] ss:$16 sps:$4 sm:$0x3f]   ;;  %s20966_s1 = smov 84  }
 0x3ac   : > { %v4055_v56 = vadd.f32 %v4046_v55, %v3879_v51  ;;  %v15639_v57 = vpop.f32.mrb[91].mxu1 }
 0x3ad   : > { %v5115_v57 = vsel %vm5107_vm4, %v17036_v53, 0 }
 0x3b1   : > { %v4179_v26 = vpop.f32.mrb[92].mxu1 }
 0x3b2   : > { %v4188_v58 = vadd.f32 %v4179_v26, %v4052_v6  ;;  %v15646_v61 = vpop.f32.mrb[93].mxu1  ;;  %v5444_v26 = vpop.permute.xlu0 %5443 }
 0x3b3   : > { %v4182_v62 = vpop.f32.mrb[94].mxu1 }
 0x3b4   : > { %v4191_v63 = vadd.f32 %v4182_v62, %v4055_v56  ;;  %v15647_v0 = vpop.f32.mrb[95].mxu1  ;;  %v5109_v56 = vsel %vm5107_vm4, %v17035_v52, 0 }
 0x3b6   : > { %v5446_v61 = vpop.permute.xlu0 %5445 }
 0x3b9   : > { %v4315_v1 = vpop.f32.mrb[96].mxu1 }
 0x3ba   : > { %v4324_v2 = vadd.f32 %v4315_v1, %v4188_v58  ;;  %v15654_v46 = vpop.f32.mrb[97].mxu1  ;;  %v5442_v58 = vpop.permute.xlu1 %5441 }
 0x3bb   : > { %v4318_v3 = vpop.f32.mrb[98].mxu1 }
 0x3bc   : > { %v4327_v59 = vadd.f32 %v4318_v3, %v4191_v63  ;;  %v15655_v20 = vpop.f32.mrb[99].mxu1 }
 0x3bd   : > { %v4544_v5 = vpop.f32.mrb[8].mxu0 }
 0x3be   : > { %v4612_v47 = vadd.f32 %v4605_v4, %v4544_v5  ;;  %v4546_v7 = vpop.f32.mrb[9].mxu0  ;;  %v5440_v62 = vpop.permute.xlu1 %5439 }
 0x3bf   : > { %v4613_v8 = vadd.f32 %v4605_v4, %v4546_v7  ;;  %v4548_v9 = vpop.f32.mrb[10].mxu0 }
 0x3c0   : > { %v4615_v49 = vadd.f32 %v4610_v33, %v4548_v9  ;;  %v4550_v11 = vpop.f32.mrb[11].mxu0  ;;  %v4618_v25 = vmax.f32 %v4612_v47, 0.0 }
 0x3c1   : > { %v4616_v12 = vadd.f32 %v4610_v33, %v4550_v11  ;;  %v4451_v60 = vpop.f32.mrb[100].mxu1  ;;  %v4619_v10 = vmax.f32 %v4613_v8, 0.0  ;;  %v5452_v8 = vsel %vm2860_vm0, %v5442_v58, %v5444_v26  ;;  %v5451_v11 = vsel %vm2860_vm0, %v5440_v62, %v5442_v58  ;;  %v8269_v62 = vld [vmem:[%s20977_s23 + $0x8] sm:$0xff] }
 0x3c2   : > { %v4621_v15 = vmax.f32 %v4615_v49, 0.0  ;;  %v4460_v16 = vadd.f32 %v4451_v60, %v4324_v2  ;;  %v15662_v13 = vpop.f32.mrb[101].mxu1  ;;  %v5448_v9 = vpop.permute.xlu1 %5447 }
 0x3c3   : > { %v4622_v17 = vmax.f32 %v4616_v12, 0.0  ;;  %v4454_v30 = vpop.f32.mrb[102].mxu1  ;;  %v5450_v49 = vpop.permute.xlu0 %5449  ;;  %v5453_v12 = vsel %vm2860_vm0, %v5446_v61, %v5448_v9 }
 0x3c4   : > { %v4624_v14 = vpack.c.bf16 %v4621_v15, %v4618_v25  ;;  %v4463_v19 = vadd.f32 %v4454_v30, %v4327_v59  ;;  %v15663_v21 = vpop.f32.mrb[103].mxu1  ;;  %v5454_v60 = vsel %vm2860_vm0, %v5448_v9, %v5450_v49  ;;  %v5468_v25 = vsel %vm1342_vm8, %v5450_v49, 0  ;;  %v17038_v15 = vld [vmem:[%s20954_s0] sm:$0xff]   ;;  %s20962_s0 = smov 88  }
 0x3c5   : > { %v4625_v22 = vpack.c.bf16 %v4622_v17, %v4619_v10  ;;  %v17039_v10 = vld [vmem:[%s20951_s5 + $0x8] sm:$0xff]  }
 0x3c7   : > { %5152 = vmatprep.mubr.bf16.mxu0 %v4625_v22  ;;  %5238 = vmatprep.mubr.bf16.mxu1 %v4625_v22 }
 0x3c8   : > { %5153 = vmatmul.mubr.bf16.vlgmr.msra.gmra.mrb[12].mxu0 %v4624_v14  ;;  %5239 = vmatmul.mubr.bf16.vlgmr.msra.gmra.mrb[108].mxu1 %v4624_v14 }
 0x3c9   : > { %5164 = vmatpush1.bf16.msra.mxu0 %v17013_v23  ;;  %5250 = vmatpush1.bf16.msra.mxu1 %v17016_v42  ;;  %v4587_v29 = vpop.f32.mrb[104].mxu1 }
 0x3ca   : > { %v4596_v34 = vadd.f32 %v4587_v29, %v4460_v16  ;;  %v15670_v35 = vpop.f32.mrb[105].mxu1  ;;  %5165 = vmatprep.subr.bf16.mxu0 %v17021_v27  ;;  %5251 = vmatprep.subr.bf16.mxu1 %v17024_v28  ;;  %v5462_v16 = vsel %vm1342_vm8, %v5453_v12, 0  ;;  %v17040_v28 = vld [vmem:[%s20951_s5 + $0x10] sm:$0xff]  }
 0x3cb   : > { %v4590_v38 = vpop.f32.mrb[106].mxu1  ;;  %5195 = vmatprep.mubr.bf16.mxu0 %v17162_v43  ;;  %5281 = vmatprep.mubr.bf16.mxu1 %v17162_v43 }
 0x3cc   : > { %v4614_v39 = vadd.f32 %v4605_v4, %v4596_v34  ;;  %v4599_v40 = vadd.f32 %v4590_v38, %v4463_v19  ;;  %v15671_v41 = vpop.f32.mrb[107].mxu1 }
 0x3cd   : > { %5166 = vmatpush1.bf16.msra.mxu0 %v17019_v31  ;;  %5252 = vmatpush1.bf16.msra.mxu1 %v17022_v32 }
 0x3ce   : > { %v4617_v51 = vadd.f32 %v4610_v33, %v4599_v40  ;;  %5167 = vmatprep.subr.bf16.mxu0 %v17027_v36  ;;  %5253 = vmatprep.subr.bf16.mxu1 %v17030_v37  ;;  %v4620_v6 = vmax.f32 %v4614_v39, 0.0  ;;  %v17037_v33 = vld [vmem:[%s20951_s5] sm:$0xff]   ;;  %v17041_v37 = vld [vmem:[%s20951_s5 + $0x18] sm:$0xff]  }
 0x3d0   : > { %v4623_v54 = vmax.f32 %v4617_v51, 0.0 }
 0x3d1   : > { %5168 = vmatpush1.bf16.msra.mxu0 %v17025_v44  ;;  %5254 = vmatpush1.bf16.msra.mxu1 %v17028_v45 }
 0x3d2   : > { %v4626_v55 = vpack.c.bf16 %v4623_v54, %v4620_v6  ;;  %14709 = vmatprep.subr.msk.bf16.mxu0 %vm5107_vm4, %v17031_v48  ;;  %14711 = vmatprep.subr.msk.bf16.mxu1 %vm5107_vm4, %v17033_v50  ;;  %v17042_v48 = vld [vmem:[%s20951_s5 + $0x20] sm:$0xff]   ;;  %v17043_v6 = vld [vmem:[%s20951_s5 + $0x28] sm:$0xff]  }
 0x3d5   : > { %5170 = vmatpush1.bf16.msra.mxu0 %v5109_v56  ;;  %5256 = vmatpush1.bf16.msra.mxu1 %v5115_v57 }
 0x3d6   : > { %15672 = vmatprep.subr.bf16.mxu1 %v17160_v24 }
 0x3d8   : > { %14710 = vmatmul.mubr.msk.bf16.vlgmr.msra.gmra.mrb[12].mxu0 %vm5103_vm1, %v4626_v55  ;;  %14712 = vmatmul.mubr.msk.bf16.vlgmr.msra.gmra.mrb[108].mxu1 %vm5103_vm1, %v4626_v55  ;;  %vm5299_vm1 = vcmask 130048   ;;  %v8268_v55 = vld [vmem:[%s20977_s23] sm:$0xff]  ;;  %s20917_s23 = smov 115  }
 0x3d9   : > { %15674 = vmatprep.mubr.msk.bf16.mxu1 %vm17163_vm6, %v17160_v24  ;;  %5356 = vmatprep.mubr.bf16.mxu0 %v17162_v43 }
 0x4ab   : > { %v5197_v63 = vpop.f32.mrb[12].mxu0  ;;  %v5283_v0 = vpop.f32.mrb[108].mxu1 }
 0x4ac   : > { %v5199_v1 = vpop.f32.mrb[13].mxu0  ;;  %v5285_v2 = vpop.f32.mrb[109].mxu1 }
 0x4ad   : > { %v5201_v46 = vpop.f32.mrb[14].mxu0  ;;  %v5287_v3 = vpop.f32.mrb[110].mxu1 }
 0x4ae   : > { %v18785_v59 = vpack.c.bf16 %v5201_v46, %v5197_v63  ;;  %v18787_v20 = vpack.c.bf16 %v5287_v3, %v5283_v0  ;;  %v5203_v4 = vpop.f32.mrb[15].mxu0  ;;  %v5289_v5 = vpop.f32.mrb[111].mxu1  ;;  %v17044_v63 = vld [vmem:[%s20951_s5 + $0x30] sm:$0xff]  }
 0x4af   : > { %v18789_v47 = vpack.c.bf16 %v5203_v4, %v5199_v1  ;;  %v5295_v7 = vpack.c.bf16 %v5289_v5, %v5285_v2 }
 0x4b0   : > { %5569 = vrot.lane.b32.xlu0 %v18787_v20, %s20952_s25  ;;  %15673 = vmatpush3.bf16.msra.mxu1 %v18787_v20 }
 0x4b1   : > { %5300 = vst.msk [vmem:[#allocation3 + $0x18] sm:$0xff] %vm5299_vm1, %v5295_v7  ;;  %5567 = vrot.lane.b32.xlu1 %v18789_v47, %s20952_s25  ;;  %5324 = vmatprep.subr.bf16.mxu0 %v18789_v47 }
 0x4b2   : > { %5325 = vmatpush1.bf16.msra.mxu0 %v18785_v59  ;;  %15678 = vmatprep.subr.bf16.mxu1 %v17160_v24 }
 0x4b3   : > { %5470 = vmatprep.subr.bf16.mxu0 %v5452_v8  ;;  %15675 = vmatmul.mubr.msk.bf16.vlgmr.msra.gmra.mrb[112].mxu1 %vm5299_vm1, %v17037_v33 }
 0x4b4   : > { %15679 = vmatpush3.bf16.msra.mxu1 %v5444_v26  ;;  %5679 = vrot.lane.b32.xlu0 %v18789_v47, %s20953_s24 }
 0x4b5   : > { %5565 = vrot.lane.b32.xlu1 %v18785_v59, %s20952_s25  ;;  %14714 = vmatmul.mubr.msk.bf16.vlgmr.msra.gmra.mrb[16].mxu0 %vm5299_vm1, %v17037_v33  ;;  %v17046_v33 = vld [vmem:[%s20951_s5 + $0x40] sm:$0xff]  }
 0x4b6   : > { %5471 = vmatpush1.bf16.msra.mxu0 %v5451_v11  ;;  %15680 = vmatprep.subr.bf16.mxu1 %v17160_v24 }
 0x4b7   : > { %14723 = vmatprep.subr.msk.bf16.mxu0 %vm1342_vm8, %v5454_v60  ;;  %15682 = vmatprep.mubr.msk.bf16.mxu1 %vm17163_vm6, %v17160_v24  ;;  %vm20978_vm8 = vcmask 859136  }
 0x4b8   : > { %15681 = vmatpush3.bf16.msra.mxu1 %v5468_v25  ;;  %5677 = vrot.lane.b32.xlu0 %v18785_v59, %s20953_s24  ;;  %v7688_v42 = vld [vmem:[#allocation3 + $0x18] sm:$0xff]  ;;  %v19081_v25 = vld [vmem:[%s20951_s5 + $0x48] sm:$0xff]  }
 0x4b9   : > { %5681 = vrot.lane.b32.xlu1 %v18787_v20, %s20953_s24  ;;  %5502 = vmatprep.mubr.bf16.mxu0 %v17162_v43 }
 0x4ba   : > { %5473 = vmatpush1.bf16.msra.mxu0 %v5462_v16  ;;  %15686 = vmatprep.subr.bf16.mxu1 %v17160_v24 }
 0x4bb   : > { %15683 = vmatmul.mubr.msk.bf16.vlgmr.msra.gmra.mrb[116].mxu1 %vm1338_vm9, %v17038_v15 }
 0x4bc   : > { %5793 = vrot.lane.b32.xlu0 %v18787_v20, %s20955_s26  ;;  %15688 = vmatprep.mubr.msk.bf16.mxu1 %vm17163_vm6, %v17160_v24 }
 0x4bd   : > { %5791 = vrot.lane.b32.xlu1 %v18789_v47, %s20955_s26 }
 0x4c0   : > { %5903 = vrot.lane.b32.xlu0 %v18789_v47, %s20956_s2 }
 0x4c1   : > { %5789 = vrot.lane.b32.xlu1 %v18785_v59, %s20955_s26  ;;  %14724 = vmatmul.mubr.msk.bf16.vlgmr.msra.gmra.mrb[16].mxu0 %vm1338_vm9, %v17038_v15  ;;  %vm20979_vm9 = vmmov %vm20978_vm8 }
 0x4c2   : > { %5611 = vmatprep.mubr.bf16.mxu0 %v17162_v43 }
 0x4c4   : > { %5901 = vrot.lane.b32.xlu0 %v18785_v59, %s20956_s2 }
 0x4c5   : > { %5905 = vrot.lane.b32.xlu1 %v18787_v20, %s20956_s2 }
 0x4c8   : > { %6017 = vrot.lane.b32.xlu0 %v18787_v20, %s20957_s6 }
 0x4c9   : > { %6015 = vrot.lane.b32.xlu1 %v18789_v47, %s20957_s6 }
 0x4cc   : > { %6127 = vrot.lane.b32.xlu0 %v18789_v47, %s20958_s27 }
 0x4cd   : > { %6013 = vrot.lane.b32.xlu1 %v18785_v59, %s20957_s6 }
 0x4d0   : > { %6125 = vrot.lane.b32.xlu0 %v18785_v59, %s20958_s27 }
 0x4d1   : > { %6129 = vrot.lane.b32.xlu1 %v18787_v20, %s20958_s27  ;;  %s20963_s27 = smov 87  }
 0x4d4   : > { %6241 = vrot.lane.b32.xlu0 %v18787_v20, %s20959_s3 }
 0x4d5   : > { %6239 = vrot.lane.b32.xlu1 %v18789_v47, %s20959_s3 }
 0x4d8   : > { %6351 = vrot.lane.b32.xlu0 %v18789_v47, %s20960_s28 }
 0x4d9   : > { %6237 = vrot.lane.b32.xlu1 %v18785_v59, %s20959_s3  ;;  %s20964_s3 = smov 86  }
 0x4dc   : > { %6349 = vrot.lane.b32.xlu0 %v18785_v59, %s20960_s28 }
 0x4dd   : > { %6353 = vrot.lane.b32.xlu1 %v18787_v20, %s20960_s28  ;;  %s20965_s28 = smov 85  }
 0x4e0   : > { %6465 = vrot.lane.b32.xlu0 %v18787_v20, %s20961_s7 }
 0x4e1   : > { %6463 = vrot.lane.b32.xlu1 %v18789_v47, %s20961_s7 }
 0x4e4   : > { %6575 = vrot.lane.b32.xlu0 %v18789_v47, %s20962_s0 }
 0x4e5   : > { %6461 = vrot.lane.b32.xlu1 %v18785_v59, %s20961_s7 }
 0x4e8   : > { %6573 = vrot.lane.b32.xlu0 %v18785_v59, %s20962_s0 }
 0x4e9   : > { %6577 = vrot.lane.b32.xlu1 %v18787_v20, %s20962_s0 }
 0x4ec   : > { %6689 = vrot.lane.b32.xlu0 %v18787_v20, %s20963_s27 }
 0x4ed   : > { %6687 = vrot.lane.b32.xlu1 %v18789_v47, %s20963_s27 }
 0x4f0   : > { %6799 = vrot.lane.b32.xlu0 %v18789_v47, %s20964_s3 }
 0x4f1   : > { %6685 = vrot.lane.b32.xlu1 %v18785_v59, %s20963_s27  ;;  %s20967_s27 = smov 68  }
 0x4f4   : > { %6797 = vrot.lane.b32.xlu0 %v18785_v59, %s20964_s3 }
 0x4f5   : > { %6801 = vrot.lane.b32.xlu1 %v18787_v20, %s20964_s3  ;;  %s20968_s3 = smov 67  }
 0x4f8   : > { %6913 = vrot.lane.b32.xlu0 %v18787_v20, %s20965_s28 }
 0x4f9   : > { %6911 = vrot.lane.b32.xlu1 %v18789_v47, %s20965_s28 }
 0x4fc   : > { %7023 = vrot.lane.b32.xlu0 %v18789_v47, %s20966_s1 }
 0x4fd   : > { %6909 = vrot.lane.b32.xlu1 %v18785_v59, %s20965_s28  ;;  %s20969_s28 = smov 66  }
 0x500   : > { %7021 = vrot.lane.b32.xlu0 %v18785_v59, %s20966_s1 }
 0x501   : > { %7025 = vrot.lane.b32.xlu1 %v18787_v20, %s20966_s1  ;;  %s20970_s1 = smov 65  }
 0x504   : > { %7137 = vrot.lane.b32.xlu0 %v18787_v20, %s20967_s27 }
 0x505   : > { %7135 = vrot.lane.b32.xlu1 %v18789_v47, %s20967_s27 }
 0x508   : > { %7247 = vrot.lane.b32.xlu0 %v18789_v47, %s20968_s3 }
 0x509   : > { %7133 = vrot.lane.b32.xlu1 %v18785_v59, %s20967_s27  ;;  %s20971_s27 = smov 64  }
 0x50c   : > { %7245 = vrot.lane.b32.xlu0 %v18785_v59, %s20968_s3 }
 0x50d   : > { %7249 = vrot.lane.b32.xlu1 %v18787_v20, %s20968_s3  ;;  %s20972_s3 = smov 48  }
 0x510   : > { %7361 = vrot.lane.b32.xlu0 %v18787_v20, %s20969_s28 }
 0x511   : > { %7359 = vrot.lane.b32.xlu1 %v18789_v47, %s20969_s28 }
 0x514   : > { %7471 = vrot.lane.b32.xlu0 %v18789_v47, %s20970_s1 }
 0x515   : > { %7357 = vrot.lane.b32.xlu1 %v18785_v59, %s20969_s28  ;;  %s20894_s28 = smov 91  }
 0x518   : > { %7469 = vrot.lane.b32.xlu0 %v18785_v59, %s20970_s1 }
 0x519   : > { %7473 = vrot.lane.b32.xlu1 %v18787_v20, %s20970_s1  ;;  %s20900_s1 = smov 103  }
 0x51c   : > { %7585 = vrot.lane.b32.xlu0 %v18787_v20, %s20971_s27 }
 0x51d   : > { %7583 = vrot.lane.b32.xlu1 %v18789_v47, %s20971_s27 }
 0x520   : > { %7703 = vrot.lane.b32.xlu0 %v18789_v47, %s20972_s3 }
 0x521   : > { %7581 = vrot.lane.b32.xlu1 %v18785_v59, %s20971_s27  ;;  %s20888_s27 = smov 100  }
 0x522   : > { %v5570_v13 = vpop.permute.xlu0 %5569 }
 0x523   : > { %15687 = vmatpush3.bf16.msra.mxu1 %v5570_v13  ;;  %v5568_v17 = vpop.permute.xlu1 %5567 }
 0x524   : > { %7701 = vrot.lane.b32.xlu0 %v18785_v59, %s20972_s3  ;;  %v5572_v30 = vsel %vm1330_vm7, %v5568_v17, %v5570_v13  ;;  %15692 = vmatprep.subr.bf16.mxu1 %v17160_v24 }
 0x525   : > { %7705 = vrot.lane.b32.xlu1 %v18787_v20, %s20972_s3  ;;  %5579 = vmatprep.subr.bf16.mxu0 %v5572_v30 }
 0x526   : > { %v5680_v14 = vpop.permute.xlu0 %5679  ;;  %15689 = vmatmul.mubr.msk.bf16.vlgmr.msra.gmra.mrb[120].mxu1 %vm5299_vm1, %v17039_v10 }
 0x527   : > { %v5566_v19 = vpop.permute.xlu1 %5565  ;;  %15694 = vmatprep.mubr.msk.bf16.mxu1 %vm17163_vm6, %v17160_v24 }
 0x528   : > { %v5571_v21 = vsel %vm1330_vm7, %v5566_v19, %v5568_v17  ;;  %7820 = vrot.lane.b32.xlu0 %v18787_v20, %s20973_s29 }
 0x529   : > { %7818 = vrot.lane.b32.xlu1 %v18789_v47, %s20973_s29  ;;  %5580 = vmatpush1.bf16.msra.mxu0 %v5571_v21 }
 0x52a   : > { %v5678_v22 = vpop.permute.xlu0 %5677 }
 0x52b   : > { %v5682_v23 = vpop.permute.xlu1 %5681  ;;  %v5683_v29 = vsel %vm1560_vm10, %v5678_v22, %v5680_v14 }
 0x52c   : > { %7707 = vrot.lane.b32.xlu0 %v7688_v42, %s20972_s3  ;;  %14729 = vmatmul.mubr.msk.bf16.vlgmr.msra.gmra.mrb[16].mxu0 %vm5299_vm1, %v17039_v10  ;;  %v5684_v27 = vsel %vm1560_vm10, %v5680_v14, %v5682_v23  ;;  %s20974_s3 = smov 46   ;;  %v19104_v14 = vld [vmem:[%s20951_s5 + $0x50] sm:$0xff]   ;;  %vm20980_vm10 = vcmask 850944  }
 0x52d   : > { %15693 = vmatpush3.bf16.msra.mxu1 %v5682_v23  ;;  %7816 = vrot.lane.b32.xlu1 %v18785_v59, %s20973_s29 }
 0x52e   : > { %5691 = vmatprep.subr.bf16.mxu0 %v5684_v27  ;;  %v5794_v31 = vpop.permute.xlu0 %5793  ;;  %15698 = vmatprep.subr.bf16.mxu1 %v17160_v24 }
 0x52f   : > { %5692 = vmatpush1.bf16.msra.mxu0 %v5683_v29  ;;  %v5792_v32 = vpop.permute.xlu1 %5791  ;;  %5723 = vmatprep.mubr.bf16.mxu0 %v17162_v43 }
 0x530   : > { %15695 = vmatmul.mubr.msk.bf16.vlgmr.msra.gmra.mrb[124].mxu1 %vm5299_vm1, %v17040_v28  ;;  %7933 = vrot.lane.b32.xlu0 %v18789_v47, %s20974_s3  ;;  %v5796_v34 = vsel %vm1690_vm11, %v5792_v32, %v5794_v31 }
 0x531   : > { %15699 = vmatpush3.bf16.msra.mxu1 %v5794_v31  ;;  %7822 = vrot.lane.b32.xlu1 %v7688_v42, %s20973_s29  ;;  %s20975_s29 = smov 45  }
 0x532   : > { %5803 = vmatprep.subr.bf16.mxu0 %v5796_v34  ;;  %v5904_v35 = vpop.permute.xlu0 %5903  ;;  %15700 = vmatprep.mubr.msk.bf16.mxu1 %vm17163_vm6, %v17160_v24 }
 0x533   : > { %v5790_v36 = vpop.permute.xlu1 %5789  ;;  %15704 = vmatprep.subr.bf16.mxu1 %v17160_v24 }
 0x534   : > { %7931 = vrot.lane.b32.xlu0 %v18785_v59, %s20974_s3  ;;  %v5795_v41 = vsel %vm1690_vm11, %v5790_v36, %v5792_v32  ;;  %vm20981_vm11 = vmmov %vm20980_vm10 }
 0x535   : > { %7935 = vrot.lane.b32.xlu1 %v18787_v20, %s20974_s3 }
 0x536   : > { %v5902_v38 = vpop.permute.xlu0 %5901 }
 0x537   : > { %v5906_v39 = vpop.permute.xlu1 %5905  ;;  %v5907_v54 = vsel %vm1820_vm12, %v5902_v38, %v5904_v35 }
 0x538   : > { %15701 = vmatmul.mubr.msk.bf16.vlgmr.msra.gmra.mrb[128].mxu1 %vm5299_vm1, %v17041_v37  ;;  %8048 = vrot.lane.b32.xlu0 %v18789_v47, %s20975_s29  ;;  %v5908_v40 = vsel %vm1820_vm12, %v5904_v35, %v5906_v39  ;;  %v19150_v35 = vld [vmem:[%s20951_s5 + $0x60] sm:$0xff]   ;;  %vm20982_vm12 = vcmask 719872  }
 0x539   : > { %14734 = vmatmul.mubr.msk.bf16.vlgmr.msra.gmra.mrb[16].mxu0 %vm5299_vm1, %v17040_v28  ;;  %15705 = vmatpush3.bf16.msra.mxu1 %v5906_v39 }
 0x53a   : > { %5804 = vmatpush1.bf16.msra.mxu0 %v5795_v41  ;;  %7937 = vrot.lane.b32.xlu1 %v7688_v42, %s20974_s3  ;;  %v6018_v44 = vpop.permute.xlu0 %6017  ;;  %s20976_s3 = smov 44  }
 0x53b   : > { %5915 = vmatprep.subr.bf16.mxu0 %v5908_v40  ;;  %v6016_v45 = vpop.permute.xlu1 %6015  ;;  %15706 = vmatprep.mubr.msk.bf16.mxu1 %vm17163_vm6, %v17160_v24  ;;  %v19172_v40 = vld [vmem:[%s20951_s5 + $0x68] sm:$0xff]  }
 0x53c   : > { %8046 = vrot.lane.b32.xlu0 %v18785_v59, %s20975_s29  ;;  %15710 = vmatprep.subr.bf16.mxu1 %v17160_v24  ;;  %v6020_v56 = vsel %vm1950_vm13, %v6016_v45, %v6018_v44 }
 0x53d   : > { %5835 = vmatprep.mubr.bf16.mxu0 %v17162_v43 }
 0x53e   : > { %8050 = vrot.lane.b32.xlu1 %v18787_v20, %s20975_s29  ;;  %v6128_v50 = vpop.permute.xlu0 %6127 }
 0x53f   : > { %v6014_v51 = vpop.permute.xlu1 %6013 }
 0x540   : > { %15707 = vmatmul.mubr.msk.bf16.vlgmr.msra.gmra.mrb[132].mxu1 %vm5299_vm1, %v17042_v48  ;;  %8163 = vrot.lane.b32.xlu0 %v18789_v47, %s20976_s3  ;;  %v6019_v2 = vsel %vm1950_vm13, %v6014_v51, %v6016_v45 }
 0x541   : > { %15711 = vmatpush3.bf16.msra.mxu1 %v6018_v44  ;;  %15712 = vmatprep.mubr.msk.bf16.mxu1 %vm17163_vm6, %v17160_v24 }
 0x542   : > { %8052 = vrot.lane.b32.xlu1 %v7688_v42, %s20975_s29  ;;  %v6126_v52 = vpop.permute.xlu0 %6125  ;;  %15716 = vmatprep.subr.bf16.mxu1 %v17160_v24  ;;  %s20887_s29 = smov 114  }
 0x543   : > { %v6130_v53 = vpop.permute.xlu1 %6129  ;;  %v6131_v8 = vsel %vm2080_vm14, %v6126_v52, %v6128_v50 }
 0x544   : > { %8167 = vrot.lane.b32.xlu0 %v7688_v42, %s20976_s3  ;;  %v6132_v46 = vsel %vm2080_vm14, %v6128_v50, %v6130_v53  ;;  %v19124_v42 = vld [vmem:[%s20951_s5 + $0x58] sm:$0xff]   ;;  %vm20983_vm14 = vmmov %vm20982_vm12 }
 0x545   : > { %14739 = vmatmul.mubr.msk.bf16.vlgmr.msra.gmra.mrb[16].mxu0 %vm5299_vm1, %v17041_v37 }
 0x546   : > { %5916 = vmatpush1.bf16.msra.mxu0 %v5907_v54  ;;  %8165 = vrot.lane.b32.xlu1 %v18787_v20, %s20976_s3  ;;  %v6242_v57 = vpop.permute.xlu0 %6241  ;;  %v17045_v20 = vld [vmem:[%s20951_s5 + $0x38] sm:$0xff]  }
 0x547   : > { %6027 = vmatprep.subr.bf16.mxu0 %v6020_v56  ;;  %v6240_v26 = vpop.permute.xlu1 %6239  ;;  %5947 = vmatprep.mubr.bf16.mxu0 %v17162_v43  ;;  %v19216_v54 = vld [vmem:[%s20951_s5 + $0x78] sm:$0xff]  }
 0x548   : > { %15713 = vmatmul.mubr.msk.bf16.vlgmr.msra.gmra.mrb[136].mxu1 %vm5299_vm1, %v17043_v6  ;;  %8272 = vperm.xlu0 %16750, %v8268_v55   ;;  %v6244_v9 = vsel %vm2210_vm15, %v6240_v26, %v6242_v57 }
 0x549   : > { %15717 = vmatpush3.bf16.msra.mxu1 %v6130_v53  ;;  %15718 = vmatprep.mubr.msk.bf16.mxu1 %vm17163_vm6, %v17160_v24 }
 0x54a   : > { %8161 = vrot.lane.b32.xlu1 %v18785_v59, %s20976_s3  ;;  %v19023_v58 = vpop.permute.xlu0 %6351  ;;  %15722 = vmatprep.subr.bf16.mxu1 %v17160_v24  ;;  %s20890_s3 = smov 101  }
 0x54b   : > { %v6238_v61 = vpop.permute.xlu1 %6237 }
 0x54c   : > { %v6243_v13 = vsel %vm2210_vm15, %v6238_v61, %v6240_v26  ;;  %vm20984_vm15 = vcmask 711680  }
 0x54e   : > { %8277 = vperm.xlu1 %16751, %v8269_v62   ;;  %v19032_v0 = vpop.permute.xlu0 %6349 }
 0x54f   : > { %v6354_v1 = vpop.permute.xlu1 %6353  ;;  %v6355_v27 = vsel %vm20979_vm9, %v19032_v0, %v19023_v58  ;;  %v19257_v0 = vld [vmem:[%s20951_s5 + $0x88] sm:$0xff]   ;;  %vm20986_vm9 = vcmask 695296  }
 0x550   : > { %15719 = vmatmul.mubr.msk.bf16.vlgmr.msra.gmra.mrb[140].mxu1 %vm5299_vm1, %v17044_v63  ;;  %v6356_v10 = vsel %vm20978_vm8, %v19023_v58, %v6354_v1  ;;  %vm20985_vm8 = vmmov %vm20984_vm15  ;;  %v19239_v58 = vld [vmem:[%s20951_s5 + $0x80] sm:$0xff]  }
 0x551   : > { %15723 = vmatpush3.bf16.msra.mxu1 %v6242_v57  ;;  %14744 = vmatmul.mubr.msk.bf16.vlgmr.msra.gmra.mrb[16].mxu0 %vm5299_vm1, %v17042_v48  ;;  %v19190_v48 = vld [vmem:[%s20951_s5 + $0x70] sm:$0xff]  }
 0x552   : > { %6028 = vmatpush1.bf16.msra.mxu0 %v6019_v2  ;;  %v6466_v3 = vpop.permute.xlu0 %6465  ;;  %15724 = vmatprep.mubr.msk.bf16.mxu1 %vm17163_vm6, %v17160_v24 }
 0x553   : > { %6139 = vmatprep.subr.bf16.mxu0 %v6132_v46  ;;  %v19040_v59 = vpop.permute.xlu1 %6463  ;;  %15728 = vmatprep.subr.bf16.mxu1 %v17160_v24 }
 0x554   : > { %6059 = vmatprep.mubr.bf16.mxu0 %v17162_v43  ;;  %v6468_v28 = vsel %vm20980_vm10, %v19040_v59, %v6466_v3  ;;  %vm20988_vm10 = vcmask 687104  }
 0x556   : > { %v19047_v4 = vpop.permute.xlu0 %6575 }
 0x557   : > { %v19049_v5 = vpop.permute.xlu1 %6461 }
 0x558   : > { %15725 = vmatmul.mubr.msk.bf16.vlgmr.msra.gmra.mrb[144].mxu1 %vm5299_vm1, %v17045_v20  ;;  %v6467_v37 = vsel %vm20981_vm11, %v19049_v5, %v19040_v59  ;;  %vm20989_vm11 = vcmask 392192  }
 0x559   : > { %15729 = vmatpush3.bf16.msra.mxu1 %v6354_v1  ;;  %15730 = vmatprep.mubr.msk.bf16.mxu1 %vm17163_vm6, %v17160_v24 }
 0x55a   : > { %v19054_v47 = vpop.permute.xlu0 %6573  ;;  %15734 = vmatprep.subr.bf16.mxu1 %v17160_v24 }
 0x55b   : > { %v19057_v7 = vpop.permute.xlu1 %6577  ;;  %v6579_v50 = vsel %vm20983_vm14, %v19054_v47, %v19047_v4  ;;  %vm20991_vm14 = vcmask 556032  }
 0x55c   : > { %v6580_v39 = vsel %vm20982_vm12, %v19047_v4, %v19057_v7  ;;  %v19283_v4 = vld [vmem:[%s20951_s5 + $0x90] sm:$0xff]   ;;  %vm20990_vm12 = vmmov %vm20988_vm10 }
 0x55d   : > { %14749 = vmatmul.mubr.msk.bf16.vlgmr.msra.gmra.mrb[16].mxu0 %vm5299_vm1, %v17043_v6 }
 0x55e   : > { %6140 = vmatpush1.bf16.msra.mxu0 %v6131_v8  ;;  %v19065_v49 = vpop.permute.xlu0 %6689  ;;  %6171 = vmatprep.mubr.bf16.mxu0 %v17162_v43 }
 0x55f   : > { %6251 = vmatprep.subr.bf16.mxu0 %v6244_v9  ;;  %v19068_v11 = vpop.permute.xlu1 %6687 }
 0x560   : > { %15731 = vmatmul.mubr.msk.bf16.vlgmr.msra.gmra.mrb[148].mxu1 %vm5299_vm1, %v17046_v33  ;;  %v6692_v52 = vsel %vm20984_vm15, %v19068_v11, %v19065_v49  ;;  %vm20992_vm15 = vmmov %vm20991_vm14 }
 0x561   : > { %15735 = vmatpush3.bf16.msra.mxu1 %v6466_v3  ;;  %15736 = vmatprep.mubr.msk.bf16.mxu1 %vm17163_vm6, %v17160_v24 }
 0x562   : > { %v19073_v12 = vpop.permute.xlu0 %6799  ;;  %15740 = vmatprep.subr.bf16.mxu1 %v17160_v24 }
 0x563   : > { %v19076_v60 = vpop.permute.xlu1 %6685 }
 0x564   : > { %v6691_v56 = vsel %vm20985_vm8, %v19076_v60, %v19068_v11  ;;  %vm20993_vm8 = vcmask 547840  }
 0x566   : > { %v19083_v15 = vpop.permute.xlu0 %6797 }
 0x567   : > { %v19085_v16 = vpop.permute.xlu1 %6801  ;;  %v6803_v1 = vsel %vm2860_vm0, %v19083_v15, %v19073_v12 }
 0x568   : > { %15737 = vmatmul.mubr.msk.bf16.vlgmr.msra.gmra.mrb[152].mxu1 %vm5299_vm1, %v19081_v25  ;;  %v6804_v26 = vsel %vm2860_vm0, %v19073_v12, %v19085_v16  ;;  %vm20987_vm0 = vmmov %vm20986_vm9 }
 0x569   : > { %15741 = vmatpush3.bf16.msra.mxu1 %v19057_v7  ;;  %14754 = vmatmul.mubr.msk.bf16.vlgmr.msra.gmra.mrb[16].mxu0 %vm5299_vm1, %v17044_v63 }
 0x56a   : > { %6252 = vmatpush1.bf16.msra.mxu0 %v6243_v13  ;;  %v19094_v17 = vpop.permute.xlu0 %6913  ;;  %15742 = vmatprep.mubr.msk.bf16.mxu1 %vm17163_vm6, %v17160_v24  ;;  %v19308_v13 = vld [vmem:[%s20951_s5 + $0x98] sm:$0xff]  }
 0x56b   : > { %6363 = vmatprep.subr.bf16.mxu0 %v6356_v10  ;;  %v19098_v30 = vpop.permute.xlu1 %6911  ;;  %15746 = vmatprep.subr.bf16.mxu1 %v17160_v24 }
 0x56c   : > { %6283 = vmatprep.mubr.bf16.mxu0 %v17162_v43  ;;  %v6916_v46 = vsel %vm20986_vm9, %v19098_v30, %v19094_v17  ;;  %vm20994_vm9 = vcmask 367616  }
 0x56e   : > { %v19107_v19 = vpop.permute.xlu0 %7023 }
 0x56f   : > { %v19109_v21 = vpop.permute.xlu1 %6909 }
 0x570   : > { %15743 = vmatmul.mubr.msk.bf16.vlgmr.msra.gmra.mrb[156].mxu1 %vm5299_vm1, %v19104_v14  ;;  %v6915_v11 = vsel %vm20987_vm0, %v19109_v21, %v19098_v30  ;;  %v19325_v21 = vld [vmem:[%s20951_s5 + $0xa0] sm:$0xff]   ;;  %vm20995_vm0 = vmmov %vm20993_vm8 }
 0x571   : > { %15747 = vmatpush3.bf16.msra.mxu1 %v19065_v49  ;;  %15748 = vmatprep.mubr.msk.bf16.mxu1 %vm17163_vm6, %v17160_v24 }
 0x572   : > { %v19116_v22 = vpop.permute.xlu0 %7021  ;;  %15752 = vmatprep.subr.bf16.mxu1 %v17160_v24 }
 0x573   : > { %v19119_v23 = vpop.permute.xlu1 %7025 }
 0x575   : > { %14759 = vmatmul.mubr.msk.bf16.vlgmr.msra.gmra.mrb[16].mxu0 %vm5299_vm1, %v17045_v20 }
 0x576   : > { %6364 = vmatpush1.bf16.msra.mxu0 %v6355_v27  ;;  %v19132_v29 = vpop.permute.xlu0 %7137  ;;  %6395 = vmatprep.mubr.bf16.mxu0 %v17162_v43 }
 0x577   : > { %6475 = vmatprep.subr.bf16.mxu0 %v6468_v28  ;;  %v19135_v31 = vpop.permute.xlu1 %7135 }
 0x578   : > { %15749 = vmatmul.mubr.msk.bf16.vlgmr.msra.gmra.mrb[160].mxu1 %vm5299_vm1, %v19124_v42  ;;  %v7140_v27 = vsel %vm20991_vm14, %v19135_v31, %v19132_v29  ;;  %vm20999_vm14 = vcmask 531456  }
 0x579   : > { %15753 = vmatpush3.bf16.msra.mxu1 %v19085_v16  ;;  %15754 = vmatprep.mubr.msk.bf16.mxu1 %vm17163_vm6, %v17160_v24 }
 0x57a   : > { %15758 = vmatprep.subr.bf16.mxu1 %v17160_v24  ;;  %v19143_v32 = vpop.permute.xlu0 %7247 }
 0x57b   : > { %v19145_v34 = vpop.permute.xlu1 %7133 }
 0x57e   : > { %v19159_v38 = vpop.permute.xlu0 %7245 }
 0x57f   : > { %v19152_v36 = vpop.permute.xlu1 %7249 }
 0x580   : > { %15755 = vmatmul.mubr.msk.bf16.vlgmr.msra.gmra.mrb[164].mxu1 %vm5299_vm1, %v19150_v35 }
 0x581   : > { %15759 = vmatpush3.bf16.msra.mxu1 %v19094_v17  ;;  %14764 = vmatmul.mubr.msk.bf16.vlgmr.msra.gmra.mrb[16].mxu0 %vm5299_vm1, %v17046_v33 }
 0x582   : > { %6476 = vmatpush1.bf16.msra.mxu0 %v6467_v37  ;;  %15760 = vmatprep.mubr.msk.bf16.mxu1 %vm17163_vm6, %v17160_v24  ;;  %v19177_v44 = vpop.permute.xlu0 %7361 }
 0x583   : > { %6587 = vmatprep.subr.bf16.mxu0 %v6580_v39  ;;  %15764 = vmatprep.subr.bf16.mxu1 %v17160_v24  ;;  %v19175_v41 = vpop.permute.xlu1 %7359  ;;  %v7139_v39 = vsel %vm20992_vm15, %v19145_v34, %v19135_v31  ;;  %v19374_v31 = vld [vmem:[%s20951_s5 + $0xb0] sm:$0xff]   ;;  %vm21000_vm15 = vmmov %vm20999_vm14 }
 0x584   : > { %6507 = vmatprep.mubr.bf16.mxu0 %v17162_v43 }
 0x586   : > { %v19195_v51 = vpop.permute.xlu0 %7471  ;;  %v5401_v20 = vpop.f32.mrb[112].mxu1 }
 0x587   : > { %v19185_v45 = vpop.permute.xlu1 %7357  ;;  %v15676_v5 = vpop.f32.mrb[113].mxu1 }
 0x588   : > { %15761 = vmatmul.mubr.msk.bf16.vlgmr.msra.gmra.mrb[168].mxu1 %vm5299_vm1, %v19172_v40  ;;  %v5404_v47 = vpop.f32.mrb[114].mxu1 }
 0x589   : > { %15765 = vmatpush3.bf16.msra.mxu1 %v19119_v23  ;;  %15766 = vmatprep.mubr.msk.bf16.mxu1 %vm17163_vm6, %v17160_v24  ;;  %v15677_v7 = vpop.f32.mrb[115].mxu1 }
 0x58a   : > { %15770 = vmatprep.subr.bf16.mxu1 %v17160_v24  ;;  %v19211_v6 = vpop.permute.xlu0 %7469 }
 0x58b   : > { %v19205_v53 = vpop.permute.xlu1 %7473 }
 0x58d   : > { %14769 = vmatmul.mubr.msk.bf16.vlgmr.msra.gmra.mrb[16].mxu0 %vm5299_vm1, %v19081_v25  ;;  %v7028_v25 = vsel %vm20988_vm10, %v19107_v19, %v19119_v23  ;;  %v7027_v23 = vsel %vm20990_vm12, %v19116_v22, %v19107_v19  ;;  %vm20996_vm10 = vcmask 539648  }
 0x58e   : > { %6588 = vmatpush1.bf16.msra.mxu0 %v6579_v50  ;;  %6619 = vmatprep.mubr.bf16.mxu0 %v17162_v43  ;;  %v19225_v57 = vpop.permute.xlu0 %7585  ;;  %v5547_v8 = vpop.f32.mrb[116].mxu1  ;;  %v7252_v50 = vsel %vm20993_vm8, %v19143_v32, %v19152_v36  ;;  %vm20998_vm12 = vmmov %vm20996_vm10  ;;  %vm21001_vm8 = vcmask 523264  }
 0x58f   : > { %6699 = vmatprep.subr.bf16.mxu0 %v6692_v52  ;;  %v19218_v55 = vpop.permute.xlu1 %7583  ;;  %v19289_v9 = vadd.f32 %v5547_v8, %v5401_v20  ;;  %v15684_v49 = vpop.f32.mrb[117].mxu1  ;;  %v7475_v20 = vsel %vm21000_vm15, %v19211_v6, %v19195_v51  ;;  %vm9480_vm15 = vcmask 744448  }
 0x590   : > { %15767 = vmatmul.mubr.msk.bf16.vlgmr.msra.gmra.mrb[172].mxu1 %vm5299_vm1, %v19190_v48  ;;  %v5550_v60 = vpop.f32.mrb[118].mxu1 }
 0x591   : > { %15771 = vmatpush3.bf16.msra.mxu1 %v19132_v29  ;;  %15772 = vmatprep.mubr.msk.bf16.mxu1 %vm17163_vm6, %v17160_v24  ;;  %v19302_v15 = vadd.f32 %v5550_v60, %v5404_v47  ;;  %v15685_v16 = vpop.f32.mrb[119].mxu1  ;;  %v19350_v29 = vld [vmem:[%s20951_s5 + $0xa8] sm:$0xff]  }
 0x592   : > { %15776 = vmatprep.subr.bf16.mxu1 %v17160_v24  ;;  %v19244_v62 = vpop.permute.xlu0 %7703 }
 0x593   : > { %v19242_v61 = vpop.permute.xlu1 %7581 }
 0x596   : > { %v19262_v2 = vpop.permute.xlu0 %7701 }
 0x597   : > { %v19252_v63 = vpop.permute.xlu1 %7705 }
 0x598   : > { %15773 = vmatmul.mubr.msk.bf16.vlgmr.msra.gmra.mrb[176].mxu1 %vm5299_vm1, %v19216_v54 }
 0x599   : > { %15777 = vmatpush3.bf16.msra.mxu1 %v19152_v36  ;;  %14774 = vmatmul.mubr.msk.bf16.vlgmr.msra.gmra.mrb[16].mxu0 %vm5299_vm1, %v19104_v14  ;;  %v19389_v36 = vld [vmem:[%s20951_s5 + $0xb8] sm:$0xff]  }
 0x59a   : > { %6700 = vmatpush1.bf16.msra.mxu0 %v6691_v56  ;;  %15778 = vmatprep.mubr.msk.bf16.mxu1 %vm17163_vm6, %v17160_v24  ;;  %v19278_v59 = vpop.permute.xlu0 %7820  ;;  %v7251_v56 = vsel %vm20995_vm0, %v19159_v38, %v19143_v32  ;;  %v19412_v38 = vld [vmem:[%s20951_s5 + $0xc0] sm:$0xff]   ;;  %vm21003_vm0 = vcmask 392192   ;;  %s20915_s5 = smov 116  }
 0x59b   : > { %6811 = vmatprep.subr.bf16.mxu0 %v6804_v26  ;;  %15782 = vmatprep.subr.bf16.mxu1 %v17160_v24  ;;  %v19272_v3 = vpop.permute.xlu1 %7818 }
 0x59c   : > { %6731 = vmatprep.mubr.bf16.mxu0 %v17162_v43  ;;  %v7825_v7 = vsel %vm4080_vm5, %v19272_v3, %v19278_v59 }
 0x59e   : > { %v7708_v12 = vpop.permute.xlu0 %7707 }
 0x59f   : > { %v19285_v33 = vpop.permute.xlu1 %7816  ;;  %v7711_v30 = vsel %vm20989_vm11, %v19252_v63, %v7708_v12  ;;  %vm20997_vm11 = vcmask 359424  }
 0x5a0   : > { %15779 = vmatmul.mubr.msk.bf16.vlgmr.msra.gmra.mrb[180].mxu1 %vm5299_vm1, %v19239_v58 }
 0x5a1   : > { %15783 = vmatpush3.bf16.msra.mxu1 %v19177_v44  ;;  %15784 = vmatprep.mubr.msk.bf16.mxu1 %vm17163_vm6, %v17160_v24 }
 0x5a2   : > { %15788 = vmatprep.subr.bf16.mxu1 %v17160_v24  ;;  %v19311_v17 = vpop.permute.xlu0 %7933 }
 0x5a3   : > { %v7823_v10 = vpop.permute.xlu1 %7822 }
 0x5a4   : > { %v7826_v28 = vsel %vm4080_vm5, %v19278_v59, %v7823_v10 }
 0x5a5   : > { %14779 = vmatmul.mubr.msk.bf16.vlgmr.msra.gmra.mrb[16].mxu0 %vm5299_vm1, %v19124_v42 }
 0x5a6   : > { %6812 = vmatpush1.bf16.msra.mxu0 %v6803_v1  ;;  %6843 = vmatprep.mubr.bf16.mxu0 %v17162_v43  ;;  %v19330_v42 = vpop.permute.xlu0 %7931 }
 0x5a7   : > { %6923 = vmatprep.subr.bf16.mxu0 %v6916_v46  ;;  %v19320_v14 = vpop.permute.xlu1 %7935  ;;  %v7364_v46 = vsel %vm20996_vm10, %v19175_v41, %v19177_v44  ;;  %v7363_v44 = vsel %vm20998_vm12, %v19185_v45, %v19175_v41  ;;  %v7588_v41 = vsel %vm21001_vm8, %v19218_v55, %v19225_v57  ;;  %vm21004_vm10 = vmmov %vm21003_vm0 }
 0x5a8   : > { %15785 = vmatmul.mubr.msk.bf16.vlgmr.msra.gmra.mrb[184].mxu1 %vm5299_vm1, %v19257_v0  ;;  %v7940_v59 = vsel %vm4216_vm3, %v19311_v17, %v19320_v14  ;;  %vm21007_vm12 = vmmov %vm20997_vm11 }
 0x5a9   : > { %15789 = vmatpush3.bf16.msra.mxu1 %v19205_v53  ;;  %15790 = vmatprep.mubr.msk.bf16.mxu1 %vm17163_vm6, %v17160_v24 }
 0x5aa   : > { %15794 = vmatprep.subr.bf16.mxu1 %v17160_v24  ;;  %v19345_v22 = vpop.permute.xlu0 %8048 }
 0x5ac   : > { %v7938_v19 = vpop.permute.xlu1 %7937 }
 0x5ad   : > { %v7941_v37 = vsel %vm4216_vm3, %v19320_v14, %v7938_v19 }
 0x5b0   : > { %15791 = vmatmul.mubr.msk.bf16.vlgmr.msra.gmra.mrb[188].mxu1 %vm5299_vm1, %v19283_v4 }
 0x5b1   : > { %15795 = vmatpush3.bf16.msra.mxu1 %v19225_v57  ;;  %14784 = vmatmul.mubr.msk.bf16.vlgmr.msra.gmra.mrb[16].mxu0 %vm5299_vm1, %v19150_v35  ;;  %v19352_v35 = vpop.permute.xlu1 %8050 }
 0x5b2   : > { %6924 = vmatpush1.bf16.msra.mxu0 %v6915_v11  ;;  %15796 = vmatprep.mubr.msk.bf16.mxu1 %vm17163_vm6, %v17160_v24 }
 0x5b3   : > { %7035 = vmatprep.subr.bf16.mxu0 %v7028_v25  ;;  %15800 = vmatprep.subr.bf16.mxu1 %v17160_v24 }
 0x5b4   : > { %6955 = vmatprep.mubr.bf16.mxu0 %v17162_v43 }
 0x5b5   : > { %v8053_v34 = vpop.permute.xlu1 %8052 }
 0x5b6   : > { %v8056_v52 = vsel %vm20994_vm9, %v19352_v35, %v8053_v34  ;;  %vm21002_vm9 = vmmov %vm21001_vm8  ;;  %vm9586_vm8 = vcmask 728064  }
 0x5b7   : > { %v7587_v45 = vsel %vm21002_vm9, %v19242_v61, %v19218_v55  ;;  %vm9691_vm9 = vcmask 654336  }
 0x5b8   : > { %15797 = vmatmul.mubr.msk.bf16.vlgmr.msra.gmra.mrb[192].mxu1 %vm5299_vm1, %v19308_v13 }
 0x5b9   : > { %15801 = vmatpush3.bf16.msra.mxu1 %v7711_v30  ;;  %15802 = vmatprep.mubr.msk.bf16.mxu1 %vm17163_vm6, %v17160_v24  ;;  %v19394_v1 = vpop.permute.xlu1 %8165 }
 0x5ba   : > { %15806 = vmatprep.subr.bf16.mxu1 %v17160_v24 }
 0x5bd   : > { %14789 = vmatmul.mubr.msk.bf16.vlgmr.msra.gmra.mrb[16].mxu0 %vm5299_vm1, %v19172_v40  ;;  %v19361_v40 = vpop.permute.xlu0 %8046 }
 0x5be   : > { %7036 = vmatpush1.bf16.msra.mxu0 %v7027_v23  ;;  %7067 = vmatprep.mubr.bf16.mxu0 %v17162_v43 }
 0x5bf   : > { %7147 = vmatprep.subr.bf16.mxu0 %v7140_v27 }
 0x5c0   : > { %15803 = vmatmul.mubr.msk.bf16.vlgmr.msra.gmra.mrb[196].mxu1 %vm5299_vm1, %v19325_v21 }
 0x5c1   : > { %15807 = vmatpush3.bf16.msra.mxu1 %v7826_v28  ;;  %15808 = vmatprep.mubr.msk.bf16.mxu1 %vm17163_vm6, %v17160_v24 }
 0x5c2   : > { %15812 = vmatprep.subr.bf16.mxu1 %v17160_v24 }
 0x5c8   : > { %15809 = vmatmul.mubr.msk.bf16.vlgmr.msra.gmra.mrb[200].mxu1 %vm5299_vm1, %v19350_v29 }
 0x5c9   : > { %15813 = vmatpush3.bf16.msra.mxu1 %v7941_v37  ;;  %14794 = vmatmul.mubr.msk.bf16.vlgmr.msra.gmra.mrb[16].mxu0 %vm5299_vm1, %v19190_v48  ;;  %v19377_v48 = vpop.permute.xlu0 %8163 }
 0x5ca   : > { %7148 = vmatpush1.bf16.msra.mxu0 %v7139_v39  ;;  %15814 = vmatprep.mubr.msk.bf16.mxu1 %vm17163_vm6, %v17160_v24 }
 0x5cb   : > { %7259 = vmatprep.subr.bf16.mxu0 %v7252_v50  ;;  %15818 = vmatprep.subr.bf16.mxu1 %v17160_v24 }
 0x5cc   : > { %7179 = vmatprep.mubr.bf16.mxu0 %v17162_v43 }
 0x5cd   : > { %v8168_v26 = vpop.permute.xlu0 %8167 }
 0x5ce   : > { %v8171_v32 = vsel %vm20997_vm11, %v19394_v1, %v8168_v26 }
 0x5d0   : > { %15815 = vmatmul.mubr.msk.bf16.vlgmr.msra.gmra.mrb[204].mxu1 %vm5299_vm1, %v19374_v31 }
 0x5d1   : > { %15819 = vmatpush3.bf16.msra.mxu1 %v8056_v52  ;;  %15820 = vmatprep.mubr.msk.bf16.mxu1 %vm17163_vm6, %v17160_v24 }
 0x5d2   : > { %15824 = vmatprep.subr.bf16.mxu1 %v17160_v24 }
 0x5d5   : > { %14799 = vmatmul.mubr.msk.bf16.vlgmr.msra.gmra.mrb[16].mxu0 %vm5299_vm1, %v19216_v54  ;;  %v7476_v54 = vsel %vm20999_vm14, %v19195_v51, %v19205_v53  ;;  %v7710_v51 = vsel %vm21003_vm0, %v19244_v62, %v19252_v63  ;;  %vm8587_vm14 = vcmask 318464   ;;  %vm9797_vm0 = vcmask 637952  }
 0x5d6   : > { %7260 = vmatpush1.bf16.msra.mxu0 %v7251_v56  ;;  %7291 = vmatprep.mubr.bf16.mxu0 %v17162_v43 }
 0x5d7   : > { %7371 = vmatprep.subr.bf16.mxu0 %v7364_v46 }
 0x5d8   : > { %15821 = vmatmul.mubr.msk.bf16.vlgmr.msra.gmra.mrb[208].mxu1 %vm5299_vm1, %v19389_v36 }
 0x5d9   : > { %15825 = vmatpush3.bf16.msra.mxu1 %v8171_v32  ;;  %15826 = vmatprep.mubr.msk.bf16.mxu1 %vm17163_vm6, %v17160_v24 }
 0x5da   : > { %15830 = vmatprep.subr.bf16.mxu1 %v17160_v24 }
 0x5e0   : > { %15827 = vmatmul.mubr.msk.bf16.vlgmr.msra.gmra.mrb[212].mxu1 %vm5299_vm1, %v19412_v38 }
 0x5e1   : > { %14804 = vmatmul.mubr.msk.bf16.vlgmr.msra.gmra.mrb[16].mxu0 %vm5299_vm1, %v19239_v58  ;;  %15832 = vmatprep.mubr.msk.bf16.mxu1 %vm17163_vm6, %v17160_v24 }
 0x5e2   : > { %7372 = vmatpush1.bf16.msra.mxu0 %v7363_v44  ;;  %7403 = vmatprep.mubr.bf16.mxu0 %v17162_v43 }
 0x5e3   : > { %7483 = vmatprep.subr.bf16.mxu0 %v7476_v54 }
 0x5ed   : > { %14809 = vmatmul.mubr.msk.bf16.vlgmr.msra.gmra.mrb[16].mxu0 %vm5299_vm1, %v19257_v0 }
 0x5ee   : > { %7484 = vmatpush1.bf16.msra.mxu0 %v7475_v20  ;;  %7515 = vmatprep.mubr.bf16.mxu0 %v17162_v43  ;;  %v8162_v20 = vpop.permute.xlu1 %8161 }
 0x5ef   : > { %7595 = vmatprep.subr.bf16.mxu0 %v7588_v41 }
 0x5f9   : > { %14814 = vmatmul.mubr.msk.bf16.vlgmr.msra.gmra.mrb[16].mxu0 %vm5299_vm1, %v19283_v4  ;;  %v5656_v53 = vpop.f32.mrb[120].mxu1  ;;  %v7709_v4 = vsel %vm21004_vm10, %v19262_v2, %v19244_v62  ;;  %v7824_v2 = vsel %vm4080_vm5, %v19285_v33, %v19272_v3  ;;  %v7939_v33 = vsel %vm4216_vm3, %v19330_v42, %v19311_v17  ;;  %vm21005_vm5 = vcmask 367616  }
 0x5fa   : > { %7596 = vmatpush1.bf16.msra.mxu0 %v7587_v45  ;;  %7627 = vmatprep.mubr.bf16.mxu0 %v17162_v43  ;;  %v5665_v6 = vadd.f32 %v5656_v53, %v19289_v9  ;;  %v15690_v57 = vpop.f32.mrb[121].mxu1  ;;  %vm21006_vm3 = vmmov %vm21005_vm5  ;;  %vm9903_vm10 = vcmask 621568  }
 0x5fb   : > { %7718 = vmatprep.subr.bf16.mxu0 %v7710_v51  ;;  %v5659_v58 = vpop.f32.mrb[122].mxu1  ;;  %v8054_v42 = vsel %vm21006_vm3, %v19361_v40, %v19345_v22  ;;  %vm21012_vm3 = vcmask 719872  }
 0x5fc   : > { %v5668_v0 = vadd.f32 %v5659_v58, %v19302_v15  ;;  %v15691_v5 = vpop.f32.mrb[123].mxu1 }
 0x603   : > { %v5768_v55 = vpop.f32.mrb[124].mxu1 }
 0x604   : > { %v5777_v61 = vadd.f32 %v5768_v55, %v5665_v6  ;;  %v15696_v47 = vpop.f32.mrb[125].mxu1 }
 0x605   : > { %14819 = vmatmul.mubr.msk.bf16.vlgmr.msra.gmra.mrb[16].mxu0 %vm5299_vm1, %v19308_v13  ;;  %v5771_v63 = vpop.f32.mrb[126].mxu1 }
 0x606   : > { %7719 = vmatpush1.bf16.msra.mxu0 %v7709_v4  ;;  %7750 = vmatprep.mubr.bf16.mxu0 %v17162_v43  ;;  %v5780_v8 = vadd.f32 %v5771_v63, %v5668_v0  ;;  %v15697_v9 = vpop.f32.mrb[127].mxu1 }
 0x607   : > { %7833 = vmatprep.subr.bf16.mxu0 %v7825_v7 }
 0x60b   : > { %v5880_v49 = vpop.f32.mrb[128].mxu1 }
 0x60c   : > { %v5889_v11 = vadd.f32 %v5880_v49, %v5777_v61  ;;  %v15702_v12 = vpop.f32.mrb[129].mxu1 }
 0x60d   : > { %v5883_v60 = vpop.f32.mrb[130].mxu1 }
 0x60e   : > { %v5892_v25 = vadd.f32 %v5883_v60, %v5780_v8  ;;  %v15703_v62 = vpop.f32.mrb[131].mxu1 }
 0x611   : > { %14824 = vmatmul.mubr.msk.bf16.vlgmr.msra.gmra.mrb[16].mxu0 %vm5299_vm1, %v19325_v21  ;;  %v8055_v21 = vsel %vm21005_vm5, %v19345_v22, %v19352_v35  ;;  %vm9533_vm5 = vcmask 736256  }
 0x612   : > { %7834 = vmatpush1.bf16.msra.mxu0 %v7824_v2  ;;  %7865 = vmatprep.mubr.bf16.mxu0 %v17162_v43 }
 0x613   : > { %7948 = vmatprep.subr.bf16.mxu0 %v7940_v59  ;;  %v5992_v15 = vpop.f32.mrb[132].mxu1 }
 0x614   : > { %v6001_v16 = vadd.f32 %v5992_v15, %v5889_v11  ;;  %v15708_v13 = vpop.f32.mrb[133].mxu1 }
 0x615   : > { %v5995_v10 = vpop.f32.mrb[134].mxu1 }
 0x616   : > { %v6004_v30 = vadd.f32 %v5995_v10, %v5892_v25  ;;  %v15709_v23 = vpop.f32.mrb[135].mxu1 }
 0x61b   : > { %v6104_v27 = vpop.f32.mrb[136].mxu1 }
 0x61c   : > { %v6113_v28 = vadd.f32 %v6104_v27, %v6001_v16  ;;  %v15714_v3 = vpop.f32.mrb[137].mxu1 }
 0x61d   : > { %14829 = vmatmul.mubr.msk.bf16.vlgmr.msra.gmra.mrb[16].mxu0 %vm5299_vm1, %v19350_v29  ;;  %v6107_v14 = vpop.f32.mrb[138].mxu1  ;;  %v8170_v29 = vsel %vm20997_vm11, %v19377_v48, %v19394_v1  ;;  %vm9744_vm11 = vcmask 646144  }
 0x61e   : > { %7949 = vmatpush1.bf16.msra.mxu0 %v7939_v33  ;;  %7980 = vmatprep.mubr.bf16.mxu0 %v17162_v43  ;;  %v6116_v19 = vadd.f32 %v6107_v14, %v6004_v30  ;;  %v15715_v37 = vpop.f32.mrb[139].mxu1 }
 0x61f   : > { %8063 = vmatprep.subr.bf16.mxu0 %v8055_v21 }
 0x623   : > { %v6216_v39 = vpop.f32.mrb[140].mxu1 }
 0x624   : > { %v6225_v50 = vadd.f32 %v6216_v39, %v6113_v28  ;;  %v15720_v34 = vpop.f32.mrb[141].mxu1 }
 0x625   : > { %v6219_v52 = vpop.f32.mrb[142].mxu1 }
 0x626   : > { %v6228_v56 = vadd.f32 %v6219_v52, %v6116_v19  ;;  %v15721_v17 = vpop.f32.mrb[143].mxu1 }
 0x629   : > { %14834 = vmatmul.mubr.msk.bf16.vlgmr.msra.gmra.mrb[16].mxu0 %vm5299_vm1, %v19374_v31  ;;  %v8169_v31 = vsel %vm21007_vm12, %v8162_v20, %v19377_v48  ;;  %vm9850_vm12 = vcmask 629760  }
 0x62a   : > { %8064 = vmatpush1.bf16.msra.mxu0 %v8054_v42  ;;  %8095 = vmatprep.mubr.bf16.mxu0 %v17162_v43 }
 0x62b   : > { %8178 = vmatprep.subr.bf16.mxu0 %v8170_v29  ;;  %v6328_v35 = vpop.f32.mrb[144].mxu1 }
 0x62c   : > { %v6337_v26 = vadd.f32 %v6328_v35, %v6225_v50  ;;  %v15726_v46 = vpop.f32.mrb[145].mxu1 }
 0x62d   : > { %v6331_v32 = vpop.f32.mrb[146].mxu1 }
 0x62e   : > { %v6340_v44 = vadd.f32 %v6331_v32, %v6228_v56  ;;  %v15727_v54 = vpop.f32.mrb[147].mxu1 }
 0x633   : > { %v6440_v41 = vpop.f32.mrb[148].mxu1 }
 0x634   : > { %v6449_v22 = vadd.f32 %v6440_v41, %v6337_v26  ;;  %v15732_v40 = vpop.f32.mrb[149].mxu1 }
 0x635   : > { %14839 = vmatmul.mubr.msk.bf16.vlgmr.msra.gmra.mrb[16].mxu0 %vm5299_vm1, %v19389_v36  ;;  %v6443_v1 = vpop.f32.mrb[150].mxu1 }
 0x636   : > { %8179 = vmatpush1.bf16.msra.mxu0 %v8169_v31  ;;  %8210 = vmatprep.mubr.bf16.mxu0 %v17162_v43  ;;  %v6452_v45 = vadd.f32 %v6443_v1, %v6340_v44  ;;  %v15733_v53 = vpop.f32.mrb[151].mxu1 }
 0x63b   : > { %v6552_v51 = vpop.f32.mrb[152].mxu1 }
 0x63c   : > { %v6561_v6 = vadd.f32 %v6552_v51, %v6449_v22  ;;  %v15738_v57 = vpop.f32.mrb[153].mxu1 }
 0x63d   : > { %v6555_v58 = vpop.f32.mrb[154].mxu1 }
 0x63e   : > { %v6564_v0 = vadd.f32 %v6555_v58, %v6452_v45  ;;  %v15739_v5 = vpop.f32.mrb[155].mxu1 }
 0x641   : > { %14844 = vmatmul.mubr.msk.bf16.vlgmr.msra.gmra.mrb[16].mxu0 %vm5299_vm1, %v19412_v38 }
 0x643   : > { %v6664_v55 = vpop.f32.mrb[156].mxu1 }
 0x644   : > { %v6673_v48 = vadd.f32 %v6664_v55, %v6561_v6  ;;  %v15744_v61 = vpop.f32.mrb[157].mxu1 }
 0x645   : > { %v6667_v47 = vpop.f32.mrb[158].mxu1 }
 0x646   : > { %v6676_v36 = vadd.f32 %v6667_v47, %v6564_v0  ;;  %v15745_v4 = vpop.f32.mrb[159].mxu1 }
 0x64b   : > { %v6776_v63 = vpop.f32.mrb[160].mxu1 }
 0x64c   : > { %v6785_v7 = vadd.f32 %v6776_v63, %v6673_v48  ;;  %v15750_v8 = vpop.f32.mrb[161].mxu1 }
 0x64d   : > { %v6779_v9 = vpop.f32.mrb[162].mxu1 }
 0x64e   : > { %v6788_v49 = vadd.f32 %v6779_v9, %v6676_v36  ;;  %v15751_v11 = vpop.f32.mrb[163].mxu1 }
 0x653   : > { %v6888_v12 = vpop.f32.mrb[164].mxu1 }
 0x654   : > { %v6897_v60 = vadd.f32 %v6888_v12, %v6785_v7  ;;  %v15756_v25 = vpop.f32.mrb[165].mxu1 }
 0x655   : > { %v6891_v62 = vpop.f32.mrb[166].mxu1 }
 0x656   : > { %v6900_v2 = vadd.f32 %v6891_v62, %v6788_v49  ;;  %v15757_v59 = vpop.f32.mrb[167].mxu1 }
 0x65b   : > { %v7000_v15 = vpop.f32.mrb[168].mxu1 }
 0x65c   : > { %v7009_v38 = vadd.f32 %v7000_v15, %v6897_v60  ;;  %v15762_v16 = vpop.f32.mrb[169].mxu1 }
 0x65d   : > { %v7003_v13 = vpop.f32.mrb[170].mxu1 }
 0x65e   : > { %v7012_v10 = vadd.f32 %v7003_v13, %v6900_v2  ;;  %v15763_v30 = vpop.f32.mrb[171].mxu1 }
 0x663   : > { %v7112_v23 = vpop.f32.mrb[172].mxu1 }
 0x664   : > { %v7121_v27 = vadd.f32 %v7112_v23, %v7009_v38  ;;  %v15768_v28 = vpop.f32.mrb[173].mxu1 }
 0x665   : > { %v7115_v3 = vpop.f32.mrb[174].mxu1 }
 0x666   : > { %v7124_v33 = vadd.f32 %v7115_v3, %v7012_v10  ;;  %v15769_v14 = vpop.f32.mrb[175].mxu1 }
 0x667   : > { %v8273_v14 = vpop.permute.xlu0 %8272 }
 0x66b   : > { %v7224_v21 = vpop.f32.mrb[176].mxu1 }
 0x66c   : > { %v7233_v19 = vadd.f32 %v7224_v21, %v7121_v27  ;;  %v15774_v37 = vpop.f32.mrb[177].mxu1  ;;  %v8278_v21 = vpop.permute.xlu1 %8277 }
 0x66d   : > { %v7227_v39 = vpop.f32.mrb[178].mxu1 }
 0x66e   : > { %v7236_v50 = vadd.f32 %v7227_v39, %v7124_v33  ;;  %v15775_v34 = vpop.f32.mrb[179].mxu1 }
 0x673   : > { %v7336_v52 = vpop.f32.mrb[180].mxu1 }
 0x674   : > { %v7345_v56 = vadd.f32 %v7336_v52, %v7233_v19  ;;  %v15780_v17 = vpop.f32.mrb[181].mxu1 }
 0x675   : > { %v7339_v42 = vpop.f32.mrb[182].mxu1 }
 0x676   : > { %v7348_v29 = vadd.f32 %v7339_v42, %v7236_v50  ;;  %v15781_v35 = vpop.f32.mrb[183].mxu1 }
 0x67b   : > { %v7448_v26 = vpop.f32.mrb[184].mxu1 }
 0x67c   : > { %v15786_v46 = vpop.f32.mrb[185].mxu1  ;;  %v7457_v32 = vadd.f32 %v7448_v26, %v7345_v56 }
 0x67d   : > { %v7451_v44 = vpop.f32.mrb[186].mxu1 }
 0x67e   : > { %v15787_v54 = vpop.f32.mrb[187].mxu1  ;;  %v7460_v20 = vadd.f32 %v7451_v44, %v7348_v29 }
 0x683   : > { %v7560_v41 = vpop.f32.mrb[188].mxu1 }
 0x684   : > { %v7569_v22 = vadd.f32 %v7560_v41, %v7457_v32  ;;  %v15792_v40 = vpop.f32.mrb[189].mxu1  ;;  %v17065_v41 = vld [vmem:[%s21008_s8 + $0x4] ss:$8 sps:$4 sm:$0xff]  }
 0x685   : > { %v7563_v31 = vpop.f32.mrb[190].mxu1  ;;  %8600 = vmatprep.subr.bf16.mxu0 %v17065_v41 }
 0x686   : > { %v7572_v1 = vadd.f32 %v7563_v31, %v7460_v20  ;;  %v15793_v45 = vpop.f32.mrb[191].mxu1  ;;  %v17063_v20 = vld [vmem:[%s21008_s8] ss:$8 sps:$4 sm:$0xff]  }
 0x687   : > { %8601 = vmatpush1.bf16.msra.mxu0 %v17063_v20 }
 0x68b   : > { %v7672_v53 = vpop.f32.mrb[192].mxu1 }
 0x68c   : > { %v7681_v51 = vadd.f32 %v7672_v53, %v7569_v22  ;;  %v15798_v6 = vpop.f32.mrb[193].mxu1  ;;  %v17068_v22 = vld [vmem:[%s21008_s8 + $0x14] ss:$8 sps:$4 sm:$0xff]   ;;  %v17071_v53 = vld [vmem:[%s21008_s8 + $0x24] ss:$8 sps:$4 sm:$0xff]  }
 0x68d   : > { %v7675_v57 = vpop.f32.mrb[194].mxu1  ;;  %8602 = vmatprep.subr.bf16.mxu0 %v17068_v22  ;;  %v17074_v6 = vld [vmem:[%s21008_s8 + $0x34] ss:$8 sps:$4 sm:$0xff]  }
 0x68e   : > { %v7684_v58 = vadd.f32 %v7675_v57, %v7572_v1  ;;  %v15799_v0 = vpop.f32.mrb[195].mxu1  ;;  %v17066_v1 = vld [vmem:[%s21008_s8 + $0x10] ss:$8 sps:$4 sm:$0xff]  }
 0x68f   : > { %8603 = vmatpush1.bf16.msra.mxu0 %v17066_v1  ;;  %v17072_v57 = vld [vmem:[%s21008_s8 + $0x30] ss:$8 sps:$4 sm:$0xff]   ;;  %v17075_v0 = vld [vmem:[%s21008_s8 + $0x40] ss:$8 sps:$4 sm:$0xff]  }
 0x690   : > { %8604 = vmatprep.subr.bf16.mxu0 %v17071_v53 }
 0x693   : > { %v7795_v5 = vpop.f32.mrb[196].mxu1 }
 0x694   : > { %v7804_v55 = vadd.f32 %v7795_v5, %v7681_v51  ;;  %v15804_v48 = vpop.f32.mrb[197].mxu1  ;;  %v17069_v51 = vld [vmem:[%s21008_s8 + $0x20] ss:$8 sps:$4 sm:$0xff]   ;;  %v17080_v5 = vld [vmem:[%s21008_s8 + $0x54] ss:$8 sps:$4 sm:$0xff]  }
 0x695   : > { %v7798_v61 = vpop.f32.mrb[198].mxu1  ;;  %8605 = vmatpush1.bf16.msra.mxu0 %v17069_v51  ;;  %v17083_v48 = vld [vmem:[%s21008_s8 + $0x64] ss:$8 sps:$4 sm:$0xff]  }
 0x696   : > { %v7807_v47 = vadd.f32 %v7798_v61, %v7684_v58  ;;  %v15805_v36 = vpop.f32.mrb[199].mxu1  ;;  %8606 = vmatprep.subr.bf16.mxu0 %v17074_v6  ;;  %v17077_v58 = vld [vmem:[%s21008_s8 + $0x44] ss:$8 sps:$4 sm:$0xff]   ;;  %v17081_v61 = vld [vmem:[%s21008_s8 + $0x60] ss:$8 sps:$4 sm:$0xff]  }
 0x697   : > { %v17084_v36 = vld [vmem:[%s21008_s8 + $0x70] ss:$8 sps:$4 sm:$0xff]  }
 0x699   : > { %8607 = vmatpush1.bf16.msra.mxu0 %v17072_v57 }
 0x69a   : > { %8608 = vmatprep.subr.bf16.mxu0 %v17077_v58 }
 0x69b   : > { %v7910_v4 = vpop.f32.mrb[200].mxu1 }
 0x69c   : > { %v7919_v63 = vadd.f32 %v7910_v4, %v7804_v55  ;;  %v15810_v7 = vpop.f32.mrb[201].mxu1  ;;  %v17078_v55 = vld [vmem:[%s21008_s8 + $0x50] ss:$8 sps:$4 sm:$0xff]   ;;  %v17089_v4 = vld [vmem:[%s21008_s8 + $0x84] ss:$8 sps:$4 sm:$0xff]  }
 0x69d   : > { %v7913_v8 = vpop.f32.mrb[202].mxu1  ;;  %8609 = vmatpush1.bf16.msra.mxu0 %v17075_v0  ;;  %v17092_v7 = vld [vmem:[%s21008_s8 + $0x94] ss:$8 sps:$4 sm:$0xff]   ;;  %v8401_v0 = vld [vmem:[%s21008_s8 + $0x120] sm:$0xff] }
 0x69e   : > { %v7922_v9 = vadd.f32 %v7913_v8, %v7807_v47  ;;  %v15811_v49 = vpop.f32.mrb[203].mxu1  ;;  %8610 = vmatprep.subr.bf16.mxu0 %v17080_v5  ;;  %v17086_v47 = vld [vmem:[%s21008_s8 + $0x74] ss:$8 sps:$4 sm:$0xff]   ;;  %v17090_v8 = vld [vmem:[%s21008_s8 + $0x90] ss:$8 sps:$4 sm:$0xff]  }
 0x69f   : > { %v17093_v49 = vld [vmem:[%s21008_s8 + $0xa0] ss:$8 sps:$4 sm:$0xff]  }
 0x6a1   : > { %8611 = vmatpush1.bf16.msra.mxu0 %v17078_v55 }
 0x6a2   : > { %8612 = vmatprep.subr.bf16.mxu0 %v17083_v48 }
 0x6a3   : > { %v8025_v11 = vpop.f32.mrb[204].mxu1 }
 0x6a4   : > { %v8034_v12 = vadd.f32 %v8025_v11, %v7919_v63  ;;  %v15816_v60 = vpop.f32.mrb[205].mxu1  ;;  %v17087_v63 = vld [vmem:[%s21008_s8 + $0x80] ss:$8 sps:$4 sm:$0xff]   ;;  %v17098_v11 = vld [vmem:[%s21008_s8 + $0xb4] ss:$8 sps:$4 sm:$0xff]  }
 0x6a5   : > { %v8028_v25 = vpop.f32.mrb[206].mxu1  ;;  %8613 = vmatpush1.bf16.msra.mxu0 %v17081_v61  ;;  %v17101_v60 = vld [vmem:[%s21008_s8 + $0xc4] ss:$8 sps:$4 sm:$0xff]   ;;  %v17187_v61 = vmov 65535  }
 0x6a6   : > { %v8037_v62 = vadd.f32 %v8028_v25, %v7922_v9  ;;  %v15817_v2 = vpop.f32.mrb[207].mxu1  ;;  %8614 = vmatprep.subr.bf16.mxu0 %v17086_v47  ;;  %v17095_v9 = vld [vmem:[%s21008_s8 + $0xa4] ss:$8 sps:$4 sm:$0xff]   ;;  %v17099_v25 = vld [vmem:[%s21008_s8 + $0xc0] ss:$8 sps:$4 sm:$0xff]  }
 0x6a7   : > { %v17102_v2 = vld [vmem:[%s21008_s8 + $0xd0] ss:$8 sps:$4 sm:$0xff]  }
 0x6a9   : > { %8615 = vmatpush1.bf16.msra.mxu0 %v17084_v36  ;;  %v17111_v36 = vld [vmem:[%s21008_s8 + $0x100] ss:$8 sps:$4 sm:$0xff]  }
 0x6aa   : > { %8616 = vmatprep.subr.bf16.mxu0 %v17089_v4 }
 0x6ab   : > { %v8140_v59 = vpop.f32.mrb[208].mxu1 }
 0x6ac   : > { %v8149_v15 = vadd.f32 %v8140_v59, %v8034_v12  ;;  %v15822_v38 = vpop.f32.mrb[209].mxu1  ;;  %v17096_v12 = vld [vmem:[%s21008_s8 + $0xb0] ss:$8 sps:$4 sm:$0xff]   ;;  %v17107_v59 = vld [vmem:[%s21008_s8 + $0xe4] ss:$8 sps:$4 sm:$0xff]  }
 0x6ad   : > { %v8143_v16 = vpop.f32.mrb[210].mxu1  ;;  %8617 = vmatpush1.bf16.msra.mxu0 %v17087_v63  ;;  %v17105_v38 = vld [vmem:[%s21008_s8 + $0xe0] ss:$8 sps:$4 sm:$0xff]   ;;  %v17116_v63 = vld [vmem:[%s21008_s8 + $0x114] ss:$8 sps:$4 sm:$0xff]  }
 0x6ae   : > { %v8152_v13 = vadd.f32 %v8143_v16, %v8037_v62  ;;  %v15823_v10 = vpop.f32.mrb[211].mxu1  ;;  %8618 = vmatprep.subr.bf16.mxu0 %v17092_v7  ;;  %v17104_v62 = vld [vmem:[%s21008_s8 + $0xd4] ss:$8 sps:$4 sm:$0xff]   ;;  %v14883_v7 = vcombine.high %v8401_v0, %v8401_v0 }
 0x6b1   : > { %8619 = vmatpush1.bf16.msra.mxu0 %v17090_v8 }
 0x6b2   : > { %8620 = vmatprep.subr.bf16.mxu0 %v17095_v9  ;;  %v17114_v9 = vld [vmem:[%s21008_s8 + $0x110] ss:$8 sps:$4 sm:$0xff]  }
 0x6b3   : > { %v8255_v30 = vpop.f32.mrb[212].mxu1 }
 0x6b4   : > { %v8264_v23 = vadd.f32 %v8255_v30, %v8149_v15  ;;  %v15828_v27 = vpop.f32.mrb[213].mxu1  ;;  %v17108_v30 = vld [vmem:[%s21008_s8 + $0xf0] ss:$8 sps:$4 sm:$0xff]  }
 0x6b5   : > { %v8258_v28 = vpop.f32.mrb[214].mxu1  ;;  %8621 = vmatpush1.bf16.msra.mxu0 %v17093_v49  ;;  %v14882_v49 = vcombine.low %v8401_v0, %v8401_v0 }
 0x6b6   : > { %v8267_v3 = vadd.f32 %v8258_v28, %v8152_v13  ;;  %v15829_v33 = vpop.f32.mrb[215].mxu1  ;;  %v19490_v19 = vadd.f32 %v8273_v14, %v8264_v23  ;;  %8622 = vmatprep.subr.bf16.mxu0 %v17098_v11  ;;  %v17110_v23 = vld [vmem:[%s21008_s8 + $0xf4] ss:$8 sps:$4 sm:$0xff]  }
 0x6b8   : > { %v19492_v39 = vadd.f32 %v8278_v21, %v8267_v3  ;;  %v8288_v42 = vmax.f32 %v19490_v19, 0.0 }
 0x6b9   : > { %8623 = vmatpush1.bf16.msra.mxu0 %v17096_v12 }
 0x6ba   : > { %v8291_v46 = vmax.f32 %v19492_v39, 0.0  ;;  %8624 = vmatprep.subr.bf16.mxu0 %v17101_v60 }
 0x6bd   : > { %8625 = vmatpush1.bf16.msra.mxu0 %v17099_v25 }
 0x6be   : > { %8626 = vmatprep.subr.bf16.mxu0 %v17104_v62 }
 0x6c1   : > { %8627 = vmatpush1.bf16.msra.mxu0 %v17102_v2 }
 0x6c2   : > { %8628 = vmatprep.subr.bf16.mxu0 %v17107_v59 }
 0x6c5   : > { %8629 = vmatpush1.bf16.msra.mxu0 %v17105_v38 }
 0x6c6   : > { %8630 = vmatprep.subr.bf16.mxu0 %v17110_v23 }
 0x6c9   : > { %8631 = vmatpush1.bf16.msra.mxu0 %v17108_v30  ;;  %v9950_v30 = vld [vmem:[%s21010_s10] sm:$0xff]  ;;  %s21030_s10 = smov 78  }
 0x714   : > { %v8212_v37 = vpop.f32.mrb[16].mxu0 }
 0x715   : > { %v8214_v50 = vpop.f32.mrb[17].mxu0  ;;  %v19499_v29 = vadd.f32 %v8273_v14, %v8212_v37 }
 0x716   : > { %v19494_v34 = vadd.f32 %v8273_v14, %v8214_v50  ;;  %v8216_v52 = vpop.f32.mrb[18].mxu0 }
 0x717   : > { %v19496_v56 = vadd.f32 %v8278_v21, %v8216_v52  ;;  %v8218_v17 = vpop.f32.mrb[19].mxu0  ;;  %v8286_v40 = vmax.f32 %v19499_v29, 0.0 }
 0x718   : > { %v8287_v35 = vmax.f32 %v19494_v34, 0.0  ;;  %v19502_v26 = vadd.f32 %v8278_v21, %v8218_v17  ;;  %v17113_v34 = vld [vmem:[%s21008_s8 + $0x104] ss:$8 sps:$4 sm:$0xff]   ;;  %s21028_s8 = smov 80  }
 0x719   : > { %v8289_v44 = vmax.f32 %v19496_v56, 0.0  ;;  %8643 = vmatprep.subr.bf16.mxu0 %v17113_v34  ;;  %v14888_v34 = vld [vmem:[%s21011_s9 + $0x8] sm:$0xf] }
 0x71a   : > { %v16752_v32 = vpack.i.bf16 %v8288_v42, %v8287_v35  ;;  %v8290_v54 = vmax.f32 %v19502_v26, 0.0 }
 0x71b   : > { %v16762_v45 = vpack.i.bf16 %v8289_v44, %v8286_v40 }
 0x71c   : > { %v16757_v31 = vpack.i.bf16 %v8291_v46, %v8290_v54  ;;  %16753 = vrot.lane.b32.xlu0 %v16752_v32, %s20952_s25 }
 0x71e   : > { %16758 = vrot.lane.b32.xlu1 %v16757_v31, %s20952_s25 }
 0x720   : > { %16763 = vrot.lane.b32.xlu0 %v16762_v45, %s20952_s25 }
 0x78e   : > { %v16754_v15 = vpop.permute.xlu0 %16753 }
 0x78f   : > { %v16756_v16 = vunpack.i.h.bf16 %v16754_v15  ;;  %v16755_v13 = vunpack.i.l.bf16 %v16754_v15 }
 0x790   : > { %v16759_v10 = vpop.permute.xlu1 %16758 }
 0x791   : > { %v19621_v27 = vmax.f32 %v8288_v42, %v16756_v16  ;;  %v8312_v28 = vsel %vm1330_vm7, %v16755_v13, %v16756_v16  ;;  %v16761_v3 = vunpack.i.h.bf16 %v16759_v10  ;;  %v16760_v33 = vunpack.i.l.bf16 %v16759_v10 }
 0x792   : > { %v8322_v14 = vmax.f32 %v8287_v35, %v8312_v28  ;;  %v16764_v21 = vpop.permute.xlu0 %16763  ;;  %v14885_v28 = vld [vmem:[%s21011_s9 + $0x4] sm:$0xf] }
 0x793   : > { %v8326_v37 = vmax.f32 %v8291_v46, %v16761_v3  ;;  %v8314_v50 = vsel %vm1330_vm7, %v16760_v33, %v16761_v3  ;;  %v16766_v52 = vunpack.i.h.bf16 %v16764_v21  ;;  %v16765_v17 = vunpack.i.l.bf16 %v16764_v21 }
 0x794   : > { %v8325_v19 = vmax.f32 %v8290_v54, %v8314_v50  ;;  %v16767_v42 = vpack.i.bf16 %v19621_v27, %v8322_v14 }
 0x795   : > { %v8311_v35 = vsel %vm1330_vm7, %v16765_v17, %v16755_v13  ;;  %v8313_v32 = vsel %vm1330_vm7, %v16766_v52, %v16760_v33  ;;  %vm8591_vm7 = vcmask 1042432  }
 0x796   : > { %v8321_v39 = vmax.f32 %v8286_v40, %v8311_v35  ;;  %v8324_v46 = vmax.f32 %v8289_v44, %v8313_v32  ;;  %16768 = vrot.lane.b32.xlu1 %v16767_v42, %s20957_s6  ;;  %v16772_v26 = vpack.i.bf16 %v8326_v37, %v8325_v19  ;;  %v8592_v47 = vsel %vm8591_vm7, 4294967295, %v17187_v61  ;;  %v14904_v42 = vld [vmem:[%s21011_s9 + $0x28] sm:$0xf] }
 0x798   : > { %16773 = vrot.lane.b32.xlu0 %v16772_v26, %s20957_s6  ;;  %v16777_v54 = vpack.i.bf16 %v8324_v46, %v8321_v39  ;;  %v14908_v26 = vld [vmem:[%s21011_s9 + $0x30] sm:$0xf] }
 0x79a   : > { %16778 = vrot.lane.b32.xlu1 %v16777_v54, %s20957_s6  ;;  %v14890_v54 = vld [vmem:[%s21011_s9 + $0xc] sm:$0xf] }
 0x808   : > { %v16769_v20 = vpop.permute.xlu1 %16768 }
 0x809   : > { %v16771_v41 = vunpack.i.h.bf16 %v16769_v20  ;;  %v16770_v22 = vunpack.i.l.bf16 %v16769_v20 }
 0x80a   : > { %v16774_v31 = vpop.permute.xlu0 %16773 }
 0x80b   : > { %v16776_v1 = vunpack.i.h.bf16 %v16774_v31  ;;  %v16775_v45 = vunpack.i.l.bf16 %v16774_v31  ;;  %v8347_v29 = vsel %vm1950_vm13, %v16770_v22, %v16771_v41  ;;  %v8358_v25 = vmax.f32 %v19621_v27, %v16771_v41 }
 0x80c   : > { %v16779_v40 = vpop.permute.xlu1 %16778  ;;  %v8357_v51 = vmax.f32 %v8322_v14, %v8347_v29 }
 0x80d   : > { %v16781_v56 = vunpack.i.h.bf16 %v16779_v40  ;;  %v16780_v44 = vunpack.i.l.bf16 %v16779_v40  ;;  %v8349_v53 = vsel %vm1950_vm13, %v16775_v45, %v16776_v1  ;;  %v8361_v60 = vmax.f32 %v8326_v37, %v16776_v1  ;;  %v8691_v37 = vld [vmem:[%s21011_s9] sm:$0xf]  ;;  %v14912_v1 = vld [vmem:[%s21011_s9 + $0x38] sm:$0xf] }
 0x80e   : > { %v8360_v6 = vmax.f32 %v8325_v19, %v8349_v53 }
 0x80f   : > { %v8348_v57 = vsel %vm1950_vm13, %v16781_v56, %v16775_v45  ;;  %v8346_v58 = vsel %vm1950_vm13, %v16780_v44, %v16770_v22  ;;  %vm21009_vm13 = vcmask 1043456   ;;  %v8364_v62 = vpack.c.bf16 %v8361_v60, %v8358_v25  ;;  %v14892_v45 = vld [vmem:[%s21011_s9 + $0x10] sm:$0xf]  ;;  %v14900_v25 = vld [vmem:[%s21011_s9 + $0x20] sm:$0xf] }
 0x810   : > { %v8359_v5 = vmax.f32 %v8324_v46, %v8348_v57  ;;  %v8356_v55 = vmax.f32 %v8321_v39, %v8346_v58  ;;  %v8363_v48 = vpack.c.bf16 %v8360_v6, %v8357_v51  ;;  %v8593_v8 = vsel %vm21009_vm13, %v8592_v47, 0  ;;  %v14894_v51 = vld [vmem:[%s21011_s9 + $0x14] sm:$0xf]  ;;  %v14916_v6 = vld [vmem:[%s21011_s9 + $0x40] sm:$0xf] }
 0x811   : > { %v8598_v11 = vand.u32 %v14883_v7, %v8593_v8  ;;  %v8595_v12 = vand.u32 %v14882_v49, %v8593_v8  ;;  %v14920_v47 = vld [vmem:[%s21011_s9 + $0x48] sm:$0xf]  ;;  %v14898_v8 = vld [vmem:[%s21011_s9 + $0x1c] sm:$0xf]  ;;  %vm10029_vm13 = vcmask 752640  }
 0x812   : > { %8632 = vmatprep.mubr.bf16.mxu0 %v8363_v48  ;;  %v8362_v4 = vpack.c.bf16 %v8359_v5, %v8356_v55  ;;  %v14896_v48 = vld [vmem:[%s21011_s9 + $0x18] sm:$0xf] }
 0x814   : > { %8633 = vmatmul.mubr.bf16.vlgmr.msra.gmra.mrb[20].mxu0 %v8362_v4 }
 0x815   : > { %8644 = vmatpush1.bf16.msra.mxu0 %v17111_v36  ;;  %8675 = vmatprep.mubr.bf16.mxu0 %v17162_v43 }
 0x816   : > { %8645 = vmatprep.subr.bf16.mxu0 %v17116_v63 }
 0x819   : > { %8646 = vmatpush1.bf16.msra.mxu0 %v17114_v9  ;;  %v14924_v9 = vld [vmem:[%s21011_s9 + $0x50] sm:$0xf] }
 0x81a   : > { %8647 = vmatprep.subr.bf16.mxu0 %v8598_v11 }
 0x81d   : > { %8648 = vmatpush1.bf16.msra.mxu0 %v8595_v12 }
 0x81e   : > { %15890 = vmatprep.subr.bf16.mxu0 %v17160_v24 }
 0x820   : > { %14884 = vmatmul.mubr.msk.bf16.vlgmr.msra.gmra.mrb[20].mxu0 %vm8587_vm14, %v8364_v62  ;;  %v14928_v62 = vld [vmem:[%s21011_s9 + $0x58] sm:$0xf]  ;;  %vm21013_vm14 = vcmask 1043456  }
 0x821   : > { %15892 = vmatprep.mubr.msk.bf16.mxu0 %vm17163_vm6, %v17160_v24 }
 0x8f3   : > { %v8677_v2 = vpop.f32.mrb[20].mxu0 }
 0x8f4   : > { %v8679_v59 = vpop.f32.mrb[21].mxu0 }
 0x8f5   : > { %v8681_v15 = vpop.f32.mrb[22].mxu0 }
 0x8f6   : > { %v19668_v38 = vpack.c.bf16 %v8681_v15, %v8677_v2  ;;  %v8683_v16 = vpop.f32.mrb[23].mxu0  ;;  %v14902_v15 = vld [vmem:[%s21011_s9 + $0x24] sm:$0xf] }
 0x8f7   : > { %v8687_v13 = vpack.c.bf16 %v8683_v16, %v8679_v59  ;;  %v14906_v16 = vld [vmem:[%s21011_s9 + $0x2c] sm:$0xf] }
 0x8f8   : > { %8786 = vrot.lane.b32.xlu1 %v19668_v38, %s20953_s24  ;;  %8695 = vrot.lane.b32.xlu0 %v19668_v38, %s20952_s25 }
 0x8f9   : > { %8689 = vst.msk [vmem:[#allocation4 + $0x8] sm:$0xff] %vm5299_vm1, %v8687_v13  ;;  %v14910_v13 = vld [vmem:[%s21011_s9 + $0x34] sm:$0xf] }
 0x8fc   : > { %8884 = vrot.lane.b32.xlu1 %v19668_v38, %s20956_s2  ;;  %8835 = vrot.lane.b32.xlu0 %v19668_v38, %s20955_s26 }
 0x900   : > { %8982 = vrot.lane.b32.xlu1 %v19668_v38, %s20917_s23  ;;  %8933 = vrot.lane.b32.xlu0 %v19668_v38, %s20915_s5  ;;  %v9471_v10 = vld [vmem:[#allocation4 + $0x8] sm:$0xff]  ;;  %s21023_s23 = smov 101   ;;  %s21024_s5 = smov 91  }
 0x904   : > { %9080 = vrot.lane.b32.xlu1 %v19668_v38, %s20914_s4  ;;  %9031 = vrot.lane.b32.xlu0 %v19668_v38, %s20887_s29  ;;  %s20896_s29 = smov 90   ;;  %s21021_s4 = smov 103  }
 0x908   : > { %9178 = vrot.lane.b32.xlu1 %v19668_v38, %s20961_s7  ;;  %9129 = vrot.lane.b32.xlu0 %v19668_v38, %s20885_s22  ;;  %s20892_s22 = smov 92  }
 0x90c   : > { %9276 = vrot.lane.b32.xlu1 %v19668_v38, %s20912_s30  ;;  %9227 = vrot.lane.b32.xlu0 %v19668_v38, %s20900_s1  ;;  %s21018_s1 = smov 114  }
 0x910   : > { %9374 = vrot.lane.b32.xlu1 %v19668_v38, %s20888_s27  ;;  %9325 = vrot.lane.b32.xlu0 %v19668_v38, %s20890_s3  ;;  %s20898_s27 = smov 89   ;;  %s20902_s3 = smov 80  }
 0x914   : > { %9476 = vrot.lane.b32.xlu1 %v19668_v38, %s20894_s28  ;;  %9423 = vrot.lane.b32.xlu0 %v19668_v38, %s20892_s22  ;;  %s20906_s22 = smov 79  }
 0x918   : > { %9529 = vrot.lane.b32.xlu1 %v19668_v38, %s20896_s29  ;;  %9478 = vrot.lane.b32.xlu0 %v9471_v10, %s20894_s28  ;;  %s20904_s28 = smov 78  }
 0x91c   : > { %9582 = vrot.lane.b32.xlu1 %v19668_v38, %s20898_s27  ;;  %9531 = vrot.lane.b32.xlu0 %v9471_v10, %s20896_s29  ;;  %s20910_s29 = smov 77  }
 0x920   : > { %9635 = vrot.lane.b32.xlu1 %v19668_v38, %s20962_s0  ;;  %9584 = vrot.lane.b32.xlu0 %v9471_v10, %s20898_s27  ;;  %s20908_s27 = smov 76  }
 0x924   : > { %9687 = vrot.lane.b32.xlu1 %v19668_v38, %s20902_s3  ;;  %9637 = vrot.lane.b32.xlu0 %v9471_v10, %s20962_s0 }
 0x928   : > { %9740 = vrot.lane.b32.xlu1 %v19668_v38, %s20906_s22  ;;  %9689 = vrot.lane.b32.xlu0 %v9471_v10, %s20902_s3  ;;  %s21020_s3 = smov 102  }
 0x92c   : > { %9793 = vrot.lane.b32.xlu1 %v19668_v38, %s20904_s28  ;;  %9742 = vrot.lane.b32.xlu0 %v9471_v10, %s20906_s22  ;;  %s21015_s22 = smov 115  }
 0x930   : > { %9846 = vrot.lane.b32.xlu1 %v19668_v38, %s20910_s29  ;;  %9795 = vrot.lane.b32.xlu0 %v9471_v10, %s20904_s28  ;;  %s21016_s28 = smov 116  }
 0x934   : > { %9899 = vrot.lane.b32.xlu1 %v19668_v38, %s20908_s27  ;;  %9848 = vrot.lane.b32.xlu0 %v9471_v10, %s20910_s29  ;;  %s21019_s29 = smov 112  }
 0x938   : > { %9953 = vperm.xlu1 %16751, %v9950_v30   ;;  %9901 = vrot.lane.b32.xlu0 %v9471_v10, %s20908_s27  ;;  %v14914_v10 = vld [vmem:[%s21011_s9 + $0x3c] sm:$0xf]  ;;  %s21017_s27 = smov 113  }
 0x93c   : > { %10141 = vrot.lane.b32.xlu0 %v19668_v38, %s20912_s30  ;;  %s21022_s30 = smov 100  }
 0x96a   : > { %v8787_v23 = vpop.permute.xlu1 %8786  ;;  %v8696_v27 = vpop.permute.xlu0 %8695 }
 0x96b   : > { %15831 = vmatpush3.bf16.msra.mxu1 %v8696_v27 }
 0x96c   : > { %15836 = vmatprep.subr.bf16.mxu1 %v17160_v24 }
 0x96e   : > { %v8885_v3 = vpop.permute.xlu1 %8884  ;;  %15833 = vmatmul.mubr.msk.bf16.vlgmr.msra.gmra.mrb[216].mxu1 %vm5299_vm1, %v14885_v28  ;;  %v8836_v33 = vpop.permute.xlu0 %8835  ;;  %v14922_v28 = vld [vmem:[%s21011_s9 + $0x4c] sm:$0xf] }
 0x96f   : > { %15837 = vmatpush3.bf16.msra.mxu1 %v19668_v38  ;;  %15838 = vmatprep.mubr.msk.bf16.mxu1 %vm17163_vm6, %v17160_v24  ;;  %v14932_v38 = vld [vmem:[%s21011_s9 + $0x60] sm:$0xf] }
 0x970   : > { %15842 = vmatprep.subr.bf16.mxu1 %v17160_v24 }
 0x972   : > { %v19742_v14 = vpop.permute.xlu1 %8982  ;;  %v8934_v21 = vpop.permute.xlu0 %8933 }
 0x976   : > { %v19747_v50 = vpop.permute.xlu1 %9080  ;;  %15839 = vmatmul.mubr.msk.bf16.vlgmr.msra.gmra.mrb[220].mxu1 %vm5299_vm1, %v8691_v37  ;;  %v19750_v52 = vpop.permute.xlu0 %9031  ;;  %v17119_v37 = vld [vmem:[%s20797_s14] ss:$8 sps:$4 sm:$0xff]  }
 0x977   : > { %15843 = vmatpush3.bf16.msra.mxu1 %v8787_v23  ;;  %15844 = vmatprep.mubr.msk.bf16.mxu1 %vm17163_vm6, %v17160_v24  ;;  %v14918_v23 = vld [vmem:[%s21011_s9 + $0x44] sm:$0xf] }
 0x978   : > { %15848 = vmatprep.subr.bf16.mxu1 %v17160_v24 }
 0x97a   : > { %v9179_v17 = vpop.permute.xlu1 %9178  ;;  %v19755_v19 = vpop.permute.xlu0 %9129 }
 0x97b   : > { %15891 = vmatpush3.bf16.msra.mxu0 %v9179_v17  ;;  %v17122_v17 = vld [vmem:[%s20797_s14 + $0x10] ss:$8 sps:$4 sm:$0xff]  }
 0x97c   : > { %15902 = vmatprep.subr.bf16.mxu0 %v17160_v24 }
 0x97e   : > { %15893 = vmatmul.mubr.msk.bf16.vlgmr.msra.gmra.mrb[24].mxu0 %vm5299_vm1, %v14904_v42  ;;  %v9277_v35 = vpop.permute.xlu1 %9276  ;;  %15845 = vmatmul.mubr.msk.bf16.vlgmr.msra.gmra.mrb[224].mxu1 %vm5299_vm1, %v14888_v34  ;;  %v19766_v32 = vpop.permute.xlu0 %9227  ;;  %v17130_v42 = vld [vmem:[%s20797_s14 + $0x34] ss:$8 sps:$4 sm:$0xff]   ;;  %v17128_v34 = vld [vmem:[%s20797_s14 + $0x30] ss:$8 sps:$4 sm:$0xff]  }
 0x97f   : > { %15849 = vmatpush3.bf16.msra.mxu1 %v8836_v33  ;;  %15903 = vmatpush3.bf16.msra.mxu0 %v9277_v35  ;;  %v14926_v33 = vld [vmem:[%s21011_s9 + $0x54] sm:$0xf] }
 0x980   : > { %15850 = vmatprep.mubr.msk.bf16.mxu1 %vm17163_vm6, %v17160_v24  ;;  %15854 = vmatprep.subr.bf16.mxu1 %v17160_v24 }
 0x981   : > { %15904 = vmatprep.mubr.msk.bf16.mxu0 %vm17163_vm6, %v17160_v24  ;;  %15914 = vmatprep.subr.bf16.mxu0 %v17160_v24 }
 0x982   : > { %v9375_v39 = vpop.permute.xlu1 %9374  ;;  %v19774_v46 = vpop.permute.xlu0 %9325 }
 0x986   : > { %15905 = vmatmul.mubr.msk.bf16.vlgmr.msra.gmra.mrb[28].mxu0 %vm5299_vm1, %v14908_v26  ;;  %v9477_v20 = vpop.permute.xlu1 %9476  ;;  %15851 = vmatmul.mubr.msk.bf16.vlgmr.msra.gmra.mrb[228].mxu1 %vm5299_vm1, %v14890_v54  ;;  %v19784_v41 = vpop.permute.xlu0 %9423  ;;  %v17133_v26 = vld [vmem:[%s20797_s14 + $0x44] ss:$8 sps:$4 sm:$0xff]   ;;  %v17131_v54 = vld [vmem:[%s20797_s14 + $0x40] ss:$8 sps:$4 sm:$0xff]  }
 0x987   : > { %15915 = vmatpush3.bf16.msra.mxu0 %v9375_v39  ;;  %15855 = vmatpush3.bf16.msra.mxu1 %v8885_v3 }
 0x988   : > { %15856 = vmatprep.mubr.msk.bf16.mxu1 %vm17163_vm6, %v17160_v24  ;;  %15860 = vmatprep.subr.bf16.mxu1 %v17160_v24 }
 0x989   : > { %15916 = vmatprep.mubr.msk.bf16.mxu0 %vm17163_vm6, %v17160_v24  ;;  %15926 = vmatprep.subr.bf16.mxu0 %v17160_v24 }
 0x98a   : > { %v19792_v22 = vpop.permute.xlu1 %9529  ;;  %v9479_v31 = vpop.permute.xlu0 %9478 }
 0x98b   : > { %v9481_v29 = vsel %vm9480_vm15, %v9477_v20, %v9479_v31 }
 0x98e   : > { %15917 = vmatmul.mubr.msk.bf16.vlgmr.msra.gmra.mrb[32].mxu0 %vm5299_vm1, %v14912_v1  ;;  %v9583_v40 = vpop.permute.xlu1 %9582  ;;  %15857 = vmatmul.mubr.msk.bf16.vlgmr.msra.gmra.mrb[232].mxu1 %vm5299_vm1, %v14892_v45  ;;  %v19803_v56 = vpop.permute.xlu0 %9531  ;;  %v17136_v1 = vld [vmem:[%s20797_s14 + $0x50] ss:$8 sps:$4 sm:$0x3f]  }
 0x98f   : > { %15861 = vmatpush3.bf16.msra.mxu1 %v8934_v21  ;;  %15927 = vmatpush3.bf16.msra.mxu0 %v9481_v29  ;;  %v9534_v30 = vsel %vm9533_vm5, %v19792_v22, %v19803_v56  ;;  %v14930_v21 = vld [vmem:[%s21011_s9 + $0x5c] sm:$0xf]  ;;  %s21029_s9 = smov 79  }
 0x990   : > { %15862 = vmatprep.mubr.msk.bf16.mxu1 %vm17163_vm6, %v17160_v24  ;;  %15866 = vmatprep.subr.bf16.mxu1 %v17160_v24 }
 0x991   : > { %15928 = vmatprep.mubr.msk.bf16.mxu0 %vm17163_vm6, %v17160_v24  ;;  %15938 = vmatprep.subr.bf16.mxu0 %v17160_v24 }
 0x992   : > { %v19811_v44 = vpop.permute.xlu1 %9635  ;;  %v9585_v53 = vpop.permute.xlu0 %9584 }
 0x993   : > { %v9587_v57 = vsel %vm9586_vm8, %v9583_v40, %v9585_v53  ;;  %v10034_v40 = vsel %vm5107_vm4, %v17136_v1, 0 }
 0x996   : > { %v9688_v58 = vpop.permute.xlu1 %9687  ;;  %15863 = vmatmul.mubr.msk.bf16.vlgmr.msra.gmra.mrb[236].mxu1 %vm5299_vm1, %v14894_v51  ;;  %15929 = vmatmul.mubr.msk.bf16.vlgmr.msra.gmra.mrb[36].mxu0 %vm5299_vm1, %v14916_v6  ;;  %v19822_v0 = vpop.permute.xlu0 %9637 }
 0x997   : > { %15867 = vmatpush3.bf16.msra.mxu1 %v19742_v14  ;;  %15939 = vmatpush3.bf16.msra.mxu0 %v9587_v57  ;;  %v9639_v27 = vsel %vm21012_vm3, %v19811_v44, %v19822_v0  ;;  %vm10093_vm3 = vcmask 64512  }
 0x998   : > { %15868 = vmatprep.mubr.msk.bf16.mxu1 %vm17163_vm6, %v17160_v24  ;;  %15872 = vmatprep.subr.bf16.mxu1 %v17160_v24 }
 0x999   : > { %15940 = vmatprep.mubr.msk.bf16.mxu0 %vm17163_vm6, %v17160_v24  ;;  %15950 = vmatprep.subr.bf16.mxu0 %v17160_v24 }
 0x99a   : > { %v9690_v5 = vpop.permute.xlu0 %9689  ;;  %v19831_v55 = vpop.permute.xlu1 %9740 }
 0x99b   : > { %v9692_v36 = vsel %vm9691_vm9, %v9688_v58, %v9690_v5 }
 0x99e   : > { %15869 = vmatmul.mubr.msk.bf16.vlgmr.msra.gmra.mrb[240].mxu1 %vm5299_vm1, %v14896_v48  ;;  %15941 = vmatmul.mubr.msk.bf16.vlgmr.msra.gmra.mrb[40].mxu0 %vm5299_vm1, %v14920_v47  ;;  %v19842_v4 = vpop.permute.xlu0 %9742  ;;  %v9794_v63 = vpop.permute.xlu1 %9793 }
 0x99f   : > { %15873 = vmatpush3.bf16.msra.mxu1 %v19750_v52  ;;  %15951 = vmatpush3.bf16.msra.mxu0 %v9692_v36  ;;  %v9745_v3 = vsel %vm9744_vm11, %v19831_v55, %v19842_v4  ;;  %v17124_v52 = vld [vmem:[%s20797_s14 + $0x14] ss:$8 sps:$4 sm:$0xff]  }
 0x9a0   : > { %15874 = vmatprep.mubr.msk.bf16.mxu1 %vm17163_vm6, %v17160_v24  ;;  %15878 = vmatprep.subr.bf16.mxu1 %v17160_v24 }
 0x9a1   : > { %15952 = vmatprep.mubr.msk.bf16.mxu0 %vm17163_vm6, %v17160_v24  ;;  %15962 = vmatprep.subr.bf16.mxu0 %v17160_v24 }
 0x9a2   : > { %v9796_v7 = vpop.permute.xlu0 %9795  ;;  %v9847_v12 = vpop.permute.xlu1 %9846 }
 0x9a3   : > { %v9798_v49 = vsel %vm9797_vm0, %v9794_v63, %v9796_v7 }
 0x9a6   : > { %15875 = vmatmul.mubr.msk.bf16.vlgmr.msra.gmra.mrb[244].mxu1 %vm5299_vm1, %v14898_v8  ;;  %15953 = vmatmul.mubr.msk.bf16.vlgmr.msra.gmra.mrb[44].mxu0 %vm5299_vm1, %v14924_v9  ;;  %v19860_v11 = vpop.permute.xlu0 %9848  ;;  %v9900_v2 = vpop.permute.xlu1 %9899 }
 0x9a7   : > { %15879 = vmatpush3.bf16.msra.mxu1 %v19747_v50  ;;  %15963 = vmatpush3.bf16.msra.mxu0 %v9798_v49  ;;  %v9851_v14 = vsel %vm9850_vm12, %v9847_v12, %v19860_v11  ;;  %v17121_v50 = vld [vmem:[%s20797_s14 + $0x4] ss:$8 sps:$4 sm:$0xff]  }
 0x9a8   : > { %15880 = vmatprep.mubr.msk.bf16.mxu1 %vm17163_vm6, %v17160_v24  ;;  %15884 = vmatprep.subr.bf16.mxu1 %v17160_v24 }
 0x9a9   : > { %15964 = vmatprep.mubr.msk.bf16.mxu0 %vm17163_vm6, %v17160_v24  ;;  %15974 = vmatprep.subr.bf16.mxu0 %v17160_v24 }
 0x9aa   : > { %v9902_v60 = vpop.permute.xlu0 %9901 }
 0x9ab   : > { %v9904_v59 = vsel %vm9903_vm10, %v9900_v2, %v9902_v60 }
 0x9ae   : > { %15881 = vmatmul.mubr.msk.bf16.vlgmr.msra.gmra.mrb[248].mxu1 %vm5299_vm1, %v14900_v25  ;;  %15965 = vmatmul.mubr.msk.bf16.vlgmr.msra.gmra.mrb[48].mxu0 %vm5299_vm1, %v14928_v62 }
 0x9af   : > { %15885 = vmatpush3.bf16.msra.mxu1 %v19755_v19  ;;  %15975 = vmatpush3.bf16.msra.mxu0 %v9904_v59  ;;  %v17127_v19 = vld [vmem:[%s20797_s14 + $0x24] ss:$8 sps:$4 sm:$0xff]  }
 0x9b0   : > { %15886 = vmatprep.mubr.msk.bf16.mxu1 %vm17163_vm6, %v17160_v24  ;;  %15896 = vmatprep.subr.bf16.mxu1 %v17160_v24 }
 0x9b1   : > { %15976 = vmatprep.mubr.msk.bf16.mxu0 %vm17163_vm6, %v17160_v24  ;;  %15980 = vmatprep.subr.bf16.mxu0 %v17160_v24 }
 0x9b6   : > { %15887 = vmatmul.mubr.msk.bf16.vlgmr.msra.gmra.mrb[252].mxu1 %vm5299_vm1, %v14902_v15  ;;  %15977 = vmatmul.mubr.msk.bf16.vlgmr.msra.gmra.mrb[52].mxu0 %vm5299_vm1, %v14932_v38 }
 0x9b7   : > { %15897 = vmatpush3.bf16.msra.mxu1 %v19766_v32  ;;  %15898 = vmatprep.mubr.msk.bf16.mxu1 %vm17163_vm6, %v17160_v24 }
 0x9b8   : > { %15908 = vmatprep.subr.bf16.mxu1 %v17160_v24  ;;  %15982 = vmatprep.mubr.msk.bf16.mxu0 %vm17163_vm6, %v17160_v24 }
 0x9be   : > { %15899 = vmatmul.mubr.msk.bf16.vlgmr.msra.gmra.mrb[0].mxu1 %vm5299_vm1, %v14906_v16 }
 0x9bf   : > { %15909 = vmatpush3.bf16.msra.mxu1 %v19774_v46  ;;  %15910 = vmatprep.mubr.msk.bf16.mxu1 %vm17163_vm6, %v17160_v24 }
 0x9c0   : > { %15920 = vmatprep.subr.bf16.mxu1 %v17160_v24 }
 0x9c6   : > { %15911 = vmatmul.mubr.msk.bf16.vlgmr.msra.gmra.mrb[4].mxu1 %vm5299_vm1, %v14910_v13 }
 0x9c7   : > { %15921 = vmatpush3.bf16.msra.mxu1 %v19784_v41  ;;  %15922 = vmatprep.mubr.msk.bf16.mxu1 %vm17163_vm6, %v17160_v24  ;;  %v17134_v41 = vld [vmem:[%s20797_s14 + $0x54] ss:$8 sps:$4 sm:$0x3f]  }
 0x9c8   : > { %15932 = vmatprep.subr.bf16.mxu1 %v17160_v24 }
 0x9ce   : > { %15923 = vmatmul.mubr.msk.bf16.vlgmr.msra.gmra.mrb[8].mxu1 %vm5299_vm1, %v14914_v10 }
 0x9cf   : > { %15933 = vmatpush3.bf16.msra.mxu1 %v9534_v30  ;;  %15934 = vmatprep.mubr.msk.bf16.mxu1 %vm17163_vm6, %v17160_v24 }
 0x9d0   : > { %15944 = vmatprep.subr.bf16.mxu1 %v17160_v24 }
 0x9d6   : > { %15935 = vmatmul.mubr.msk.bf16.vlgmr.msra.gmra.mrb[12].mxu1 %vm5299_vm1, %v14918_v23 }
 0x9d7   : > { %15945 = vmatpush3.bf16.msra.mxu1 %v9639_v27  ;;  %15946 = vmatprep.mubr.msk.bf16.mxu1 %vm17163_vm6, %v17160_v24 }
 0x9d8   : > { %15956 = vmatprep.subr.bf16.mxu1 %v17160_v24 }
 0x9de   : > { %15947 = vmatmul.mubr.msk.bf16.vlgmr.msra.gmra.mrb[16].mxu1 %vm5299_vm1, %v14922_v28 }
 0x9df   : > { %15957 = vmatpush3.bf16.msra.mxu1 %v9745_v3  ;;  %15958 = vmatprep.mubr.msk.bf16.mxu1 %vm17163_vm6, %v17160_v24 }
 0x9e0   : > { %15968 = vmatprep.subr.bf16.mxu1 %v17160_v24 }
 0x9e6   : > { %15959 = vmatmul.mubr.msk.bf16.vlgmr.msra.gmra.mrb[20].mxu1 %vm5299_vm1, %v14926_v33 }
 0x9e7   : > { %15969 = vmatpush3.bf16.msra.mxu1 %v9851_v14  ;;  %15970 = vmatprep.mubr.msk.bf16.mxu1 %vm17163_vm6, %v17160_v24 }
 0x9e8   : > { %10039 = vmatprep.subr.bf16.mxu1 %v17121_v50 }
 0x9ee   : > { %15971 = vmatmul.mubr.msk.bf16.vlgmr.msra.gmra.mrb[24].mxu1 %vm5299_vm1, %v14930_v21 }
 0x9ef   : > { %10071 = vmatprep.mubr.bf16.mxu1 %v17162_v43  ;;  %10040 = vmatpush1.bf16.msra.mxu1 %v17119_v37  ;;  %v17125_v43 = vld [vmem:[%s20797_s14 + $0x20] ss:$8 sps:$4 sm:$0xff]  }
 0x9f0   : > { %10041 = vmatprep.subr.bf16.mxu1 %v17124_v52 }
 0x9f3   : > { %10042 = vmatpush1.bf16.msra.mxu1 %v17122_v17 }
 0x9f4   : > { %10043 = vmatprep.subr.bf16.mxu1 %v17127_v19 }
 0x9f7   : > { %10044 = vmatpush1.bf16.msra.mxu1 %v17125_v43 }
 0x9f8   : > { %10045 = vmatprep.subr.bf16.mxu1 %v17130_v42 }
 0x9fb   : > { %10046 = vmatpush1.bf16.msra.mxu1 %v17128_v34 }
 0x9fc   : > { %10047 = vmatprep.subr.bf16.mxu1 %v17133_v26 }
 0x9ff   : > { %10048 = vmatpush1.bf16.msra.mxu1 %v17131_v54 }
 0xa00   : > { %14946 = vmatprep.subr.msk.bf16.mxu1 %vm5107_vm4, %v17134_v41 }
 0xa03   : > { %10050 = vmatpush1.bf16.msra.mxu1 %v10034_v40 }
 0xa04   : > { %15998 = vmatprep.subr.bf16.mxu1 %v17160_v24 }
 0xa41   : > { %v8735_v35 = vpop.f32.mrb[216].mxu1 }
 0xa42   : > { %v15834_v32 = vpop.f32.mrb[217].mxu1 }
 0xa43   : > { %v8738_v39 = vpop.f32.mrb[218].mxu1 }
 0xa44   : > { %v15835_v46 = vpop.f32.mrb[219].mxu1 }
 0xa49   : > { %v8778_v20 = vpop.f32.mrb[220].mxu1 }
 0xa4a   : > { %v8779_v22 = vadd.f32 %v8778_v20, %v8735_v35  ;;  %v15840_v31 = vpop.f32.mrb[221].mxu1 }
 0xa4b   : > { %v8781_v45 = vpop.f32.mrb[222].mxu1 }
 0xa4c   : > { %v15841_v29 = vpop.f32.mrb[223].mxu1 }
 0xa51   : > { %v8826_v56 = vpop.f32.mrb[224].mxu1  ;;  %v19997_v44 = vpop.f32.mrb[24].mxu0 }
 0xa52   : > { %v8832_v53 = vadd.f32 %v8826_v56, %v8779_v22  ;;  %v15846_v51 = vpop.f32.mrb[225].mxu1  ;;  %v15894_v6 = vpop.f32.mrb[25].mxu0 }
 0xa53   : > { %v8829_v57 = vpop.f32.mrb[226].mxu1  ;;  %v9221_v58 = vpop.f32.mrb[26].mxu0 }
 0xa54   : > { %v15847_v0 = vpop.f32.mrb[227].mxu1  ;;  %v15895_v5 = vpop.f32.mrb[27].mxu0 }
 0xa59   : > { %v8875_v55 = vpop.f32.mrb[228].mxu1  ;;  %v19999_v48 = vpop.f32.mrb[28].mxu0 }
 0xa5a   : > { %v8881_v47 = vadd.f32 %v8875_v55, %v8832_v53  ;;  %v15852_v36 = vpop.f32.mrb[229].mxu1  ;;  %v15906_v4 = vpop.f32.mrb[29].mxu0 }
 0xa5b   : > { %v8878_v63 = vpop.f32.mrb[230].mxu1  ;;  %v9319_v7 = vpop.f32.mrb[30].mxu0 }
 0xa5c   : > { %v15853_v8 = vpop.f32.mrb[231].mxu1  ;;  %v15907_v9 = vpop.f32.mrb[31].mxu0 }
 0xa61   : > { %v8924_v49 = vpop.f32.mrb[232].mxu1  ;;  %v20001_v11 = vpop.f32.mrb[32].mxu0 }
 0xa62   : > { %v8930_v12 = vadd.f32 %v8924_v49, %v8881_v47  ;;  %v15858_v60 = vpop.f32.mrb[233].mxu1  ;;  %v15918_v25 = vpop.f32.mrb[33].mxu0 }
 0xa63   : > { %v8927_v62 = vpop.f32.mrb[234].mxu1  ;;  %v9417_v2 = vpop.f32.mrb[34].mxu0 }
 0xa64   : > { %v15859_v59 = vpop.f32.mrb[235].mxu1  ;;  %v15919_v15 = vpop.f32.mrb[35].mxu0 }
 0xa69   : > { %v8973_v38 = vpop.f32.mrb[236].mxu1  ;;  %v9520_v16 = vpop.f32.mrb[36].mxu0 }
 0xa6a   : > { %v8979_v13 = vadd.f32 %v8973_v38, %v8930_v12  ;;  %v15864_v10 = vpop.f32.mrb[237].mxu1  ;;  %v15930_v30 = vpop.f32.mrb[37].mxu0 }
 0xa6b   : > { %v8976_v23 = vpop.f32.mrb[238].mxu1  ;;  %v9523_v27 = vpop.f32.mrb[38].mxu0 }
 0xa6c   : > { %v15865_v28 = vpop.f32.mrb[239].mxu1  ;;  %v15931_v3 = vpop.f32.mrb[39].mxu0 }
 0xa71   : > { %v9022_v33 = vpop.f32.mrb[240].mxu1  ;;  %v9626_v14 = vpop.f32.mrb[40].mxu0 }
 0xa72   : > { %v9028_v21 = vadd.f32 %v9022_v33, %v8979_v13  ;;  %v15870_v37 = vpop.f32.mrb[241].mxu1  ;;  %v15942_v50 = vpop.f32.mrb[41].mxu0 }
 0xa73   : > { %v9025_v52 = vpop.f32.mrb[242].mxu1  ;;  %v9629_v17 = vpop.f32.mrb[42].mxu0 }
 0xa74   : > { %v15871_v43 = vpop.f32.mrb[243].mxu1  ;;  %v15943_v19 = vpop.f32.mrb[43].mxu0 }
 0xa79   : > { %v9071_v42 = vpop.f32.mrb[244].mxu1  ;;  %v9731_v34 = vpop.f32.mrb[44].mxu0 }
 0xa7a   : > { %v9077_v35 = vadd.f32 %v9071_v42, %v9028_v21  ;;  %v15876_v32 = vpop.f32.mrb[245].mxu1  ;;  %v15954_v39 = vpop.f32.mrb[45].mxu0 }
 0xa7b   : > { %v9074_v46 = vpop.f32.mrb[246].mxu1  ;;  %v9734_v26 = vpop.f32.mrb[46].mxu0 }
 0xa7c   : > { %v15877_v54 = vpop.f32.mrb[247].mxu1  ;;  %v15955_v20 = vpop.f32.mrb[47].mxu0 }
 0xa81   : > { %v9120_v41 = vpop.f32.mrb[248].mxu1  ;;  %v9837_v22 = vpop.f32.mrb[48].mxu0 }
 0xa82   : > { %v9126_v31 = vadd.f32 %v9120_v41, %v9077_v35  ;;  %v15882_v1 = vpop.f32.mrb[249].mxu1  ;;  %v15966_v45 = vpop.f32.mrb[49].mxu0 }
 0xa83   : > { %v9123_v29 = vpop.f32.mrb[250].mxu1  ;;  %v9840_v40 = vpop.f32.mrb[50].mxu0 }
 0xa84   : > { %v15883_v56 = vpop.f32.mrb[251].mxu1  ;;  %v15967_v53 = vpop.f32.mrb[51].mxu0 }
 0xa89   : > { %v9169_v51 = vpop.f32.mrb[252].mxu1  ;;  %v9943_v6 = vpop.f32.mrb[52].mxu0 }
 0xa8a   : > { %v9175_v57 = vadd.f32 %v9169_v51, %v9126_v31  ;;  %v15888_v58 = vpop.f32.mrb[253].mxu1  ;;  %v15978_v0 = vpop.f32.mrb[53].mxu0 }
 0xa8b   : > { %v9172_v5 = vpop.f32.mrb[254].mxu1  ;;  %v9946_v55 = vpop.f32.mrb[54].mxu0  ;;  %v10092_v58 = vld [vmem:[%s20795_s12] sm:$0xf] }
 0xa8c   : > { %v9224_v47 = vadd.f32 %v19997_v44, %v9175_v57  ;;  %v15889_v36 = vpop.f32.mrb[255].mxu1  ;;  %v15979_v4 = vpop.f32.mrb[55].mxu0 }
 0xa8d   : > { %v10142_v0 = vpop.permute.xlu0 %10141  ;;  %v11447_v36 = vld [vmem:[%s20796_s13] sm:$0xff] }
 0xa91   : > { %v9267_v63 = vpop.f32.mrb[0].mxu1 }
 0xa92   : > { %v9273_v7 = vadd.f32 %v9267_v63, %v9224_v47  ;;  %v15900_v8 = vpop.f32.mrb[1].mxu1 }
 0xa93   : > { %v9270_v9 = vpop.f32.mrb[2].mxu1 }
 0xa94   : > { %v9322_v49 = vadd.f32 %v19999_v48, %v9273_v7  ;;  %v15901_v12 = vpop.f32.mrb[3].mxu1  ;;  %v14951_v9 = vld [vmem:[%s20795_s12 + $0x4] sm:$0xf] }
 0xa99   : > { %v9365_v60 = vpop.f32.mrb[4].mxu1 }
 0xa9a   : > { %v9371_v25 = vadd.f32 %v9365_v60, %v9322_v49  ;;  %v15912_v62 = vpop.f32.mrb[5].mxu1  ;;  %v14954_v49 = vld [vmem:[%s20795_s12 + $0x8] sm:$0xf] }
 0xa9b   : > { %v9368_v2 = vpop.f32.mrb[6].mxu1 }
 0xa9c   : > { %v9420_v59 = vadd.f32 %v20001_v11, %v9371_v25  ;;  %v15913_v15 = vpop.f32.mrb[7].mxu1 }
 0xa9d   : > { %v14956_v15 = vld [vmem:[%s20795_s12 + $0xc] sm:$0xf] }
 0xaa1   : > { %v9463_v38 = vpop.f32.mrb[8].mxu1 }
 0xaa2   : > { %v9469_v13 = vadd.f32 %v9463_v38, %v9420_v59  ;;  %v15924_v10 = vpop.f32.mrb[9].mxu1  ;;  %v14958_v38 = vld [vmem:[%s20795_s12 + $0x10] sm:$0xf] }
 0xaa3   : > { %v9466_v44 = vpop.f32.mrb[10].mxu1 }
 0xaa4   : > { %v9526_v30 = vadd.f32 %v9520_v16, %v9469_v13  ;;  %v15925_v23 = vpop.f32.mrb[11].mxu1 }
 0xaa9   : > { %v9573_v27 = vpop.f32.mrb[12].mxu1 }
 0xaaa   : > { %v9579_v28 = vadd.f32 %v9573_v27, %v9526_v30  ;;  %v15936_v3 = vpop.f32.mrb[13].mxu1 }
 0xaab   : > { %v9576_v33 = vpop.f32.mrb[14].mxu1  ;;  %v14962_v3 = vld [vmem:[%s20795_s12 + $0x18] sm:$0xf] }
 0xaac   : > { %v9632_v21 = vadd.f32 %v9626_v14, %v9579_v28  ;;  %v15937_v48 = vpop.f32.mrb[15].mxu1  ;;  %v9954_v14 = vpop.permute.xlu1 %9953  ;;  %v14960_v28 = vld [vmem:[%s20795_s12 + $0x14] sm:$0xf] }
 0xab1   : > { %v9678_v37 = vpop.f32.mrb[16].mxu1 }
 0xab2   : > { %v9684_v50 = vadd.f32 %v9678_v37, %v9632_v21  ;;  %v15948_v52 = vpop.f32.mrb[17].mxu1 }
 0xab3   : > { %v9681_v17 = vpop.f32.mrb[18].mxu1  ;;  %v14964_v52 = vld [vmem:[%s20795_s12 + $0x1c] sm:$0xf] }
 0xab4   : > { %v9737_v43 = vadd.f32 %v9731_v34, %v9684_v50  ;;  %v15949_v19 = vpop.f32.mrb[19].mxu1  ;;  %v14966_v17 = vld [vmem:[%s20795_s12 + $0x20] sm:$0xf] }
 0xab9   : > { %v9784_v11 = vpop.f32.mrb[20].mxu1 }
 0xaba   : > { %v9790_v42 = vadd.f32 %v9784_v11, %v9737_v43  ;;  %v15960_v35 = vpop.f32.mrb[21].mxu1 }
 0xabb   : > { %v9787_v32 = vpop.f32.mrb[22].mxu1 }
 0xabc   : > { %v9843_v39 = vadd.f32 %v9837_v22, %v9790_v42  ;;  %v15961_v46 = vpop.f32.mrb[23].mxu1 }
 0xabd   : > { %v14970_v46 = vld [vmem:[%s20795_s12 + $0x28] sm:$0xf] }
 0xac1   : > { %v9890_v16 = vpop.f32.mrb[24].mxu1 }
 0xac2   : > { %v9896_v26 = vadd.f32 %v9890_v16, %v9843_v39  ;;  %v15972_v54 = vpop.f32.mrb[25].mxu1  ;;  %v14968_v39 = vld [vmem:[%s20795_s12 + $0x24] sm:$0xf] }
 0xac3   : > { %v9893_v20 = vpop.f32.mrb[26].mxu1 }
 0xac4   : > { %v9949_v41 = vadd.f32 %v9943_v6, %v9896_v26  ;;  %v15973_v31 = vpop.f32.mrb[27].mxu1 }
 0xac5   : > { %v14974_v31 = vld [vmem:[%s20795_s12 + $0x30] sm:$0xf] }
 0xac6   : > { %v9956_v1 = vadd.f32 %v9954_v14, %v9949_v41  ;;  %v14972_v41 = vld [vmem:[%s20795_s12 + $0x2c] sm:$0xf] }
 0xac8   : > { %v9957_v45 = vmax.f32 %v9956_v1, 0.0 }
 0xaca   : > { %v9958_v29 = vpack.c.bf16 %v9957_v45, %v9957_v45 }
 0xacc   : > { %14947 = vmatmul.mubr.msk.bf16.vlgmr.msra.gmra.mrb[28].mxu1 %vm10029_vm13, %v9958_v29 }
 0xacd   : > { %16000 = vmatprep.mubr.msk.bf16.mxu1 %vm17163_vm6, %v17160_v24 }
 0xb9f   : > { %v10073_v34 = vpop.f32.mrb[28].mxu1 }
 0xba0   : > { %v10075_v40 = vpop.f32.mrb[29].mxu1 }
 0xba1   : > { %v15126_v56 = vpack.c.bf16 %v10075_v40, %v10073_v34  ;;  %v10077_v22 = vpop.f32.mrb[30].mxu1 }
 0xba2   : > { %v10078_v53 = vpop.f32.mrb[31].mxu1  ;;  %v14978_v22 = vld [vmem:[%s20795_s12 + $0x38] sm:$0xf] }
 0xba3   : > { %10088 = vst.msk [vmem:[#allocation5] sm:$0xff] %vm17559_vm2, %v15126_v56  ;;  %vm21033_vm2 = vmmov %vm21013_vm14  ;;  %v14976_v56 = vld [vmem:[%s20795_s12 + $0x34] sm:$0xf] }
 0xbaa   : > { %v10091_v51 = vld [vmem:[#allocation5] sm:$0xf] }
 0xbab   : > { %v10098_v6 = vsel %vm21013_vm14, %v10091_v51, 0  ;;  %v14952_v57 = vcombine.low %v10091_v51, %v10091_v51  ;;  %v10955_v5 = vld [vmem:[#allocation5] sm:$0xff] }
 0xbac   : > { %15981 = vmatpush3.bf16.msra.mxu0 %v10098_v6  ;;  %v14983_v55 = vcombine.low %v10955_v5, %v10955_v5  ;;  %v14984_v47 = vcombine.high %v10955_v5, %v10955_v5  ;;  %v14980_v5 = vld [vmem:[%s20795_s12 + $0x3c] sm:$0xf] }
 0xbad   : > { %10243 = vrot.lane.b32.xlu0 %v14952_v57, %s20953_s24  ;;  %10192 = vrot.lane.b32.xlu1 %v14952_v57, %s20952_s25 }
 0xbae   : > { %15986 = vmatprep.subr.bf16.mxu0 %v17160_v24 }
 0xbaf   : > { %15983 = vmatmul.mubr.msk.bf16.vlgmr.msra.gmra.mrb[56].mxu0 %vm10093_vm3, %v10092_v58 }
 0xbb0   : > { %15987 = vmatpush3.bf16.msra.mxu0 %v10142_v0  ;;  %15988 = vmatprep.mubr.msk.bf16.mxu0 %vm17163_vm6, %v17160_v24 }
 0xbb1   : > { %10345 = vrot.lane.b32.xlu0 %v14952_v57, %s20956_s2  ;;  %10294 = vrot.lane.b32.xlu1 %v14952_v57, %s20955_s26 }
 0xbb2   : > { %15992 = vmatprep.subr.bf16.mxu0 %v17160_v24 }
 0xbb5   : > { %10447 = vrot.lane.b32.xlu0 %v14952_v57, %s21015_s22  ;;  %10396 = vrot.lane.b32.xlu1 %v14952_v57, %s21016_s28  ;;  %s21025_s22 = smov 92  }
 0xbb7   : > { %15989 = vmatmul.mubr.msk.bf16.vlgmr.msra.gmra.mrb[60].mxu0 %vm5299_vm1, %v10090_v18  ;;  %vm21034_vm1 = vmmov %vm21033_vm2 }
 0xbb8   : > { %15994 = vmatprep.mubr.msk.bf16.mxu0 %vm17163_vm6, %v17160_v24  ;;  %vm21035_vm13 = vmmov %vm21034_vm1 }
 0xbb9   : > { %10549 = vrot.lane.b32.xlu0 %v14952_v57, %s21017_s27  ;;  %10498 = vrot.lane.b32.xlu1 %v14952_v57, %s21018_s1  ;;  %s21026_s27 = smov 90   ;;  %s21027_s1 = smov 89   ;;  %vm21036_vm14 = vmmov %vm21034_vm1 }
 0xbbd   : > { %10651 = vrot.lane.b32.xlu0 %v14952_v57, %s20961_s7  ;;  %10600 = vrot.lane.b32.xlu1 %v14952_v57, %s21019_s29 }
 0xbc1   : > { %10753 = vrot.lane.b32.xlu0 %v14952_v57, %s21020_s3  ;;  %10702 = vrot.lane.b32.xlu1 %v14952_v57, %s21021_s4 }
 0xbc5   : > { %10855 = vrot.lane.b32.xlu0 %v14952_v57, %s21022_s30  ;;  %10804 = vrot.lane.b32.xlu1 %v14952_v57, %s21023_s23 }
 0xbc9   : > { %10963 = vrot.lane.b32.xlu0 %v14983_v55, %s21024_s5  ;;  %10906 = vrot.lane.b32.xlu1 %v14952_v57, %s21025_s22 }
 0xbcd   : > { %11017 = vrot.lane.b32.xlu0 %v14983_v55, %s21026_s27  ;;  %10965 = vrot.lane.b32.xlu1 %v14984_v47, %s21024_s5  ;;  %s21031_s5 = smov 77  }
 0xbd1   : > { %11071 = vrot.lane.b32.xlu0 %v14983_v55, %s21027_s1  ;;  %11019 = vrot.lane.b32.xlu1 %v14984_v47, %s21026_s27  ;;  %s21032_s27 = smov 76  }
 0xbd5   : > { %11125 = vrot.lane.b32.xlu0 %v14983_v55, %s20962_s0  ;;  %11073 = vrot.lane.b32.xlu1 %v14984_v47, %s21027_s1  ;;  %s20919_s1 = smov 111  }
 0xbd9   : > { %11179 = vrot.lane.b32.xlu0 %v14983_v55, %s21028_s8  ;;  %11127 = vrot.lane.b32.xlu1 %v14984_v47, %s20962_s0  ;;  %s20922_s0 = smov 120  }
 0xbdd   : > { %11233 = vrot.lane.b32.xlu0 %v14983_v55, %s21029_s9  ;;  %11181 = vrot.lane.b32.xlu1 %v14984_v47, %s21028_s8  ;;  %s20920_s8 = smov 109  }
 0xbe1   : > { %11287 = vrot.lane.b32.xlu0 %v14983_v55, %s21030_s10  ;;  %11235 = vrot.lane.b32.xlu1 %v14984_v47, %s21029_s9  ;;  %s20927_s9 = smov 96  }
 0xbe5   : > { %11341 = vrot.lane.b32.xlu0 %v14983_v55, %s21031_s5  ;;  %11289 = vrot.lane.b32.xlu1 %v14984_v47, %s21030_s10  ;;  %s17206_s10 = smov 119  }
 0xbe9   : > { %11395 = vrot.lane.b32.xlu0 %v14983_v55, %s21032_s27  ;;  %11343 = vrot.lane.b32.xlu1 %v14984_v47, %s21031_s5  ;;  %v14982_v55 = vld [vmem:[%s20795_s12 + $0x40] sm:$0xf]  ;;  %s20918_s5 = smov 118  }
 0xbed   : > { %11450 = vperm.xlu0 %16750, %v11447_v36   ;;  %11397 = vrot.lane.b32.xlu1 %v14984_v47, %s21032_s27  ;;  %s17210_s27 = smov 110  }
 0xc1f   : > { %v10193_v4 = vpop.permute.xlu1 %10192  ;;  %v10244_v63 = vpop.permute.xlu0 %10243 }
 0xc20   : > { %v10198_v7 = vsel %vm21033_vm2, %v10193_v4, 0  ;;  %v10249_v8 = vsel %vm21034_vm1, %v10244_v63, 0  ;;  %vm21037_vm2 = vmmov %vm21034_vm1 }
 0xc21   : > { %15993 = vmatpush3.bf16.msra.mxu0 %v10198_v7  ;;  %15999 = vmatpush3.bf16.msra.mxu1 %v10249_v8 }
 0xc22   : > { %16004 = vmatprep.subr.bf16.mxu0 %v17160_v24  ;;  %16010 = vmatprep.subr.bf16.mxu1 %v17160_v24 }
 0xc23   : > { %v10295_v12 = vpop.permute.xlu1 %10294  ;;  %v10346_v60 = vpop.permute.xlu0 %10345 }
 0xc24   : > { %v10300_v25 = vsel %vm21035_vm13, %v10295_v12, 0  ;;  %v10351_v62 = vsel %vm21036_vm14, %v10346_v60, 0  ;;  %15995 = vmatmul.mubr.msk.bf16.vlgmr.msra.gmra.mrb[64].mxu0 %vm10093_vm3, %v14951_v9  ;;  %16001 = vmatmul.mubr.msk.bf16.vlgmr.msra.gmra.mrb[32].mxu1 %vm10093_vm3, %v14954_v49  ;;  %vm21038_vm13 = vmmov %vm21034_vm1  ;;  %v14986_v9 = vld [vmem:[%s20795_s12 + $0x44] sm:$0xf]  ;;  %v14988_v49 = vld [vmem:[%s20795_s12 + $0x48] sm:$0xf] }
 0xc25   : > { %16005 = vmatpush3.bf16.msra.mxu0 %v10300_v25  ;;  %16011 = vmatpush3.bf16.msra.mxu1 %v10351_v62  ;;  %vm21039_vm14 = vmmov %vm21034_vm1 }
 0xc26   : > { %16006 = vmatprep.mubr.msk.bf16.mxu0 %vm17163_vm6, %v17160_v24  ;;  %16012 = vmatprep.mubr.msk.bf16.mxu1 %vm17163_vm6, %v17160_v24 }
 0xc27   : > { %v10397_v2 = vpop.permute.xlu1 %10396  ;;  %v10448_v59 = vpop.permute.xlu0 %10447  ;;  %16016 = vmatprep.subr.bf16.mxu0 %v17160_v24  ;;  %16022 = vmatprep.subr.bf16.mxu1 %v17160_v24 }
 0xc28   : > { %v10402_v44 = vsel %vm21037_vm2, %v10397_v2, 0  ;;  %v10453_v30 = vsel %vm21034_vm1, %v10448_v59, 0  ;;  %vm21040_vm2 = vmmov %vm21034_vm1 }
 0xc2b   : > { %v10499_v13 = vpop.permute.xlu1 %10498  ;;  %v10550_v10 = vpop.permute.xlu0 %10549 }
 0xc2c   : > { %16007 = vmatmul.mubr.msk.bf16.vlgmr.msra.gmra.mrb[68].mxu0 %vm10093_vm3, %v14956_v15  ;;  %16013 = vmatmul.mubr.msk.bf16.vlgmr.msra.gmra.mrb[36].mxu1 %vm10093_vm3, %v14958_v38  ;;  %v10504_v21 = vsel %vm21038_vm13, %v10499_v13, 0  ;;  %v10555_v48 = vsel %vm21039_vm14, %v10550_v10, 0  ;;  %vm21041_vm13 = vmmov %vm21034_vm1  ;;  %v14990_v38 = vld [vmem:[%s20795_s12 + $0x4c] sm:$0xf]  ;;  %v14992_v13 = vld [vmem:[%s20795_s12 + $0x50] sm:$0xf] }
 0xc2d   : > { %16017 = vmatpush3.bf16.msra.mxu0 %v10402_v44  ;;  %16023 = vmatpush3.bf16.msra.mxu1 %v10453_v30  ;;  %vm21042_vm14 = vmmov %vm21034_vm1 }
 0xc2e   : > { %16018 = vmatprep.mubr.msk.bf16.mxu0 %vm17163_vm6, %v17160_v24  ;;  %16024 = vmatprep.mubr.msk.bf16.mxu1 %vm17163_vm6, %v17160_v24 }
 0xc2f   : > { %v10601_v23 = vpop.permute.xlu1 %10600  ;;  %v10652_v27 = vpop.permute.xlu0 %10651  ;;  %16028 = vmatprep.subr.bf16.mxu0 %v17160_v24  ;;  %16034 = vmatprep.subr.bf16.mxu1 %v17160_v24 }
 0xc30   : > { %v10606_v11 = vsel %vm21040_vm2, %v10601_v23, 0  ;;  %v10657_v42 = vsel %vm21034_vm1, %v10652_v27, 0  ;;  %vm21043_vm2 = vmmov %vm21034_vm1 }
 0xc33   : > { %v10703_v33 = vpop.permute.xlu1 %10702  ;;  %v10754_v37 = vpop.permute.xlu0 %10753 }
 0xc34   : > { %16019 = vmatmul.mubr.msk.bf16.vlgmr.msra.gmra.mrb[72].mxu0 %vm10093_vm3, %v14960_v28  ;;  %16025 = vmatmul.mubr.msk.bf16.vlgmr.msra.gmra.mrb[40].mxu1 %vm10093_vm3, %v14962_v3  ;;  %v10708_v16 = vsel %vm21041_vm13, %v10703_v33, 0  ;;  %v10759_v26 = vsel %vm21042_vm14, %v10754_v37, 0  ;;  %vm21044_vm13 = vmmov %vm21034_vm1  ;;  %v14994_v33 = vld [vmem:[%s20795_s12 + $0x54] sm:$0xf] }
 0xc35   : > { %16029 = vmatpush3.bf16.msra.mxu0 %v10504_v21  ;;  %16035 = vmatpush3.bf16.msra.mxu1 %v10555_v48  ;;  %vm21045_vm14 = vmmov %vm21034_vm1  ;;  %v14996_v21 = vld [vmem:[%s20795_s12 + $0x58] sm:$0xf] }
 0xc36   : > { %16030 = vmatprep.mubr.msk.bf16.mxu0 %vm17163_vm6, %v17160_v24  ;;  %16036 = vmatprep.mubr.msk.bf16.mxu1 %vm17163_vm6, %v17160_v24 }
 0xc37   : > { %v10805_v50 = vpop.permute.xlu1 %10804  ;;  %16040 = vmatprep.subr.bf16.mxu0 %v17160_v24  ;;  %16046 = vmatprep.subr.bf16.mxu1 %v17160_v24  ;;  %v10856_v43 = vpop.permute.xlu0 %10855 }
 0xc38   : > { %v10810_v1 = vsel %vm21043_vm2, %v10805_v50, 0  ;;  %v10861_v45 = vsel %vm21034_vm1, %v10856_v43, 0  ;;  %vm21047_vm2 = vmmov %vm21034_vm1  ;;  %v14998_v50 = vld [vmem:[%s20795_s12 + $0x5c] sm:$0xf] }
 0xc3b   : > { %v10907_v19 = vpop.permute.xlu1 %10906  ;;  %v10964_v32 = vpop.permute.xlu0 %10963 }
 0xc3c   : > { %16031 = vmatmul.mubr.msk.bf16.vlgmr.msra.gmra.mrb[76].mxu0 %vm10093_vm3, %v14964_v52  ;;  %16037 = vmatmul.mubr.msk.bf16.vlgmr.msra.gmra.mrb[44].mxu1 %vm10093_vm3, %v14966_v17  ;;  %v10912_v51 = vsel %vm21044_vm13, %v10907_v19, 0  ;;  %vm21051_vm13 = vmmov %vm21034_vm1  ;;  %v15000_v52 = vld [vmem:[%s20795_s12 + $0x60] sm:$0xf] }
 0xc3d   : > { %16041 = vmatpush3.bf16.msra.mxu0 %v10606_v11  ;;  %16047 = vmatpush3.bf16.msra.mxu1 %v10657_v42 }
 0xc3e   : > { %16042 = vmatprep.mubr.msk.bf16.mxu0 %vm17163_vm6, %v17160_v24  ;;  %16048 = vmatprep.mubr.msk.bf16.mxu1 %vm17163_vm6, %v17160_v24 }
 0xc3f   : > { %v10966_v35 = vpop.permute.xlu1 %10965  ;;  %16052 = vmatprep.subr.bf16.mxu0 %v17160_v24  ;;  %16058 = vmatprep.subr.bf16.mxu1 %v17160_v24  ;;  %v11018_v20 = vpop.permute.xlu0 %11017 }
 0xc40   : > { %v10967_v40 = vsel %vm9480_vm15, %v10964_v32, %v10966_v35  ;;  %vm21046_vm15 = vmmov %vm21034_vm1 }
 0xc41   : > { %v10972_v6 = vsel %vm21045_vm14, %v10967_v40, 0 }
 0xc43   : > { %v11020_v54 = vpop.permute.xlu1 %11019  ;;  %v11072_v29 = vpop.permute.xlu0 %11071 }
 0xc44   : > { %16043 = vmatmul.mubr.msk.bf16.vlgmr.msra.gmra.mrb[80].mxu0 %vm10093_vm3, %v14968_v39  ;;  %16049 = vmatmul.mubr.msk.bf16.vlgmr.msra.gmra.mrb[48].mxu1 %vm10093_vm3, %v14970_v46  ;;  %v11021_v0 = vsel %vm9533_vm5, %v11018_v20, %v11020_v54  ;;  %vm21049_vm5 = vmmov %vm21034_vm1 }
 0xc45   : > { %16053 = vmatpush3.bf16.msra.mxu0 %v10708_v16  ;;  %16059 = vmatpush3.bf16.msra.mxu1 %v10759_v26  ;;  %v11026_v47 = vsel %vm21046_vm15, %v11021_v0, 0  ;;  %vm11557_vm15 = vcmask 519168  }
 0xc46   : > { %16054 = vmatprep.mubr.msk.bf16.mxu0 %vm17163_vm6, %v17160_v24  ;;  %16060 = vmatprep.mubr.msk.bf16.mxu1 %vm17163_vm6, %v17160_v24 }
 0xc47   : > { %16064 = vmatprep.subr.bf16.mxu0 %v17160_v24  ;;  %16070 = vmatprep.subr.bf16.mxu1 %v17160_v24  ;;  %v11074_v14 = vpop.permute.xlu1 %11073  ;;  %v11126_v53 = vpop.permute.xlu0 %11125 }
 0xc48   : > { %v11075_v18 = vsel %vm9586_vm8, %v11072_v29, %v11074_v14  ;;  %vm21048_vm8 = vcmask 719872  }
 0xc49   : > { %v11080_v36 = vsel %vm21047_vm2, %v11075_v18, 0 }
 0xc4b   : > { %v11128_v34 = vpop.permute.xlu1 %11127  ;;  %v11180_v58 = vpop.permute.xlu0 %11179 }
 0xc4c   : > { %16055 = vmatmul.mubr.msk.bf16.vlgmr.msra.gmra.mrb[84].mxu0 %vm10093_vm3, %v14972_v41  ;;  %16061 = vmatmul.mubr.msk.bf16.vlgmr.msra.gmra.mrb[52].mxu1 %vm10093_vm3, %v14974_v31  ;;  %v11129_v7 = vsel %vm21048_vm8, %v11126_v53, %v11128_v34 }
 0xc4d   : > { %16065 = vmatpush3.bf16.msra.mxu0 %v10810_v1  ;;  %16071 = vmatpush3.bf16.msra.mxu1 %v10861_v45  ;;  %v11134_v60 = vsel %vm21049_vm5, %v11129_v7, 0 }
 0xc4e   : > { %16066 = vmatprep.mubr.msk.bf16.mxu0 %vm17163_vm6, %v17160_v24  ;;  %16072 = vmatprep.mubr.msk.bf16.mxu1 %vm17163_vm6, %v17160_v24 }
 0xc4f   : > { %16076 = vmatprep.subr.bf16.mxu0 %v17160_v24  ;;  %16082 = vmatprep.subr.bf16.mxu1 %v17160_v24  ;;  %v11182_v57 = vpop.permute.xlu1 %11181  ;;  %v11234_v63 = vpop.permute.xlu0 %11233 }
 0xc50   : > { %v11183_v8 = vsel %vm9691_vm9, %v11180_v58, %v11182_v57  ;;  %vm21050_vm9 = vmmov %vm21034_vm1 }
 0xc51   : > { %v11188_v25 = vsel %vm21034_vm1, %v11183_v8, 0 }
 0xc53   : > { %v11236_v4 = vpop.permute.xlu1 %11235  ;;  %v11288_v62 = vpop.permute.xlu0 %11287 }
 0xc54   : > { %16067 = vmatmul.mubr.msk.bf16.vlgmr.msra.gmra.mrb[88].mxu0 %vm10093_vm3, %v14976_v56  ;;  %16073 = vmatmul.mubr.msk.bf16.vlgmr.msra.gmra.mrb[56].mxu1 %vm10093_vm3, %v14978_v22  ;;  %v11237_v59 = vsel %vm9744_vm11, %v11234_v63, %v11236_v4 }
 0xc55   : > { %16077 = vmatpush3.bf16.msra.mxu0 %v10912_v51  ;;  %16083 = vmatpush3.bf16.msra.mxu1 %v10972_v6  ;;  %v11242_v44 = vsel %vm21050_vm9, %v11237_v59, 0 }
 0xc56   : > { %16078 = vmatprep.mubr.msk.bf16.mxu0 %vm17163_vm6, %v17160_v24  ;;  %16084 = vmatprep.mubr.msk.bf16.mxu1 %vm17163_vm6, %v17160_v24 }
 0xc57   : > { %16088 = vmatprep.subr.bf16.mxu0 %v17160_v24  ;;  %16094 = vmatprep.subr.bf16.mxu1 %v17160_v24  ;;  %v11290_v12 = vpop.permute.xlu1 %11289  ;;  %v11342_v10 = vpop.permute.xlu0 %11341 }
 0xc58   : > { %v11291_v15 = vsel %vm9797_vm0, %v11288_v62, %v11290_v12  ;;  %vm21052_vm0 = vmmov %vm21034_vm1 }
 0xc59   : > { %v11296_v30 = vsel %vm21051_vm13, %v11291_v15, 0  ;;  %vm21053_vm14 = vmmov %vm21052_vm0 }
 0xc5a   : > { %vm21055_vm2 = vmmov %vm21052_vm0 }
 0xc5b   : > { %v11344_v2 = vpop.permute.xlu1 %11343  ;;  %v11396_v27 = vpop.permute.xlu0 %11395  ;;  %vm21056_vm8 = vmmov %vm21052_vm0 }
 0xc5c   : > { %16079 = vmatmul.mubr.msk.bf16.vlgmr.msra.gmra.mrb[92].mxu0 %vm10093_vm3, %v14980_v5  ;;  %16085 = vmatmul.mubr.msk.bf16.vlgmr.msra.gmra.mrb[60].mxu1 %vm10093_vm3, %v14982_v55  ;;  %v11345_v28 = vsel %vm9850_vm12, %v11342_v10, %v11344_v2  ;;  %vm11510_vm12 = vcmask 1047552   ;;  %vm21057_vm5 = vmmov %vm21052_vm0 }
 0xc5d   : > { %16089 = vmatpush3.bf16.msra.mxu0 %v11026_v47  ;;  %16095 = vmatpush3.bf16.msra.mxu1 %v11080_v36  ;;  %v11350_v48 = vsel %vm21052_vm0, %v11345_v28, 0  ;;  %vm21058_vm1 = vmmov %vm21052_vm0 }
 0xc5e   : > { %16090 = vmatprep.mubr.msk.bf16.mxu0 %vm17163_vm6, %v17160_v24  ;;  %16096 = vmatprep.mubr.msk.bf16.mxu1 %vm17163_vm6, %v17160_v24  ;;  %vm21059_vm9 = vmmov %vm21052_vm0 }
 0xc5f   : > { %16100 = vmatprep.subr.bf16.mxu0 %v17160_v24  ;;  %16106 = vmatprep.subr.bf16.mxu1 %v17160_v24  ;;  %v11398_v23 = vpop.permute.xlu1 %11397  ;;  %vm21060_vm13 = vmmov %vm21052_vm0 }
 0xc60   : > { %v11399_v3 = vsel %vm9903_vm10, %v11396_v27, %v11398_v23  ;;  %vm11509_vm10 = vcmask 1046528  }
 0xc61   : > { %v11404_v37 = vsel %vm21053_vm14, %v11399_v3, 0  ;;  %vm21061_vm14 = vmmov %vm21052_vm0 }
 0xc64   : > { %16091 = vmatmul.mubr.msk.bf16.vlgmr.msra.gmra.mrb[96].mxu0 %vm10093_vm3, %v14986_v9  ;;  %16097 = vmatmul.mubr.msk.bf16.vlgmr.msra.gmra.mrb[64].mxu1 %vm10093_vm3, %v14988_v49 }
 0xc65   : > { %16101 = vmatpush3.bf16.msra.mxu0 %v11134_v60  ;;  %16107 = vmatpush3.bf16.msra.mxu1 %v11188_v25 }
 0xc66   : > { %16102 = vmatprep.mubr.msk.bf16.mxu0 %vm17163_vm6, %v17160_v24  ;;  %16108 = vmatprep.mubr.msk.bf16.mxu1 %vm17163_vm6, %v17160_v24 }
 0xc67   : > { %16112 = vmatprep.subr.bf16.mxu0 %v17160_v24  ;;  %16118 = vmatprep.subr.bf16.mxu1 %v17160_v24 }
 0xc6c   : > { %16103 = vmatmul.mubr.msk.bf16.vlgmr.msra.gmra.mrb[100].mxu0 %vm10093_vm3, %v14990_v38  ;;  %16109 = vmatmul.mubr.msk.bf16.vlgmr.msra.gmra.mrb[68].mxu1 %vm10093_vm3, %v14992_v13 }
 0xc6d   : > { %16113 = vmatpush3.bf16.msra.mxu0 %v11242_v44  ;;  %16119 = vmatpush3.bf16.msra.mxu1 %v11296_v30 }
 0xc6e   : > { %16114 = vmatprep.mubr.msk.bf16.mxu0 %vm17163_vm6, %v17160_v24  ;;  %16120 = vmatprep.mubr.msk.bf16.mxu1 %vm17163_vm6, %v17160_v24 }
 0xc6f   : > { %16124 = vmatprep.subr.bf16.mxu0 %v17160_v24  ;;  %16130 = vmatprep.subr.bf16.mxu1 %v17160_v24 }
 0xc74   : > { %16115 = vmatmul.mubr.msk.bf16.vlgmr.msra.gmra.mrb[104].mxu0 %vm10093_vm3, %v14994_v33  ;;  %16121 = vmatmul.mubr.msk.bf16.vlgmr.msra.gmra.mrb[72].mxu1 %vm10093_vm3, %v14996_v21 }
 0xc75   : > { %16125 = vmatpush3.bf16.msra.mxu0 %v11350_v48  ;;  %16131 = vmatpush3.bf16.msra.mxu1 %v11404_v37 }
 0xc76   : > { %16126 = vmatprep.mubr.msk.bf16.mxu0 %vm17163_vm6, %v17160_v24  ;;  %16132 = vmatprep.mubr.msk.bf16.mxu1 %vm17163_vm6, %v17160_v24 }
 0xc77   : > { %16136 = vmatprep.subr.bf16.mxu0 %v17160_v24  ;;  %16150 = vmatprep.subr.bf16.mxu1 %v17160_v24 }
 0xc7c   : > { %16127 = vmatmul.mubr.msk.bf16.vlgmr.msra.gmra.mrb[108].mxu0 %vm10093_vm3, %v14998_v50  ;;  %16133 = vmatmul.mubr.msk.bf16.vlgmr.msra.gmra.mrb[76].mxu1 %vm10093_vm3, %v15000_v52 }
 0xc7d   : > { %16146 = vmatprep.mubr.msk.bf16.mxu0 %vm17163_vm6, %v17160_v24  ;;  %16152 = vmatprep.mubr.msk.bf16.mxu1 %vm17163_vm6, %v17160_v24 }
 0xc82   : > { %v10134_v17 = vpop.f32.mrb[56].mxu0 }
 0xc83   : > { %v15984_v43 = vpop.f32.mrb[57].mxu0 }
 0xc84   : > { %v10137_v19 = vpop.f32.mrb[58].mxu0 }
 0xc85   : > { %v15985_v11 = vpop.f32.mrb[59].mxu0 }
 0xc8a   : > { %v10181_v42 = vpop.f32.mrb[60].mxu0 }
 0xc8b   : > { %v10182_v35 = vadd.f32 %v10181_v42, %v10134_v17  ;;  %v15990_v32 = vpop.f32.mrb[61].mxu0 }
 0xc8c   : > { %v10184_v39 = vpop.f32.mrb[62].mxu0 }
 0xc8d   : > { %v15991_v46 = vpop.f32.mrb[63].mxu0 }
 0xcf7   : > { %v10234_v16 = vpop.f32.mrb[64].mxu0  ;;  %v10285_v26 = vpop.f32.mrb[32].mxu1 }
 0xcf8   : > { %v10240_v54 = vadd.f32 %v10234_v16, %v10182_v35  ;;  %v15996_v20 = vpop.f32.mrb[65].mxu0  ;;  %v16002_v41 = vpop.f32.mrb[33].mxu1 }
 0xcf9   : > { %v10237_v31 = vpop.f32.mrb[66].mxu0  ;;  %v10288_v14 = vpop.f32.mrb[34].mxu1 }
 0xcfa   : > { %v10291_v1 = vadd.f32 %v10285_v26, %v10240_v54  ;;  %v15997_v45 = vpop.f32.mrb[67].mxu0  ;;  %v16003_v29 = vpop.f32.mrb[35].mxu1 }
 0xcff   : > { %v10336_v34 = vpop.f32.mrb[68].mxu0  ;;  %v10387_v40 = vpop.f32.mrb[36].mxu1 }
 0xd00   : > { %v10342_v56 = vadd.f32 %v10336_v34, %v10291_v1  ;;  %v16008_v22 = vpop.f32.mrb[69].mxu0  ;;  %v16014_v53 = vpop.f32.mrb[37].mxu1 }
 0xd01   : > { %v10339_v51 = vpop.f32.mrb[70].mxu0  ;;  %v10390_v6 = vpop.f32.mrb[38].mxu1 }
 0xd02   : > { %v10393_v57 = vadd.f32 %v10387_v40, %v10342_v56  ;;  %v16009_v58 = vpop.f32.mrb[71].mxu0  ;;  %v16015_v0 = vpop.f32.mrb[39].mxu1 }
 0xd07   : > { %v10438_v18 = vpop.f32.mrb[72].mxu0  ;;  %v10489_v5 = vpop.f32.mrb[40].mxu1 }
 0xd08   : > { %v10444_v55 = vadd.f32 %v10438_v18, %v10393_v57  ;;  %v16020_v47 = vpop.f32.mrb[73].mxu0  ;;  %v16026_v36 = vpop.f32.mrb[41].mxu1 }
 0xd09   : > { %v10441_v4 = vpop.f32.mrb[74].mxu0  ;;  %v10492_v63 = vpop.f32.mrb[42].mxu1 }
 0xd0a   : > { %v10495_v7 = vadd.f32 %v10489_v5, %v10444_v55  ;;  %v16021_v8 = vpop.f32.mrb[75].mxu0  ;;  %v16027_v9 = vpop.f32.mrb[43].mxu1 }
 0xd0f   : > { %v10540_v49 = vpop.f32.mrb[76].mxu0  ;;  %v10591_v12 = vpop.f32.mrb[44].mxu1 }
 0xd10   : > { %v10546_v60 = vadd.f32 %v10540_v49, %v10495_v7  ;;  %v16032_v25 = vpop.f32.mrb[77].mxu0  ;;  %v16038_v62 = vpop.f32.mrb[45].mxu1 }
 0xd11   : > { %v10543_v2 = vpop.f32.mrb[78].mxu0  ;;  %v10594_v59 = vpop.f32.mrb[46].mxu1 }
 0xd12   : > { %v10597_v15 = vadd.f32 %v10591_v12, %v10546_v60  ;;  %v16033_v38 = vpop.f32.mrb[79].mxu0  ;;  %v16039_v13 = vpop.f32.mrb[47].mxu1 }
 0xd17   : > { %v10642_v10 = vpop.f32.mrb[80].mxu0  ;;  %v10693_v44 = vpop.f32.mrb[48].mxu1 }
 0xd18   : > { %v10648_v30 = vadd.f32 %v10642_v10, %v10597_v15  ;;  %v16044_v23 = vpop.f32.mrb[81].mxu0  ;;  %v16050_v27 = vpop.f32.mrb[49].mxu1 }
 0xd19   : > { %v10645_v28 = vpop.f32.mrb[82].mxu0  ;;  %v10696_v3 = vpop.f32.mrb[50].mxu1 }
 0xd1a   : > { %v10699_v33 = vadd.f32 %v10693_v44, %v10648_v30  ;;  %v16045_v21 = vpop.f32.mrb[83].mxu0  ;;  %v16051_v48 = vpop.f32.mrb[51].mxu1 }
 0xd1b   : > { %v17140_v21 = vld [vmem:[%s20798_s15] sm:$0xff]  }
 0xd1c   : > { %16137 = vmatpush3.bf16.msra.mxu0 %v17140_v21 }
 0xd1d   : > { %16138 = vmatprep.subr.bf16.mxu0 %v17160_v24 }
 0xd1f   : > { %v10744_v37 = vpop.f32.mrb[84].mxu0  ;;  %v10795_v50 = vpop.f32.mrb[52].mxu1 }
 0xd20   : > { %v10750_v52 = vadd.f32 %v10744_v37, %v10699_v33  ;;  %v16056_v17 = vpop.f32.mrb[85].mxu0  ;;  %v16062_v43 = vpop.f32.mrb[53].mxu1 }
 0xd21   : > { %v10747_v19 = vpop.f32.mrb[86].mxu0  ;;  %v10798_v11 = vpop.f32.mrb[54].mxu1 }
 0xd22   : > { %v10801_v42 = vadd.f32 %v10795_v50, %v10750_v52  ;;  %v16057_v35 = vpop.f32.mrb[87].mxu0  ;;  %v16063_v32 = vpop.f32.mrb[55].mxu1  ;;  %v17141_v50 = vld [vmem:[%s20798_s15 + $0x8] sm:$0xff]  }
 0xd23   : > { %16139 = vmatpush3.bf16.msra.mxu0 %v17141_v50 }
 0xd24   : > { %16140 = vmatprep.subr.bf16.mxu0 %v17160_v24 }
 0xd27   : > { %v10846_v39 = vpop.f32.mrb[88].mxu0  ;;  %v10897_v46 = vpop.f32.mrb[56].mxu1 }
 0xd28   : > { %v10852_v16 = vadd.f32 %v10846_v39, %v10801_v42  ;;  %v16068_v26 = vpop.f32.mrb[89].mxu0  ;;  %v16074_v54 = vpop.f32.mrb[57].mxu1 }
 0xd29   : > { %v10849_v20 = vpop.f32.mrb[90].mxu0  ;;  %v10900_v41 = vpop.f32.mrb[58].mxu1  ;;  %v17143_v54 = vld [vmem:[%s20798_s15 + $0x18] sm:$0xff]  }
 0xd2a   : > { %v10903_v31 = vadd.f32 %v10897_v46, %v10852_v16  ;;  %v16069_v14 = vpop.f32.mrb[91].mxu0  ;;  %v16075_v1 = vpop.f32.mrb[59].mxu1  ;;  %v17142_v46 = vld [vmem:[%s20798_s15 + $0x10] sm:$0xff]   ;;  %v11511_v20 = vsel %vm11509_vm10, 4294967295, %v17187_v61  ;;  %v17144_v41 = vld [vmem:[%s20798_s15 + $0x20] sm:$0xff]   ;;  %vm21062_vm10 = vmmov %vm21052_vm0 }
 0xd2b   : > { %v11451_v39 = vpop.permute.xlu0 %11450  ;;  %16141 = vmatpush3.bf16.msra.mxu0 %v17142_v46  ;;  %v15030_v46 = vld [vmem:[%s20799_s16 + $0x2c] sm:$0xf] }
 0xd2c   : > { %16142 = vmatprep.subr.bf16.mxu0 %v17160_v24 }
 0xd2f   : > { %v10948_v45 = vpop.f32.mrb[92].mxu0  ;;  %v11008_v29 = vpop.f32.mrb[60].mxu1  ;;  %16143 = vmatpush3.bf16.msra.mxu0 %v17143_v54 }
 0xd30   : > { %v10954_v34 = vadd.f32 %v10948_v45, %v10903_v31  ;;  %v16080_v40 = vpop.f32.mrb[93].mxu0  ;;  %v16086_v56 = vpop.f32.mrb[61].mxu1  ;;  %16144 = vmatprep.subr.bf16.mxu0 %v17160_v24  ;;  %v11512_v31 = vsel %vm11510_vm12, %v11511_v20, 0  ;;  %vm21063_vm12 = vmmov %vm21052_vm0 }
 0xd31   : > { %v10951_v22 = vpop.f32.mrb[94].mxu0  ;;  %v11011_v53 = vpop.f32.mrb[62].mxu1  ;;  %v11514_v14 = vand.u32 %v17144_v41, %v11512_v31  ;;  %v15034_v31 = vld [vmem:[%s20799_s16 + $0x34] sm:$0xf] }
 0xd32   : > { %v11014_v51 = vadd.f32 %v11008_v29, %v10954_v34  ;;  %v16081_v6 = vpop.f32.mrb[95].mxu0  ;;  %v16087_v57 = vpop.f32.mrb[63].mxu1 }
 0xd33   : > { %16145 = vmatpush3.bf16.msra.mxu0 %v11514_v14  ;;  %v15040_v14 = vld [vmem:[%s20799_s16 + $0x40] sm:$0xf] }
 0xd34   : > { %16162 = vmatprep.subr.bf16.mxu0 %v17160_v24 }
 0xd37   : > { %v11062_v58 = vpop.f32.mrb[96].mxu0  ;;  %v11116_v0 = vpop.f32.mrb[64].mxu1 }
 0xd38   : > { %v11068_v18 = vadd.f32 %v11062_v58, %v11014_v51  ;;  %v16092_v5 = vpop.f32.mrb[97].mxu0  ;;  %v16098_v55 = vpop.f32.mrb[65].mxu1  ;;  %v12833_v58 = vld [vmem:[%s20800_s17] sm:$0xff] }
 0xd39   : > { %v11065_v47 = vpop.f32.mrb[98].mxu0  ;;  %v11119_v36 = vpop.f32.mrb[66].mxu1 }
 0xd3a   : > { %v11122_v4 = vadd.f32 %v11116_v0, %v11068_v18  ;;  %v16093_v63 = vpop.f32.mrb[99].mxu0  ;;  %v16099_v7 = vpop.f32.mrb[67].mxu1  ;;  %v15008_v36 = vld [vmem:[%s20799_s16 + $0x4] sm:$0xf] }
 0xd3f   : > { %v11170_v8 = vpop.f32.mrb[100].mxu0  ;;  %v11224_v9 = vpop.f32.mrb[68].mxu1 }
 0xd40   : > { %v11176_v49 = vadd.f32 %v11170_v8, %v11122_v4  ;;  %v16104_v12 = vpop.f32.mrb[101].mxu0  ;;  %v16110_v60 = vpop.f32.mrb[69].mxu1  ;;  %v15012_v4 = vld [vmem:[%s20799_s16 + $0x8] sm:$0xf] }
 0xd41   : > { %v11173_v25 = vpop.f32.mrb[102].mxu0  ;;  %v11227_v62 = vpop.f32.mrb[70].mxu1  ;;  %v11560_v12 = vld [vmem:[%s20799_s16] sm:$0xf]  ;;  %v15016_v60 = vld [vmem:[%s20799_s16 + $0x10] sm:$0xf] }
 0xd42   : > { %v11230_v2 = vadd.f32 %v11224_v9, %v11176_v49  ;;  %v16105_v59 = vpop.f32.mrb[103].mxu0  ;;  %v16111_v15 = vpop.f32.mrb[71].mxu1 }
 0xd43   : > { %v15014_v15 = vld [vmem:[%s20799_s16 + $0xc] sm:$0xf] }
 0xd47   : > { %v11278_v38 = vpop.f32.mrb[104].mxu0  ;;  %v11332_v13 = vpop.f32.mrb[72].mxu1 }
 0xd48   : > { %v11284_v10 = vadd.f32 %v11278_v38, %v11230_v2  ;;  %v16116_v44 = vpop.f32.mrb[105].mxu0  ;;  %v16122_v30 = vpop.f32.mrb[73].mxu1  ;;  %v15020_v38 = vld [vmem:[%s20799_s16 + $0x18] sm:$0xf] }
 0xd49   : > { %v11281_v23 = vpop.f32.mrb[106].mxu0  ;;  %v11335_v27 = vpop.f32.mrb[74].mxu1 }
 0xd4a   : > { %v11338_v28 = vadd.f32 %v11332_v13, %v11284_v10  ;;  %v16117_v3 = vpop.f32.mrb[107].mxu0  ;;  %v16123_v33 = vpop.f32.mrb[75].mxu1  ;;  %v15018_v23 = vld [vmem:[%s20799_s16 + $0x14] sm:$0xf]  ;;  %v15024_v27 = vld [vmem:[%s20799_s16 + $0x20] sm:$0xf] }
 0xd4f   : > { %v11386_v48 = vpop.f32.mrb[108].mxu0  ;;  %v11440_v37 = vpop.f32.mrb[76].mxu1 }
 0xd50   : > { %v11392_v52 = vadd.f32 %v11386_v48, %v11338_v28  ;;  %v16128_v17 = vpop.f32.mrb[109].mxu0  ;;  %v16134_v43 = vpop.f32.mrb[77].mxu1  ;;  %v15022_v48 = vld [vmem:[%s20799_s16 + $0x1c] sm:$0xf] }
 0xd51   : > { %v11389_v19 = vpop.f32.mrb[110].mxu0  ;;  %v11443_v11 = vpop.f32.mrb[78].mxu1 }
 0xd52   : > { %v11446_v42 = vadd.f32 %v11440_v37, %v11392_v52  ;;  %v16129_v35 = vpop.f32.mrb[111].mxu0  ;;  %v16135_v32 = vpop.f32.mrb[79].mxu1  ;;  %v15028_v37 = vld [vmem:[%s20799_s16 + $0x28] sm:$0xf]  ;;  %v15026_v19 = vld [vmem:[%s20799_s16 + $0x24] sm:$0xf] }
 0xd53   : > { %v15032_v11 = vld [vmem:[%s20799_s16 + $0x30] sm:$0xf] }
 0xd54   : > { %v11453_v16 = vadd.f32 %v11451_v39, %v11446_v42 }
 0xd56   : > { %v11454_v26 = vmax.f32 %v11453_v16, 0.0  ;;  %v15036_v16 = vld [vmem:[%s20799_s16 + $0x38] sm:$0xf] }
 0xd58   : > { %11456 = vrot.lane.b32.xlu1 %v11454_v26, %s20952_s25 }
 0xdca   : > { %v11457_v1 = vpop.permute.xlu1 %11456 }
 0xdcb   : > { %v11459_v45 = vmax.f32 %v11454_v26, %v11457_v1 }
 0xdcd   : > { %11461 = vrot.lane.b32.xlu0 %v11459_v45, %s21016_s28 }
 0xe3f   : > { %v11462_v29 = vpop.permute.xlu0 %11461 }
 0xe40   : > { %v11464_v34 = vmax.f32 %v11459_v45, %v11462_v29 }
 0xe42   : > { %v11465_v40 = vpack.c.bf16 %v11464_v34, %v11464_v34 }
 0xe44   : > { %16147 = vmatmul.mubr.msk.bf16.vlgmr.msra.gmra.mrb[112].mxu0 %vm9744_vm11, %v11465_v40  ;;  %vm21054_vm11 = vmmov %vm21052_vm0  ;;  %v15038_v40 = vld [vmem:[%s20799_s16 + $0x3c] sm:$0xf] }
 0xe45   : > { %16164 = vmatprep.mubr.msk.bf16.mxu0 %vm17163_vm6, %v17160_v24 }
 0xf17   : > { %v11550_v61 = vpop.f32.mrb[112].mxu0 }
 0xf18   : > { %v11556_v56 = vpack.c.bf16 %v11550_v61, %v11550_v61  ;;  %v16148_v22 = vpop.f32.mrb[113].mxu0  ;;  %v15044_v61 = vld [vmem:[%s20799_s16 + $0x48] sm:$0xf] }
 0xf19   : > { %v11553_v53 = vpop.f32.mrb[114].mxu0 }
 0xf1a   : > { %11558 = vst.msk [vmem:[#allocation6] sm:$0xf] %vm11557_vm15, %v11556_v56  ;;  %v16149_v51 = vpop.f32.mrb[115].mxu0 }
 0xf21   : > { %v11559_v6 = vld [vmem:[#allocation6] sm:$0xf] }
 0xf22   : > { %v15009_v57 = vcombine.low %v11559_v6, %v11559_v6  ;;  %v17146_v0 = vld [vmem:[#allocation6] ss:$0 sps:$4 sm:$0xff]   ;;  %v11618_v8 = vsel %vm21057_vm5, %v11559_v6, 0  ;;  %vm21067_vm5 = vmmov %vm21052_vm0  ;;  %v15042_v6 = vld [vmem:[%s20799_s16 + $0x44] sm:$0xf] }
 0xf24   : > { %11662 = vrot.lane.b32.xlu0 %v15009_v57, %s20953_s24  ;;  %11566 = vrot.lane.b32.xlu1 %v15009_v57, %s20952_s25 }
 0xf28   : > { %11764 = vrot.lane.b32.xlu0 %v15009_v57, %s20956_s2  ;;  %11713 = vrot.lane.b32.xlu1 %v15009_v57, %s20955_s26 }
 0xf2c   : > { %11866 = vrot.lane.b32.xlu0 %v15009_v57, %s17206_s10  ;;  %11815 = vrot.lane.b32.xlu1 %v15009_v57, %s20922_s0  ;;  %s21079_s0 = smov 120  }
 0xf30   : > { %11968 = vrot.lane.b32.xlu0 %v15009_v57, %s20921_s11  ;;  %11917 = vrot.lane.b32.xlu1 %v15009_v57, %s20918_s5  ;;  %s20925_s5 = smov 94   ;;  %s21080_s11 = smov 117  }
 0xf34   : > { %12070 = vrot.lane.b32.xlu0 %v15009_v57, %s21019_s29  ;;  %12019 = vrot.lane.b32.xlu1 %v15009_v57, %s21016_s28 }
 0xf38   : > { %12172 = vrot.lane.b32.xlu0 %v15009_v57, %s17210_s27  ;;  %12121 = vrot.lane.b32.xlu1 %v15009_v57, %s20919_s1  ;;  %s20924_s1 = smov 95  }
 0xf3c   : > { %12274 = vrot.lane.b32.xlu0 %v15009_v57, %s20957_s6  ;;  %12223 = vrot.lane.b32.xlu1 %v15009_v57, %s20920_s8  ;;  %s20926_s8 = smov 93  }
 0xf40   : > { %12376 = vrot.lane.b32.xlu0 %v15009_v57, %s21021_s4  ;;  %12325 = vrot.lane.b32.xlu1 %v15009_v57, %s20961_s7 }
 0xf44   : > { %12478 = vrot.lane.b32.xlu0 %v15009_v57, %s21023_s23  ;;  %12427 = vrot.lane.b32.xlu1 %v15009_v57, %s21020_s3 }
 0xf48   : > { %12580 = vrot.lane.b32.xlu0 %v15009_v57, %s20927_s9  ;;  %12529 = vrot.lane.b32.xlu1 %v15009_v57, %s21022_s30 }
 0xf4c   : > { %12682 = vrot.lane.b32.xlu0 %v15009_v57, %s20925_s5  ;;  %12631 = vrot.lane.b32.xlu1 %v15009_v57, %s20924_s1  ;;  %s21082_s5 = smov 111  }
 0xf50   : > { %12784 = vrot.lane.b32.xlu0 %v15009_v57, %s21025_s22  ;;  %12733 = vrot.lane.b32.xlu1 %v15009_v57, %s20926_s8  ;;  %v15048_v57 = vld [vmem:[%s20799_s16 + $0x50] sm:$0xf] }
 0xf54   : > { %12959 = vrot.lane.b32.xlu0 %v17146_v0, %s17210_s27  ;;  %12836 = vperm.xlu1 %16751, %v12833_v58  }
 0xf96   : > { %v11663_v18 = vpop.permute.xlu0 %11662  ;;  %v11567_v5 = vpop.permute.xlu1 %11566 }
 0xf97   : > { %v11668_v55 = vsel %vm21054_vm11, %v11663_v18, 0  ;;  %v11572_v47 = vsel %vm21055_vm2, %v11567_v5, 0  ;;  %vm21064_vm11 = vmmov %vm21052_vm0 }
 0xf98   : > { %16151 = vmatpush3.bf16.msra.mxu1 %v11572_v47  ;;  %16163 = vmatpush3.bf16.msra.mxu0 %v11668_v55  ;;  %vm21065_vm2 = vmmov %vm21052_vm0  ;;  %v15046_v55 = vld [vmem:[%s20799_s16 + $0x4c] sm:$0xf]  ;;  %v15052_v47 = vld [vmem:[%s20799_s16 + $0x58] sm:$0xf] }
 0xf99   : > { %16156 = vmatprep.subr.bf16.mxu1 %v17160_v24  ;;  %16174 = vmatprep.subr.bf16.mxu0 %v17160_v24 }
 0xf9a   : > { %v11765_v63 = vpop.permute.xlu0 %11764  ;;  %v11714_v9 = vpop.permute.xlu1 %11713 }
 0xf9b   : > { %v11770_v7 = vsel %vm21056_vm8, %v11765_v63, 0  ;;  %16153 = vmatmul.mubr.msk.bf16.vlgmr.msra.gmra.mrb[80].mxu1 %vm10093_vm3, %v15008_v36  ;;  %16165 = vmatmul.mubr.msk.bf16.vlgmr.msra.gmra.mrb[116].mxu0 %vm10093_vm3, %v15012_v4  ;;  %v11719_v25 = vsel %vm21058_vm1, %v11714_v9, 0  ;;  %vm21066_vm8 = vmmov %vm21052_vm0 }
 0xf9c   : > { %16157 = vmatpush3.bf16.msra.mxu1 %v11618_v8  ;;  %16175 = vmatpush3.bf16.msra.mxu0 %v11770_v7  ;;  %vm21068_vm1 = vmmov %vm21052_vm0  ;;  %v15050_v7 = vld [vmem:[%s20799_s16 + $0x54] sm:$0xf]  ;;  %v15056_v8 = vld [vmem:[%s20799_s16 + $0x60] sm:$0xf] }
 0xf9d   : > { %16176 = vmatprep.mubr.msk.bf16.mxu0 %vm17163_vm6, %v17160_v24  ;;  %16186 = vmatprep.subr.bf16.mxu0 %v17160_v24 }
 0xf9e   : > { %16158 = vmatprep.mubr.msk.bf16.mxu1 %vm17163_vm6, %v17160_v24  ;;  %16168 = vmatprep.subr.bf16.mxu1 %v17160_v24  ;;  %v11867_v49 = vpop.permute.xlu0 %11866  ;;  %v11816_v2 = vpop.permute.xlu1 %11815 }
 0xf9f   : > { %v11872_v62 = vsel %vm21059_vm9, %v11867_v49, 0  ;;  %v11821_v13 = vsel %vm21060_vm13, %v11816_v2, 0  ;;  %vm21069_vm9 = vmmov %vm21052_vm0  ;;  %v15054_v49 = vld [vmem:[%s20799_s16 + $0x5c] sm:$0xf] }
 0xfa0   : > { %vm21070_vm13 = vmmov %vm21052_vm0 }
 0xfa2   : > { %v11969_v59 = vpop.permute.xlu0 %11968  ;;  %v11918_v44 = vpop.permute.xlu1 %11917 }
 0xfa3   : > { %16159 = vmatmul.mubr.msk.bf16.vlgmr.msra.gmra.mrb[84].mxu1 %vm10093_vm3, %v11560_v12  ;;  %16177 = vmatmul.mubr.msk.bf16.vlgmr.msra.gmra.mrb[120].mxu0 %vm10093_vm3, %v15016_v60  ;;  %v11974_v10 = vsel %vm21052_vm0, %v11969_v59, 0  ;;  %v11923_v28 = vsel %vm21061_vm14, %v11918_v44, 0  ;;  %vm21071_vm14 = vmmov %vm21052_vm0  ;;  %v17147_v12 = vld [vmem:[%s20804_s21] sm:$0xff]   ;;  %v17148_v60 = vld [vmem:[%s20804_s21 + $0x8] sm:$0x3f]  }
 0xfa4   : > { %16169 = vmatpush3.bf16.msra.mxu1 %v11719_v25  ;;  %16187 = vmatpush3.bf16.msra.mxu0 %v11872_v62  ;;  %v12862_v25 = vsel %vm5107_vm4, %v17148_v60, 0  ;;  %vm12857_vm4 = vcmask 228352  }
 0xfa5   : > { %16188 = vmatprep.mubr.msk.bf16.mxu0 %vm17163_vm6, %v17160_v24  ;;  %16198 = vmatprep.subr.bf16.mxu0 %v17160_v24 }
 0xfa6   : > { %16170 = vmatprep.mubr.msk.bf16.mxu1 %vm17163_vm6, %v17160_v24  ;;  %16180 = vmatprep.subr.bf16.mxu1 %v17160_v24  ;;  %v12071_v30 = vpop.permute.xlu0 %12070  ;;  %v12020_v33 = vpop.permute.xlu1 %12019 }
 0xfa7   : > { %v12076_v3 = vsel %vm21062_vm10, %v12071_v30, 0  ;;  %v12025_v50 = vsel %vm21063_vm12, %v12020_v33, 0  ;;  %vm21072_vm10 = vmmov %vm21052_vm0 }
 0xfa8   : > { %vm21073_vm12 = vmmov %vm21052_vm0 }
 0xfaa   : > { %v12173_v21 = vpop.permute.xlu0 %12172  ;;  %v12122_v17 = vpop.permute.xlu1 %12121 }
 0xfab   : > { %16171 = vmatmul.mubr.msk.bf16.vlgmr.msra.gmra.mrb[88].mxu1 %vm10093_vm3, %v15014_v15  ;;  %16189 = vmatmul.mubr.msk.bf16.vlgmr.msra.gmra.mrb[124].mxu0 %vm10093_vm3, %v15020_v38  ;;  %v12178_v52 = vsel %vm21064_vm11, %v12173_v21, 0  ;;  %v12127_v42 = vsel %vm21065_vm2, %v12122_v17, 0  ;;  %vm21074_vm11 = vmmov %vm21052_vm0 }
 0xfac   : > { %16181 = vmatpush3.bf16.msra.mxu1 %v11821_v13  ;;  %16199 = vmatpush3.bf16.msra.mxu0 %v11974_v10  ;;  %vm21075_vm2 = vmmov %vm21052_vm0 }
 0xfad   : > { %16200 = vmatprep.mubr.msk.bf16.mxu0 %vm17163_vm6, %v17160_v24  ;;  %16210 = vmatprep.subr.bf16.mxu0 %v17160_v24 }
 0xfae   : > { %16182 = vmatprep.mubr.msk.bf16.mxu1 %vm17163_vm6, %v17160_v24  ;;  %16192 = vmatprep.subr.bf16.mxu1 %v17160_v24  ;;  %v12275_v43 = vpop.permute.xlu0 %12274  ;;  %v12224_v32 = vpop.permute.xlu1 %12223 }
 0xfaf   : > { %v12280_v35 = vsel %vm21066_vm8, %v12275_v43, 0  ;;  %v12229_v26 = vsel %vm21067_vm5, %v12224_v32, 0  ;;  %vm21076_vm8 = vmmov %vm21052_vm0 }
 0xfb0   : > { %vm21077_vm5 = vmmov %vm21052_vm0 }
 0xfb2   : > { %v12377_v39 = vpop.permute.xlu0 %12376  ;;  %v12326_v20 = vpop.permute.xlu1 %12325 }
 0xfb3   : > { %16183 = vmatmul.mubr.msk.bf16.vlgmr.msra.gmra.mrb[92].mxu1 %vm10093_vm3, %v15018_v23  ;;  %16201 = vmatmul.mubr.msk.bf16.vlgmr.msra.gmra.mrb[128].mxu0 %vm10093_vm3, %v15024_v27  ;;  %v12382_v54 = vsel %vm21068_vm1, %v12377_v39, 0  ;;  %v12331_v1 = vsel %vm21069_vm9, %v12326_v20, 0  ;;  %vm21078_vm1 = vmmov %vm21052_vm0 }
 0xfb4   : > { %16193 = vmatpush3.bf16.msra.mxu1 %v11923_v28  ;;  %16211 = vmatpush3.bf16.msra.mxu0 %v12076_v3  ;;  %vm21089_vm9 = vmmov %vm21052_vm0 }
 0xfb5   : > { %16212 = vmatprep.mubr.msk.bf16.mxu0 %vm17163_vm6, %v17160_v24  ;;  %16222 = vmatprep.subr.bf16.mxu0 %v17160_v24 }
 0xfb6   : > { %16194 = vmatprep.mubr.msk.bf16.mxu1 %vm17163_vm6, %v17160_v24  ;;  %16204 = vmatprep.subr.bf16.mxu1 %v17160_v24  ;;  %v12479_v41 = vpop.permute.xlu0 %12478  ;;  %v12428_v29 = vpop.permute.xlu1 %12427 }
 0xfb7   : > { %v12484_v45 = vsel %vm21070_vm13, %v12479_v41, 0  ;;  %v12433_v56 = vsel %vm21052_vm0, %v12428_v29, 0  ;;  %vm21090_vm13 = vmmov %vm21052_vm0 }
 0xfba   : > { %v12581_v34 = vpop.permute.xlu0 %12580  ;;  %v12530_v53 = vpop.permute.xlu1 %12529 }
 0xfbb   : > { %16195 = vmatmul.mubr.msk.bf16.vlgmr.msra.gmra.mrb[96].mxu1 %vm10093_vm3, %v15022_v48  ;;  %16213 = vmatmul.mubr.msk.bf16.vlgmr.msra.gmra.mrb[132].mxu0 %vm10093_vm3, %v15028_v37  ;;  %v12586_v22 = vsel %vm21071_vm14, %v12581_v34, 0  ;;  %v12535_v58 = vsel %vm21072_vm10, %v12530_v53, 0  ;;  %vm21091_vm14 = vmmov %vm21052_vm0 }
 0xfbc   : > { %16205 = vmatpush3.bf16.msra.mxu1 %v12025_v50  ;;  %16223 = vmatpush3.bf16.msra.mxu0 %v12178_v52  ;;  %vm21092_vm10 = vmmov %vm21052_vm0 }
 0xfbd   : > { %16224 = vmatprep.mubr.msk.bf16.mxu0 %vm17163_vm6, %v17160_v24  ;;  %16234 = vmatprep.subr.bf16.mxu0 %v17160_v24 }
 0xfbe   : > { %16206 = vmatprep.mubr.msk.bf16.mxu1 %vm17163_vm6, %v17160_v24  ;;  %16216 = vmatprep.subr.bf16.mxu1 %v17160_v24  ;;  %v12683_v51 = vpop.permute.xlu0 %12682  ;;  %v12632_v18 = vpop.permute.xlu1 %12631 }
 0xfbf   : > { %v12688_v0 = vsel %vm21073_vm12, %v12683_v51, 0  ;;  %v12637_v36 = vsel %vm21074_vm11, %v12632_v18, 0  ;;  %vm21093_vm12 = vmmov %vm21052_vm0 }
 0xfc0   : > { %vm21094_vm11 = vmmov %vm21052_vm0 }
 0xfc2   : > { %v12785_v5 = vpop.permute.xlu0 %12784  ;;  %v12734_v63 = vpop.permute.xlu1 %12733 }
 0xfc3   : > { %16207 = vmatmul.mubr.msk.bf16.vlgmr.msra.gmra.mrb[100].mxu1 %vm10093_vm3, %v15026_v19  ;;  %16225 = vmatmul.mubr.msk.bf16.vlgmr.msra.gmra.mrb[136].mxu0 %vm10093_vm3, %v15032_v11  ;;  %v12790_v4 = vsel %vm21075_vm2, %v12785_v5, 0  ;;  %v12739_v9 = vsel %vm21076_vm8, %v12734_v63, 0  ;;  %vm21095_vm2 = vmmov %vm21052_vm0 }
 0xfc4   : > { %16217 = vmatpush3.bf16.msra.mxu1 %v12127_v42  ;;  %16235 = vmatpush3.bf16.msra.mxu0 %v12280_v35  ;;  %vm21096_vm8 = vmmov %vm21052_vm0 }
 0xfc5   : > { %16218 = vmatprep.mubr.msk.bf16.mxu1 %vm17163_vm6, %v17160_v24  ;;  %16228 = vmatprep.subr.bf16.mxu1 %v17160_v24 }
 0xfc6   : > { %16236 = vmatprep.mubr.msk.bf16.mxu0 %vm17163_vm6, %v17160_v24  ;;  %16246 = vmatprep.subr.bf16.mxu0 %v17160_v24 }
 0xfcb   : > { %16219 = vmatmul.mubr.msk.bf16.vlgmr.msra.gmra.mrb[104].mxu1 %vm10093_vm3, %v15030_v46  ;;  %16237 = vmatmul.mubr.msk.bf16.vlgmr.msra.gmra.mrb[140].mxu0 %vm10093_vm3, %v15036_v16 }
 0xfcc   : > { %16229 = vmatpush3.bf16.msra.mxu1 %v12229_v26  ;;  %16247 = vmatpush3.bf16.msra.mxu0 %v12382_v54 }
 0xfcd   : > { %16230 = vmatprep.mubr.msk.bf16.mxu1 %vm17163_vm6, %v17160_v24  ;;  %16240 = vmatprep.subr.bf16.mxu1 %v17160_v24 }
 0xfce   : > { %16248 = vmatprep.mubr.msk.bf16.mxu0 %vm17163_vm6, %v17160_v24  ;;  %16258 = vmatprep.subr.bf16.mxu0 %v17160_v24 }
 0xfd3   : > { %16231 = vmatmul.mubr.msk.bf16.vlgmr.msra.gmra.mrb[108].mxu1 %vm10093_vm3, %v15034_v31  ;;  %16249 = vmatmul.mubr.msk.bf16.vlgmr.msra.gmra.mrb[144].mxu0 %vm10093_vm3, %v15040_v14 }
 0xfd4   : > { %16241 = vmatpush3.bf16.msra.mxu1 %v12331_v1  ;;  %16259 = vmatpush3.bf16.msra.mxu0 %v12484_v45 }
 0xfd5   : > { %16242 = vmatprep.mubr.msk.bf16.mxu1 %vm17163_vm6, %v17160_v24  ;;  %16252 = vmatprep.subr.bf16.mxu1 %v17160_v24 }
 0xfd6   : > { %16260 = vmatprep.mubr.msk.bf16.mxu0 %vm17163_vm6, %v17160_v24  ;;  %16270 = vmatprep.subr.bf16.mxu0 %v17160_v24 }
 0xfdb   : > { %16243 = vmatmul.mubr.msk.bf16.vlgmr.msra.gmra.mrb[112].mxu1 %vm10093_vm3, %v15038_v40  ;;  %16261 = vmatmul.mubr.msk.bf16.vlgmr.msra.gmra.mrb[148].mxu0 %vm10093_vm3, %v15044_v61 }
 0xfdc   : > { %16253 = vmatpush3.bf16.msra.mxu1 %v12433_v56  ;;  %16271 = vmatpush3.bf16.msra.mxu0 %v12586_v22 }
 0xfdd   : > { %16254 = vmatprep.mubr.msk.bf16.mxu1 %vm17163_vm6, %v17160_v24  ;;  %16264 = vmatprep.subr.bf16.mxu1 %v17160_v24 }
 0xfde   : > { %16272 = vmatprep.mubr.msk.bf16.mxu0 %vm17163_vm6, %v17160_v24  ;;  %16282 = vmatprep.subr.bf16.mxu0 %v17160_v24 }
 0xfe3   : > { %16255 = vmatmul.mubr.msk.bf16.vlgmr.msra.gmra.mrb[116].mxu1 %vm10093_vm3, %v15042_v6  ;;  %16273 = vmatmul.mubr.msk.bf16.vlgmr.msra.gmra.mrb[152].mxu0 %vm10093_vm3, %v15048_v57 }
 0xfe4   : > { %16265 = vmatpush3.bf16.msra.mxu1 %v12535_v58  ;;  %16283 = vmatpush3.bf16.msra.mxu0 %v12688_v0 }
 0xfe5   : > { %16266 = vmatprep.mubr.msk.bf16.mxu1 %vm17163_vm6, %v17160_v24  ;;  %16276 = vmatprep.subr.bf16.mxu1 %v17160_v24 }
 0xfe6   : > { %16284 = vmatprep.mubr.msk.bf16.mxu0 %vm17163_vm6, %v17160_v24  ;;  %16294 = vmatprep.subr.bf16.mxu0 %v17160_v24 }
 0xfeb   : > { %16267 = vmatmul.mubr.msk.bf16.vlgmr.msra.gmra.mrb[120].mxu1 %vm10093_vm3, %v15046_v55  ;;  %16285 = vmatmul.mubr.msk.bf16.vlgmr.msra.gmra.mrb[156].mxu0 %vm10093_vm3, %v15052_v47 }
 0xfec   : > { %16277 = vmatpush3.bf16.msra.mxu1 %v12637_v36  ;;  %16295 = vmatpush3.bf16.msra.mxu0 %v12790_v4 }
 0xfed   : > { %16278 = vmatprep.mubr.msk.bf16.mxu1 %vm17163_vm6, %v17160_v24  ;;  %16288 = vmatprep.subr.bf16.mxu1 %v17160_v24 }
 0xfee   : > { %16296 = vmatprep.mubr.msk.bf16.mxu0 %vm17163_vm6, %v17160_v24  ;;  %16308 = vmatprep.subr.bf16.mxu0 %v17160_v24 }
 0xff3   : > { %16279 = vmatmul.mubr.msk.bf16.vlgmr.msra.gmra.mrb[124].mxu1 %vm10093_vm3, %v15050_v7  ;;  %16297 = vmatmul.mubr.msk.bf16.vlgmr.msra.gmra.mrb[160].mxu0 %vm10093_vm3, %v15056_v8 }
 0xff4   : > { %16289 = vmatpush3.bf16.msra.mxu1 %v12739_v9  ;;  %16290 = vmatprep.mubr.msk.bf16.mxu1 %vm17163_vm6, %v17160_v24 }
 0xff5   : > { %16300 = vmatprep.subr.bf16.mxu1 %v17160_v24  ;;  %16310 = vmatprep.mubr.msk.bf16.mxu0 %vm17163_vm6, %v17160_v24 }
 0xffb   : > { %16291 = vmatmul.mubr.msk.bf16.vlgmr.msra.gmra.mrb[128].mxu1 %vm10093_vm3, %v15054_v49 }
 0xffc   : > { %16304 = vmatprep.mubr.msk.bf16.mxu1 %vm17163_vm6, %v17160_v24  ;;  %16301 = vmatpush3.bf16.msra.mxu1 %v17147_v12 }
 0xffd   : > { %16302 = vmatprep.subr.bf16.mxu1 %v17160_v24 }
0x1000   : > { %16303 = vmatpush3.bf16.msra.mxu1 %v12862_v25 }
0x1001   : > { %16314 = vmatprep.subr.bf16.mxu1 %v17160_v24 }
0x106e   : > { %v11608_v62 = vpop.f32.mrb[80].mxu1  ;;  %v11704_v2 = vpop.f32.mrb[116].mxu0 }
0x106f   : > { %v16154_v59 = vpop.f32.mrb[81].mxu1  ;;  %v16166_v15 = vpop.f32.mrb[117].mxu0 }
0x1070   : > { %v11611_v38 = vpop.f32.mrb[82].mxu1  ;;  %v11707_v13 = vpop.f32.mrb[118].mxu0 }
0x1071   : > { %v16155_v10 = vpop.f32.mrb[83].mxu1  ;;  %v16167_v44 = vpop.f32.mrb[119].mxu0 }
0x1076   : > { %v11654_v30 = vpop.f32.mrb[84].mxu1  ;;  %v11806_v23 = vpop.f32.mrb[120].mxu0 }
0x1077   : > { %v11655_v27 = vadd.f32 %v11654_v30, %v11608_v62  ;;  %v16160_v28 = vpop.f32.mrb[85].mxu1  ;;  %v16178_v3 = vpop.f32.mrb[121].mxu0 }
0x1078   : > { %v11657_v33 = vpop.f32.mrb[86].mxu1  ;;  %v11809_v21 = vpop.f32.mrb[122].mxu0 }
0x1079   : > { %v11710_v48 = vadd.f32 %v11704_v2, %v11655_v27  ;;  %v16161_v37 = vpop.f32.mrb[87].mxu1  ;;  %v16179_v50 = vpop.f32.mrb[123].mxu0 }
0x107e   : > { %v11755_v52 = vpop.f32.mrb[88].mxu1  ;;  %v11908_v17 = vpop.f32.mrb[124].mxu0 }
0x107f   : > { %v11761_v43 = vadd.f32 %v11755_v52, %v11710_v48  ;;  %v16172_v19 = vpop.f32.mrb[89].mxu1  ;;  %v16190_v11 = vpop.f32.mrb[125].mxu0 }
0x1080   : > { %v11758_v42 = vpop.f32.mrb[90].mxu1  ;;  %v11911_v35 = vpop.f32.mrb[126].mxu0 }
0x1081   : > { %v11812_v32 = vadd.f32 %v11806_v23, %v11761_v43  ;;  %v16173_v39 = vpop.f32.mrb[91].mxu1  ;;  %v16191_v46 = vpop.f32.mrb[127].mxu0 }
0x1086   : > { %v11857_v16 = vpop.f32.mrb[92].mxu1  ;;  %v12010_v26 = vpop.f32.mrb[128].mxu0 }
0x1087   : > { %v11863_v54 = vadd.f32 %v11857_v16, %v11812_v32  ;;  %v16184_v20 = vpop.f32.mrb[93].mxu1  ;;  %v16202_v41 = vpop.f32.mrb[129].mxu0 }
0x1088   : > { %v11860_v31 = vpop.f32.mrb[94].mxu1  ;;  %v12013_v14 = vpop.f32.mrb[130].mxu0 }
0x1089   : > { %v11914_v1 = vadd.f32 %v11908_v17, %v11863_v54  ;;  %v16185_v45 = vpop.f32.mrb[95].mxu1  ;;  %v16203_v29 = vpop.f32.mrb[131].mxu0 }
0x108e   : > { %v11959_v34 = vpop.f32.mrb[96].mxu1  ;;  %v12112_v40 = vpop.f32.mrb[132].mxu0 }
0x108f   : > { %v11965_v61 = vadd.f32 %v11959_v34, %v11914_v1  ;;  %v16196_v56 = vpop.f32.mrb[97].mxu1  ;;  %v16214_v22 = vpop.f32.mrb[133].mxu0 }
0x1090   : > { %v11962_v53 = vpop.f32.mrb[98].mxu1  ;;  %v12115_v51 = vpop.f32.mrb[134].mxu0 }
0x1091   : > { %v12016_v6 = vadd.f32 %v12010_v26, %v11965_v61  ;;  %v16197_v57 = vpop.f32.mrb[99].mxu1  ;;  %v16215_v58 = vpop.f32.mrb[135].mxu0 }
0x1096   : > { %v12061_v0 = vpop.f32.mrb[100].mxu1  ;;  %v12214_v18 = vpop.f32.mrb[136].mxu0 }
0x1097   : > { %v12067_v5 = vadd.f32 %v12061_v0, %v12016_v6  ;;  %v16208_v55 = vpop.f32.mrb[101].mxu1  ;;  %v16226_v47 = vpop.f32.mrb[137].mxu0 }
0x1098   : > { %v12064_v36 = vpop.f32.mrb[102].mxu1  ;;  %v12217_v4 = vpop.f32.mrb[138].mxu0 }
0x1099   : > { %v12118_v63 = vadd.f32 %v12112_v40, %v12067_v5  ;;  %v16209_v7 = vpop.f32.mrb[103].mxu1  ;;  %v16227_v8 = vpop.f32.mrb[139].mxu0 }
0x109e   : > { %v12163_v9 = vpop.f32.mrb[104].mxu1  ;;  %v12316_v49 = vpop.f32.mrb[140].mxu0 }
0x109f   : > { %v12169_v12 = vadd.f32 %v12163_v9, %v12118_v63  ;;  %v16220_v60 = vpop.f32.mrb[105].mxu1  ;;  %v16238_v25 = vpop.f32.mrb[141].mxu0 }
0x10a0   : > { %v12166_v62 = vpop.f32.mrb[106].mxu1  ;;  %v12319_v2 = vpop.f32.mrb[142].mxu0 }
0x10a1   : > { %v12220_v59 = vadd.f32 %v12214_v18, %v12169_v12  ;;  %v16221_v15 = vpop.f32.mrb[107].mxu1  ;;  %v16239_v38 = vpop.f32.mrb[143].mxu0 }
0x10a2   : > { %v12837_v60 = vpop.permute.xlu1 %12836  ;;  %v12960_v2 = vpop.permute.xlu0 %12959  ;;  %v12907_v38 = vld [vmem:[%s20801_s18] sm:$0xf] }
0x10a3   : > { %v12965_v15 = vsel %vm21077_vm5, %v12960_v2, 0  ;;  %vm21098_vm5 = vmmov %vm21052_vm0 }
0x10a6   : > { %v12265_v13 = vpop.f32.mrb[108].mxu1  ;;  %v12418_v10 = vpop.f32.mrb[144].mxu0 }
0x10a7   : > { %v12271_v44 = vadd.f32 %v12265_v13, %v12220_v59  ;;  %v16232_v30 = vpop.f32.mrb[109].mxu1  ;;  %v16250_v23 = vpop.f32.mrb[145].mxu0 }
0x10a8   : > { %v12268_v27 = vpop.f32.mrb[110].mxu1  ;;  %v12421_v28 = vpop.f32.mrb[146].mxu0 }
0x10a9   : > { %v12322_v3 = vadd.f32 %v12316_v49, %v12271_v44  ;;  %v16233_v33 = vpop.f32.mrb[111].mxu1  ;;  %v16251_v21 = vpop.f32.mrb[147].mxu0 }
0x10aa   : > { %v12909_v33 = vld [vmem:[%s20802_s19] sm:$0xf] }
0x10ab   : > { %v14234_v21 = vld [vmem:[%s20803_s20] sm:$0xff] }
0x10ae   : > { %v12367_v48 = vpop.f32.mrb[112].mxu1  ;;  %v12520_v37 = vpop.f32.mrb[148].mxu0 }
0x10af   : > { %v12373_v50 = vadd.f32 %v12367_v48, %v12322_v3  ;;  %v16244_v52 = vpop.f32.mrb[113].mxu1  ;;  %v16262_v17 = vpop.f32.mrb[149].mxu0 }
0x10b0   : > { %v12370_v43 = vpop.f32.mrb[114].mxu1  ;;  %v12523_v19 = vpop.f32.mrb[150].mxu0  ;;  %v15064_v17 = vld [vmem:[%s20802_s19 + $0x4] sm:$0xf] }
0x10b1   : > { %v12424_v11 = vadd.f32 %v12418_v10, %v12373_v50  ;;  %v16245_v42 = vpop.f32.mrb[115].mxu1  ;;  %v16263_v35 = vpop.f32.mrb[151].mxu0  ;;  %v15067_v43 = vld [vmem:[%s20802_s19 + $0x8] sm:$0xf] }
0x10b6   : > { %v12469_v32 = vpop.f32.mrb[116].mxu1  ;;  %v12622_v39 = vpop.f32.mrb[152].mxu0 }
0x10b7   : > { %v12475_v46 = vadd.f32 %v12469_v32, %v12424_v11  ;;  %v16256_v16 = vpop.f32.mrb[117].mxu1  ;;  %v16274_v26 = vpop.f32.mrb[153].mxu0 }
0x10b8   : > { %v12472_v54 = vpop.f32.mrb[118].mxu1  ;;  %v12625_v20 = vpop.f32.mrb[154].mxu0  ;;  %v15071_v16 = vld [vmem:[%s20802_s19 + $0x10] sm:$0xf] }
0x10b9   : > { %v12526_v41 = vadd.f32 %v12520_v37, %v12475_v46  ;;  %v16257_v31 = vpop.f32.mrb[119].mxu1  ;;  %v16275_v14 = vpop.f32.mrb[155].mxu0  ;;  %v15069_v46 = vld [vmem:[%s20802_s19 + $0xc] sm:$0xf] }
0x10ba   : > { %v15073_v31 = vld [vmem:[%s20802_s19 + $0x14] sm:$0xf]  ;;  %v15075_v14 = vld [vmem:[%s20802_s19 + $0x18] sm:$0xf] }
0x10be   : > { %v12571_v1 = vpop.f32.mrb[120].mxu1  ;;  %v12724_v45 = vpop.f32.mrb[156].mxu0 }
0x10bf   : > { %v12577_v29 = vadd.f32 %v12571_v1, %v12526_v41  ;;  %v16268_v34 = vpop.f32.mrb[121].mxu1  ;;  %v16286_v40 = vpop.f32.mrb[157].mxu0 }
0x10c0   : > { %v12574_v61 = vpop.f32.mrb[122].mxu1  ;;  %v12727_v56 = vpop.f32.mrb[158].mxu0 }
0x10c1   : > { %v12628_v22 = vadd.f32 %v12622_v39, %v12577_v29  ;;  %v16269_v53 = vpop.f32.mrb[123].mxu1  ;;  %v16287_v51 = vpop.f32.mrb[159].mxu0 }
0x10c2   : > { %v15077_v53 = vld [vmem:[%s20802_s19 + $0x1c] sm:$0xf]  ;;  %v15079_v51 = vld [vmem:[%s20802_s19 + $0x20] sm:$0xf] }
0x10c6   : > { %v12673_v6 = vpop.f32.mrb[124].mxu1  ;;  %v12826_v57 = vpop.f32.mrb[160].mxu0 }
0x10c7   : > { %v12679_v58 = vadd.f32 %v12673_v6, %v12628_v22  ;;  %v16280_v0 = vpop.f32.mrb[125].mxu1  ;;  %v16298_v18 = vpop.f32.mrb[161].mxu0 }
0x10c8   : > { %v12676_v5 = vpop.f32.mrb[126].mxu1  ;;  %v12829_v55 = vpop.f32.mrb[162].mxu0  ;;  %v15081_v18 = vld [vmem:[%s20802_s19 + $0x24] sm:$0xf] }
0x10c9   : > { %v12730_v47 = vadd.f32 %v12724_v45, %v12679_v58  ;;  %v16281_v36 = vpop.f32.mrb[127].mxu1  ;;  %v16299_v4 = vpop.f32.mrb[163].mxu0  ;;  %v15083_v5 = vld [vmem:[%s20802_s19 + $0x28] sm:$0xf] }
0x10ce   : > { %v12775_v63 = vpop.f32.mrb[128].mxu1 }
0x10cf   : > { %v12781_v7 = vadd.f32 %v12775_v63, %v12730_v47  ;;  %v16292_v8 = vpop.f32.mrb[129].mxu1  ;;  %v15085_v63 = vld [vmem:[%s20802_s19 + $0x2c] sm:$0xf] }
0x10d0   : > { %v12778_v9 = vpop.f32.mrb[130].mxu1 }
0x10d1   : > { %v12832_v49 = vadd.f32 %v12826_v57, %v12781_v7  ;;  %v16293_v12 = vpop.f32.mrb[131].mxu1  ;;  %v15087_v7 = vld [vmem:[%s20802_s19 + $0x30] sm:$0xf] }
0x10d3   : > { %v12839_v25 = vadd.f32 %v12837_v60, %v12832_v49  ;;  %v15089_v60 = vld [vmem:[%s20802_s19 + $0x34] sm:$0xf] }
0x10d5   : > { %v12840_v62 = vmax.f32 %v12839_v25, 0.0  ;;  %v15091_v25 = vld [vmem:[%s20802_s19 + $0x38] sm:$0xf] }
0x10d7   : > { %v12841_v59 = vpack.c.bf16 %v12840_v62, %v12840_v62 }
0x10d9   : > { %16305 = vmatmul.mubr.msk.bf16.vlgmr.msra.gmra.mrb[132].mxu1 %vm12857_vm4, %v12841_v59  ;;  %vm21097_vm4 = vmmov %vm21052_vm0 }
0x10da   : > { %16315 = vmatpush3.bf16.msra.mxu1 %v12965_v15  ;;  %16316 = vmatprep.mubr.msk.bf16.mxu1 %vm17163_vm6, %v17160_v24 }
0x10db   : > { %16326 = vmatprep.subr.bf16.mxu1 %v17160_v24 }
0x10e1   : > { %16317 = vmatmul.mubr.msk.bf16.vlgmr.msra.gmra.mrb[136].mxu1 %vm10093_vm3, %v12907_v38  ;;  %v15095_v38 = vld [vmem:[%s20802_s19 + $0x40] sm:$0xf] }
0x10e2   : > { %16328 = vmatprep.mubr.msk.bf16.mxu1 %vm17163_vm6, %v17160_v24 }
0x11ac   : > { %v12898_v13 = vpop.f32.mrb[132].mxu1 }
0x11ad   : > { %v12904_v10 = vpack.c.bf16 %v12898_v13, %v12898_v13  ;;  %v16306_v44 = vpop.f32.mrb[133].mxu1  ;;  %v15093_v13 = vld [vmem:[%s20802_s19 + $0x3c] sm:$0xf] }
0x11ae   : > { %v12901_v30 = vpop.f32.mrb[134].mxu1 }
0x11af   : > { %12905 = vst.msk [vmem:[#allocation7] sm:$0xf] %vm11557_vm15, %v12904_v10  ;;  %v16307_v23 = vpop.f32.mrb[135].mxu1  ;;  %vm21088_vm15 = vmmov %vm21052_vm0 }
0x11b4   : > { %v20614_v1 = vpop.f32.mrb[136].mxu1 }
0x11b5   : > { %v16318_v45 = vpop.f32.mrb[137].mxu1 }
0x11b6   : > { %v12908_v27 = vld [vmem:[#allocation7] sm:$0xf]  ;;  %v13004_v40 = vpop.f32.mrb[138].mxu1 }
0x11b7   : > { %v12914_v28 = vsel %vm21078_vm1, %v12908_v27, 0  ;;  %v15065_v3 = vcombine.low %v12908_v27, %v12908_v27  ;;  %v16319_v61 = vpop.f32.mrb[139].mxu1  ;;  %vm21099_vm1 = vmmov %vm21052_vm0  ;;  %v15097_v27 = vld [vmem:[%s20802_s19 + $0x44] sm:$0xf] }
0x11b8   : > { %16309 = vmatpush3.bf16.msra.mxu0 %v12914_v28  ;;  %v15099_v28 = vld [vmem:[%s20802_s19 + $0x48] sm:$0xf] }
0x11b9   : > { %13063 = vrot.lane.b32.xlu0 %v15065_v3, %s20953_s24  ;;  %13012 = vrot.lane.b32.xlu1 %v15065_v3, %s20952_s25  ;;  %s21081_s24 = smov 118  }
0x11ba   : > { %16320 = vmatprep.subr.bf16.mxu0 %v17160_v24 }
0x11bb   : > { %16311 = vmatmul.mubr.msk.bf16.vlgmr.msra.gmra.mrb[164].mxu0 %vm10093_vm3, %v12909_v33 }
0x11bc   : > { %16322 = vmatprep.mubr.msk.bf16.mxu0 %vm17163_vm6, %v17160_v24 }
0x11bd   : > { %13165 = vrot.lane.b32.xlu0 %v15065_v3, %s20956_s2  ;;  %13114 = vrot.lane.b32.xlu1 %v15065_v3, %s20955_s26  ;;  %s21083_s2 = smov 109   ;;  %s21084_s26 = smov 96  }
0x11c1   : > { %13267 = vrot.lane.b32.xlu0 %v15065_v3, %s17206_s10  ;;  %13216 = vrot.lane.b32.xlu1 %v15065_v3, %s21079_s0 }
0x11c5   : > { %13369 = vrot.lane.b32.xlu0 %v15065_v3, %s21080_s11  ;;  %13318 = vrot.lane.b32.xlu1 %v15065_v3, %s21081_s24 }
0x11c9   : > { %13471 = vrot.lane.b32.xlu0 %v15065_v3, %s21019_s29  ;;  %13420 = vrot.lane.b32.xlu1 %v15065_v3, %s21016_s28  ;;  %s21085_s28 = smov 94   ;;  %s21086_s29 = smov 95  }
0x11cd   : > { %13573 = vrot.lane.b32.xlu0 %v15065_v3, %s17210_s27  ;;  %13522 = vrot.lane.b32.xlu1 %v15065_v3, %s21082_s5 }
0x11d1   : > { %13675 = vrot.lane.b32.xlu0 %v15065_v3, %s20957_s6  ;;  %13624 = vrot.lane.b32.xlu1 %v15065_v3, %s21083_s2  ;;  %s21087_s6 = smov 93   ;;  %s21110_s2 = sld [smem:[#allocation22_spill]] }
0x11d5   : > { %13777 = vrot.lane.b32.xlu0 %v15065_v3, %s21021_s4  ;;  %13726 = vrot.lane.b32.xlu1 %v15065_v3, %s20961_s7 }
0x11d9   : > { %13879 = vrot.lane.b32.xlu0 %v15065_v3, %s21023_s23  ;;  %13828 = vrot.lane.b32.xlu1 %v15065_v3, %s21020_s3 }
0x11dd   : > { %13981 = vrot.lane.b32.xlu0 %v15065_v3, %s21084_s26  ;;  %13930 = vrot.lane.b32.xlu1 %v15065_v3, %s21022_s30  ;;  %s21112_s30 = sld [smem:[#allocation23_spill]] }
0x11e1   : > { %14083 = vrot.lane.b32.xlu0 %v15065_v3, %s21085_s28  ;;  %14032 = vrot.lane.b32.xlu1 %v15065_v3, %s21086_s29  ;;  %s21111_s29 = sld [smem:[#allocation9_spill]] }
0x11e5   : > { %14185 = vrot.lane.b32.xlu0 %v15065_v3, %s21025_s22  ;;  %14134 = vrot.lane.b32.xlu1 %v15065_v3, %s21087_s6 }
0x11e7   : > { %s14394_s4 = sshll.u32 %s21111_s29, 3 }
0x11e8   : > { %s708_s23 = scalar_lea.vmem %s21112_s30, %s14394_s4 }
0x11e9   : > { %14237 = vperm.xlu1 %16751, %v14234_v21  }
0x122b   : > { %v13064_v48 = vpop.permute.xlu0 %13063  ;;  %v13013_v37 = vpop.permute.xlu1 %13012 }
0x122c   : > { %v13069_v50 = vsel %vm21088_vm15, %v13064_v48, 0  ;;  %v13018_v52 = vsel %vm21089_vm9, %v13013_v37, 0  ;;  %vm21100_vm15 = vmmov %vm21052_vm0  ;;  %v15101_v37 = vld [vmem:[%s20802_s19 + $0x4c] sm:$0xf] }
0x122d   : > { %16321 = vmatpush3.bf16.msra.mxu0 %v13018_v52  ;;  %16327 = vmatpush3.bf16.msra.mxu1 %v13069_v50  ;;  %vm21101_vm9 = vmmov %vm21052_vm0  ;;  %v15103_v50 = vld [vmem:[%s20802_s19 + $0x50] sm:$0xf] }
0x122e   : > { %16332 = vmatprep.subr.bf16.mxu0 %v17160_v24  ;;  %16338 = vmatprep.subr.bf16.mxu1 %v17160_v24 }
0x122f   : > { %v13166_v19 = vpop.permute.xlu0 %13165  ;;  %v13115_v11 = vpop.permute.xlu1 %13114 }
0x1230   : > { %v13171_v42 = vsel %vm21090_vm13, %v13166_v19, 0  ;;  %v13120_v35 = vsel %vm21052_vm0, %v13115_v11, 0  ;;  %16323 = vmatmul.mubr.msk.bf16.vlgmr.msra.gmra.mrb[168].mxu0 %vm10093_vm3, %v15064_v17  ;;  %16329 = vmatmul.mubr.msk.bf16.vlgmr.msra.gmra.mrb[140].mxu1 %vm10093_vm3, %v15067_v43  ;;  %vm21102_vm13 = vmmov %vm21052_vm0  ;;  %v15105_v11 = vld [vmem:[%s20802_s19 + $0x54] sm:$0xf] }
0x1231   : > { %16333 = vmatpush3.bf16.msra.mxu0 %v13120_v35  ;;  %16339 = vmatpush3.bf16.msra.mxu1 %v13171_v42  ;;  %v15107_v42 = vld [vmem:[%s20802_s19 + $0x58] sm:$0xf] }
0x1232   : > { %16340 = vmatprep.mubr.msk.bf16.mxu1 %vm17163_vm6, %v17160_v24  ;;  %16350 = vmatprep.subr.bf16.mxu1 %v17160_v24 }
0x1233   : > { %16334 = vmatprep.mubr.msk.bf16.mxu0 %vm17163_vm6, %v17160_v24  ;;  %16344 = vmatprep.subr.bf16.mxu0 %v17160_v24  ;;  %v13268_v32 = vpop.permute.xlu0 %13267  ;;  %v13217_v39 = vpop.permute.xlu1 %13216 }
0x1234   : > { %v13273_v26 = vsel %vm21091_vm14, %v13268_v32, 0  ;;  %v13222_v54 = vsel %vm21092_vm10, %v13217_v39, 0  ;;  %vm21103_vm14 = vmmov %vm21052_vm0  ;;  %v15109_v39 = vld [vmem:[%s20802_s19 + $0x5c] sm:$0xf] }
0x1235   : > { %vm21104_vm10 = vmmov %vm21052_vm0 }
0x1237   : > { %v13370_v20 = vpop.permute.xlu0 %13369  ;;  %v13319_v41 = vpop.permute.xlu1 %13318 }
0x1238   : > { %16335 = vmatmul.mubr.msk.bf16.vlgmr.msra.gmra.mrb[172].mxu0 %vm10093_vm3, %v15069_v46  ;;  %16341 = vmatmul.mubr.msk.bf16.vlgmr.msra.gmra.mrb[144].mxu1 %vm10093_vm3, %v15071_v16  ;;  %v13375_v29 = vsel %vm21093_vm12, %v13370_v20, 0  ;;  %v13324_v34 = vsel %vm21094_vm11, %v13319_v41, 0  ;;  %vm21105_vm12 = vmmov %vm21052_vm0  ;;  %v15111_v46 = vld [vmem:[%s20802_s19 + $0x60] sm:$0xf] }
0x1239   : > { %16345 = vmatpush3.bf16.msra.mxu0 %v13222_v54  ;;  %16351 = vmatpush3.bf16.msra.mxu1 %v13273_v26  ;;  %vm21106_vm11 = vmmov %vm21052_vm0 }
0x123a   : > { %16352 = vmatprep.mubr.msk.bf16.mxu1 %vm17163_vm6, %v17160_v24  ;;  %16362 = vmatprep.subr.bf16.mxu1 %v17160_v24 }
0x123b   : > { %16346 = vmatprep.mubr.msk.bf16.mxu0 %vm17163_vm6, %v17160_v24  ;;  %16356 = vmatprep.subr.bf16.mxu0 %v17160_v24  ;;  %v13472_v56 = vpop.permute.xlu0 %13471  ;;  %v13421_v22 = vpop.permute.xlu1 %13420 }
0x123c   : > { %v13477_v6 = vsel %vm21095_vm2, %v13472_v56, 0  ;;  %v13426_v57 = vsel %vm21096_vm8, %v13421_v22, 0  ;;  %vm21107_vm2 = vmmov %vm21052_vm0 }
0x123d   : > { %vm21108_vm8 = vmmov %vm21052_vm0 }
0x123f   : > { %v13574_v58 = vpop.permute.xlu0 %13573  ;;  %v13523_v0 = vpop.permute.xlu1 %13522 }
0x1240   : > { %16347 = vmatmul.mubr.msk.bf16.vlgmr.msra.gmra.mrb[176].mxu0 %vm10093_vm3, %v15073_v31  ;;  %16353 = vmatmul.mubr.msk.bf16.vlgmr.msra.gmra.mrb[148].mxu1 %vm10093_vm3, %v15075_v14  ;;  %v13579_v55 = vsel %vm21097_vm4, %v13574_v58, 0  ;;  %v13528_v47 = vsel %vm21098_vm5, %v13523_v0, 0  ;;  %vm21109_vm4 = vmmov %vm21052_vm0 }
0x1241   : > { %16357 = vmatpush3.bf16.msra.mxu0 %v13324_v34  ;;  %16363 = vmatpush3.bf16.msra.mxu1 %v13375_v29 }
0x1242   : > { %16364 = vmatprep.mubr.msk.bf16.mxu1 %vm17163_vm6, %v17160_v24  ;;  %16374 = vmatprep.subr.bf16.mxu1 %v17160_v24 }
0x1243   : > { %16358 = vmatprep.mubr.msk.bf16.mxu0 %vm17163_vm6, %v17160_v24  ;;  %16368 = vmatprep.subr.bf16.mxu0 %v17160_v24  ;;  %v13676_v36 = vpop.permute.xlu0 %13675  ;;  %v13625_v4 = vpop.permute.xlu1 %13624 }
0x1244   : > { %v13681_v8 = vsel %vm21099_vm1, %v13676_v36, 0  ;;  %v13630_v9 = vsel %vm21100_vm15, %v13625_v4, 0 }
0x1247   : > { %v13778_v49 = vpop.permute.xlu0 %13777  ;;  %v13727_v12 = vpop.permute.xlu1 %13726 }
0x1248   : > { %16359 = vmatmul.mubr.msk.bf16.vlgmr.msra.gmra.mrb[180].mxu0 %vm10093_vm3, %v15077_v53  ;;  %16365 = vmatmul.mubr.msk.bf16.vlgmr.msra.gmra.mrb[152].mxu1 %vm10093_vm3, %v15079_v51  ;;  %v13783_v62 = vsel %vm21101_vm9, %v13778_v49, 0  ;;  %v13732_v2 = vsel %vm21102_vm13, %v13727_v12, 0 }
0x1249   : > { %16369 = vmatpush3.bf16.msra.mxu0 %v13426_v57  ;;  %16375 = vmatpush3.bf16.msra.mxu1 %v13477_v6 }
0x124a   : > { %16376 = vmatprep.mubr.msk.bf16.mxu1 %vm17163_vm6, %v17160_v24  ;;  %16386 = vmatprep.subr.bf16.mxu1 %v17160_v24 }
0x124b   : > { %16370 = vmatprep.mubr.msk.bf16.mxu0 %vm17163_vm6, %v17160_v24  ;;  %16380 = vmatprep.subr.bf16.mxu0 %v17160_v24  ;;  %v13880_v59 = vpop.permute.xlu0 %13879  ;;  %v13829_v15 = vpop.permute.xlu1 %13828 }
0x124c   : > { %v13885_v10 = vsel %vm21052_vm0, %v13880_v59, 0  ;;  %v13834_v44 = vsel %vm21103_vm14, %v13829_v15, 0 }
0x124f   : > { %v13982_v30 = vpop.permute.xlu0 %13981  ;;  %v13931_v23 = vpop.permute.xlu1 %13930 }
0x1250   : > { %16371 = vmatmul.mubr.msk.bf16.vlgmr.msra.gmra.mrb[184].mxu0 %vm10093_vm3, %v15081_v18  ;;  %16377 = vmatmul.mubr.msk.bf16.vlgmr.msra.gmra.mrb[156].mxu1 %vm10093_vm3, %v15083_v5  ;;  %v13987_v3 = vsel %vm21104_vm10, %v13982_v30, 0  ;;  %v13936_v33 = vsel %vm21105_vm12, %v13931_v23, 0 }
0x1251   : > { %16381 = vmatpush3.bf16.msra.mxu0 %v13528_v47  ;;  %16387 = vmatpush3.bf16.msra.mxu1 %v13579_v55 }
0x1252   : > { %16388 = vmatprep.mubr.msk.bf16.mxu1 %vm17163_vm6, %v17160_v24  ;;  %16398 = vmatprep.subr.bf16.mxu1 %v17160_v24 }
0x1253   : > { %16382 = vmatprep.mubr.msk.bf16.mxu0 %vm17163_vm6, %v17160_v24  ;;  %16392 = vmatprep.subr.bf16.mxu0 %v17160_v24  ;;  %v14084_v21 = vpop.permute.xlu0 %14083  ;;  %v14033_v48 = vpop.permute.xlu1 %14032 }
0x1254   : > { %v14089_v52 = vsel %vm21106_vm11, %v14084_v21, 0  ;;  %v14038_v17 = vsel %vm21107_vm2, %v14033_v48, 0 }
0x1257   : > { %v14186_v43 = vpop.permute.xlu0 %14185  ;;  %v14135_v19 = vpop.permute.xlu1 %14134 }
0x1258   : > { %16383 = vmatmul.mubr.msk.bf16.vlgmr.msra.gmra.mrb[188].mxu0 %vm10093_vm3, %v15085_v63  ;;  %16389 = vmatmul.mubr.msk.bf16.vlgmr.msra.gmra.mrb[160].mxu1 %vm10093_vm3, %v15087_v7  ;;  %v14191_v35 = vsel %vm21108_vm8, %v14186_v43, 0  ;;  %v14140_v32 = vsel %vm21109_vm4, %v14135_v19, 0 }
0x1259   : > { %16393 = vmatpush3.bf16.msra.mxu0 %v13630_v9  ;;  %16399 = vmatpush3.bf16.msra.mxu1 %v13681_v8 }
0x125a   : > { %16394 = vmatprep.mubr.msk.bf16.mxu0 %vm17163_vm6, %v17160_v24  ;;  %16400 = vmatprep.mubr.msk.bf16.mxu1 %vm17163_vm6, %v17160_v24 }
0x125b   : > { %16404 = vmatprep.subr.bf16.mxu0 %v17160_v24  ;;  %16410 = vmatprep.subr.bf16.mxu1 %v17160_v24 }
0x1260   : > { %16395 = vmatmul.mubr.msk.bf16.vlgmr.msra.gmra.mrb[192].mxu0 %vm10093_vm3, %v15089_v60  ;;  %16401 = vmatmul.mubr.msk.bf16.vlgmr.msra.gmra.mrb[164].mxu1 %vm10093_vm3, %v15091_v25 }
0x1261   : > { %16405 = vmatpush3.bf16.msra.mxu0 %v13732_v2  ;;  %16411 = vmatpush3.bf16.msra.mxu1 %v13783_v62 }
0x1262   : > { %16406 = vmatprep.mubr.msk.bf16.mxu0 %vm17163_vm6, %v17160_v24  ;;  %16412 = vmatprep.mubr.msk.bf16.mxu1 %vm17163_vm6, %v17160_v24 }
0x1263   : > { %16416 = vmatprep.subr.bf16.mxu0 %v17160_v24  ;;  %16422 = vmatprep.subr.bf16.mxu1 %v17160_v24 }
0x1268   : > { %16413 = vmatmul.mubr.msk.bf16.vlgmr.msra.gmra.mrb[168].mxu1 %vm10093_vm3, %v15095_v38  ;;  %16407 = vmatmul.mubr.msk.bf16.vlgmr.msra.gmra.mrb[196].mxu0 %vm10093_vm3, %v15093_v13 }
0x1269   : > { %16423 = vmatpush3.bf16.msra.mxu1 %v13885_v10  ;;  %16417 = vmatpush3.bf16.msra.mxu0 %v13834_v44 }
0x126a   : > { %16418 = vmatprep.mubr.msk.bf16.mxu0 %vm17163_vm6, %v17160_v24  ;;  %16424 = vmatprep.mubr.msk.bf16.mxu1 %vm17163_vm6, %v17160_v24 }
0x126b   : > { %16428 = vmatprep.subr.bf16.mxu0 %v17160_v24  ;;  %16434 = vmatprep.subr.bf16.mxu1 %v17160_v24 }
0x1270   : > { %16419 = vmatmul.mubr.msk.bf16.vlgmr.msra.gmra.mrb[200].mxu0 %vm10093_vm3, %v15097_v27  ;;  %16425 = vmatmul.mubr.msk.bf16.vlgmr.msra.gmra.mrb[172].mxu1 %vm10093_vm3, %v15099_v28 }
0x1271   : > { %16429 = vmatpush3.bf16.msra.mxu0 %v13936_v33  ;;  %16435 = vmatpush3.bf16.msra.mxu1 %v13987_v3 }
0x1272   : > { %16430 = vmatprep.mubr.msk.bf16.mxu0 %vm17163_vm6, %v17160_v24  ;;  %16436 = vmatprep.mubr.msk.bf16.mxu1 %vm17163_vm6, %v17160_v24 }
0x1273   : > { %16440 = vmatprep.subr.bf16.mxu0 %v17160_v24  ;;  %16446 = vmatprep.subr.bf16.mxu1 %v17160_v24 }
0x1278   : > { %16431 = vmatmul.mubr.msk.bf16.vlgmr.msra.gmra.mrb[204].mxu0 %vm10093_vm3, %v15101_v37  ;;  %16437 = vmatmul.mubr.msk.bf16.vlgmr.msra.gmra.mrb[176].mxu1 %vm10093_vm3, %v15103_v50 }
0x1279   : > { %16441 = vmatpush3.bf16.msra.mxu0 %v14038_v17  ;;  %16447 = vmatpush3.bf16.msra.mxu1 %v14089_v52 }
0x127a   : > { %16442 = vmatprep.mubr.msk.bf16.mxu0 %vm17163_vm6, %v17160_v24  ;;  %16448 = vmatprep.mubr.msk.bf16.mxu1 %vm17163_vm6, %v17160_v24 }
0x127b   : > { %16452 = vmatprep.subr.bf16.mxu0 %v17160_v24  ;;  %16458 = vmatprep.subr.bf16.mxu1 %v17160_v24 }
0x1280   : > { %16443 = vmatmul.mubr.msk.bf16.vlgmr.msra.gmra.mrb[208].mxu0 %vm10093_vm3, %v15105_v11  ;;  %16449 = vmatmul.mubr.msk.bf16.vlgmr.msra.gmra.mrb[180].mxu1 %vm10093_vm3, %v15107_v42 }
0x1281   : > { %16453 = vmatpush3.bf16.msra.mxu0 %v14140_v32  ;;  %16459 = vmatpush3.bf16.msra.mxu1 %v14191_v35 }
0x1282   : > { %16454 = vmatprep.mubr.msk.bf16.mxu0 %vm17163_vm6, %v17160_v24  ;;  %16460 = vmatprep.mubr.msk.bf16.mxu1 %vm17163_vm6, %v17160_v24 }
0x1288   : > { %16455 = vmatmul.mubr.msk.bf16.vlgmr.msra.gmra.mrb[212].mxu0 %vm10093_vm3, %v15109_v39  ;;  %16461 = vmatmul.mubr.msk.bf16.vlgmr.msra.gmra.mrb[184].mxu1 %vm10093_vm3, %v15111_v46  ;;  %vm14332_vm3 = vcmask 31744  }
0x1289   : > { %16470 = vmatprep.mubr.msk.f32.mxu0 %vm17163_vm6, %v17160_v24  ;;  %vm14255_vm6 = vcmask 154624  }
0x128e   : > { %v12950_v16 = vpop.f32.mrb[164].mxu0 }
0x128f   : > { %v16312_v26 = vpop.f32.mrb[165].mxu0  ;;  %v13002_v54 = vadd.f32 %v20614_v1, %v12950_v16 }
0x1290   : > { %v12953_v20 = vpop.f32.mrb[166].mxu0 }
0x1291   : > { %v16313_v41 = vpop.f32.mrb[167].mxu0 }
0x1303   : > { %v13054_v31 = vpop.f32.mrb[168].mxu0  ;;  %v13105_v14 = vpop.f32.mrb[140].mxu1 }
0x1304   : > { %v13060_v45 = vadd.f32 %v13054_v31, %v13002_v54  ;;  %v16324_v29 = vpop.f32.mrb[169].mxu0  ;;  %v16330_v34 = vpop.f32.mrb[141].mxu1 }
0x1305   : > { %v13057_v40 = vpop.f32.mrb[170].mxu0  ;;  %v13108_v61 = vpop.f32.mrb[142].mxu1 }
0x1306   : > { %v13111_v56 = vadd.f32 %v13105_v14, %v13060_v45  ;;  %v16325_v22 = vpop.f32.mrb[171].mxu0  ;;  %v16331_v53 = vpop.f32.mrb[143].mxu1 }
0x130b   : > { %v13156_v51 = vpop.f32.mrb[172].mxu0  ;;  %v13207_v6 = vpop.f32.mrb[144].mxu1 }
0x130c   : > { %v13162_v57 = vadd.f32 %v13156_v51, %v13111_v56  ;;  %v16336_v58 = vpop.f32.mrb[173].mxu0  ;;  %v16342_v0 = vpop.f32.mrb[145].mxu1 }
0x130d   : > { %v13159_v18 = vpop.f32.mrb[174].mxu0  ;;  %v13210_v5 = vpop.f32.mrb[146].mxu1 }
0x130e   : > { %v13213_v1 = vadd.f32 %v13207_v6, %v13162_v57  ;;  %v16337_v55 = vpop.f32.mrb[175].mxu0  ;;  %v16343_v47 = vpop.f32.mrb[147].mxu1 }
0x1313   : > { %v13258_v36 = vpop.f32.mrb[176].mxu0  ;;  %v13309_v4 = vpop.f32.mrb[148].mxu1 }
0x1314   : > { %v13264_v63 = vadd.f32 %v13258_v36, %v13213_v1  ;;  %v16348_v7 = vpop.f32.mrb[177].mxu0  ;;  %v16354_v8 = vpop.f32.mrb[149].mxu1 }
0x1315   : > { %v13261_v9 = vpop.f32.mrb[178].mxu0  ;;  %v13312_v49 = vpop.f32.mrb[150].mxu1 }
0x1316   : > { %v13315_v12 = vadd.f32 %v13309_v4, %v13264_v63  ;;  %v16349_v60 = vpop.f32.mrb[179].mxu0  ;;  %v16355_v25 = vpop.f32.mrb[151].mxu1 }
0x131b   : > { %v13360_v62 = vpop.f32.mrb[180].mxu0  ;;  %v13411_v2 = vpop.f32.mrb[152].mxu1 }
0x131c   : > { %v13366_v59 = vadd.f32 %v13360_v62, %v13315_v12  ;;  %v16360_v15 = vpop.f32.mrb[181].mxu0  ;;  %v16366_v38 = vpop.f32.mrb[153].mxu1 }
0x131d   : > { %v13363_v13 = vpop.f32.mrb[182].mxu0  ;;  %v13414_v10 = vpop.f32.mrb[154].mxu1 }
0x131e   : > { %v13417_v44 = vadd.f32 %v13411_v2, %v13366_v59  ;;  %v16361_v30 = vpop.f32.mrb[183].mxu0  ;;  %v16367_v23 = vpop.f32.mrb[155].mxu1 }
0x1323   : > { %v13462_v27 = vpop.f32.mrb[184].mxu0  ;;  %v13513_v28 = vpop.f32.mrb[156].mxu1 }
0x1324   : > { %v13468_v3 = vadd.f32 %v13462_v27, %v13417_v44  ;;  %v16372_v33 = vpop.f32.mrb[185].mxu0  ;;  %v16378_v21 = vpop.f32.mrb[157].mxu1 }
0x1325   : > { %v13465_v48 = vpop.f32.mrb[186].mxu0  ;;  %v13516_v37 = vpop.f32.mrb[158].mxu1 }
0x1326   : > { %v13519_v50 = vadd.f32 %v13513_v28, %v13468_v3  ;;  %v16373_v52 = vpop.f32.mrb[187].mxu0  ;;  %v16379_v17 = vpop.f32.mrb[159].mxu1 }
0x1327   : > { %v14253_v52 = vld [vmem:[%s21110_s2 + $0x8] sm:$0xff]  ;;  %v17217_v17 = vmov 0.0|0.0  }
0x1328   : > { %16473 = vmatprep.subr.bf16.mxu0 %v17217_v17 }
0x132b   : > { %v13564_v43 = vpop.f32.mrb[188].mxu0  ;;  %v13615_v19 = vpop.f32.mrb[160].mxu1 }
0x132c   : > { %v13570_v11 = vadd.f32 %v13564_v43, %v13519_v50  ;;  %v16384_v42 = vpop.f32.mrb[189].mxu0  ;;  %v16390_v35 = vpop.f32.mrb[161].mxu1  ;;  %v14252_v50 = vld [vmem:[%s21110_s2] sm:$0xff] }
0x132d   : > { %v13567_v32 = vpop.f32.mrb[190].mxu0  ;;  %v13618_v39 = vpop.f32.mrb[162].mxu1  ;;  %v16474_v43 = vpack.c.bf16 %v14253_v52, %v14252_v50 }
0x132e   : > { %v13621_v46 = vadd.f32 %v13615_v19, %v13570_v11  ;;  %v16385_v16 = vpop.f32.mrb[191].mxu0  ;;  %v16391_v26 = vpop.f32.mrb[163].mxu1 }
0x132f   : > { %16475 = vmatpush3.bf16.msra.mxu0 %v16474_v43 }
0x1330   : > { %16468 = vmatprep.subr.mxu0 %v17160_v24 }
0x1333   : > { %v13666_v54 = vpop.f32.mrb[192].mxu0  ;;  %v13717_v20 = vpop.f32.mrb[164].mxu1 }
0x1334   : > { %v13672_v41 = vadd.f32 %v13666_v54, %v13621_v46  ;;  %v16396_v31 = vpop.f32.mrb[193].mxu0  ;;  %v16402_v14 = vpop.f32.mrb[165].mxu1 }
0x1335   : > { %v13669_v45 = vpop.f32.mrb[194].mxu0  ;;  %v13720_v29 = vpop.f32.mrb[166].mxu1  ;;  %v14254_v14 = vld [vmem:[%s21110_s2 + $0x10] sm:$0x7] }
0x1336   : > { %v13723_v34 = vadd.f32 %v13717_v20, %v13672_v41  ;;  %v16397_v40 = vpop.f32.mrb[195].mxu0  ;;  %v16403_v61 = vpop.f32.mrb[167].mxu1  ;;  %16469 = vmatpush3.msk.msra.mxu0 %vm8591_vm7, %v14254_v14 }
0x1337   : > { %v14238_v20 = vpop.permute.xlu1 %14237 }
0x133b   : > { %v13768_v56 = vpop.f32.mrb[196].mxu0  ;;  %v13819_v22 = vpop.f32.mrb[168].mxu1 }
0x133c   : > { %v13774_v53 = vadd.f32 %v13768_v56, %v13723_v34  ;;  %v16408_v51 = vpop.f32.mrb[197].mxu0  ;;  %v16414_v6 = vpop.f32.mrb[169].mxu1 }
0x133d   : > { %v13771_v57 = vpop.f32.mrb[198].mxu0  ;;  %v13822_v58 = vpop.f32.mrb[170].mxu1 }
0x133e   : > { %v13825_v0 = vadd.f32 %v13819_v22, %v13774_v53  ;;  %v16409_v18 = vpop.f32.mrb[199].mxu0  ;;  %v16415_v5 = vpop.f32.mrb[171].mxu1 }
0x1343   : > { %v13870_v1 = vpop.f32.mrb[200].mxu0  ;;  %v13921_v55 = vpop.f32.mrb[172].mxu1 }
0x1344   : > { %v13876_v47 = vadd.f32 %v13870_v1, %v13825_v0  ;;  %v16420_v36 = vpop.f32.mrb[201].mxu0  ;;  %v16426_v4 = vpop.f32.mrb[173].mxu1 }
0x1345   : > { %v13873_v63 = vpop.f32.mrb[202].mxu0  ;;  %v13924_v7 = vpop.f32.mrb[174].mxu1 }
0x1346   : > { %v13927_v8 = vadd.f32 %v13921_v55, %v13876_v47  ;;  %v16421_v9 = vpop.f32.mrb[203].mxu0  ;;  %v16427_v49 = vpop.f32.mrb[175].mxu1 }
0x134b   : > { %v13972_v12 = vpop.f32.mrb[204].mxu0  ;;  %v14023_v60 = vpop.f32.mrb[176].mxu1 }
0x134c   : > { %v13978_v25 = vadd.f32 %v13972_v12, %v13927_v8  ;;  %v16432_v62 = vpop.f32.mrb[205].mxu0  ;;  %v16438_v2 = vpop.f32.mrb[177].mxu1 }
0x134d   : > { %v13975_v59 = vpop.f32.mrb[206].mxu0  ;;  %v14026_v15 = vpop.f32.mrb[178].mxu1 }
0x134e   : > { %v14029_v38 = vadd.f32 %v14023_v60, %v13978_v25  ;;  %v16433_v13 = vpop.f32.mrb[207].mxu0  ;;  %v16439_v10 = vpop.f32.mrb[179].mxu1 }
0x1353   : > { %v14074_v44 = vpop.f32.mrb[208].mxu0  ;;  %v14125_v30 = vpop.f32.mrb[180].mxu1 }
0x1354   : > { %v14080_v23 = vadd.f32 %v14074_v44, %v14029_v38  ;;  %v16444_v27 = vpop.f32.mrb[209].mxu0  ;;  %v16450_v28 = vpop.f32.mrb[181].mxu1 }
0x1355   : > { %v14077_v3 = vpop.f32.mrb[210].mxu0  ;;  %v14128_v33 = vpop.f32.mrb[182].mxu1 }
0x1356   : > { %v14131_v21 = vadd.f32 %v14125_v30, %v14080_v23  ;;  %v16445_v48 = vpop.f32.mrb[211].mxu0  ;;  %v16451_v37 = vpop.f32.mrb[183].mxu1 }
0x135b   : > { %v14176_v19 = vpop.f32.mrb[212].mxu0  ;;  %v14227_v11 = vpop.f32.mrb[184].mxu1 }
0x135c   : > { %v14182_v42 = vadd.f32 %v14176_v19, %v14131_v21  ;;  %v16456_v35 = vpop.f32.mrb[213].mxu0  ;;  %v16462_v32 = vpop.f32.mrb[185].mxu1 }
0x135d   : > { %v14179_v39 = vpop.f32.mrb[214].mxu0  ;;  %v14230_v46 = vpop.f32.mrb[186].mxu1 }
0x135e   : > { %v14233_v16 = vadd.f32 %v14227_v11, %v14182_v42  ;;  %v16457_v26 = vpop.f32.mrb[215].mxu0  ;;  %v16463_v54 = vpop.f32.mrb[187].mxu1 }
0x1360   : > { %v14240_v41 = vadd.f32 %v14238_v20, %v14233_v16 }
0x1362   : > { %v14241_v31 = vmax.f32 %v14240_v41, 0.0 }
0x1364   : > { %14243 = vrot.lane.b32.xlu0 %v14241_v31, %s20952_s25 }
0x13d6   : > { %v14244_v45 = vpop.permute.xlu0 %14243 }
0x13d7   : > { %v14246_v29 = vmax.f32 %v14241_v31, %v14244_v45 }
0x13d9   : > { %14248 = vrot.lane.b32.xlu1 %v14246_v29, %s21079_s0 }
0x144b   : > { %v14249_v24 = vpop.permute.xlu1 %14248 }
0x144c   : > { %v14251_v34 = vmax.f32 %v14246_v29, %v14249_v24 }
0x144e   : > { %16471 = vmatmul.mubr.msk.f32.vlgmr.msra.gmra.mrb[216].mxu0 %vm14255_vm6, %v14251_v34 }
0x1521   : > { %v14328_v40 = vpop.f32.mrb[216].mxu0 }
0x1522   : > { %14333 = vst.msk [vmem:[%s708_s23] sm:$0xff] %vm14332_vm3, %v14328_v40  ;;  %v16472_v61 = vpop.f32.mrb[217].mxu0 }
0x1523 PF: > { %s21113_s25 = sld [smem:[#allocation8_spill]] }
0x1529   : > { %s33_s4 = sadd.s32 1, %s21113_s25  }
0x152a   : > { %p30_p4 = scmp.ge.s32.totalorder %s33_s4, 4  }
0x152c   :  { %32 = sbr.rel (!%p30_p4) target bundleno = 15 (0xf), region = 286 }

</bundles_post_ra>
